<compile_context>
chip_gen: v7x
topology: tpu7x:2x2x1
jax: 0.10.0
libtpu: 0.0.40
codegen_flags: <defaults>
</compile_context>

<pallas_src>
import functools

import jax
import jax.numpy as jnp
import numpy as np
from jax import lax
from jax.experimental import pallas as pl
from jax.experimental.pallas import tpu as pltpu

C1, C2, K = 5, 10, 5
H0 = 28
H1 = H0 - K + 1        # 24  conv1 output
P1 = H1 // 2           # 12  pool1 output
H2 = P1 - K + 1        # 8   conv2 output
P2 = H2 // 2           # 4   pool2 output
FLAT = C2 * P2 * P2    # 160
FC1, FC2 = 32, 10
FC2_PAD = 128          # lane-dense padded logits width (unmasked stores)
S0 = H0 * H0           # 784 flattened input features
S1 = C1 * P1 * P1      # 720 flattened pool1 features


def _round_up(n, m):
    return (n + m - 1) // m * m


def _conv_pool_phase_matrices(w, c_in, h_in, w_in):
    """Fused conv(KxK, 'VALID') + 2x2/stride-2 max-pool phase matrices.

    Returns A of shape (4, c_in*h_in*w_in, c_out*h_p*w_p) such that
    flat_input @ A[2*a + c] equals the conv output sampled at rows 2*hp + a,
    cols 2*wp + c (channel-major flattening).  max over the 4 phases == pool.
    """
    w = np.asarray(w, np.float32)
    c_out = w.shape[0]
    k = w.shape[2]
    h_c, w_c = h_in - k + 1, w_in - k + 1
    h_p, w_p = h_c // 2, w_c // 2
    A = np.zeros((4, c_in * h_in * w_in, c_out * h_p * w_p), np.float32)
    co = np.arange(c_out).reshape(c_out, 1, 1, 1)
    ci = np.arange(c_in).reshape(1, c_in, 1, 1)
    hp = np.arange(h_p).reshape(1, 1, h_p, 1)
    wp = np.arange(w_p).reshape(1, 1, 1, w_p)
    shape = (c_out, c_in, h_p, w_p)
    out_idx = np.broadcast_to(co * (h_p * w_p) + hp * w_p + wp, shape).ravel()
    for a in range(2):
        for c in range(2):
            ph = 2 * a + c
            for di in range(k):
                for dj in range(k):
                    in_idx = np.broadcast_to(
                        ci * (h_in * w_in) + (2 * hp + a + di) * w_in
                        + (2 * wp + c + dj), shape).ravel()
                    vals = np.broadcast_to(
                        w[:, :, di, dj].reshape(c_out, c_in, 1, 1),
                        shape).ravel()
                    A[ph, in_idx, out_idx] = vals
    return A


# ----------------------- fused kernel -----------------------------------------
def _infer_kernel(x_ref, a1_ref, b1_ref, a2_ref, b2_ref,
                  fw1_ref, fb1_ref, fw2_ref, fb2_ref, o_ref):
    x = x_ref[...]                                               # (Bb, 784) bf16

    # conv1 + maxpool1 (+ bias) + relu: issue all 4 phase dots, then max tree.
    d0 = jnp.dot(x, a1_ref[0], preferred_element_type=jnp.float32)
    d1 = jnp.dot(x, a1_ref[1], preferred_element_type=jnp.float32)
    d2 = jnp.dot(x, a1_ref[2], preferred_element_type=jnp.float32)
    d3 = jnp.dot(x, a1_ref[3], preferred_element_type=jnp.float32)
    h = jnp.maximum(jnp.maximum(d0, d1), jnp.maximum(d2, d3))
    p1 = jnp.maximum(h + b1_ref[...], 0.0).astype(jnp.bfloat16)  # (Bb, 720)

    # conv2 + maxpool2 (+ bias) + relu.
    # TODO(synk): nn.Dropout(p=0.5) is stochastic in train mode; applied as
    # identity (eval semantics) to keep the kernel deterministic.
    e0 = jnp.dot(p1, a2_ref[0], preferred_element_type=jnp.float32)
    e1 = jnp.dot(p1, a2_ref[1], preferred_element_type=jnp.float32)
    e2 = jnp.dot(p1, a2_ref[2], preferred_element_type=jnp.float32)
    e3 = jnp.dot(p1, a2_ref[3], preferred_element_type=jnp.float32)
    g = jnp.maximum(jnp.maximum(e0, e1), jnp.maximum(e2, e3))
    p2 = jnp.maximum(g + b2_ref[...], 0.0).astype(jnp.bfloat16)  # (Bb, 160)

    # fc1 -> relu -> fc2 (fc2 padded to 128 output lanes: unmasked stores).
    f1 = jnp.maximum(
        jnp.dot(p2, fw1_ref[...], preferred_element_type=jnp.float32)
        + fb1_ref[...], 0.0).astype(jnp.bfloat16)
    o_ref[...] = (jnp.dot(f1, fw2_ref[...],
                          preferred_element_type=jnp.float32) + fb2_ref[...])


# ----------------------- constant prep (once per parameter set) ----------------
def prepare_params(params):
    """Build the device-resident constants once: bf16 matmul operands, f32 biases."""
    a1 = jnp.asarray(_conv_pool_phase_matrices(params["conv1_w"], 1, H0, H0),
                     jnp.bfloat16)
    a2 = jnp.asarray(_conv_pool_phase_matrices(params["conv2_w"], C1, P1, P1),
                     jnp.bfloat16)
    b1v = jnp.asarray(np.repeat(np.asarray(params["conv1_b"], np.float32),
                                P1 * P1).reshape(1, S1))
    b2v = jnp.asarray(np.repeat(np.asarray(params["conv2_b"], np.float32),
                                P2 * P2).reshape(1, FLAT))
    fw1 = jnp.asarray(np.asarray(params["fc1_w"], np.float32).T, jnp.bfloat16)
    fb1 = jnp.asarray(np.asarray(params["fc1_b"], np.float32).reshape(1, FC1))
    fw2_np = np.zeros((FC1, FC2_PAD), np.float32)
    fw2_np[:, :FC2] = np.asarray(params["fc2_w"], np.float32).T
    fb2_np = np.zeros((1, FC2_PAD), np.float32)
    fb2_np[0, :FC2] = np.asarray(params["fc2_b"], np.float32)
    fw2 = jnp.asarray(fw2_np, jnp.bfloat16)
    fb2 = jnp.asarray(fb2_np)
    return (a1, b1v, a2, b2v, fw1, fb1, fw2, fb2)


# ----------------------- wrapper ----------------------------------------------
def infer_net_forward(x_nchw, prepared, block_b=256):
    a1, b1v, a2, b2v, fw1, fb1, fw2, fb2 = prepared
    B = x_nchw.shape[0]
    assert x_nchw.shape[1:] == (1, H0, H0)
    x = x_nchw.reshape(B, S0).astype(jnp.bfloat16)

    # Batch blocking: cap at block_b, but keep >=2 grid steps whenever B
    # permits so the "parallel" batch axis shards across v7x's two TCs.
    b_blk = min(block_b, _round_up(max(1, -(-B // 2)), 8))
    b_pad = _round_up(B, b_blk)
    if b_pad != B:
        x = jnp.pad(x, ((0, b_pad - B), (0, 0)))
    grid = (b_pad // b_blk,)

    out = pl.pallas_call(
        _infer_kernel,
        out_shape=jax.ShapeDtypeStruct((b_pad, FC2_PAD), jnp.float32),
        grid=grid,
        in_specs=[
            pl.BlockSpec((b_blk, S0), lambda i: (i, 0)),
            pl.BlockSpec(a1.shape, lambda i: (0, 0, 0)),
            pl.BlockSpec(b1v.shape, lambda i: (0, 0)),
            pl.BlockSpec(a2.shape, lambda i: (0, 0, 0)),
            pl.BlockSpec(b2v.shape, lambda i: (0, 0)),
            pl.BlockSpec(fw1.shape, lambda i: (0, 0)),
            pl.BlockSpec(fb1.shape, lambda i: (0, 0)),
            pl.BlockSpec(fw2.shape, lambda i: (0, 0)),
            pl.BlockSpec(fb2.shape, lambda i: (0, 0)),
        ],
        out_specs=pl.BlockSpec((b_blk, FC2_PAD), lambda i: (i, 0)),
        compiler_params=pltpu.CompilerParams(
            dimension_semantics=("parallel",),
            vmem_limit_bytes=32 * 1024 * 1024),
    )(x, a1, b1v, a2, b2v, fw1, fb1, fw2, fb2)
    return out[:B, :FC2]


def make_infer_fn(params, block_b=256):
    """Prepare constants once and return a jitted forward over x."""
    prepared = prepare_params(params)
    fwd = jax.jit(functools.partial(infer_net_forward, block_b=block_b))
    return lambda x: fwd(x, prepared)


# ----------------------- pure-JAX reference ------------------------------------
def reference_forward(x_nchw, params):
    x = x_nchw.astype(jnp.float32)

    def conv(x, w, b):
        y = lax.conv_general_dilated(
            x, w, (1, 1), 'VALID',
            dimension_numbers=('NCHW', 'OIHW', 'NCHW'),
            precision=lax.Precision.HIGHEST)
        return y + b.reshape(1, -1, 1, 1)

    def pool(x):
        return lax.reduce_window(x, -jnp.inf, lax.max,
                                 (1, 1, 2, 2), (1, 1, 2, 2), 'VALID')

    x = conv(x, params["conv1_w"], params["conv1_b"])
    x = jnp.maximum(pool(x), 0.0)
    x = conv(x, params["conv2_w"], params["conv2_b"])
    x = jnp.maximum(pool(x), 0.0)
    x = x.reshape(x.shape[0], -1)
    x = jnp.maximum(
        jnp.dot(x, params["fc1_w"].T, precision=lax.Precision.HIGHEST)
        + params["fc1_b"], 0.0)
    return (jnp.dot(x, params["fc2_w"].T, precision=lax.Precision.HIGHEST)
            + params["fc2_b"])


# ----------------------- main ---------------------------------------------------
if __name__ == "__main__":
    key = jax.random.PRNGKey(0)
    ks = jax.random.split(key, 9)

    params = {
        "conv1_w": 0.1 * jax.random.normal(ks[0], (C1, 1, K, K), jnp.float32),
        "conv1_b": 0.1 * jax.random.normal(ks[1], (C1,), jnp.float32),
        "conv2_w": 0.1 * jax.random.normal(ks[2], (C2, C1, K, K), jnp.float32),
        "conv2_b": 0.1 * jax.random.normal(ks[3], (C2,), jnp.float32),
        "fc1_w": 0.1 * jax.random.normal(ks[4], (FC1, FLAT), jnp.float32),
        "fc1_b": 0.1 * jax.random.normal(ks[5], (FC1,), jnp.float32),
        "fc2_w": 0.1 * jax.random.normal(ks[6], (FC2, FC1), jnp.float32),
        "fc2_b": 0.1 * jax.random.normal(ks[7], (FC2,), jnp.float32),
    }

    B = 2
    x = jax.random.normal(ks[8], (B, 1, H0, H0), jnp.float32)

    infer_fn = make_infer_fn(params)           # constants built/uploaded once
    out = jax.block_until_ready(infer_fn(x))
    ref = jax.block_until_ready(reference_forward(x, params))

    assert out.shape == (B, FC2)
    err = float(np.max(np.abs(np.asarray(out) - np.asarray(ref))))
    # bf16 matmul operands with f32 accumulation: validate with bf16-level
    # tolerance against the f32 HIGHEST-precision reference.
    assert np.allclose(np.asarray(out, np.float32), np.asarray(ref, np.float32),
                       rtol=2e-2, atol=2.5e-2), f"max abs err = {err}"

    print("KERNEL_OK")
</pallas_src>

<mosaic_0001>
module attributes {stable_mosaic.version = 11 : i64} {
  func.func @_infer_kernel(%arg0: i32, %arg1: memref<8x784xbf16, #tpu.memory_space<vmem>>, %arg2: memref<4x784x720xbf16, #tpu.memory_space<vmem>>, %arg3: memref<1x720xf32, #tpu.memory_space<vmem>>, %arg4: memref<4x720x160xbf16, #tpu.memory_space<vmem>>, %arg5: memref<1x160xf32, #tpu.memory_space<vmem>>, %arg6: memref<160x32xbf16, #tpu.memory_space<vmem>>, %arg7: memref<1x32xf32, #tpu.memory_space<vmem>>, %arg8: memref<32x128xbf16, #tpu.memory_space<vmem>>, %arg9: memref<1x128xf32, #tpu.memory_space<vmem>>, %arg10: memref<8x128xf32, #tpu.memory_space<vmem>>) attributes {dimension_semantics = [#tpu.dimension_semantics<parallel>], iteration_bounds = array<i64: 1>, scalar_prefetch = 0 : i64, scratch_operands = 0 : i64, tpu.core_type = #tpu.core_type<tc>, window_params = [{transform_indices = @transform_0, window_bounds = array<i64: 8, 784>}, {pipeline_mode = #tpu.pipeline_mode<synchronous>, transform_indices = @transform_1, window_bounds = array<i64: 4, 784, 720>}, {pipeline_mode = #tpu.pipeline_mode<synchronous>, transform_indices = @transform_2, window_bounds = array<i64: 1, 720>}, {pipeline_mode = #tpu.pipeline_mode<synchronous>, transform_indices = @transform_3, window_bounds = array<i64: 4, 720, 160>}, {pipeline_mode = #tpu.pipeline_mode<synchronous>, transform_indices = @transform_4, window_bounds = array<i64: 1, 160>}, {pipeline_mode = #tpu.pipeline_mode<synchronous>, transform_indices = @transform_5, window_bounds = array<i64: 160, 32>}, {pipeline_mode = #tpu.pipeline_mode<synchronous>, transform_indices = @transform_6, window_bounds = array<i64: 1, 32>}, {pipeline_mode = #tpu.pipeline_mode<synchronous>, transform_indices = @transform_7, window_bounds = array<i64: 32, 128>}, {pipeline_mode = #tpu.pipeline_mode<synchronous>, transform_indices = @transform_8, window_bounds = array<i64: 1, 128>}, {transform_indices = @transform_9, window_bounds = array<i64: 8, 128>}]} {
    %c0 = arith.constant 0 : index
    %c0_0 = arith.constant 0 : index
    %0 = vector.load %arg1[%c0, %c0_0] : memref<8x784xbf16, #tpu.memory_space<vmem>>, vector<8x784xbf16>
    %c0_1 = arith.constant 0 : index
    %c0_2 = arith.constant 0 : index
    %c0_3 = arith.constant 0 : index
    %1 = vector.load %arg2[%c0_1, %c0_2, %c0_3] : memref<4x784x720xbf16, #tpu.memory_space<vmem>>, vector<1x784x720xbf16>
    %2 = vector.shape_cast %1 : vector<1x784x720xbf16> to vector<784x720xbf16>
    %cst = arith.constant dense<0.000000e+00> : vector<8x720xf32>
    %3 = tpu.matmul %0, %2, %cst {dimension_numbers = #tpu.dot_dimension_numbers<[1], [0], [0], [1], [0, 0, 1, 1], [], []>} : vector<8x784xbf16>, vector<784x720xbf16>, vector<8x720xf32> -> vector<8x720xf32>
    %c1 = arith.constant 1 : index
    %c0_4 = arith.constant 0 : index
    %c0_5 = arith.constant 0 : index
    %4 = vector.load %arg2[%c1, %c0_4, %c0_5] : memref<4x784x720xbf16, #tpu.memory_space<vmem>>, vector<1x784x720xbf16>
    %5 = vector.shape_cast %4 : vector<1x784x720xbf16> to vector<784x720xbf16>
    %cst_6 = arith.constant dense<0.000000e+00> : vector<8x720xf32>
    %6 = tpu.matmul %0, %5, %cst_6 {dimension_numbers = #tpu.dot_dimension_numbers<[1], [0], [0], [1], [0, 0, 1, 1], [], []>} : vector<8x784xbf16>, vector<784x720xbf16>, vector<8x720xf32> -> vector<8x720xf32>
    %c2 = arith.constant 2 : index
    %c0_7 = arith.constant 0 : index
    %c0_8 = arith.constant 0 : index
    %7 = vector.load %arg2[%c2, %c0_7, %c0_8] : memref<4x784x720xbf16, #tpu.memory_space<vmem>>, vector<1x784x720xbf16>
    %8 = vector.shape_cast %7 : vector<1x784x720xbf16> to vector<784x720xbf16>
    %cst_9 = arith.constant dense<0.000000e+00> : vector<8x720xf32>
    %9 = tpu.matmul %0, %8, %cst_9 {dimension_numbers = #tpu.dot_dimension_numbers<[1], [0], [0], [1], [0, 0, 1, 1], [], []>} : vector<8x784xbf16>, vector<784x720xbf16>, vector<8x720xf32> -> vector<8x720xf32>
    %c3 = arith.constant 3 : index
    %c0_10 = arith.constant 0 : index
    %c0_11 = arith.constant 0 : index
    %10 = vector.load %arg2[%c3, %c0_10, %c0_11] : memref<4x784x720xbf16, #tpu.memory_space<vmem>>, vector<1x784x720xbf16>
    %11 = vector.shape_cast %10 : vector<1x784x720xbf16> to vector<784x720xbf16>
    %cst_12 = arith.constant dense<0.000000e+00> : vector<8x720xf32>
    %12 = tpu.matmul %0, %11, %cst_12 {dimension_numbers = #tpu.dot_dimension_numbers<[1], [0], [0], [1], [0, 0, 1, 1], [], []>} : vector<8x784xbf16>, vector<784x720xbf16>, vector<8x720xf32> -> vector<8x720xf32>
    %13 = arith.maximumf %3, %6 : vector<8x720xf32>
    %14 = arith.maximumf %9, %12 : vector<8x720xf32>
    %15 = arith.maximumf %13, %14 : vector<8x720xf32>
    %c0_13 = arith.constant 0 : index
    %c0_14 = arith.constant 0 : index
    %16 = vector.load %arg3[%c0_13, %c0_14] : memref<1x720xf32, #tpu.memory_space<vmem>>, vector<1x720xf32>
    %17 = vector.broadcast %16 : vector<1x720xf32> to vector<8x720xf32>
    %18 = arith.addf %15, %17 : vector<8x720xf32>
    %cst_15 = arith.constant 0.000000e+00 : f32
    %19 = vector.broadcast %cst_15 : f32 to vector<8x720xf32>
    %20 = arith.maximumf %18, %19 : vector<8x720xf32>
    %21 = arith.truncf %20 : vector<8x720xf32> to vector<8x720xbf16>
    %c0_16 = arith.constant 0 : index
    %c0_17 = arith.constant 0 : index
    %c0_18 = arith.constant 0 : index
    %22 = vector.load %arg4[%c0_16, %c0_17, %c0_18] : memref<4x720x160xbf16, #tpu.memory_space<vmem>>, vector<1x720x160xbf16>
    %23 = vector.shape_cast %22 : vector<1x720x160xbf16> to vector<720x160xbf16>
    %cst_19 = arith.constant dense<0.000000e+00> : vector<8x160xf32>
    %24 = tpu.matmul %21, %23, %cst_19 {dimension_numbers = #tpu.dot_dimension_numbers<[1], [0], [0], [1], [0, 0, 1, 1], [], []>} : vector<8x720xbf16>, vector<720x160xbf16>, vector<8x160xf32> -> vector<8x160xf32>
    %c1_20 = arith.constant 1 : index
    %c0_21 = arith.constant 0 : index
    %c0_22 = arith.constant 0 : index
    %25 = vector.load %arg4[%c1_20, %c0_21, %c0_22] : memref<4x720x160xbf16, #tpu.memory_space<vmem>>, vector<1x720x160xbf16>
    %26 = vector.shape_cast %25 : vector<1x720x160xbf16> to vector<720x160xbf16>
    %cst_23 = arith.constant dense<0.000000e+00> : vector<8x160xf32>
    %27 = tpu.matmul %21, %26, %cst_23 {dimension_numbers = #tpu.dot_dimension_numbers<[1], [0], [0], [1], [0, 0, 1, 1], [], []>} : vector<8x720xbf16>, vector<720x160xbf16>, vector<8x160xf32> -> vector<8x160xf32>
    %c2_24 = arith.constant 2 : index
    %c0_25 = arith.constant 0 : index
    %c0_26 = arith.constant 0 : index
    %28 = vector.load %arg4[%c2_24, %c0_25, %c0_26] : memref<4x720x160xbf16, #tpu.memory_space<vmem>>, vector<1x720x160xbf16>
    %29 = vector.shape_cast %28 : vector<1x720x160xbf16> to vector<720x160xbf16>
    %cst_27 = arith.constant dense<0.000000e+00> : vector<8x160xf32>
    %30 = tpu.matmul %21, %29, %cst_27 {dimension_numbers = #tpu.dot_dimension_numbers<[1], [0], [0], [1], [0, 0, 1, 1], [], []>} : vector<8x720xbf16>, vector<720x160xbf16>, vector<8x160xf32> -> vector<8x160xf32>
    %c3_28 = arith.constant 3 : index
    %c0_29 = arith.constant 0 : index
    %c0_30 = arith.constant 0 : index
    %31 = vector.load %arg4[%c3_28, %c0_29, %c0_30] : memref<4x720x160xbf16, #tpu.memory_space<vmem>>, vector<1x720x160xbf16>
    %32 = vector.shape_cast %31 : vector<1x720x160xbf16> to vector<720x160xbf16>
    %cst_31 = arith.constant dense<0.000000e+00> : vector<8x160xf32>
    %33 = tpu.matmul %21, %32, %cst_31 {dimension_numbers = #tpu.dot_dimension_numbers<[1], [0], [0], [1], [0, 0, 1, 1], [], []>} : vector<8x720xbf16>, vector<720x160xbf16>, vector<8x160xf32> -> vector<8x160xf32>
    %34 = arith.maximumf %24, %27 : vector<8x160xf32>
    %35 = arith.maximumf %30, %33 : vector<8x160xf32>
    %36 = arith.maximumf %34, %35 : vector<8x160xf32>
    %c0_32 = arith.constant 0 : index
    %c0_33 = arith.constant 0 : index
    %37 = vector.load %arg5[%c0_32, %c0_33] : memref<1x160xf32, #tpu.memory_space<vmem>>, vector<1x160xf32>
    %38 = vector.broadcast %37 : vector<1x160xf32> to vector<8x160xf32>
    %39 = arith.addf %36, %38 : vector<8x160xf32>
    %cst_34 = arith.constant 0.000000e+00 : f32
    %40 = vector.broadcast %cst_34 : f32 to vector<8x160xf32>
    %41 = arith.maximumf %39, %40 : vector<8x160xf32>
    %42 = arith.truncf %41 : vector<8x160xf32> to vector<8x160xbf16>
    %c0_35 = arith.constant 0 : index
    %c0_36 = arith.constant 0 : index
    %43 = vector.load %arg6[%c0_35, %c0_36] : memref<160x32xbf16, #tpu.memory_space<vmem>>, vector<160x32xbf16>
    %cst_37 = arith.constant dense<0.000000e+00> : vector<8x32xf32>
    %44 = tpu.matmul %42, %43, %cst_37 {dimension_numbers = #tpu.dot_dimension_numbers<[1], [0], [0], [1], [0, 0, 1, 1], [], []>} : vector<8x160xbf16>, vector<160x32xbf16>, vector<8x32xf32> -> vector<8x32xf32>
    %c0_38 = arith.constant 0 : index
    %c0_39 = arith.constant 0 : index
    %45 = vector.load %arg7[%c0_38, %c0_39] : memref<1x32xf32, #tpu.memory_space<vmem>>, vector<1x32xf32>
    %46 = vector.broadcast %45 : vector<1x32xf32> to vector<8x32xf32>
    %47 = arith.addf %44, %46 : vector<8x32xf32>
    %cst_40 = arith.constant 0.000000e+00 : f32
    %48 = vector.broadcast %cst_40 : f32 to vector<8x32xf32>
    %49 = arith.maximumf %47, %48 : vector<8x32xf32>
    %50 = arith.truncf %49 : vector<8x32xf32> to vector<8x32xbf16>
    %c0_41 = arith.constant 0 : index
    %c0_42 = arith.constant 0 : index
    %51 = vector.load %arg8[%c0_41, %c0_42] : memref<32x128xbf16, #tpu.memory_space<vmem>>, vector<32x128xbf16>
    %cst_43 = arith.constant dense<0.000000e+00> : vector<8x128xf32>
    %52 = tpu.matmul %50, %51, %cst_43 {dimension_numbers = #tpu.dot_dimension_numbers<[1], [0], [0], [1], [0, 0, 1, 1], [], []>} : vector<8x32xbf16>, vector<32x128xbf16>, vector<8x128xf32> -> vector<8x128xf32>
    %c0_44 = arith.constant 0 : index
    %c0_45 = arith.constant 0 : index
    %53 = vector.load %arg9[%c0_44, %c0_45] : memref<1x128xf32, #tpu.memory_space<vmem>>, vector<1x128xf32>
    %54 = vector.broadcast %53 : vector<1x128xf32> to vector<8x128xf32>
    %55 = arith.addf %52, %54 : vector<8x128xf32>
    %c0_46 = arith.constant 0 : index
    %c0_47 = arith.constant 0 : index
    %56 = vector.load %arg10[%c0_46, %c0_47] : memref<8x128xf32, #tpu.memory_space<vmem>>, vector<8x128xf32>
    tpu.vector_store %arg10[%c0_46, %c0_47], %55 {strides = array<i32>} : memref<8x128xf32, #tpu.memory_space<vmem>>, vector<8x128xf32>,
    return
  }
  func.func @transform_0(%arg0: i32) -> (i32, i32) {
    %c0_i32 = arith.constant 0 : i32
    %c0_i32_0 = arith.constant 0 : i32
    return %arg0, %c0_i32 : i32, i32
  }
  func.func @transform_1(%arg0: i32) -> (i32, i32, i32) {
    %c0_i32 = arith.constant 0 : i32
    %c0_i32_0 = arith.constant 0 : i32
    %c0_i32_1 = arith.constant 0 : i32
    %c0_i32_2 = arith.constant 0 : i32
    return %c0_i32, %c0_i32_0, %c0_i32_1 : i32, i32, i32
  }
  func.func @transform_2(%arg0: i32) -> (i32, i32) {
    %c0_i32 = arith.constant 0 : i32
    %c0_i32_0 = arith.constant 0 : i32
    %c0_i32_1 = arith.constant 0 : i32
    return %c0_i32, %c0_i32_0 : i32, i32
  }
  func.func @transform_3(%arg0: i32) -> (i32, i32, i32) {
    %c0_i32 = arith.constant 0 : i32
    %c0_i32_0 = arith.constant 0 : i32
    %c0_i32_1 = arith.constant 0 : i32
    %c0_i32_2 = arith.constant 0 : i32
    return %c0_i32, %c0_i32_0, %c0_i32_1 : i32, i32, i32
  }
  func.func @transform_4(%arg0: i32) -> (i32, i32) {
    %c0_i32 = arith.constant 0 : i32
    %c0_i32_0 = arith.constant 0 : i32
    %c0_i32_1 = arith.constant 0 : i32
    return %c0_i32, %c0_i32_0 : i32, i32
  }
  func.func @transform_5(%arg0: i32) -> (i32, i32) {
    %c0_i32 = arith.constant 0 : i32
    %c0_i32_0 = arith.constant 0 : i32
    %c0_i32_1 = arith.constant 0 : i32
    return %c0_i32, %c0_i32_0 : i32, i32
  }
  func.func @transform_6(%arg0: i32) -> (i32, i32) {
    %c0_i32 = arith.constant 0 : i32
    %c0_i32_0 = arith.constant 0 : i32
    %c0_i32_1 = arith.constant 0 : i32
    return %c0_i32, %c0_i32_0 : i32, i32
  }
  func.func @transform_7(%arg0: i32) -> (i32, i32) {
    %c0_i32 = arith.constant 0 : i32
    %c0_i32_0 = arith.constant 0 : i32
    %c0_i32_1 = arith.constant 0 : i32
    return %c0_i32, %c0_i32_0 : i32, i32
  }
  func.func @transform_8(%arg0: i32) -> (i32, i32) {
    %c0_i32 = arith.constant 0 : i32
    %c0_i32_0 = arith.constant 0 : i32
    %c0_i32_1 = arith.constant 0 : i32
    return %c0_i32, %c0_i32_0 : i32, i32
  }
  func.func @transform_9(%arg0: i32) -> (i32, i32) {
    %c0_i32 = arith.constant 0 : i32
    %c0_i32_0 = arith.constant 0 : i32
    return %arg0, %c0_i32 : i32, i32
  }
}

</mosaic_0001>

<bundles_post_ra>
// kernel: infer_net_forward.1
= control target key start
LH: loop header
LB: loop body
LE: loop exit
PB: predicated region body
PF: predicated region fallthrough
CT: control target
= control target key end

     0   :  { %14 = vsyncpa [#allocation3], 0  ;;  %s18203_s0 = inlined_call_operand.vmem [shape: bf16[8,784], index: 0, kind: input, shape index: {}]   ;;  %s18204_s1 = inlined_call_operand.hbm [shape: bf16[4,784,720], index: 1, kind: input, shape index: {}]   ;;  %s18205_s2 = inlined_call_operand.hbm [shape: f32[1,720], index: 2, kind: input, shape index: {}]   ;;  %s18206_s3 = inlined_call_operand.vmem [shape: bf16[4,720,160], index: 3, kind: input, shape index: {}]   ;;  %s18207_s4 = inlined_call_operand.hbm [shape: f32[1,160], index: 4, kind: input, shape index: {}]   ;;  %s18208_s5 = inlined_call_operand.vmem [shape: bf16[160,32], index: 5, kind: input, shape index: {}]   ;;  %s18209_s6 = inlined_call_operand.hbm [shape: f32[1,32], index: 6, kind: input, shape index: {}]   ;;  %s18210_s7 = inlined_call_operand.hbm [shape: bf16[32,128], index: 7, kind: input, shape index: {}]   ;;  %s18211_s8 = inlined_call_operand.hbm [shape: f32[1,128], index: 8, kind: input, shape index: {}]   ;;  %s18212_s9 = inlined_call_operand.vmem [shape: f32[8,128], index: 9, kind: output, shape index: {}]  }
   0x1   :  { %15 = vsyncpa [#allocation5], 0 }
   0x2   :  { %16 = vsyncpa [#allocation8], 0 }
   0x3   :  { %17 = vsyncpa [#allocation11], 0  ;;  %s16634_s30 = smov [#allocation4]   ;;  %s16635_s11 = smov [#allocation7]  }
   0x4   :  { %s38_s10 = sshll.u32 %s16634_s30, 4  ;;  %s62_s12 = sshll.u32 %s16635_s11, 4  ;;  %s39_s10 = int_to_ptr.vmem [resolvable:$true] %s38_s10  ;;  %s63_s12 = int_to_ptr.vmem [resolvable:$true] %s62_s12 }
   0x5   :  { %s16494_s15 = scalar_lea.hbm %s18205_s2, 96 }
   0x6   :  { %p16495_p0 = scmp.ne.s32.totalorder %s18205_s2, %s16494_s15  ;;  %p16498_p1 = scmp.lt.u32.totalorder %s16494_s15, %s18205_s2 }
   0x8   :  { %p16500_p2 = pnand %p16498_p1, %p16495_p0 }
   0xa   :  { %16503 = shalt.err (!%p16500_p2)
}
   0xb   :  { %s16504_s20 = scalar_lea.vmem %s39_s10, 96  ;;  %p16509_p4 = scmp.lt.s32.totalorder %s39_s10, %s39_s10 }
   0xc   :  { %p16505_p3 = scmp.ne.s32.totalorder %s39_s10, %s16504_s20  ;;  %p16510_p5 = scmp.lt.s32.totalorder %s16504_s20, %s16504_s20 }
   0xe   :  { %p16511_p6 = por %p16510_p5, %p16509_p4 }
  0x10   :  { %p16512_p7 = pnand %p16511_p6, %p16505_p3 }
  0x12   :  { %16515 = shalt.err (!%p16512_p7)
}
  0x13   :  { %41 = dma.hbm_to_vmem [thread:$0]  %s18205_s2, 96, %s39_s10, [#allocation5]  }
  0x14   :  { %s16516_s25 = scalar_lea.hbm %s18209_s6, 16 }
  0x15   :  { %p16517_p8 = scmp.ne.s32.totalorder %s18209_s6, %s16516_s25  ;;  %p16520_p9 = scmp.lt.u32.totalorder %s16516_s25, %s18209_s6 }
  0x17   :  { %p16522_p10 = pnand %p16520_p9, %p16517_p8 }
  0x19   :  { %16525 = shalt.err (!%p16522_p10)
}
  0x1a   :  { %s16526_s30 = scalar_lea.vmem %s63_s12, 16  ;;  %s16530_s11 = scalar_lea.vmem %s63_s12, 32 }
  0x1b   :  { %p16527_p11 = scmp.ne.s32.totalorder %s63_s12, %s16526_s30  ;;  %p16531_p12 = scmp.lt.s32.totalorder %s63_s12, %s63_s12 }
  0x1c   :  { %p16532_p13 = scmp.lt.s32.totalorder %s16530_s11, %s16526_s30 }
  0x1e   :  { %p16533_p0 = por %p16532_p13, %p16531_p12 }
  0x20   :  { %p16534_p1 = pnand %p16533_p0, %p16527_p11 }
  0x22   :  { %16537 = shalt.err (!%p16534_p1)
}
  0x23   :  { %65 = dma.hbm_to_vmem [thread:$0]  %s18209_s6, 16, %s63_s12, [#allocation8]  }
  0x24   :  { %s16636_s13 = smov [#allocation2]   ;;  %s16538_s17 = scalar_lea.hbm %s18204_s1, 150528 }
  0x25   :  { %s25_s14 = sshll.u32 %s16636_s13, 4  ;;  %p16539_p2 = scmp.ne.s32.totalorder %s18204_s1, %s16538_s17  ;;  %s26_s14 = int_to_ptr.vmem [resolvable:$true] %s25_s14 }
  0x26   :  { %p16542_p3 = scmp.lt.u32.totalorder %s16538_s17, %s18204_s1 }
  0x28   :  { %p16544_p4 = pnand %p16542_p3, %p16539_p2 }
  0x2a   :  { %16547 = shalt.err (!%p16544_p4)
}
  0x2b   :  { %s16548_s22 = scalar_lea.vmem %s26_s14, 150528  ;;  %p16553_p6 = scmp.lt.s32.totalorder %s26_s14, %s26_s14 }
  0x2c   :  { %p16549_p5 = scmp.ne.s32.totalorder %s26_s14, %s16548_s22  ;;  %p16554_p7 = scmp.lt.s32.totalorder %s16548_s22, %s16548_s22 }
  0x2e   :  { %p16555_p8 = por %p16554_p7, %p16553_p6 }
  0x30   :  { %p16556_p9 = pnand %p16555_p8, %p16549_p5 }
  0x32   :  { %16559 = shalt.err (!%p16556_p9)
}
  0x33   :  { %s16637_s6 = smov 384   ;;  %s16638_s12 = smov 24  }
  0x34   :  { %31 = dma.hbm_to_vmem [thread:$0]  %s18204_s1, 150528, %s26_s14, [#allocation3], %s16637_s6, %s16637_s6, %s16638_s12  }
  0x35   :  { %s16639_s25 = smov [#allocation6]   ;;  %s16640_s27 = smov [#allocation9]  }
  0x36   :  { %s50_s26 = sshll.u32 %s16639_s25, 4  ;;  %s71_s28 = sshll.u32 %s16640_s27, 4  ;;  %s51_s26 = int_to_ptr.vmem [resolvable:$true] %s50_s26  ;;  %s72_s28 = int_to_ptr.vmem [resolvable:$true] %s71_s28 }
  0x37   :  { %s16560_s11 = scalar_lea.hbm %s18207_s4, 32 }
  0x38   :  { %p16561_p10 = scmp.ne.s32.totalorder %s18207_s4, %s16560_s11  ;;  %p16564_p11 = scmp.lt.u32.totalorder %s16560_s11, %s18207_s4 }
  0x3a   :  { %p16566_p12 = pnand %p16564_p11, %p16561_p10 }
  0x3c   :  { %16569 = shalt.err (!%p16566_p12)
}
  0x3d   :  { %s16570_s1 = scalar_lea.vmem %s51_s26, 32  ;;  %p16575_p0 = scmp.lt.s32.totalorder %s51_s26, %s51_s26 }
  0x3e   :  { %p16571_p13 = scmp.ne.s32.totalorder %s51_s26, %s16570_s1  ;;  %p16576_p1 = scmp.lt.s32.totalorder %s16570_s1, %s16570_s1 }
  0x40   :  { %p16577_p2 = por %p16576_p1, %p16575_p0 }
  0x42   :  { %p16578_p3 = pnand %p16577_p2, %p16571_p13 }
  0x44   :  { %16581 = shalt.err (!%p16578_p3)
}
  0x45   :  { %53 = dma.hbm_to_vmem [thread:$0]  %s18207_s4, 32, %s51_s26, [#allocation5]  }
  0x46   :  { %s16582_s19 = scalar_lea.hbm %s18210_s7, 256 }
  0x47   :  { %p16583_p4 = scmp.ne.s32.totalorder %s18210_s7, %s16582_s19  ;;  %p16586_p5 = scmp.lt.u32.totalorder %s16582_s19, %s18210_s7 }
  0x49   :  { %p16588_p6 = pnand %p16586_p5, %p16583_p4 }
  0x4b   :  { %16591 = shalt.err (!%p16588_p6)
}
  0x4c   :  { %s16592_s12 = scalar_lea.vmem %s72_s28, 256  ;;  %p16597_p8 = scmp.lt.s32.totalorder %s72_s28, %s72_s28 }
  0x4d   :  { %p16593_p7 = scmp.ne.s32.totalorder %s72_s28, %s16592_s12  ;;  %p16598_p9 = scmp.lt.s32.totalorder %s16592_s12, %s16592_s12 }
  0x4f   :  { %p16599_p10 = por %p16598_p9, %p16597_p8 }
  0x51   :  { %p16600_p11 = pnand %p16599_p10, %p16593_p7 }
  0x53   :  { %16603 = shalt.err (!%p16600_p11)
}
  0x54   :  { %s16641_s4 = smov 64   ;;  %s16642_s23 = smov 4  }
  0x55   :  { %77 = dma.hbm_to_vmem [thread:$0]  %s18210_s7, 256, %s72_s28, [#allocation8], %s16641_s4, %s16641_s4, %s16642_s23  }
  0x56   :  { %s16643_s26 = smov [#allocation10]   ;;  %s16604_s11 = scalar_lea.hbm %s18211_s8, 16 }
  0x57   :  { %s84_s27 = sshll.u32 %s16643_s26, 4  ;;  %p16605_p12 = scmp.ne.s32.totalorder %s18211_s8, %s16604_s11  ;;  %s85_s27 = int_to_ptr.vmem [resolvable:$true] %s84_s27 }
  0x58   :  { %p16608_p13 = scmp.lt.u32.totalorder %s16604_s11, %s18211_s8 }
  0x5a   :  { %p16610_p0 = pnand %p16608_p13, %p16605_p12 }
  0x5c   :  { %16613 = shalt.err (!%p16610_p0)
}
  0x5d   :  { %s16614_s1 = scalar_lea.vmem %s85_s27, 16  ;;  %s16618_s7 = scalar_lea.vmem %s85_s27, 32 }
  0x5e   :  { %p16615_p1 = scmp.ne.s32.totalorder %s85_s27, %s16614_s1  ;;  %p16619_p2 = scmp.lt.s32.totalorder %s85_s27, %s85_s27 }
  0x5f   :  { %p16620_p3 = scmp.lt.s32.totalorder %s16618_s7, %s16614_s1 }
  0x61   :  { %p16621_p4 = por %p16620_p3, %p16619_p2 }
  0x63   :  { %p16622_p5 = pnand %p16621_p4, %p16615_p1 }
  0x65   :  { %16625 = shalt.err (!%p16622_p5)
}
  0x66   :  { %87 = dma.hbm_to_vmem [thread:$0]  %s18211_s8, 16, %s85_s27, [#allocation11]  }
  0x67   :  { %16626 = dma.done.wait [#allocation3], 150528  }
  0x68   :  { %16627 = vsyncadd [#allocation3], 4294816768 }
  0x69   :  { %16628 = dma.done.wait [#allocation5], 128  }
  0x6a   :  { %16629 = vsyncadd [#allocation5], 4294967168 }
  0x6b   :  { %16630 = dma.done.wait [#allocation8], 272  }
  0x6c   :  { %16631 = vsyncadd [#allocation8], 4294967024 }
  0x6d   :  { %16632 = dma.done.wait [#allocation11], 16  }
  0x6e   :  { %16633 = vsyncadd [#allocation11], 4294967280  ;;  %v16644_v0 = vmov 0   ;;  %v14166_v1 = vld [vmem:[#allocation2 + $0x4] ss:$24 sps:$4 sm:$0xff]   ;;  %vm1899_vm0 = vcmask 130048  }
  0x6f   :  { %2058 = vmatprep.mubr.bf16.mxu1 %v16644_v0  ;;  %v14168_v2 = vld [vmem:[#allocation2 + $0x904] ss:$24 sps:$4 sm:$0xff]   ;;  %1903 = vmatprep.subr.bf16.mxu0 %v14166_v1  ;;  %v14170_v3 = vld [vmem:[#allocation2] ss:$24 sps:$4 sm:$0xff]   ;;  %v14172_v5 = vld [vmem:[#allocation2 + $0x34] ss:$24 sps:$4 sm:$0xff]  }
  0x70   :  { %v14171_v4 = vld [vmem:[#allocation2 + $0x900] ss:$24 sps:$4 sm:$0xff]   ;;  %2026 = vmatprep.subr.bf16.mxu1 %v14168_v2  ;;  %1904 = vmatpush1.bf16.msra.mxu0 %v14170_v3  ;;  %v14176_v7 = vld [vmem:[#allocation2 + $0xc] ss:$24 sps:$4 sm:$0xff]   ;;  %v14177_v8 = vld [vmem:[#allocation2 + $0x30] ss:$24 sps:$4 sm:$0xff]  }
  0x71   :  { %2027 = vmatpush1.bf16.msra.mxu1 %v14171_v4  ;;  %v14174_v6 = vld [vmem:[#allocation2 + $0x8] ss:$24 sps:$4 sm:$0xff]   ;;  %1905 = vmatprep.subr.bf16.mxu0 %v14172_v5  ;;  %v14178_v9 = vld [vmem:[%s18203_s0 + $0x18] ss:$0 sps:$4 sm:$0xff]   ;;  %v14179_v10 = vld [vmem:[#allocation2 + $0x64] ss:$24 sps:$4 sm:$0xff]  }
  0x72   :  { %2067 = vmatprep.subr.bf16.mxu1 %v14176_v7  ;;  %v14181_v11 = vld [vmem:[#allocation2 + $0x38] ss:$24 sps:$4 sm:$0xff]   ;;  %v14183_v12 = vld [vmem:[#allocation2 + $0x3c] ss:$24 sps:$4 sm:$0xff]   ;;  %v14189_v15 = vld [vmem:[#allocation2 + $0x6c] ss:$24 sps:$4 sm:$0xff]  }
  0x73   :  { %v14184_v13 = vld [vmem:[#allocation2 + $0x60] ss:$24 sps:$4 sm:$0xff]   ;;  %v14185_v14 = vld [vmem:[#allocation2 + $0x94] ss:$24 sps:$4 sm:$0xff]   ;;  %v14190_v17 = vld [vmem:[#allocation2 + $0x90] ss:$24 sps:$4 sm:$0xff]  }
  0x74   :  { %12426 = vmatmul.mubr.msk.bf16.vlgmr.msra.gmra.mrb[0].mxu1 %vm1899_vm0, %v14178_v9  ;;  %1906 = vmatpush1.bf16.msra.mxu0 %v14177_v8  ;;  %v14187_v16 = vld [vmem:[#allocation2 + $0x68] ss:$24 sps:$4 sm:$0xff]   ;;  %v14191_v18 = vld [vmem:[#allocation2 + $0xc4] ss:$24 sps:$4 sm:$0xff]   ;;  %v14193_v20 = vld [vmem:[#allocation2 + $0x98] ss:$24 sps:$4 sm:$0xff]  }
  0x75   :  { %2068 = vmatpush1.bf16.msra.mxu1 %v14174_v6  ;;  %1907 = vmatprep.subr.bf16.mxu0 %v14179_v10  ;;  %v14195_v19 = vld [vmem:[#allocation2 + $0x9c] ss:$24 sps:$4 sm:$0xff]   ;;  %v14196_v21 = vld [vmem:[#allocation2 + $0xc0] ss:$24 sps:$4 sm:$0xff]   ;;  %v14201_v23 = vld [vmem:[#allocation2 + $0xcc] ss:$24 sps:$4 sm:$0xff]  }
  0x76   :  { %2069 = vmatprep.subr.bf16.mxu1 %v14183_v12  ;;  %v14197_v22 = vld [vmem:[#allocation2 + $0xf4] ss:$24 sps:$4 sm:$0xff]   ;;  %v14199_v24 = vld [vmem:[#allocation2 + $0xc8] ss:$24 sps:$4 sm:$0xff]   ;;  %v14203_v26 = vld [vmem:[#allocation2 + $0x124] ss:$24 sps:$4 sm:$0xff]  }
  0x77   :  { %v14202_v25 = vld [vmem:[#allocation2 + $0xf0] ss:$24 sps:$4 sm:$0xff]   ;;  %v14207_v27 = vld [vmem:[#allocation2 + $0xfc] ss:$24 sps:$4 sm:$0xff]   ;;  %v14208_v29 = vld [vmem:[#allocation2 + $0x120] ss:$24 sps:$4 sm:$0xff]  }
  0x78   :  { %1908 = vmatpush1.bf16.msra.mxu0 %v14184_v13  ;;  %v14205_v28 = vld [vmem:[#allocation2 + $0xf8] ss:$24 sps:$4 sm:$0xff]   ;;  %v14209_v30 = vld [vmem:[#allocation2 + $0x154] ss:$24 sps:$4 sm:$0xff]   ;;  %v14211_v32 = vld [vmem:[#allocation2 + $0x128] ss:$24 sps:$4 sm:$0xff]  }
  0x79   :  { %2070 = vmatpush1.bf16.msra.mxu1 %v14181_v11  ;;  %1909 = vmatprep.subr.bf16.mxu0 %v14185_v14  ;;  %v14213_v31 = vld [vmem:[#allocation2 + $0x12c] ss:$24 sps:$4 sm:$0xff]   ;;  %v14214_v33 = vld [vmem:[#allocation2 + $0x150] ss:$24 sps:$4 sm:$0xff]   ;;  %v14219_v35 = vld [vmem:[#allocation2 + $0x15c] ss:$24 sps:$4 sm:$0xff]  }
  0x7a   :  { %2071 = vmatprep.subr.bf16.mxu1 %v14189_v15  ;;  %v14215_v34 = vld [vmem:[#allocation2 + $0x184] ss:$24 sps:$4 sm:$0xff]   ;;  %v14217_v36 = vld [vmem:[#allocation2 + $0x158] ss:$24 sps:$4 sm:$0xff]   ;;  %v14221_v38 = vld [vmem:[#allocation2 + $0x1b4] ss:$24 sps:$4 sm:$0xff]  }
  0x7b   :  { %v14220_v37 = vld [vmem:[#allocation2 + $0x180] ss:$24 sps:$4 sm:$0xff]   ;;  %v14225_v39 = vld [vmem:[#allocation2 + $0x18c] ss:$24 sps:$4 sm:$0xff]   ;;  %v14226_v41 = vld [vmem:[#allocation2 + $0x1b0] ss:$24 sps:$4 sm:$0xff]  }
  0x7c   :  { %1910 = vmatpush1.bf16.msra.mxu0 %v14190_v17  ;;  %v14223_v40 = vld [vmem:[#allocation2 + $0x188] ss:$24 sps:$4 sm:$0xff]   ;;  %v14227_v42 = vld [vmem:[#allocation2 + $0x1e4] ss:$24 sps:$4 sm:$0xff]   ;;  %v14229_v44 = vld [vmem:[#allocation2 + $0x1b8] ss:$24 sps:$4 sm:$0xff]  }
  0x7d   :  { %2072 = vmatpush1.bf16.msra.mxu1 %v14187_v16  ;;  %1911 = vmatprep.subr.bf16.mxu0 %v14191_v18  ;;  %v14231_v43 = vld [vmem:[#allocation2 + $0x1bc] ss:$24 sps:$4 sm:$0xff]   ;;  %v14232_v45 = vld [vmem:[#allocation2 + $0x1e0] ss:$24 sps:$4 sm:$0xff]   ;;  %v14237_v47 = vld [vmem:[#allocation2 + $0x1ec] ss:$24 sps:$4 sm:$0xff]  }
  0x7e   :  { %2073 = vmatprep.subr.bf16.mxu1 %v14195_v19  ;;  %v14233_v46 = vld [vmem:[#allocation2 + $0x214] ss:$24 sps:$4 sm:$0xff]   ;;  %v14235_v48 = vld [vmem:[#allocation2 + $0x1e8] ss:$24 sps:$4 sm:$0xff]   ;;  %v14239_v51 = vld [vmem:[#allocation2 + $0x244] ss:$24 sps:$4 sm:$0xff]  }
  0x7f   :  { %v107_v49 = vld [vmem:[%s18203_s0] sm:$0xff]  ;;  %v14238_v50 = vld [vmem:[#allocation2 + $0x210] ss:$24 sps:$4 sm:$0xff]   ;;  %v14243_v53 = vld [vmem:[#allocation2 + $0x21c] ss:$24 sps:$4 sm:$0xff]   ;;  %vm9774_vm1 = vcmask 654336  }
  0x80   :  { %1912 = vmatpush1.bf16.msra.mxu0 %v14196_v21  ;;  %v16777_v52 = vcombine.high %v107_v49, %v107_v49  ;;  %v14241_v54 = vld [vmem:[#allocation2 + $0x218] ss:$24 sps:$4 sm:$0xff]   ;;  %v14245_v56 = vld [vmem:[#allocation2 + $0x274] ss:$24 sps:$4 sm:$0xff]   ;;  %v14247_v58 = vld [vmem:[#allocation2 + $0x248] ss:$24 sps:$4 sm:$0xff]   ;;  %v16781_v8 = vcombine.low %v107_v49, %v107_v49 }
  0x81   :  { %2074 = vmatpush1.bf16.msra.mxu1 %v14193_v20  ;;  %1913 = vmatprep.subr.bf16.mxu0 %v14197_v22  ;;  %v14244_v55 = vld [vmem:[#allocation2 + $0x240] ss:$24 sps:$4 sm:$0xff]   ;;  %v14249_v57 = vld [vmem:[#allocation2 + $0x24c] ss:$24 sps:$4 sm:$0xff]   ;;  %v14250_v59 = vld [vmem:[#allocation2 + $0x270] ss:$24 sps:$4 sm:$0xff]  }
  0x82   :  { %2075 = vmatprep.subr.bf16.mxu1 %v14201_v23  ;;  %1935 = vmatprep.mubr.bf16.mxu0 %v16777_v52  ;;  %v14251_v60 = vld [vmem:[#allocation2 + $0x2a4] ss:$24 sps:$4 sm:$0xff]   ;;  %v14253_v62 = vld [vmem:[#allocation2 + $0x278] ss:$24 sps:$4 sm:$0xff]   ;;  %v14257_v1 = vld [vmem:[#allocation2 + $0x2d4] ss:$24 sps:$4 sm:$0xff]  }
  0x83   :  { %2099 = vmatprep.mubr.bf16.mxu1 %v16777_v52  ;;  %v14255_v61 = vld [vmem:[#allocation2 + $0x27c] ss:$24 sps:$4 sm:$0xff]   ;;  %v14256_v63 = vld [vmem:[#allocation2 + $0x2a0] ss:$24 sps:$4 sm:$0xff]   ;;  %v14261_v2 = vld [vmem:[#allocation2 + $0x2ac] ss:$24 sps:$4 sm:$0xff]  }
  0x84   :  { %1914 = vmatpush1.bf16.msra.mxu0 %v14202_v25  ;;  %v14259_v3 = vld [vmem:[#allocation2 + $0x2a8] ss:$24 sps:$4 sm:$0xff]   ;;  %v14266_v5 = vld [vmem:[#allocation2 + $0x304] ss:$24 sps:$4 sm:$0xff]   ;;  %v14267_v9 = vld [vmem:[#allocation2 + $0x2d8] ss:$24 sps:$4 sm:$0xff]  }
  0x85   :  { %2076 = vmatpush1.bf16.msra.mxu1 %v14199_v24  ;;  %1915 = vmatprep.subr.bf16.mxu0 %v14203_v26  ;;  %v14262_v4 = vld [vmem:[#allocation2 + $0x2d0] ss:$24 sps:$4 sm:$0xff]   ;;  %v14269_v6 = vld [vmem:[#allocation2 + $0x2dc] ss:$24 sps:$4 sm:$0xff]   ;;  %v14264_v7 = vld [vmem:[#allocation2 + $0x300] ss:$24 sps:$4 sm:$0xff]  }
  0x86   :  { %2077 = vmatprep.subr.bf16.mxu1 %v14207_v27  ;;  %v14273_v10 = vld [vmem:[#allocation2 + $0x334] ss:$24 sps:$4 sm:$0xff]   ;;  %v14271_v12 = vld [vmem:[#allocation2 + $0x330] ss:$24 sps:$4 sm:$0xff]   ;;  %v14279_v14 = vld [vmem:[#allocation2 + $0x364] ss:$24 sps:$4 sm:$0xff]  }
  0x87   :  { %v14276_v11 = vld [vmem:[#allocation2 + $0x30c] ss:$24 sps:$4 sm:$0xff]   ;;  %v14274_v13 = vld [vmem:[#allocation2 + $0x308] ss:$24 sps:$4 sm:$0xff]   ;;  %v14282_v15 = vld [vmem:[#allocation2 + $0x33c] ss:$24 sps:$4 sm:$0xff]  }
  0x88   :  { %1916 = vmatpush1.bf16.msra.mxu0 %v14208_v29  ;;  %v14277_v16 = vld [vmem:[#allocation2 + $0x360] ss:$24 sps:$4 sm:$0xff]   ;;  %v14285_v18 = vld [vmem:[#allocation2 + $0x394] ss:$24 sps:$4 sm:$0xff]   ;;  %v14283_v20 = vld [vmem:[#allocation2 + $0x390] ss:$24 sps:$4 sm:$0xff]  }
  0x89   :  { %2078 = vmatpush1.bf16.msra.mxu1 %v14205_v28  ;;  %1917 = vmatprep.subr.bf16.mxu0 %v14209_v30  ;;  %v14280_v17 = vld [vmem:[#allocation2 + $0x338] ss:$24 sps:$4 sm:$0xff]   ;;  %v14288_v19 = vld [vmem:[#allocation2 + $0x36c] ss:$24 sps:$4 sm:$0xff]   ;;  %v14286_v21 = vld [vmem:[#allocation2 + $0x368] ss:$24 sps:$4 sm:$0xff]  }
  0x8a   :  { %2079 = vmatprep.subr.bf16.mxu1 %v14213_v31  ;;  %v14291_v22 = vld [vmem:[#allocation2 + $0x3c4] ss:$24 sps:$4 sm:$0xff]   ;;  %v14289_v24 = vld [vmem:[#allocation2 + $0x3c0] ss:$24 sps:$4 sm:$0xff]   ;;  %v14297_v26 = vld [vmem:[#allocation2 + $0x3f4] ss:$24 sps:$4 sm:$0xff]  }
  0x8b   :  { %v14294_v23 = vld [vmem:[#allocation2 + $0x39c] ss:$24 sps:$4 sm:$0xff]   ;;  %v14292_v25 = vld [vmem:[#allocation2 + $0x398] ss:$24 sps:$4 sm:$0xff]   ;;  %v14300_v27 = vld [vmem:[#allocation2 + $0x3cc] ss:$24 sps:$4 sm:$0xff]  }
  0x8c   :  { %1918 = vmatpush1.bf16.msra.mxu0 %v14214_v33  ;;  %v14295_v28 = vld [vmem:[#allocation2 + $0x3f0] ss:$24 sps:$4 sm:$0xff]   ;;  %v14303_v30 = vld [vmem:[#allocation2 + $0x424] ss:$24 sps:$4 sm:$0xff]   ;;  %v14301_v33 = vld [vmem:[#allocation2 + $0x420] ss:$24 sps:$4 sm:$0xff]  }
  0x8d   :  { %2080 = vmatpush1.bf16.msra.mxu1 %v14211_v32  ;;  %1919 = vmatprep.subr.bf16.mxu0 %v14215_v34  ;;  %v14298_v29 = vld [vmem:[#allocation2 + $0x3c8] ss:$24 sps:$4 sm:$0xff]   ;;  %v14306_v31 = vld [vmem:[#allocation2 + $0x3fc] ss:$24 sps:$4 sm:$0xff]   ;;  %v14304_v34 = vld [vmem:[#allocation2 + $0x3f8] ss:$24 sps:$4 sm:$0xff]  }
  0x8e   :  { %2081 = vmatprep.subr.bf16.mxu1 %v14219_v35  ;;  %v16788_v32 = vld [vmem:[%s18203_s0 + $0x8] sm:$0xff]  ;;  %v14330_v49 = vld [vmem:[#allocation2 + $0x4bc] ss:$24 sps:$4 sm:$0xff]   ;;  %vm12004_vm2 = vcmask 261120   ;;  %vm16646_vm3 = vmmov 0  }
  0x8f   :  { %v16792_v35 = vcombine.high %v16788_v32, %v16788_v32 }
  0x90   :  { %1920 = vmatpush1.bf16.msra.mxu0 %v14220_v37  ;;  %v14312_v37 = vld [vmem:[#allocation2 + $0x42c] ss:$24 sps:$4 sm:$0xff]  }
  0x91   :  { %2082 = vmatpush1.bf16.msra.mxu1 %v14217_v36  ;;  %1921 = vmatprep.subr.bf16.mxu0 %v14221_v38  ;;  %v14309_v36 = vld [vmem:[#allocation2 + $0x454] ss:$24 sps:$4 sm:$0xff]   ;;  %v14307_v38 = vld [vmem:[#allocation2 + $0x450] ss:$24 sps:$4 sm:$0xff]  }
  0x92   :  { %2083 = vmatprep.subr.bf16.mxu1 %v14225_v39  ;;  %v14310_v39 = vld [vmem:[#allocation2 + $0x428] ss:$24 sps:$4 sm:$0xff]  }
  0x94   :  { %1922 = vmatpush1.bf16.msra.mxu0 %v14226_v41  ;;  %v14318_v41 = vld [vmem:[#allocation2 + $0x45c] ss:$24 sps:$4 sm:$0xff]  }
  0x95   :  { %2084 = vmatpush1.bf16.msra.mxu1 %v14223_v40  ;;  %1923 = vmatprep.subr.bf16.mxu0 %v14227_v42  ;;  %v14315_v40 = vld [vmem:[#allocation2 + $0x484] ss:$24 sps:$4 sm:$0xff]   ;;  %v14313_v42 = vld [vmem:[#allocation2 + $0x480] ss:$24 sps:$4 sm:$0xff]  }
  0x96   :  { %2085 = vmatprep.subr.bf16.mxu1 %v14231_v43  ;;  %v14316_v43 = vld [vmem:[#allocation2 + $0x458] ss:$24 sps:$4 sm:$0xff]  }
  0x98   :  { %1924 = vmatpush1.bf16.msra.mxu0 %v14232_v45  ;;  %v14324_v45 = vld [vmem:[#allocation2 + $0x48c] ss:$24 sps:$4 sm:$0xff]  }
  0x99   :  { %2086 = vmatpush1.bf16.msra.mxu1 %v14229_v44  ;;  %1925 = vmatprep.subr.bf16.mxu0 %v14233_v46  ;;  %v14321_v44 = vld [vmem:[#allocation2 + $0x4b4] ss:$24 sps:$4 sm:$0xff]   ;;  %v14319_v46 = vld [vmem:[#allocation2 + $0x4b0] ss:$24 sps:$4 sm:$0xff]  }
  0x9a   :  { %2087 = vmatprep.subr.bf16.mxu1 %v14237_v47  ;;  %v14322_v47 = vld [vmem:[#allocation2 + $0x488] ss:$24 sps:$4 sm:$0xff]  }
  0x9c   :  { %1926 = vmatpush1.bf16.msra.mxu0 %v14238_v50  ;;  %v14325_v50 = vld [vmem:[#allocation2 + $0x4e0] ss:$24 sps:$4 sm:$0xff]  }
  0x9d   :  { %2088 = vmatpush1.bf16.msra.mxu1 %v14235_v48  ;;  %1927 = vmatprep.subr.bf16.mxu0 %v14239_v51  ;;  %v14327_v48 = vld [vmem:[#allocation2 + $0x4e4] ss:$24 sps:$4 sm:$0xff]   ;;  %v14328_v51 = vld [vmem:[#allocation2 + $0x4b8] ss:$24 sps:$4 sm:$0xff]  }
  0x9e   :  { %2089 = vmatprep.subr.bf16.mxu1 %v14243_v53  ;;  %v14333_v53 = vld [vmem:[#allocation2 + $0x514] ss:$24 sps:$4 sm:$0xff]  }
  0xa0   :  { %1928 = vmatpush1.bf16.msra.mxu0 %v14244_v55  ;;  %v14331_v55 = vld [vmem:[#allocation2 + $0x510] ss:$24 sps:$4 sm:$0xff]  }
  0xa1   :  { %2090 = vmatpush1.bf16.msra.mxu1 %v14241_v54  ;;  %1929 = vmatprep.subr.bf16.mxu0 %v14245_v56  ;;  %v14336_v54 = vld [vmem:[#allocation2 + $0x4ec] ss:$24 sps:$4 sm:$0xff]   ;;  %v14334_v56 = vld [vmem:[#allocation2 + $0x4e8] ss:$24 sps:$4 sm:$0xff]  }
  0xa2   :  { %2091 = vmatprep.subr.bf16.mxu1 %v14249_v57  ;;  %v14339_v57 = vld [vmem:[#allocation2 + $0x544] ss:$24 sps:$4 sm:$0xff]  }
  0xa4   :  { %1930 = vmatpush1.bf16.msra.mxu0 %v14250_v59  ;;  %v14337_v59 = vld [vmem:[#allocation2 + $0x540] ss:$24 sps:$4 sm:$0xff]  }
  0xa5   :  { %2092 = vmatpush1.bf16.msra.mxu1 %v14247_v58  ;;  %1931 = vmatprep.subr.bf16.mxu0 %v14251_v60  ;;  %v14342_v58 = vld [vmem:[#allocation2 + $0x51c] ss:$24 sps:$4 sm:$0xff]   ;;  %v14340_v60 = vld [vmem:[#allocation2 + $0x518] ss:$24 sps:$4 sm:$0xff]  }
  0xa6   :  { %2093 = vmatprep.subr.bf16.mxu1 %v14255_v61  ;;  %v14345_v61 = vld [vmem:[#allocation2 + $0x574] ss:$24 sps:$4 sm:$0xff]  }
  0xa8   :  { %1932 = vmatpush1.bf16.msra.mxu0 %v14256_v63  ;;  %v14343_v63 = vld [vmem:[#allocation2 + $0x570] ss:$24 sps:$4 sm:$0xff]  }
  0xa9   :  { %2094 = vmatpush1.bf16.msra.mxu1 %v14253_v62  ;;  %1933 = vmatprep.subr.bf16.mxu0 %v14257_v1  ;;  %v14348_v62 = vld [vmem:[#allocation2 + $0x54c] ss:$24 sps:$4 sm:$0xff]   ;;  %v14346_v1 = vld [vmem:[#allocation2 + $0x548] ss:$24 sps:$4 sm:$0xff]  }
  0xaa   :  { %2095 = vmatprep.subr.bf16.mxu1 %v14261_v2  ;;  %v14351_v2 = vld [vmem:[#allocation2 + $0x5a4] ss:$24 sps:$4 sm:$0xff]  }
  0xac   :  { %1934 = vmatpush1.bf16.msra.mxu0 %v14262_v4  ;;  %v14349_v4 = vld [vmem:[#allocation2 + $0x5a0] ss:$24 sps:$4 sm:$0xff]  }
  0xad   :  { %2096 = vmatpush1.bf16.msra.mxu1 %v14259_v3  ;;  %1944 = vmatprep.subr.bf16.mxu0 %v14266_v5  ;;  %v14354_v3 = vld [vmem:[#allocation2 + $0x57c] ss:$24 sps:$4 sm:$0xff]   ;;  %v14352_v5 = vld [vmem:[#allocation2 + $0x578] ss:$24 sps:$4 sm:$0xff]  }
  0xae   :  { %2097 = vmatprep.subr.bf16.mxu1 %v14269_v6  ;;  %v14357_v6 = vld [vmem:[#allocation2 + $0x5d4] ss:$24 sps:$4 sm:$0xff]  }
  0xaf   :  { %1936 = vmatmul.mubr.bf16.vlgmr.msra.gmra.mrb[0].mxu0 %v16781_v8 }
  0xb0   :  { %1945 = vmatpush1.bf16.msra.mxu0 %v14264_v7  ;;  %1976 = vmatprep.mubr.bf16.mxu0 %v16792_v35  ;;  %v14360_v7 = vld [vmem:[#allocation2 + $0x5ac] ss:$24 sps:$4 sm:$0xff]  }
  0xb1   :  { %2098 = vmatpush1.bf16.msra.mxu1 %v14267_v9  ;;  %1946 = vmatprep.subr.bf16.mxu0 %v14273_v10  ;;  %v14355_v9 = vld [vmem:[#allocation2 + $0x5d0] ss:$24 sps:$4 sm:$0xff]  }
  0xb2   :  { %2108 = vmatprep.subr.bf16.mxu1 %v14276_v11  ;;  %v14358_v10 = vld [vmem:[#allocation2 + $0x5a8] ss:$24 sps:$4 sm:$0xff]   ;;  %v14364_v11 = vld [vmem:[#allocation2 + $0x604] ss:$24 sps:$4 sm:$0xff]  }
  0xb4   :  { %2100 = vmatmul.mubr.bf16.vlgmr.msra.gmra.mrb[4].mxu1 %v16781_v8  ;;  %1947 = vmatpush1.bf16.msra.mxu0 %v14271_v12  ;;  %v14367_v12 = vld [vmem:[#allocation2 + $0x5dc] ss:$24 sps:$4 sm:$0xff]  }
  0xb5   :  { %2109 = vmatpush1.bf16.msra.mxu1 %v14274_v13  ;;  %1948 = vmatprep.subr.bf16.mxu0 %v14279_v14  ;;  %v14362_v13 = vld [vmem:[#allocation2 + $0x600] ss:$24 sps:$4 sm:$0xff]  }
  0xb6   :  { %2110 = vmatprep.subr.bf16.mxu1 %v14282_v15  ;;  %2140 = vmatprep.mubr.bf16.mxu1 %v16792_v35  ;;  %v14365_v14 = vld [vmem:[#allocation2 + $0x5d8] ss:$24 sps:$4 sm:$0xff]   ;;  %v16798_v15 = vcombine.low %v16788_v32, %v16788_v32 }
  0xb7   :  { %v14387_v32 = vld [vmem:[#allocation2 + $0x6c0] ss:$24 sps:$4 sm:$0xff]  }
  0xb8   :  { %1949 = vmatpush1.bf16.msra.mxu0 %v14277_v16  ;;  %v14371_v16 = vld [vmem:[#allocation2 + $0x634] ss:$24 sps:$4 sm:$0xff]  }
  0xb9   :  { %2111 = vmatpush1.bf16.msra.mxu1 %v14280_v17  ;;  %1950 = vmatprep.subr.bf16.mxu0 %v14285_v18  ;;  %v14374_v17 = vld [vmem:[#allocation2 + $0x60c] ss:$24 sps:$4 sm:$0xff]   ;;  %v16803_v18 = vld [vmem:[%s18203_s0 + $0x10] sm:$0xff] }
  0xba   :  { %2112 = vmatprep.subr.bf16.mxu1 %v14288_v19  ;;  %v16807_v19 = vcombine.high %v16803_v18, %v16803_v18 }
  0xbc   :  { %1951 = vmatpush1.bf16.msra.mxu0 %v14283_v20  ;;  %v14369_v20 = vld [vmem:[#allocation2 + $0x630] ss:$24 sps:$4 sm:$0xff]  }
  0xbd   :  { %2113 = vmatpush1.bf16.msra.mxu1 %v14286_v21  ;;  %1952 = vmatprep.subr.bf16.mxu0 %v14291_v22  ;;  %v14372_v21 = vld [vmem:[#allocation2 + $0x608] ss:$24 sps:$4 sm:$0xff]   ;;  %v14377_v22 = vld [vmem:[#allocation2 + $0x664] ss:$24 sps:$4 sm:$0xff]  }
  0xbe   :  { %2114 = vmatprep.subr.bf16.mxu1 %v14294_v23  ;;  %v14380_v23 = vld [vmem:[#allocation2 + $0x63c] ss:$24 sps:$4 sm:$0xff]  }
  0xc0   :  { %1953 = vmatpush1.bf16.msra.mxu0 %v14289_v24  ;;  %v14375_v24 = vld [vmem:[#allocation2 + $0x660] ss:$24 sps:$4 sm:$0xff]  }
  0xc1   :  { %2115 = vmatpush1.bf16.msra.mxu1 %v14292_v25  ;;  %1954 = vmatprep.subr.bf16.mxu0 %v14297_v26  ;;  %v14378_v25 = vld [vmem:[#allocation2 + $0x638] ss:$24 sps:$4 sm:$0xff]   ;;  %v14383_v26 = vld [vmem:[#allocation2 + $0x694] ss:$24 sps:$4 sm:$0xff]  }
  0xc2   :  { %2116 = vmatprep.subr.bf16.mxu1 %v14300_v27  ;;  %v14386_v27 = vld [vmem:[#allocation2 + $0x66c] ss:$24 sps:$4 sm:$0xff]  }
  0xc4   :  { %1955 = vmatpush1.bf16.msra.mxu0 %v14295_v28  ;;  %v14381_v28 = vld [vmem:[#allocation2 + $0x690] ss:$24 sps:$4 sm:$0xff]  }
  0xc5   :  { %2117 = vmatpush1.bf16.msra.mxu1 %v14298_v29  ;;  %1956 = vmatprep.subr.bf16.mxu0 %v14303_v30  ;;  %v14384_v29 = vld [vmem:[#allocation2 + $0x668] ss:$24 sps:$4 sm:$0xff]   ;;  %v14389_v30 = vld [vmem:[#allocation2 + $0x6c4] ss:$24 sps:$4 sm:$0xff]  }
  0xc6   :  { %2118 = vmatprep.subr.bf16.mxu1 %v14306_v31  ;;  %v14392_v31 = vld [vmem:[#allocation2 + $0x69c] ss:$24 sps:$4 sm:$0xff]  }
  0xc8   :  { %1957 = vmatpush1.bf16.msra.mxu0 %v14301_v33  ;;  %v14390_v33 = vld [vmem:[#allocation2 + $0x698] ss:$24 sps:$4 sm:$0xff]  }
  0xc9   :  { %2119 = vmatpush1.bf16.msra.mxu1 %v14304_v34  ;;  %1958 = vmatprep.subr.bf16.mxu0 %v14309_v36  ;;  %v14395_v34 = vld [vmem:[#allocation2 + $0x6f4] ss:$24 sps:$4 sm:$0xff]  }
  0xca   :  { %2120 = vmatprep.subr.bf16.mxu1 %v14312_v37  ;;  %v14398_v36 = vld [vmem:[#allocation2 + $0x6cc] ss:$24 sps:$4 sm:$0xff]   ;;  %v14393_v37 = vld [vmem:[#allocation2 + $0x6f0] ss:$24 sps:$4 sm:$0xff]  }
  0xcc   :  { %1959 = vmatpush1.bf16.msra.mxu0 %v14307_v38  ;;  %v14396_v38 = vld [vmem:[#allocation2 + $0x6c8] ss:$24 sps:$4 sm:$0xff]  }
  0xcd   :  { %2121 = vmatpush1.bf16.msra.mxu1 %v14310_v39  ;;  %1960 = vmatprep.subr.bf16.mxu0 %v14315_v40  ;;  %v14401_v39 = vld [vmem:[#allocation2 + $0x724] ss:$24 sps:$4 sm:$0xff]  }
  0xce   :  { %2122 = vmatprep.subr.bf16.mxu1 %v14318_v41  ;;  %v14404_v40 = vld [vmem:[#allocation2 + $0x6fc] ss:$24 sps:$4 sm:$0xff]   ;;  %v14399_v41 = vld [vmem:[#allocation2 + $0x720] ss:$24 sps:$4 sm:$0xff]  }
  0xd0   :  { %1961 = vmatpush1.bf16.msra.mxu0 %v14313_v42  ;;  %v14402_v42 = vld [vmem:[#allocation2 + $0x6f8] ss:$24 sps:$4 sm:$0xff]  }
  0xd1   :  { %2123 = vmatpush1.bf16.msra.mxu1 %v14316_v43  ;;  %1962 = vmatprep.subr.bf16.mxu0 %v14321_v44  ;;  %v14407_v43 = vld [vmem:[#allocation2 + $0x754] ss:$24 sps:$4 sm:$0xff]  }
  0xd2   :  { %2124 = vmatprep.subr.bf16.mxu1 %v14324_v45  ;;  %v14410_v44 = vld [vmem:[#allocation2 + $0x72c] ss:$24 sps:$4 sm:$0xff]   ;;  %v14405_v45 = vld [vmem:[#allocation2 + $0x750] ss:$24 sps:$4 sm:$0xff]  }
  0xd4   :  { %1963 = vmatpush1.bf16.msra.mxu0 %v14319_v46  ;;  %v14408_v46 = vld [vmem:[#allocation2 + $0x728] ss:$24 sps:$4 sm:$0xff]  }
  0xd5   :  { %2125 = vmatpush1.bf16.msra.mxu1 %v14322_v47  ;;  %1964 = vmatprep.subr.bf16.mxu0 %v14327_v48  ;;  %v14413_v47 = vld [vmem:[#allocation2 + $0x784] ss:$24 sps:$4 sm:$0xff]  }
  0xd6   :  { %2126 = vmatprep.subr.bf16.mxu1 %v14330_v49  ;;  %v14416_v48 = vld [vmem:[#allocation2 + $0x75c] ss:$24 sps:$4 sm:$0xff]   ;;  %v14411_v49 = vld [vmem:[#allocation2 + $0x780] ss:$24 sps:$4 sm:$0xff]  }
  0xd8   :  { %1965 = vmatpush1.bf16.msra.mxu0 %v14325_v50  ;;  %v14414_v50 = vld [vmem:[#allocation2 + $0x758] ss:$24 sps:$4 sm:$0xff]  }
  0xd9   :  { %2127 = vmatpush1.bf16.msra.mxu1 %v14328_v51  ;;  %1966 = vmatprep.subr.bf16.mxu0 %v14333_v53  ;;  %v14419_v51 = vld [vmem:[#allocation2 + $0x7b4] ss:$24 sps:$4 sm:$0xff]  }
  0xda   :  { %2128 = vmatprep.subr.bf16.mxu1 %v14336_v54  ;;  %v14422_v53 = vld [vmem:[#allocation2 + $0x78c] ss:$24 sps:$4 sm:$0xff]   ;;  %v14417_v54 = vld [vmem:[#allocation2 + $0x7b0] ss:$24 sps:$4 sm:$0xff]  }
  0xdc   :  { %1967 = vmatpush1.bf16.msra.mxu0 %v14331_v55  ;;  %v14420_v55 = vld [vmem:[#allocation2 + $0x788] ss:$24 sps:$4 sm:$0xff]  }
  0xdd   :  { %2129 = vmatpush1.bf16.msra.mxu1 %v14334_v56  ;;  %1968 = vmatprep.subr.bf16.mxu0 %v14339_v57  ;;  %v14425_v56 = vld [vmem:[#allocation2 + $0x7e4] ss:$24 sps:$4 sm:$0xff]  }
  0xde   :  { %2130 = vmatprep.subr.bf16.mxu1 %v14342_v58  ;;  %v14428_v57 = vld [vmem:[#allocation2 + $0x7bc] ss:$24 sps:$4 sm:$0xff]   ;;  %v14423_v58 = vld [vmem:[#allocation2 + $0x7e0] ss:$24 sps:$4 sm:$0xff]  }
  0xe0   :  { %1969 = vmatpush1.bf16.msra.mxu0 %v14337_v59  ;;  %v14426_v59 = vld [vmem:[#allocation2 + $0x7b8] ss:$24 sps:$4 sm:$0xff]  }
  0xe1   :  { %2131 = vmatpush1.bf16.msra.mxu1 %v14340_v60  ;;  %1970 = vmatprep.subr.bf16.mxu0 %v14345_v61  ;;  %v14431_v60 = vld [vmem:[#allocation2 + $0x814] ss:$24 sps:$4 sm:$0xff]  }
  0xe2   :  { %2132 = vmatprep.subr.bf16.mxu1 %v14348_v62  ;;  %v14434_v61 = vld [vmem:[#allocation2 + $0x7ec] ss:$24 sps:$4 sm:$0xff]   ;;  %v14429_v62 = vld [vmem:[#allocation2 + $0x810] ss:$24 sps:$4 sm:$0xff]  }
  0xe4   :  { %1971 = vmatpush1.bf16.msra.mxu0 %v14343_v63  ;;  %v14432_v63 = vld [vmem:[#allocation2 + $0x7e8] ss:$24 sps:$4 sm:$0xff]  }
  0xe5   :  { %2133 = vmatpush1.bf16.msra.mxu1 %v14346_v1  ;;  %1972 = vmatprep.subr.bf16.mxu0 %v14351_v2  ;;  %v14437_v1 = vld [vmem:[#allocation2 + $0x844] ss:$24 sps:$4 sm:$0xff]  }
  0xe6   :  { %2134 = vmatprep.subr.bf16.mxu1 %v14354_v3  ;;  %v14440_v2 = vld [vmem:[#allocation2 + $0x81c] ss:$24 sps:$4 sm:$0xff]   ;;  %v14435_v3 = vld [vmem:[#allocation2 + $0x840] ss:$24 sps:$4 sm:$0xff]  }
  0xe8   :  { %1973 = vmatpush1.bf16.msra.mxu0 %v14349_v4  ;;  %v14438_v4 = vld [vmem:[#allocation2 + $0x818] ss:$24 sps:$4 sm:$0xff]  }
  0xe9   :  { %2135 = vmatpush1.bf16.msra.mxu1 %v14352_v5  ;;  %1974 = vmatprep.subr.bf16.mxu0 %v14357_v6  ;;  %v14443_v5 = vld [vmem:[#allocation2 + $0x874] ss:$24 sps:$4 sm:$0xff]  }
  0xea   :  { %2136 = vmatprep.subr.bf16.mxu1 %v14360_v7  ;;  %v14446_v6 = vld [vmem:[#allocation2 + $0x84c] ss:$24 sps:$4 sm:$0xff]   ;;  %v14441_v7 = vld [vmem:[#allocation2 + $0x870] ss:$24 sps:$4 sm:$0xff]  }
  0xec   :  { %1975 = vmatpush1.bf16.msra.mxu0 %v14355_v9  ;;  %v14444_v9 = vld [vmem:[#allocation2 + $0x848] ss:$24 sps:$4 sm:$0xff]  }
  0xed   :  { %2137 = vmatpush1.bf16.msra.mxu1 %v14358_v10  ;;  %1985 = vmatprep.subr.bf16.mxu0 %v14364_v11  ;;  %v14449_v10 = vld [vmem:[#allocation2 + $0x8a4] ss:$24 sps:$4 sm:$0xff]  }
  0xee   :  { %2138 = vmatprep.subr.bf16.mxu1 %v14367_v12  ;;  %v14452_v11 = vld [vmem:[#allocation2 + $0x87c] ss:$24 sps:$4 sm:$0xff]   ;;  %v14447_v12 = vld [vmem:[#allocation2 + $0x8a0] ss:$24 sps:$4 sm:$0xff]  }
  0xef   :  { %1977 = vmatmul.mubr.bf16.vlgmr.msra.gmra.mrb[0].mxu0 %v16798_v15 }
  0xf0   :  { %1986 = vmatpush1.bf16.msra.mxu0 %v14362_v13  ;;  %2017 = vmatprep.mubr.bf16.mxu0 %v16807_v19  ;;  %v14450_v13 = vld [vmem:[#allocation2 + $0x878] ss:$24 sps:$4 sm:$0xff]  }
  0xf1   :  { %2139 = vmatpush1.bf16.msra.mxu1 %v14365_v14  ;;  %1987 = vmatprep.subr.bf16.mxu0 %v14371_v16  ;;  %v14455_v14 = vld [vmem:[#allocation2 + $0x8d4] ss:$24 sps:$4 sm:$0xff]  }
  0xf2   :  { %2149 = vmatprep.subr.bf16.mxu1 %v14374_v17  ;;  %v14458_v16 = vld [vmem:[#allocation2 + $0x8ac] ss:$24 sps:$4 sm:$0xff]   ;;  %v14453_v17 = vld [vmem:[#allocation2 + $0x8d0] ss:$24 sps:$4 sm:$0xff]  }
  0xf4   :  { %2141 = vmatmul.mubr.bf16.vlgmr.msra.gmra.mrb[4].mxu1 %v16798_v15  ;;  %1988 = vmatpush1.bf16.msra.mxu0 %v14369_v20  ;;  %v14456_v20 = vld [vmem:[#allocation2 + $0x8a8] ss:$24 sps:$4 sm:$0xff]  }
  0xf5   :  { %2150 = vmatpush1.bf16.msra.mxu1 %v14372_v21  ;;  %1989 = vmatprep.subr.bf16.mxu0 %v14377_v22  ;;  %v14463_v21 = vld [vmem:[#allocation2 + $0x8dc] ss:$24 sps:$4 sm:$0xff]  }
  0xf6   :  { %2151 = vmatprep.subr.bf16.mxu1 %v14380_v23  ;;  %2181 = vmatprep.mubr.bf16.mxu1 %v16807_v19  ;;  %v14466_v22 = vld [vmem:[#allocation2 + $0x14] ss:$24 sps:$4 sm:$0xff]   ;;  %v16815_v23 = vcombine.low %v16803_v18, %v16803_v18  ;;  %v14470_v18 = vld [vmem:[#allocation2 + $0x70] ss:$24 sps:$4 sm:$0xff]  }
  0xf8   :  { %1990 = vmatpush1.bf16.msra.mxu0 %v14375_v24  ;;  %v14461_v24 = vld [vmem:[#allocation2 + $0x8d8] ss:$24 sps:$4 sm:$0xff]  }
  0xf9   :  { %2152 = vmatpush1.bf16.msra.mxu1 %v14378_v25  ;;  %1991 = vmatprep.subr.bf16.mxu0 %v14383_v26  ;;  %v14464_v25 = vld [vmem:[#allocation2 + $0x10] ss:$24 sps:$4 sm:$0xff]   ;;  %v14469_v26 = vld [vmem:[#allocation2 + $0x44] ss:$24 sps:$4 sm:$0xff]  }
  0xfa   :  { %2153 = vmatprep.subr.bf16.mxu1 %v14386_v27  ;;  %v14475_v27 = vld [vmem:[#allocation2 + $0x90c] ss:$24 sps:$4 sm:$0xff]  }
  0xfc   :  { %1992 = vmatpush1.bf16.msra.mxu0 %v14381_v28  ;;  %v14467_v28 = vld [vmem:[#allocation2 + $0x40] ss:$24 sps:$4 sm:$0xff]  }
  0xfd   :  { %2154 = vmatpush1.bf16.msra.mxu1 %v14384_v29  ;;  %1993 = vmatprep.subr.bf16.mxu0 %v14389_v30  ;;  %v14473_v29 = vld [vmem:[#allocation2 + $0x908] ss:$24 sps:$4 sm:$0xff]   ;;  %v14472_v30 = vld [vmem:[#allocation2 + $0x74] ss:$24 sps:$4 sm:$0xff]  }
  0xfe   :  { %2155 = vmatprep.subr.bf16.mxu1 %v14392_v31  ;;  %v14484_v31 = vld [vmem:[#allocation2 + $0x914] ss:$24 sps:$4 sm:$0xff]  }
 0x100   :  { %1994 = vmatpush1.bf16.msra.mxu0 %v14387_v32  ;;  %v14478_v32 = vld [vmem:[#allocation2 + $0xa4] ss:$24 sps:$4 sm:$0xff]  }
 0x101   :  { %2156 = vmatpush1.bf16.msra.mxu1 %v14390_v33  ;;  %1995 = vmatprep.subr.bf16.mxu0 %v14395_v34  ;;  %v14476_v33 = vld [vmem:[#allocation2 + $0xa0] ss:$24 sps:$4 sm:$0xff]   ;;  %v14481_v34 = vld [vmem:[#allocation2 + $0xd4] ss:$24 sps:$4 sm:$0xff]  }
 0x102   :  { %2157 = vmatprep.subr.bf16.mxu1 %v14398_v36  ;;  %v14479_v36 = vld [vmem:[#allocation2 + $0xd0] ss:$24 sps:$4 sm:$0xff]  }
 0x104   :  { %1996 = vmatpush1.bf16.msra.mxu0 %v14393_v37  ;;  %v14482_v37 = vld [vmem:[#allocation2 + $0x910] ss:$24 sps:$4 sm:$0xff]  }
 0x105   :  { %2158 = vmatpush1.bf16.msra.mxu1 %v14396_v38  ;;  %1997 = vmatprep.subr.bf16.mxu0 %v14401_v39  ;;  %v14487_v38 = vld [vmem:[#allocation2 + $0x104] ss:$24 sps:$4 sm:$0xff]   ;;  %v14490_v39 = vld [vmem:[#allocation2 + $0x934] ss:$24 sps:$4 sm:$0xff]  }
 0x106   :  { %2159 = vmatprep.subr.bf16.mxu1 %v14404_v40  ;;  %v16489_v40 = vld [vmem:[%s18203_s0 + $0x18] ss:$0 sps:$4 sm:$0xff]  }
 0x108   :  { %1998 = vmatpush1.bf16.msra.mxu0 %v14399_v41  ;;  %v14485_v41 = vld [vmem:[#allocation2 + $0x100] ss:$24 sps:$4 sm:$0xff]  }
 0x109   :  { %2160 = vmatpush1.bf16.msra.mxu1 %v14402_v42  ;;  %1999 = vmatprep.subr.bf16.mxu0 %v14407_v43  ;;  %v14493_v42 = vld [vmem:[#allocation2 + $0x134] ss:$24 sps:$4 sm:$0xff]   ;;  %v14488_v43 = vld [vmem:[#allocation2 + $0x930] ss:$24 sps:$4 sm:$0xff]  }
 0x10a   :  { %2161 = vmatprep.subr.bf16.mxu1 %v14410_v44  ;;  %v14491_v44 = vld [vmem:[#allocation2 + $0x130] ss:$24 sps:$4 sm:$0xff]  }
 0x10c   :  { %2000 = vmatpush1.bf16.msra.mxu0 %v14405_v45  ;;  %v14496_v45 = vld [vmem:[#allocation2 + $0x964] ss:$24 sps:$4 sm:$0xff]  }
 0x10d   :  { %2162 = vmatpush1.bf16.msra.mxu1 %v14408_v46  ;;  %2001 = vmatprep.subr.bf16.mxu0 %v14413_v47  ;;  %v14499_v46 = vld [vmem:[#allocation2 + $0x164] ss:$24 sps:$4 sm:$0xff]  }
 0x10e   :  { %2163 = vmatprep.subr.bf16.mxu1 %v14416_v48  ;;  %v14494_v48 = vld [vmem:[#allocation2 + $0x960] ss:$24 sps:$4 sm:$0xff]  }
 0x110   :  { %2002 = vmatpush1.bf16.msra.mxu0 %v14411_v49 }
 0x111   :  { %2164 = vmatpush1.bf16.msra.mxu1 %v14414_v50  ;;  %2003 = vmatprep.subr.bf16.mxu0 %v14419_v51  ;;  %v14497_v50 = vld [vmem:[#allocation2 + $0x160] ss:$24 sps:$4 sm:$0xff]  }
 0x112   :  { %2165 = vmatprep.subr.bf16.mxu1 %v14422_v53  ;;  %v14502_v53 = vld [vmem:[#allocation2 + $0x994] ss:$24 sps:$4 sm:$0xff]  }
 0x114   :  { %2004 = vmatpush1.bf16.msra.mxu0 %v14417_v54  ;;  %v14505_v54 = vld [vmem:[#allocation2 + $0x194] ss:$24 sps:$4 sm:$0xff]  }
 0x115   :  { %2166 = vmatpush1.bf16.msra.mxu1 %v14420_v55  ;;  %2005 = vmatprep.subr.bf16.mxu0 %v14425_v56  ;;  %v14500_v56 = vld [vmem:[#allocation2 + $0x990] ss:$24 sps:$4 sm:$0xff]  }
 0x116   :  { %2167 = vmatprep.subr.bf16.mxu1 %v14428_v57  ;;  %v14503_v57 = vld [vmem:[#allocation2 + $0x190] ss:$24 sps:$4 sm:$0xff]  }
 0x118   :  { %2006 = vmatpush1.bf16.msra.mxu0 %v14423_v58  ;;  %v14508_v58 = vld [vmem:[#allocation2 + $0x9c4] ss:$24 sps:$4 sm:$0xff]  }
 0x119   :  { %2168 = vmatpush1.bf16.msra.mxu1 %v14426_v59  ;;  %2007 = vmatprep.subr.bf16.mxu0 %v14431_v60  ;;  %v14511_v59 = vld [vmem:[#allocation2 + $0x1c4] ss:$24 sps:$4 sm:$0xff]   ;;  %v14506_v60 = vld [vmem:[#allocation2 + $0x9c0] ss:$24 sps:$4 sm:$0xff]  }
 0x11a   :  { %2169 = vmatprep.subr.bf16.mxu1 %v14434_v61  ;;  %v14509_v61 = vld [vmem:[#allocation2 + $0x1c0] ss:$24 sps:$4 sm:$0xff]  }
 0x11c   :  { %2008 = vmatpush1.bf16.msra.mxu0 %v14429_v62  ;;  %v14514_v62 = vld [vmem:[#allocation2 + $0x9f4] ss:$24 sps:$4 sm:$0xff]  }
 0x11d   :  { %2170 = vmatpush1.bf16.msra.mxu1 %v14432_v63  ;;  %2009 = vmatprep.subr.bf16.mxu0 %v14437_v1  ;;  %v14517_v63 = vld [vmem:[#allocation2 + $0x1f4] ss:$24 sps:$4 sm:$0xff]   ;;  %v14512_v1 = vld [vmem:[#allocation2 + $0x9f0] ss:$24 sps:$4 sm:$0xff]  }
 0x11e   :  { %2171 = vmatprep.subr.bf16.mxu1 %v14440_v2  ;;  %v14515_v2 = vld [vmem:[#allocation2 + $0x1f0] ss:$24 sps:$4 sm:$0xff]  }
 0x120   :  { %2010 = vmatpush1.bf16.msra.mxu0 %v14435_v3  ;;  %v14520_v3 = vld [vmem:[#allocation2 + $0xa24] ss:$24 sps:$4 sm:$0xff]  }
 0x121   :  { %2172 = vmatpush1.bf16.msra.mxu1 %v14438_v4  ;;  %2011 = vmatprep.subr.bf16.mxu0 %v14443_v5  ;;  %v14523_v4 = vld [vmem:[#allocation2 + $0x224] ss:$24 sps:$4 sm:$0xff]   ;;  %v14518_v5 = vld [vmem:[#allocation2 + $0xa20] ss:$24 sps:$4 sm:$0xff]  }
 0x122   :  { %2173 = vmatprep.subr.bf16.mxu1 %v14446_v6  ;;  %v14521_v6 = vld [vmem:[#allocation2 + $0x220] ss:$24 sps:$4 sm:$0xff]  }
 0x124   :  { %2012 = vmatpush1.bf16.msra.mxu0 %v14441_v7  ;;  %v14526_v7 = vld [vmem:[#allocation2 + $0xa54] ss:$24 sps:$4 sm:$0xff]  }
 0x125   :  { %2174 = vmatpush1.bf16.msra.mxu1 %v14444_v9  ;;  %2013 = vmatprep.subr.bf16.mxu0 %v14449_v10  ;;  %v14529_v9 = vld [vmem:[#allocation2 + $0x254] ss:$24 sps:$4 sm:$0xff]   ;;  %v14524_v10 = vld [vmem:[#allocation2 + $0xa50] ss:$24 sps:$4 sm:$0xff]  }
 0x126   :  { %2175 = vmatprep.subr.bf16.mxu1 %v14452_v11  ;;  %v14527_v11 = vld [vmem:[#allocation2 + $0x250] ss:$24 sps:$4 sm:$0xff]  }
 0x128   :  { %2014 = vmatpush1.bf16.msra.mxu0 %v14447_v12  ;;  %v14532_v12 = vld [vmem:[#allocation2 + $0xa84] ss:$24 sps:$4 sm:$0xff]  }
 0x129   :  { %2176 = vmatpush1.bf16.msra.mxu1 %v14450_v13  ;;  %2015 = vmatprep.subr.bf16.mxu0 %v14455_v14  ;;  %v14535_v13 = vld [vmem:[#allocation2 + $0x284] ss:$24 sps:$4 sm:$0xff]   ;;  %v14530_v14 = vld [vmem:[#allocation2 + $0xa80] ss:$24 sps:$4 sm:$0xff]  }
 0x12a   :  { %2177 = vmatprep.subr.bf16.mxu1 %v14458_v16  ;;  %v14533_v16 = vld [vmem:[#allocation2 + $0x280] ss:$24 sps:$4 sm:$0xff]  }
 0x12c   :  { %2016 = vmatpush1.bf16.msra.mxu0 %v14453_v17  ;;  %v14538_v17 = vld [vmem:[#allocation2 + $0xab4] ss:$24 sps:$4 sm:$0xff]  }
 0x12d   :  { %2178 = vmatpush1.bf16.msra.mxu1 %v14456_v20  ;;  %2231 = vmatprep.subr.bf16.mxu0 %v14466_v22  ;;  %v14541_v20 = vld [vmem:[#allocation2 + $0x2b4] ss:$24 sps:$4 sm:$0xff]   ;;  %v14539_v22 = vld [vmem:[#allocation2 + $0x2b0] ss:$24 sps:$4 sm:$0xff]  }
 0x12e   :  { %2179 = vmatprep.subr.bf16.mxu1 %v14463_v21  ;;  %v14536_v21 = vld [vmem:[#allocation2 + $0xab0] ss:$24 sps:$4 sm:$0xff]  }
 0x12f   :  { %2018 = vmatmul.mubr.bf16.vlgmr.msra.gmra.mrb[0].mxu0 %v16815_v23 }
 0x130   :  { %2232 = vmatpush1.bf16.msra.mxu0 %v14464_v25  ;;  %2263 = vmatprep.mubr.bf16.mxu0 %v16777_v52  ;;  %v14547_v25 = vld [vmem:[#allocation2 + $0x2e4] ss:$24 sps:$4 sm:$0xff]  }
 0x131   :  { %2180 = vmatpush1.bf16.msra.mxu1 %v14461_v24  ;;  %2233 = vmatprep.subr.bf16.mxu0 %v14469_v26  ;;  %v14544_v24 = vld [vmem:[#allocation2 + $0xae4] ss:$24 sps:$4 sm:$0xff]   ;;  %v14542_v26 = vld [vmem:[#allocation2 + $0xae0] ss:$24 sps:$4 sm:$0xff]  }
 0x132   :  { %2190 = vmatprep.subr.bf16.mxu1 %v14475_v27  ;;  %v14545_v27 = vld [vmem:[#allocation2 + $0x2e0] ss:$24 sps:$4 sm:$0xff]  }
 0x134   :  { %2182 = vmatmul.mubr.bf16.vlgmr.msra.gmra.mrb[4].mxu1 %v16815_v23  ;;  %2234 = vmatpush1.bf16.msra.mxu0 %v14467_v28  ;;  %v14550_v28 = vld [vmem:[#allocation2 + $0xb14] ss:$24 sps:$4 sm:$0xff]  }
 0x135   :  { %2191 = vmatpush1.bf16.msra.mxu1 %v14473_v29  ;;  %2235 = vmatprep.subr.bf16.mxu0 %v14472_v30  ;;  %v14553_v29 = vld [vmem:[#allocation2 + $0x314] ss:$24 sps:$4 sm:$0xff]   ;;  %v14548_v30 = vld [vmem:[#allocation2 + $0xb10] ss:$24 sps:$4 sm:$0xff]  }
 0x136   :  { %2222 = vmatprep.mubr.bf16.mxu1 %v16644_v0  ;;  %2354 = vmatprep.subr.bf16.mxu1 %v14484_v31  ;;  %v14551_v31 = vld [vmem:[#allocation2 + $0x310] ss:$24 sps:$4 sm:$0xff]  }
 0x138   :  { %2236 = vmatpush1.bf16.msra.mxu0 %v14470_v18  ;;  %v14556_v18 = vld [vmem:[#allocation2 + $0xb44] ss:$24 sps:$4 sm:$0xff]  }
 0x139   :  { %2237 = vmatprep.subr.bf16.mxu0 %v14478_v32  ;;  %v14559_v32 = vld [vmem:[#allocation2 + $0x344] ss:$24 sps:$4 sm:$0xff]  }
 0x13c   :  { %2238 = vmatpush1.bf16.msra.mxu0 %v14476_v33  ;;  %v14554_v33 = vld [vmem:[#allocation2 + $0xb40] ss:$24 sps:$4 sm:$0xff]  }
 0x13d   :  { %2239 = vmatprep.subr.bf16.mxu0 %v14481_v34  ;;  %v14557_v34 = vld [vmem:[#allocation2 + $0x340] ss:$24 sps:$4 sm:$0xff]  }
 0x140   :  { %12427 = vmatmul.mubr.msk.bf16.vlgmr.msra.gmra.mrb[4].mxu1 %vm1899_vm0, %v16489_v40  ;;  %2240 = vmatpush1.bf16.msra.mxu0 %v14479_v36  ;;  %v14562_v36 = vld [vmem:[#allocation2 + $0xb74] ss:$24 sps:$4 sm:$0xff]  }
 0x141   :  { %2355 = vmatpush1.bf16.msra.mxu1 %v14482_v37  ;;  %2241 = vmatprep.subr.bf16.mxu0 %v14487_v38  ;;  %v14565_v37 = vld [vmem:[#allocation2 + $0x374] ss:$24 sps:$4 sm:$0xff]   ;;  %v14560_v38 = vld [vmem:[#allocation2 + $0xb70] ss:$24 sps:$4 sm:$0xff]  }
 0x142   :  { %2386 = vmatprep.mubr.bf16.mxu1 %v16644_v0  ;;  %4160 = vmatprep.subr.bf16.mxu1 %v14490_v39  ;;  %v14563_v39 = vld [vmem:[#allocation2 + $0x370] ss:$24 sps:$4 sm:$0xff]  }
 0x144   :  { %2242 = vmatpush1.bf16.msra.mxu0 %v14485_v41  ;;  %v14571_v41 = vld [vmem:[#allocation2 + $0x3a4] ss:$24 sps:$4 sm:$0xff]  }
 0x145   :  { %2243 = vmatprep.subr.bf16.mxu0 %v14493_v42  ;;  %v14566_v42 = vld [vmem:[#allocation2 + $0xba0] ss:$24 sps:$4 sm:$0xff]  }
 0x147   :  { %v16826_v47 = vpop.f32.mrb[0].mxu1 }
 0x148   :  { %12428 = vmatmul.mubr.msk.bf16.vlgmr.msra.gmra.mrb[8].mxu1 %vm1899_vm0, %v16489_v40  ;;  %v16829_v49 = vpop.f32.mrb[1].mxu1  ;;  %2244 = vmatpush1.bf16.msra.mxu0 %v14491_v44  ;;  %v14568_v40 = vld [vmem:[#allocation2 + $0xba4] ss:$24 sps:$4 sm:$0xff]   ;;  %v14574_v44 = vld [vmem:[#allocation2 + $0xbd4] ss:$24 sps:$4 sm:$0xff]  }
 0x149   :  { %4161 = vmatpush1.bf16.msra.mxu1 %v14488_v43  ;;  %v2064_v51 = vpop.f32.mrb[2].mxu1  ;;  %2245 = vmatprep.subr.bf16.mxu0 %v14499_v46  ;;  %v14569_v43 = vld [vmem:[#allocation2 + $0x3a0] ss:$24 sps:$4 sm:$0xff]   ;;  %v14572_v46 = vld [vmem:[#allocation2 + $0xbd0] ss:$24 sps:$4 sm:$0xff]  }
 0x14a   :  { %4162 = vmatprep.subr.bf16.mxu1 %v14496_v45  ;;  %v2065_v55 = vpop.f32.mrb[3].mxu1  ;;  %4192 = vmatprep.mubr.bf16.mxu1 %v16777_v52  ;;  %v14577_v45 = vld [vmem:[#allocation2 + $0x3d4] ss:$24 sps:$4 sm:$0xff]   ;;  %v14583_v51 = vld [vmem:[#allocation2 + $0x404] ss:$24 sps:$4 sm:$0xff]  }
 0x14b   :  { %v14586_v55 = vld [vmem:[#allocation2 + $0xc34] ss:$24 sps:$4 sm:$0xff]  }
 0x14c   :  { %2246 = vmatpush1.bf16.msra.mxu0 %v14497_v50  ;;  %v14580_v50 = vld [vmem:[#allocation2 + $0xc04] ss:$24 sps:$4 sm:$0xff]  }
 0x14d   :  { %4163 = vmatpush1.bf16.msra.mxu1 %v14494_v48  ;;  %2247 = vmatprep.subr.bf16.mxu0 %v14505_v54  ;;  %v14575_v48 = vld [vmem:[#allocation2 + $0x3d0] ss:$24 sps:$4 sm:$0xff]   ;;  %v14581_v54 = vld [vmem:[#allocation2 + $0x400] ss:$24 sps:$4 sm:$0xff]  }
 0x14e   :  { %4164 = vmatprep.subr.bf16.mxu1 %v14502_v53  ;;  %v14578_v53 = vld [vmem:[#allocation2 + $0xc00] ss:$24 sps:$4 sm:$0xff]  }
 0x150   :  { %2248 = vmatpush1.bf16.msra.mxu0 %v14503_v57  ;;  %v14584_v57 = vld [vmem:[#allocation2 + $0xc30] ss:$24 sps:$4 sm:$0xff]  }
 0x151   :  { %4165 = vmatpush1.bf16.msra.mxu1 %v14500_v56  ;;  %2249 = vmatprep.subr.bf16.mxu0 %v14511_v59  ;;  %v14589_v56 = vld [vmem:[#allocation2 + $0x434] ss:$24 sps:$4 sm:$0xff]   ;;  %v14592_v59 = vld [vmem:[#allocation2 + $0xc64] ss:$24 sps:$4 sm:$0xff]  }
 0x152   :  { %4166 = vmatprep.subr.bf16.mxu1 %v14508_v58  ;;  %v14587_v58 = vld [vmem:[#allocation2 + $0x430] ss:$24 sps:$4 sm:$0xff]  }
 0x154   :  { %2250 = vmatpush1.bf16.msra.mxu0 %v14509_v61  ;;  %v14590_v61 = vld [vmem:[#allocation2 + $0xc60] ss:$24 sps:$4 sm:$0xff]  }
 0x155   :  { %4167 = vmatpush1.bf16.msra.mxu1 %v14506_v60  ;;  %2251 = vmatprep.subr.bf16.mxu0 %v14517_v63  ;;  %v14595_v60 = vld [vmem:[#allocation2 + $0x464] ss:$24 sps:$4 sm:$0xff]   ;;  %v14598_v63 = vld [vmem:[#allocation2 + $0xc94] ss:$24 sps:$4 sm:$0xff]  }
 0x156   :  { %4168 = vmatprep.subr.bf16.mxu1 %v14514_v62  ;;  %v14593_v62 = vld [vmem:[#allocation2 + $0x460] ss:$24 sps:$4 sm:$0xff]  }
 0x158   :  { %2252 = vmatpush1.bf16.msra.mxu0 %v14515_v2  ;;  %v14596_v2 = vld [vmem:[#allocation2 + $0xc90] ss:$24 sps:$4 sm:$0xff]  }
 0x159   :  { %4169 = vmatpush1.bf16.msra.mxu1 %v14512_v1  ;;  %2253 = vmatprep.subr.bf16.mxu0 %v14523_v4  ;;  %v14601_v1 = vld [vmem:[#allocation2 + $0x494] ss:$24 sps:$4 sm:$0xff]   ;;  %v14604_v4 = vld [vmem:[#allocation2 + $0xcc4] ss:$24 sps:$4 sm:$0xff]  }
 0x15a   :  { %4170 = vmatprep.subr.bf16.mxu1 %v14520_v3  ;;  %v14599_v3 = vld [vmem:[#allocation2 + $0x490] ss:$24 sps:$4 sm:$0xff]  }
 0x15c   :  { %2254 = vmatpush1.bf16.msra.mxu0 %v14521_v6  ;;  %v14602_v6 = vld [vmem:[#allocation2 + $0xcc0] ss:$24 sps:$4 sm:$0xff]  }
 0x15d   :  { %4171 = vmatpush1.bf16.msra.mxu1 %v14518_v5  ;;  %2255 = vmatprep.subr.bf16.mxu0 %v14529_v9  ;;  %v14607_v5 = vld [vmem:[#allocation2 + $0x4c4] ss:$24 sps:$4 sm:$0xff]   ;;  %v14610_v9 = vld [vmem:[#allocation2 + $0xcf4] ss:$24 sps:$4 sm:$0xff]  }
 0x15e   :  { %4172 = vmatprep.subr.bf16.mxu1 %v14526_v7  ;;  %v14605_v7 = vld [vmem:[#allocation2 + $0x4c0] ss:$24 sps:$4 sm:$0xff]  }
 0x160   :  { %2256 = vmatpush1.bf16.msra.mxu0 %v14527_v11  ;;  %v14608_v11 = vld [vmem:[#allocation2 + $0xcf0] ss:$24 sps:$4 sm:$0xff]  }
 0x161   :  { %4173 = vmatpush1.bf16.msra.mxu1 %v14524_v10  ;;  %2257 = vmatprep.subr.bf16.mxu0 %v14535_v13  ;;  %v14613_v10 = vld [vmem:[#allocation2 + $0x4f4] ss:$24 sps:$4 sm:$0xff]   ;;  %v14616_v13 = vld [vmem:[#allocation2 + $0xd24] ss:$24 sps:$4 sm:$0xff]  }
 0x162   :  { %4174 = vmatprep.subr.bf16.mxu1 %v14532_v12  ;;  %v14611_v12 = vld [vmem:[#allocation2 + $0x4f0] ss:$24 sps:$4 sm:$0xff]  }
 0x164   :  { %2258 = vmatpush1.bf16.msra.mxu0 %v14533_v16  ;;  %v14614_v16 = vld [vmem:[#allocation2 + $0xd20] ss:$24 sps:$4 sm:$0xff]  }
 0x165   :  { %4175 = vmatpush1.bf16.msra.mxu1 %v14530_v14  ;;  %2259 = vmatprep.subr.bf16.mxu0 %v14541_v20  ;;  %v14619_v14 = vld [vmem:[#allocation2 + $0x524] ss:$24 sps:$4 sm:$0xff]   ;;  %v14622_v20 = vld [vmem:[#allocation2 + $0xd54] ss:$24 sps:$4 sm:$0xff]  }
 0x166   :  { %4176 = vmatprep.subr.bf16.mxu1 %v14538_v17  ;;  %v14617_v17 = vld [vmem:[#allocation2 + $0x520] ss:$24 sps:$4 sm:$0xff]  }
 0x168   :  { %2260 = vmatpush1.bf16.msra.mxu0 %v14539_v22  ;;  %v14620_v22 = vld [vmem:[#allocation2 + $0xd50] ss:$24 sps:$4 sm:$0xff]  }
 0x169   :  { %4177 = vmatpush1.bf16.msra.mxu1 %v14536_v21  ;;  %2261 = vmatprep.subr.bf16.mxu0 %v14547_v25  ;;  %v14625_v21 = vld [vmem:[#allocation2 + $0x554] ss:$24 sps:$4 sm:$0xff]   ;;  %v14628_v25 = vld [vmem:[#allocation2 + $0xd84] ss:$24 sps:$4 sm:$0xff]  }
 0x16a   :  { %4178 = vmatprep.subr.bf16.mxu1 %v14544_v24  ;;  %v14623_v24 = vld [vmem:[#allocation2 + $0x550] ss:$24 sps:$4 sm:$0xff]  }
 0x16c   :  { %2262 = vmatpush1.bf16.msra.mxu0 %v14545_v27  ;;  %v14626_v27 = vld [vmem:[#allocation2 + $0xd80] ss:$24 sps:$4 sm:$0xff]  }
 0x16d   :  { %4179 = vmatpush1.bf16.msra.mxu1 %v14542_v26  ;;  %2272 = vmatprep.subr.bf16.mxu0 %v14553_v29  ;;  %v14631_v26 = vld [vmem:[#allocation2 + $0x584] ss:$24 sps:$4 sm:$0xff]   ;;  %v14634_v29 = vld [vmem:[#allocation2 + $0xdb4] ss:$24 sps:$4 sm:$0xff]  }
 0x16e   :  { %4180 = vmatprep.subr.bf16.mxu1 %v14550_v28  ;;  %v14629_v28 = vld [vmem:[#allocation2 + $0x580] ss:$24 sps:$4 sm:$0xff]  }
 0x16f   :  { %2264 = vmatmul.mubr.bf16.vlgmr.msra.gmra.mrb[4].mxu0 %v16781_v8 }
 0x170   :  { %2273 = vmatpush1.bf16.msra.mxu0 %v14551_v31  ;;  %2304 = vmatprep.mubr.bf16.mxu0 %v16792_v35  ;;  %v14632_v31 = vld [vmem:[#allocation2 + $0xdb0] ss:$24 sps:$4 sm:$0xff]  }
 0x171   :  { %4181 = vmatpush1.bf16.msra.mxu1 %v14548_v30  ;;  %2274 = vmatprep.subr.bf16.mxu0 %v14559_v32  ;;  %v14637_v30 = vld [vmem:[#allocation2 + $0x5b4] ss:$24 sps:$4 sm:$0xff]   ;;  %v14640_v32 = vld [vmem:[#allocation2 + $0xde4] ss:$24 sps:$4 sm:$0xff]  }
 0x172   :  { %4182 = vmatprep.subr.bf16.mxu1 %v14556_v18  ;;  %v14635_v18 = vld [vmem:[#allocation2 + $0x5b0] ss:$24 sps:$4 sm:$0xff]  }
 0x174   :  { %2275 = vmatpush1.bf16.msra.mxu0 %v14557_v34  ;;  %v14638_v34 = vld [vmem:[#allocation2 + $0xde0] ss:$24 sps:$4 sm:$0xff]  }
 0x175   :  { %4183 = vmatpush1.bf16.msra.mxu1 %v14554_v33  ;;  %2276 = vmatprep.subr.bf16.mxu0 %v14565_v37  ;;  %v14643_v33 = vld [vmem:[#allocation2 + $0x5e4] ss:$24 sps:$4 sm:$0xff]   ;;  %v14646_v37 = vld [vmem:[#allocation2 + $0xe14] ss:$24 sps:$4 sm:$0xff]  }
 0x176   :  { %4184 = vmatprep.subr.bf16.mxu1 %v14562_v36  ;;  %v14641_v36 = vld [vmem:[#allocation2 + $0x5e0] ss:$24 sps:$4 sm:$0xff]  }
 0x178   :  { %2277 = vmatpush1.bf16.msra.mxu0 %v14563_v39  ;;  %v14644_v39 = vld [vmem:[#allocation2 + $0xe10] ss:$24 sps:$4 sm:$0xff]  }
 0x179   :  { %4185 = vmatpush1.bf16.msra.mxu1 %v14560_v38  ;;  %2278 = vmatprep.subr.bf16.mxu0 %v14571_v41  ;;  %v14649_v38 = vld [vmem:[#allocation2 + $0x614] ss:$24 sps:$4 sm:$0xff]   ;;  %v14652_v41 = vld [vmem:[#allocation2 + $0xe44] ss:$24 sps:$4 sm:$0xff]  }
 0x17a   :  { %4186 = vmatprep.subr.bf16.mxu1 %v14568_v40  ;;  %v14647_v40 = vld [vmem:[#allocation2 + $0x610] ss:$24 sps:$4 sm:$0xff]  }
 0x17c   :  { %2279 = vmatpush1.bf16.msra.mxu0 %v14569_v43  ;;  %v14650_v43 = vld [vmem:[#allocation2 + $0xe40] ss:$24 sps:$4 sm:$0xff]  }
 0x17d   :  { %4187 = vmatpush1.bf16.msra.mxu1 %v14566_v42  ;;  %2280 = vmatprep.subr.bf16.mxu0 %v14577_v45  ;;  %v14655_v42 = vld [vmem:[#allocation2 + $0x644] ss:$24 sps:$4 sm:$0xff]   ;;  %v14658_v45 = vld [vmem:[#allocation2 + $0xe74] ss:$24 sps:$4 sm:$0xff]  }
 0x17e   :  { %4188 = vmatprep.subr.bf16.mxu1 %v14574_v44  ;;  %v14653_v44 = vld [vmem:[#allocation2 + $0x640] ss:$24 sps:$4 sm:$0xff]  }
 0x180   :  { %2281 = vmatpush1.bf16.msra.mxu0 %v14575_v48  ;;  %v14656_v48 = vld [vmem:[#allocation2 + $0xe70] ss:$24 sps:$4 sm:$0xff]  }
 0x181   :  { %4189 = vmatpush1.bf16.msra.mxu1 %v14572_v46  ;;  %2282 = vmatprep.subr.bf16.mxu0 %v14583_v51  ;;  %v14661_v46 = vld [vmem:[#allocation2 + $0x674] ss:$24 sps:$4 sm:$0xff]   ;;  %v14664_v51 = vld [vmem:[#allocation2 + $0xea4] ss:$24 sps:$4 sm:$0xff]  }
 0x182   :  { %4190 = vmatprep.subr.bf16.mxu1 %v14580_v50  ;;  %v14659_v50 = vld [vmem:[#allocation2 + $0x670] ss:$24 sps:$4 sm:$0xff]  }
 0x184   :  { %2283 = vmatpush1.bf16.msra.mxu0 %v14581_v54  ;;  %v14662_v54 = vld [vmem:[#allocation2 + $0xea0] ss:$24 sps:$4 sm:$0xff]  }
 0x185   :  { %4191 = vmatpush1.bf16.msra.mxu1 %v14578_v53  ;;  %2284 = vmatprep.subr.bf16.mxu0 %v14589_v56  ;;  %v14667_v53 = vld [vmem:[#allocation2 + $0x6a4] ss:$24 sps:$4 sm:$0xff]   ;;  %v14670_v56 = vld [vmem:[#allocation2 + $0xed4] ss:$24 sps:$4 sm:$0xff]  }
 0x186   :  { %4201 = vmatprep.subr.bf16.mxu1 %v14586_v55  ;;  %v14665_v55 = vld [vmem:[#allocation2 + $0x6a0] ss:$24 sps:$4 sm:$0xff]  }
 0x188   :  { %4193 = vmatmul.mubr.bf16.vlgmr.msra.gmra.mrb[12].mxu1 %v16781_v8  ;;  %2285 = vmatpush1.bf16.msra.mxu0 %v14587_v58  ;;  %v14668_v58 = vld [vmem:[#allocation2 + $0xed0] ss:$24 sps:$4 sm:$0xff]  }
 0x189   :  { %4202 = vmatpush1.bf16.msra.mxu1 %v14584_v57  ;;  %2286 = vmatprep.subr.bf16.mxu0 %v14595_v60  ;;  %v14673_v57 = vld [vmem:[#allocation2 + $0x6d4] ss:$24 sps:$4 sm:$0xff]   ;;  %v14676_v60 = vld [vmem:[#allocation2 + $0xf04] ss:$24 sps:$4 sm:$0xff]  }
 0x18a   :  { %4203 = vmatprep.subr.bf16.mxu1 %v14592_v59  ;;  %4233 = vmatprep.mubr.bf16.mxu1 %v16792_v35  ;;  %v14671_v59 = vld [vmem:[#allocation2 + $0x6d0] ss:$24 sps:$4 sm:$0xff]  }
 0x18c   :  { %2287 = vmatpush1.bf16.msra.mxu0 %v14593_v62  ;;  %v14674_v62 = vld [vmem:[#allocation2 + $0xf00] ss:$24 sps:$4 sm:$0xff]  }
 0x18d   :  { %4204 = vmatpush1.bf16.msra.mxu1 %v14590_v61  ;;  %2288 = vmatprep.subr.bf16.mxu0 %v14601_v1  ;;  %v14679_v61 = vld [vmem:[#allocation2 + $0x704] ss:$24 sps:$4 sm:$0xff]   ;;  %v14682_v1 = vld [vmem:[#allocation2 + $0xf34] ss:$24 sps:$4 sm:$0xff]  }
 0x18e   :  { %4205 = vmatprep.subr.bf16.mxu1 %v14598_v63  ;;  %v14677_v63 = vld [vmem:[#allocation2 + $0x700] ss:$24 sps:$4 sm:$0xff]  }
 0x190   :  { %2289 = vmatpush1.bf16.msra.mxu0 %v14599_v3  ;;  %v14680_v3 = vld [vmem:[#allocation2 + $0xf30] ss:$24 sps:$4 sm:$0xff]  }
 0x191   :  { %4206 = vmatpush1.bf16.msra.mxu1 %v14596_v2  ;;  %2290 = vmatprep.subr.bf16.mxu0 %v14607_v5  ;;  %v14685_v2 = vld [vmem:[#allocation2 + $0x734] ss:$24 sps:$4 sm:$0xff]   ;;  %v14688_v5 = vld [vmem:[#allocation2 + $0xf64] ss:$24 sps:$4 sm:$0xff]  }
 0x192   :  { %4207 = vmatprep.subr.bf16.mxu1 %v14604_v4  ;;  %v14683_v4 = vld [vmem:[#allocation2 + $0x730] ss:$24 sps:$4 sm:$0xff]  }
 0x194   :  { %2291 = vmatpush1.bf16.msra.mxu0 %v14605_v7  ;;  %v14686_v7 = vld [vmem:[#allocation2 + $0xf60] ss:$24 sps:$4 sm:$0xff]  }
 0x195   :  { %4208 = vmatpush1.bf16.msra.mxu1 %v14602_v6  ;;  %2292 = vmatprep.subr.bf16.mxu0 %v14613_v10  ;;  %v14691_v6 = vld [vmem:[#allocation2 + $0x764] ss:$24 sps:$4 sm:$0xff]   ;;  %v14694_v10 = vld [vmem:[#allocation2 + $0xf94] ss:$24 sps:$4 sm:$0xff]  }
 0x196   :  { %4209 = vmatprep.subr.bf16.mxu1 %v14610_v9  ;;  %v14689_v9 = vld [vmem:[#allocation2 + $0x760] ss:$24 sps:$4 sm:$0xff]  }
 0x198   :  { %2293 = vmatpush1.bf16.msra.mxu0 %v14611_v12  ;;  %v14692_v12 = vld [vmem:[#allocation2 + $0xf90] ss:$24 sps:$4 sm:$0xff]  }
 0x199   :  { %4210 = vmatpush1.bf16.msra.mxu1 %v14608_v11  ;;  %2294 = vmatprep.subr.bf16.mxu0 %v14619_v14  ;;  %v14697_v11 = vld [vmem:[#allocation2 + $0x794] ss:$24 sps:$4 sm:$0xff]   ;;  %v14700_v14 = vld [vmem:[#allocation2 + $0xfc4] ss:$24 sps:$4 sm:$0xff]  }
 0x19a   :  { %4211 = vmatprep.subr.bf16.mxu1 %v14616_v13  ;;  %v14695_v13 = vld [vmem:[#allocation2 + $0x790] ss:$24 sps:$4 sm:$0xff]  }
 0x19c   :  { %2295 = vmatpush1.bf16.msra.mxu0 %v14617_v17  ;;  %v14698_v17 = vld [vmem:[#allocation2 + $0xfc0] ss:$24 sps:$4 sm:$0xff]  }
 0x19d   :  { %4212 = vmatpush1.bf16.msra.mxu1 %v14614_v16  ;;  %2296 = vmatprep.subr.bf16.mxu0 %v14625_v21  ;;  %v14703_v16 = vld [vmem:[#allocation2 + $0x7c4] ss:$24 sps:$4 sm:$0xff]   ;;  %v14706_v21 = vld [vmem:[#allocation2 + $0xff4] ss:$24 sps:$4 sm:$0xff]  }
 0x19e   :  { %4213 = vmatprep.subr.bf16.mxu1 %v14622_v20  ;;  %v14701_v20 = vld [vmem:[#allocation2 + $0x7c0] ss:$24 sps:$4 sm:$0xff]  }
 0x1a0   :  { %2297 = vmatpush1.bf16.msra.mxu0 %v14623_v24  ;;  %v14704_v24 = vld [vmem:[#allocation2 + $0xff0] ss:$24 sps:$4 sm:$0xff]  }
 0x1a1   :  { %4214 = vmatpush1.bf16.msra.mxu1 %v14620_v22  ;;  %2298 = vmatprep.subr.bf16.mxu0 %v14631_v26  ;;  %v14709_v22 = vld [vmem:[#allocation2 + $0x7f4] ss:$24 sps:$4 sm:$0xff]   ;;  %v14712_v26 = vld [vmem:[#allocation2 + $0x1024] ss:$24 sps:$4 sm:$0xff]  }
 0x1a2   :  { %4215 = vmatprep.subr.bf16.mxu1 %v14628_v25  ;;  %v14707_v25 = vld [vmem:[#allocation2 + $0x7f0] ss:$24 sps:$4 sm:$0xff]  }
 0x1a4   :  { %2299 = vmatpush1.bf16.msra.mxu0 %v14629_v28  ;;  %v14710_v28 = vld [vmem:[#allocation2 + $0x1020] ss:$24 sps:$4 sm:$0xff]  }
 0x1a5   :  { %4216 = vmatpush1.bf16.msra.mxu1 %v14626_v27  ;;  %2300 = vmatprep.subr.bf16.mxu0 %v14637_v30  ;;  %v14715_v27 = vld [vmem:[#allocation2 + $0x824] ss:$24 sps:$4 sm:$0xff]   ;;  %v14718_v30 = vld [vmem:[#allocation2 + $0x1054] ss:$24 sps:$4 sm:$0xff]  }
 0x1a6   :  { %4217 = vmatprep.subr.bf16.mxu1 %v14634_v29  ;;  %v14713_v29 = vld [vmem:[#allocation2 + $0x820] ss:$24 sps:$4 sm:$0xff]  }
 0x1a8   :  { %2301 = vmatpush1.bf16.msra.mxu0 %v14635_v18  ;;  %v14716_v18 = vld [vmem:[#allocation2 + $0x1050] ss:$24 sps:$4 sm:$0xff]  }
 0x1a9   :  { %4218 = vmatpush1.bf16.msra.mxu1 %v14632_v31  ;;  %2302 = vmatprep.subr.bf16.mxu0 %v14643_v33  ;;  %v14721_v31 = vld [vmem:[#allocation2 + $0x854] ss:$24 sps:$4 sm:$0xff]   ;;  %v14724_v33 = vld [vmem:[#allocation2 + $0x1084] ss:$24 sps:$4 sm:$0xff]  }
 0x1aa   :  { %4219 = vmatprep.subr.bf16.mxu1 %v14640_v32  ;;  %v14719_v32 = vld [vmem:[#allocation2 + $0x850] ss:$24 sps:$4 sm:$0xff]  }
 0x1ac   :  { %2303 = vmatpush1.bf16.msra.mxu0 %v14641_v36  ;;  %v14722_v36 = vld [vmem:[#allocation2 + $0x1080] ss:$24 sps:$4 sm:$0xff]  }
 0x1ad   :  { %4220 = vmatpush1.bf16.msra.mxu1 %v14638_v34  ;;  %2313 = vmatprep.subr.bf16.mxu0 %v14649_v38  ;;  %v14727_v34 = vld [vmem:[#allocation2 + $0x884] ss:$24 sps:$4 sm:$0xff]   ;;  %v14730_v38 = vld [vmem:[#allocation2 + $0x10b4] ss:$24 sps:$4 sm:$0xff]  }
 0x1ae   :  { %4221 = vmatprep.subr.bf16.mxu1 %v14646_v37  ;;  %v14725_v37 = vld [vmem:[#allocation2 + $0x880] ss:$24 sps:$4 sm:$0xff]  }
 0x1af   :  { %2305 = vmatmul.mubr.bf16.vlgmr.msra.gmra.mrb[4].mxu0 %v16798_v15 }
 0x1b0   :  { %2314 = vmatpush1.bf16.msra.mxu0 %v14647_v40  ;;  %2345 = vmatprep.mubr.bf16.mxu0 %v16807_v19  ;;  %v14728_v40 = vld [vmem:[#allocation2 + $0x10b0] ss:$24 sps:$4 sm:$0xff]  }
 0x1b1   :  { %4222 = vmatpush1.bf16.msra.mxu1 %v14644_v39  ;;  %2315 = vmatprep.subr.bf16.mxu0 %v14655_v42  ;;  %v14733_v39 = vld [vmem:[#allocation2 + $0x8b4] ss:$24 sps:$4 sm:$0xff]   ;;  %v14736_v42 = vld [vmem:[#allocation2 + $0x10e4] ss:$24 sps:$4 sm:$0xff]  }
 0x1b2   :  { %4223 = vmatprep.subr.bf16.mxu1 %v14652_v41  ;;  %v14731_v41 = vld [vmem:[#allocation2 + $0x8b0] ss:$24 sps:$4 sm:$0xff]  }
 0x1b4   :  { %2316 = vmatpush1.bf16.msra.mxu0 %v14653_v44  ;;  %v14734_v44 = vld [vmem:[#allocation2 + $0x10e0] ss:$24 sps:$4 sm:$0xff]  }
 0x1b5   :  { %4224 = vmatpush1.bf16.msra.mxu1 %v14650_v43  ;;  %2317 = vmatprep.subr.bf16.mxu0 %v14661_v46  ;;  %v14739_v43 = vld [vmem:[#allocation2 + $0x8e4] ss:$24 sps:$4 sm:$0xff]   ;;  %v14742_v46 = vld [vmem:[#allocation2 + $0x1114] ss:$24 sps:$4 sm:$0xff]  }
 0x1b6   :  { %4225 = vmatprep.subr.bf16.mxu1 %v14658_v45  ;;  %v14737_v45 = vld [vmem:[#allocation2 + $0x8e0] ss:$24 sps:$4 sm:$0xff]  }
 0x1b8   :  { %2318 = vmatpush1.bf16.msra.mxu0 %v14659_v50  ;;  %v14740_v50 = vld [vmem:[#allocation2 + $0x1110] ss:$24 sps:$4 sm:$0xff]  }
 0x1b9   :  { %4226 = vmatpush1.bf16.msra.mxu1 %v14656_v48  ;;  %2319 = vmatprep.subr.bf16.mxu0 %v14667_v53  ;;  %v14745_v48 = vld [vmem:[#allocation2 + $0x93c] ss:$24 sps:$4 sm:$0xff]  }
 0x1ba   :  { %4227 = vmatprep.subr.bf16.mxu1 %v14664_v51  ;;  %v14743_v51 = vld [vmem:[#allocation2 + $0x938] ss:$24 sps:$4 sm:$0xff]   ;;  %v14748_v53 = vld [vmem:[#allocation2 + $0x1144] ss:$24 sps:$4 sm:$0xff]  }
 0x1bc   :  { %2320 = vmatpush1.bf16.msra.mxu0 %v14665_v55  ;;  %v14746_v55 = vld [vmem:[#allocation2 + $0x1140] ss:$24 sps:$4 sm:$0xff]  }
 0x1bd   :  { %4228 = vmatpush1.bf16.msra.mxu1 %v14662_v54  ;;  %2321 = vmatprep.subr.bf16.mxu0 %v14673_v57  ;;  %v14751_v54 = vld [vmem:[#allocation2 + $0x96c] ss:$24 sps:$4 sm:$0xff]  }
 0x1be   :  { %4229 = vmatprep.subr.bf16.mxu1 %v14670_v56  ;;  %v14749_v56 = vld [vmem:[#allocation2 + $0x968] ss:$24 sps:$4 sm:$0xff]   ;;  %v14754_v57 = vld [vmem:[#allocation2 + $0x1174] ss:$24 sps:$4 sm:$0xff]  }
 0x1c0   :  { %2322 = vmatpush1.bf16.msra.mxu0 %v14671_v59  ;;  %v14752_v59 = vld [vmem:[#allocation2 + $0x1170] ss:$24 sps:$4 sm:$0xff]  }
 0x1c1   :  { %4230 = vmatpush1.bf16.msra.mxu1 %v14668_v58  ;;  %2323 = vmatprep.subr.bf16.mxu0 %v14679_v61  ;;  %v14757_v58 = vld [vmem:[#allocation2 + $0x99c] ss:$24 sps:$4 sm:$0xff]  }
 0x1c2   :  { %4231 = vmatprep.subr.bf16.mxu1 %v14676_v60  ;;  %v14755_v60 = vld [vmem:[#allocation2 + $0x998] ss:$24 sps:$4 sm:$0xff]   ;;  %v14760_v61 = vld [vmem:[#allocation2 + $0x11a4] ss:$24 sps:$4 sm:$0xff]  }
 0x1c4   :  { %2324 = vmatpush1.bf16.msra.mxu0 %v14677_v63  ;;  %v14758_v63 = vld [vmem:[#allocation2 + $0x11a0] ss:$24 sps:$4 sm:$0xff]  }
 0x1c5   :  { %4232 = vmatpush1.bf16.msra.mxu1 %v14674_v62  ;;  %2325 = vmatprep.subr.bf16.mxu0 %v14685_v2  ;;  %v14763_v62 = vld [vmem:[#allocation2 + $0x9cc] ss:$24 sps:$4 sm:$0xff]  }
 0x1c6   :  { %4242 = vmatprep.subr.bf16.mxu1 %v14682_v1  ;;  %v14761_v1 = vld [vmem:[#allocation2 + $0x9c8] ss:$24 sps:$4 sm:$0xff]   ;;  %v14766_v2 = vld [vmem:[#allocation2 + $0x11d4] ss:$24 sps:$4 sm:$0xff]  }
 0x1c8   :  { %4234 = vmatmul.mubr.bf16.vlgmr.msra.gmra.mrb[12].mxu1 %v16798_v15  ;;  %2326 = vmatpush1.bf16.msra.mxu0 %v14683_v4  ;;  %v14764_v4 = vld [vmem:[#allocation2 + $0x11d0] ss:$24 sps:$4 sm:$0xff]  }
 0x1c9   :  { %4243 = vmatpush1.bf16.msra.mxu1 %v14680_v3  ;;  %2327 = vmatprep.subr.bf16.mxu0 %v14691_v6  ;;  %v14769_v3 = vld [vmem:[#allocation2 + $0x9fc] ss:$24 sps:$4 sm:$0xff]  }
 0x1ca   :  { %4244 = vmatprep.subr.bf16.mxu1 %v14688_v5  ;;  %4274 = vmatprep.mubr.bf16.mxu1 %v16807_v19  ;;  %v14767_v5 = vld [vmem:[#allocation2 + $0x9f8] ss:$24 sps:$4 sm:$0xff]   ;;  %v14772_v6 = vld [vmem:[#allocation2 + $0x1204] ss:$24 sps:$4 sm:$0xff]  }
 0x1cc   :  { %2328 = vmatpush1.bf16.msra.mxu0 %v14689_v9  ;;  %v14770_v9 = vld [vmem:[#allocation2 + $0x1200] ss:$24 sps:$4 sm:$0xff]  }
 0x1cd   :  { %4245 = vmatpush1.bf16.msra.mxu1 %v14686_v7  ;;  %2329 = vmatprep.subr.bf16.mxu0 %v14697_v11  ;;  %v14775_v7 = vld [vmem:[#allocation2 + $0xa2c] ss:$24 sps:$4 sm:$0xff]   ;;  %v14778_v11 = vld [vmem:[#allocation2 + $0xa5c] ss:$24 sps:$4 sm:$0xff]  }
 0x1ce   :  { %4246 = vmatprep.subr.bf16.mxu1 %v14694_v10  ;;  %v14773_v10 = vld [vmem:[#allocation2 + $0xa28] ss:$24 sps:$4 sm:$0xff]  }
 0x1d0   :  { %2330 = vmatpush1.bf16.msra.mxu0 %v14695_v13 }
 0x1d1   :  { %4247 = vmatpush1.bf16.msra.mxu1 %v14692_v12  ;;  %2331 = vmatprep.subr.bf16.mxu0 %v14703_v16  ;;  %v14784_v12 = vld [vmem:[#allocation2 + $0x1234] ss:$24 sps:$4 sm:$0xff]  }
 0x1d2   :  { %4248 = vmatprep.subr.bf16.mxu1 %v14700_v14 }
 0x1d4   :  { %2332 = vmatpush1.bf16.msra.mxu0 %v14701_v20 }
 0x1d5   :  { %4249 = vmatpush1.bf16.msra.mxu1 %v14698_v17  ;;  %2333 = vmatprep.subr.bf16.mxu0 %v14709_v22  ;;  %v14776_v17 = vld [vmem:[#allocation2 + $0xa58] ss:$24 sps:$4 sm:$0xff]   ;;  %v14781_v22 = vld [vmem:[#allocation2 + $0xa8c] ss:$24 sps:$4 sm:$0xff]  }
 0x1d6   :  { %4250 = vmatprep.subr.bf16.mxu1 %v14706_v21 }
 0x1d8   :  { %2334 = vmatpush1.bf16.msra.mxu0 %v14707_v25 }
 0x1d9   :  { %4251 = vmatpush1.bf16.msra.mxu1 %v14704_v24  ;;  %2335 = vmatprep.subr.bf16.mxu0 %v14715_v27  ;;  %v14782_v24 = vld [vmem:[#allocation2 + $0x1230] ss:$24 sps:$4 sm:$0xff]  }
 0x1da   :  { %4252 = vmatprep.subr.bf16.mxu1 %v14712_v26  ;;  %v14790_v26 = vld [vmem:[#allocation2 + $0x944] ss:$24 sps:$4 sm:$0xff]   ;;  %v14779_v27 = vld [vmem:[#allocation2 + $0xa88] ss:$24 sps:$4 sm:$0xff]  }
 0x1dc   :  { %2336 = vmatpush1.bf16.msra.mxu0 %v14713_v29  ;;  %v14788_v29 = vld [vmem:[#allocation2 + $0x940] ss:$24 sps:$4 sm:$0xff]  }
 0x1dd   :  { %4253 = vmatpush1.bf16.msra.mxu1 %v14710_v28  ;;  %2337 = vmatprep.subr.bf16.mxu0 %v14721_v31  ;;  %v14793_v28 = vld [vmem:[#allocation2 + $0xaec] ss:$24 sps:$4 sm:$0xff]  }
 0x1de   :  { %4254 = vmatprep.subr.bf16.mxu1 %v14718_v30  ;;  %v14791_v30 = vld [vmem:[#allocation2 + $0xae8] ss:$24 sps:$4 sm:$0xff]   ;;  %v14796_v31 = vld [vmem:[#allocation2 + $0x974] ss:$24 sps:$4 sm:$0xff]  }
 0x1e0   :  { %2338 = vmatpush1.bf16.msra.mxu0 %v14719_v32 }
 0x1e1   :  { %4255 = vmatpush1.bf16.msra.mxu1 %v14716_v18  ;;  %2339 = vmatprep.subr.bf16.mxu0 %v14727_v34  ;;  %v14799_v18 = vld [vmem:[#allocation2 + $0xb1c] ss:$24 sps:$4 sm:$0xff]  }
 0x1e2   :  { %4256 = vmatprep.subr.bf16.mxu1 %v14724_v33  ;;  %v16490_v33 = vld [vmem:[%s18203_s0 + $0x18] ss:$0 sps:$4 sm:$0xff]  }
 0x1e4   :  { %2340 = vmatpush1.bf16.msra.mxu0 %v14725_v37 }
 0x1e5   :  { %4257 = vmatpush1.bf16.msra.mxu1 %v14722_v36  ;;  %2341 = vmatprep.subr.bf16.mxu0 %v14733_v39  ;;  %v14794_v36 = vld [vmem:[#allocation2 + $0x970] ss:$24 sps:$4 sm:$0xff]   ;;  %v14802_v39 = vld [vmem:[#allocation2 + $0x9a4] ss:$24 sps:$4 sm:$0xff]  }
 0x1e6   :  { %4258 = vmatprep.subr.bf16.mxu1 %v14730_v38  ;;  %v14797_v38 = vld [vmem:[#allocation2 + $0xb18] ss:$24 sps:$4 sm:$0xff]  }
 0x1e8   :  { %2342 = vmatpush1.bf16.msra.mxu0 %v14731_v41  ;;  %v14805_v41 = vld [vmem:[#allocation2 + $0xb4c] ss:$24 sps:$4 sm:$0xff]  }
 0x1e9   :  { %4259 = vmatpush1.bf16.msra.mxu1 %v14728_v40  ;;  %2343 = vmatprep.subr.bf16.mxu0 %v14739_v43  ;;  %v14803_v43 = vld [vmem:[#allocation2 + $0xb48] ss:$24 sps:$4 sm:$0xff]  }
 0x1ea   :  { %4260 = vmatprep.subr.bf16.mxu1 %v14736_v42  ;;  %v14800_v42 = vld [vmem:[#allocation2 + $0x9a0] ss:$24 sps:$4 sm:$0xff]  }
 0x1ec   :  { %2344 = vmatpush1.bf16.msra.mxu0 %v14737_v45  ;;  %v14811_v45 = vld [vmem:[#allocation2 + $0xb7c] ss:$24 sps:$4 sm:$0xff]  }
 0x1ed   :  { %4261 = vmatpush1.bf16.msra.mxu1 %v14734_v44  ;;  %4324 = vmatprep.subr.bf16.mxu0 %v14745_v48  ;;  %v14808_v44 = vld [vmem:[#allocation2 + $0x9d4] ss:$24 sps:$4 sm:$0xff]   ;;  %v14806_v48 = vld [vmem:[#allocation2 + $0x9d0] ss:$24 sps:$4 sm:$0xff]  }
 0x1ee   :  { %4262 = vmatprep.subr.bf16.mxu1 %v14742_v46 }
 0x1ef   :  { %2346 = vmatmul.mubr.bf16.vlgmr.msra.gmra.mrb[4].mxu0 %v16815_v23 }
 0x1f0   :  { %4325 = vmatpush1.bf16.msra.mxu0 %v14743_v51  ;;  %4356 = vmatprep.mubr.bf16.mxu0 %v16777_v52  ;;  %v14809_v51 = vld [vmem:[#allocation2 + $0xb78] ss:$24 sps:$4 sm:$0xff]  }
 0x1f1   :  { %4263 = vmatpush1.bf16.msra.mxu1 %v14740_v50  ;;  %4326 = vmatprep.subr.bf16.mxu0 %v14751_v54 }
 0x1f2   :  { %4264 = vmatprep.subr.bf16.mxu1 %v14748_v53  ;;  %v14814_v53 = vld [vmem:[#allocation2 + $0xa04] ss:$24 sps:$4 sm:$0xff]  }
 0x1f4   :  { %4327 = vmatpush1.bf16.msra.mxu0 %v14749_v56 }
 0x1f5   :  { %4265 = vmatpush1.bf16.msra.mxu1 %v14746_v55  ;;  %4328 = vmatprep.subr.bf16.mxu0 %v14757_v58  ;;  %v14817_v55 = vld [vmem:[#allocation2 + $0xbac] ss:$24 sps:$4 sm:$0xff]   ;;  %v14815_v58 = vld [vmem:[#allocation2 + $0xba8] ss:$24 sps:$4 sm:$0xff]  }
 0x1f6   :  { %4266 = vmatprep.subr.bf16.mxu1 %v14754_v57  ;;  %v14812_v57 = vld [vmem:[#allocation2 + $0xa00] ss:$24 sps:$4 sm:$0xff]  }
 0x1f8   :  { %4329 = vmatpush1.bf16.msra.mxu0 %v14755_v60  ;;  %v14823_v60 = vld [vmem:[#allocation2 + $0xbdc] ss:$24 sps:$4 sm:$0xff]  }
 0x1f9   :  { %4267 = vmatpush1.bf16.msra.mxu1 %v14752_v59  ;;  %4330 = vmatprep.subr.bf16.mxu0 %v14763_v62  ;;  %v14820_v59 = vld [vmem:[#allocation2 + $0xa34] ss:$24 sps:$4 sm:$0xff]   ;;  %v14821_v62 = vld [vmem:[#allocation2 + $0xbd8] ss:$24 sps:$4 sm:$0xff]  }
 0x1fa   :  { %4268 = vmatprep.subr.bf16.mxu1 %v14760_v61  ;;  %v14818_v61 = vld [vmem:[#allocation2 + $0xa30] ss:$24 sps:$4 sm:$0xff]  }
 0x1fc   :  { %4331 = vmatpush1.bf16.msra.mxu0 %v14761_v1  ;;  %v14829_v1 = vld [vmem:[#allocation2 + $0xc0c] ss:$24 sps:$4 sm:$0xff]  }
 0x1fd   :  { %4269 = vmatpush1.bf16.msra.mxu1 %v14758_v63  ;;  %4332 = vmatprep.subr.bf16.mxu0 %v14769_v3  ;;  %v14826_v63 = vld [vmem:[#allocation2 + $0xa64] ss:$24 sps:$4 sm:$0xff]   ;;  %v14827_v3 = vld [vmem:[#allocation2 + $0xc08] ss:$24 sps:$4 sm:$0xff]  }
 0x1fe   :  { %4270 = vmatprep.subr.bf16.mxu1 %v14766_v2  ;;  %v14824_v2 = vld [vmem:[#allocation2 + $0xa60] ss:$24 sps:$4 sm:$0xff]  }
 0x200   :  { %4333 = vmatpush1.bf16.msra.mxu0 %v14767_v5  ;;  %v14835_v5 = vld [vmem:[#allocation2 + $0xc3c] ss:$24 sps:$4 sm:$0xff]  }
 0x201   :  { %4271 = vmatpush1.bf16.msra.mxu1 %v14764_v4  ;;  %4334 = vmatprep.subr.bf16.mxu0 %v14775_v7  ;;  %v14832_v4 = vld [vmem:[#allocation2 + $0xa94] ss:$24 sps:$4 sm:$0xff]   ;;  %v14833_v7 = vld [vmem:[#allocation2 + $0xc38] ss:$24 sps:$4 sm:$0xff]  }
 0x202   :  { %4272 = vmatprep.subr.bf16.mxu1 %v14772_v6  ;;  %v2019_v13 = vpop.f32.mrb[0].mxu0  ;;  %v14830_v6 = vld [vmem:[#allocation2 + $0xa90] ss:$24 sps:$4 sm:$0xff]  }
 0x203   :  { %v16843_v14 = vadd.f32 %v16826_v47, %v2019_v13  ;;  %v2021_v16 = vpop.f32.mrb[1].mxu0  ;;  %v14787_v47 = vld [vmem:[#allocation2 + $0xabc] ss:$24 sps:$4 sm:$0xff]  }
 0x204   :  { %v16846_v20 = vadd.f32 %v16829_v49, %v2021_v16  ;;  %v2023_v21 = vpop.f32.mrb[2].mxu0  ;;  %4335 = vmatpush1.bf16.msra.mxu0 %v14773_v10  ;;  %v14785_v49 = vld [vmem:[#allocation2 + $0xab8] ss:$24 sps:$4 sm:$0xff]   ;;  %v14841_v10 = vld [vmem:[#allocation2 + $0xc6c] ss:$24 sps:$4 sm:$0xff]  }
 0x205   :  { %4273 = vmatpush1.bf16.msra.mxu1 %v14770_v9  ;;  %v2024_v25 = vpop.f32.mrb[3].mxu0  ;;  %4336 = vmatprep.subr.bf16.mxu0 %v14778_v11  ;;  %v14838_v9 = vld [vmem:[#allocation2 + $0xac4] ss:$24 sps:$4 sm:$0xff]   ;;  %v14836_v11 = vld [vmem:[#allocation2 + $0xac0] ss:$24 sps:$4 sm:$0xff]  }
 0x206   :  { %4283 = vmatprep.subr.bf16.mxu1 %v14784_v12  ;;  %v14839_v12 = vld [vmem:[#allocation2 + $0xc68] ss:$24 sps:$4 sm:$0xff]   ;;  %v14844_v13 = vld [vmem:[#allocation2 + $0xaf4] ss:$24 sps:$4 sm:$0xff]   ;;  %v14845_v21 = vld [vmem:[#allocation2 + $0xc98] ss:$24 sps:$4 sm:$0xff]  }
 0x207   :  { %v14847_v16 = vld [vmem:[#allocation2 + $0xc9c] ss:$24 sps:$4 sm:$0xff]   ;;  %v14848_v25 = vld [vmem:[#allocation2 + $0xb20] ss:$24 sps:$4 sm:$0xff]  }
 0x208   :  { %4275 = vmatmul.mubr.bf16.vlgmr.msra.gmra.mrb[12].mxu1 %v16815_v23  ;;  %4337 = vmatpush1.bf16.msra.mxu0 %v14776_v17  ;;  %v14842_v17 = vld [vmem:[#allocation2 + $0xaf0] ss:$24 sps:$4 sm:$0xff]  }
 0x209   :  { %4284 = vmatpush1.bf16.msra.mxu1 %v14782_v24  ;;  %4338 = vmatprep.subr.bf16.mxu0 %v14781_v22  ;;  %v14850_v22 = vld [vmem:[#allocation2 + $0xb24] ss:$24 sps:$4 sm:$0xff]  }
 0x20a   :  { %4315 = vmatprep.mubr.bf16.mxu1 %v16644_v0  ;;  %4488 = vmatprep.subr.bf16.mxu1 %v14790_v26  ;;  %v14853_v24 = vld [vmem:[#allocation2 + $0xccc] ss:$24 sps:$4 sm:$0xff]   ;;  %v14851_v26 = vld [vmem:[#allocation2 + $0xcc8] ss:$24 sps:$4 sm:$0xff]  }
 0x20c   :  { %4339 = vmatpush1.bf16.msra.mxu0 %v14779_v27  ;;  %v14856_v27 = vld [vmem:[#allocation2 + $0xb54] ss:$24 sps:$4 sm:$0xff]  }
 0x20d   :  { %4340 = vmatprep.subr.bf16.mxu0 %v14787_v47  ;;  %v14859_v47 = vld [vmem:[#allocation2 + $0xcfc] ss:$24 sps:$4 sm:$0xff]  }
 0x210   :  { %4341 = vmatpush1.bf16.msra.mxu0 %v14785_v49  ;;  %v14854_v49 = vld [vmem:[#allocation2 + $0xb50] ss:$24 sps:$4 sm:$0xff]  }
 0x211   :  { %4342 = vmatprep.subr.bf16.mxu0 %v14793_v28  ;;  %v14857_v28 = vld [vmem:[#allocation2 + $0xcf8] ss:$24 sps:$4 sm:$0xff]  }
 0x213   :  { %v16850_v32 = vpop.f32.mrb[4].mxu1 }
 0x214   :  { %12723 = vmatmul.mubr.msk.bf16.vlgmr.msra.gmra.mrb[12].mxu1 %vm1899_vm0, %v16490_v33  ;;  %v16856_v34 = vpop.f32.mrb[5].mxu1  ;;  %4343 = vmatpush1.bf16.msra.mxu0 %v14791_v30  ;;  %v14865_v30 = vld [vmem:[#allocation2 + $0xd2c] ss:$24 sps:$4 sm:$0xff]  }
 0x215   :  { %4489 = vmatpush1.bf16.msra.mxu1 %v14788_v29  ;;  %v2228_v37 = vpop.f32.mrb[6].mxu1  ;;  %4344 = vmatprep.subr.bf16.mxu0 %v14799_v18  ;;  %v14862_v29 = vld [vmem:[#allocation2 + $0xb84] ss:$24 sps:$4 sm:$0xff]   ;;  %v14863_v18 = vld [vmem:[#allocation2 + $0xd28] ss:$24 sps:$4 sm:$0xff]  }
 0x216   :  { %v2229_v40 = vpop.f32.mrb[7].mxu1  ;;  %4490 = vmatprep.subr.bf16.mxu1 %v14796_v31  ;;  %4520 = vmatprep.mubr.bf16.mxu1 %v16777_v52  ;;  %v14860_v31 = vld [vmem:[#allocation2 + $0xb80] ss:$24 sps:$4 sm:$0xff]   ;;  %v14868_v33 = vld [vmem:[#allocation2 + $0xbb4] ss:$24 sps:$4 sm:$0xff]  }
 0x217   :  { %v14866_v37 = vld [vmem:[#allocation2 + $0xbb0] ss:$24 sps:$4 sm:$0xff]   ;;  %v14877_v40 = vld [vmem:[#allocation2 + $0xd8c] ss:$24 sps:$4 sm:$0xff]  }
 0x218   :  { %4345 = vmatpush1.bf16.msra.mxu0 %v14797_v38  ;;  %v14869_v38 = vld [vmem:[#allocation2 + $0xd58] ss:$24 sps:$4 sm:$0xff]  }
 0x219   :  { %4491 = vmatpush1.bf16.msra.mxu1 %v14794_v36  ;;  %4346 = vmatprep.subr.bf16.mxu0 %v14805_v41  ;;  %v14871_v36 = vld [vmem:[#allocation2 + $0xd5c] ss:$24 sps:$4 sm:$0xff]   ;;  %v14872_v41 = vld [vmem:[#allocation2 + $0xbe0] ss:$24 sps:$4 sm:$0xff]  }
 0x21a   :  { %4492 = vmatprep.subr.bf16.mxu1 %v14802_v39  ;;  %v14874_v39 = vld [vmem:[#allocation2 + $0xbe4] ss:$24 sps:$4 sm:$0xff]  }
 0x21b   :  { %v16859_v46 = vpop.f32.mrb[8].mxu1 }
 0x21c   :  { %v16861_v50 = vpop.f32.mrb[9].mxu1  ;;  %4347 = vmatpush1.bf16.msra.mxu0 %v14803_v43  ;;  %v14880_v43 = vld [vmem:[#allocation2 + $0xc14] ss:$24 sps:$4 sm:$0xff]  }
 0x21d   :  { %4493 = vmatpush1.bf16.msra.mxu1 %v14800_v42  ;;  %v2392_v54 = vpop.f32.mrb[10].mxu1  ;;  %4348 = vmatprep.subr.bf16.mxu0 %v14811_v45  ;;  %v14875_v42 = vld [vmem:[#allocation2 + $0xd88] ss:$24 sps:$4 sm:$0xff]  }
 0x21e   :  { %4494 = vmatprep.subr.bf16.mxu1 %v14808_v44  ;;  %v2393_v56 = vpop.f32.mrb[11].mxu1  ;;  %v14883_v44 = vld [vmem:[#allocation2 + $0xdbc] ss:$24 sps:$4 sm:$0xff]   ;;  %v14878_v45 = vld [vmem:[#allocation2 + $0xc10] ss:$24 sps:$4 sm:$0xff]  }
 0x21f   :  { %v14884_v54 = vld [vmem:[#allocation2 + $0xc40] ss:$24 sps:$4 sm:$0xff]   ;;  %v14892_v56 = vld [vmem:[#allocation2 + $0xc74] ss:$24 sps:$4 sm:$0xff]  }
 0x220   :  { %4349 = vmatpush1.bf16.msra.mxu0 %v14809_v51  ;;  %v14886_v51 = vld [vmem:[#allocation2 + $0xc44] ss:$24 sps:$4 sm:$0xff]  }
 0x221   :  { %4495 = vmatpush1.bf16.msra.mxu1 %v14806_v48  ;;  %4350 = vmatprep.subr.bf16.mxu0 %v14817_v55  ;;  %v14881_v48 = vld [vmem:[#allocation2 + $0xdb8] ss:$24 sps:$4 sm:$0xff]   ;;  %v14887_v55 = vld [vmem:[#allocation2 + $0xde8] ss:$24 sps:$4 sm:$0xff]  }
 0x222   :  { %4496 = vmatprep.subr.bf16.mxu1 %v14814_v53  ;;  %v14889_v53 = vld [vmem:[#allocation2 + $0xdec] ss:$24 sps:$4 sm:$0xff]  }
 0x224   :  { %4351 = vmatpush1.bf16.msra.mxu0 %v14815_v58  ;;  %v14890_v58 = vld [vmem:[#allocation2 + $0xc70] ss:$24 sps:$4 sm:$0xff]  }
 0x225   :  { %4497 = vmatpush1.bf16.msra.mxu1 %v14812_v57  ;;  %4352 = vmatprep.subr.bf16.mxu0 %v14823_v60  ;;  %v14895_v57 = vld [vmem:[#allocation2 + $0xe1c] ss:$24 sps:$4 sm:$0xff]  }
 0x226   :  { %4498 = vmatprep.subr.bf16.mxu1 %v14820_v59  ;;  %v14893_v59 = vld [vmem:[#allocation2 + $0xe18] ss:$24 sps:$4 sm:$0xff]   ;;  %v14898_v60 = vld [vmem:[#allocation2 + $0xca4] ss:$24 sps:$4 sm:$0xff]  }
 0x228   :  { %4353 = vmatpush1.bf16.msra.mxu0 %v14821_v62  ;;  %v14896_v62 = vld [vmem:[#allocation2 + $0xca0] ss:$24 sps:$4 sm:$0xff]  }
 0x229   :  { %4499 = vmatpush1.bf16.msra.mxu1 %v14818_v61  ;;  %4354 = vmatprep.subr.bf16.mxu0 %v14829_v1  ;;  %v14901_v61 = vld [vmem:[#allocation2 + $0xe4c] ss:$24 sps:$4 sm:$0xff]  }
 0x22a   :  { %4500 = vmatprep.subr.bf16.mxu1 %v14826_v63  ;;  %v14899_v63 = vld [vmem:[#allocation2 + $0xe48] ss:$24 sps:$4 sm:$0xff]   ;;  %v14904_v1 = vld [vmem:[#allocation2 + $0xcd4] ss:$24 sps:$4 sm:$0xff]  }
 0x22c   :  { %4355 = vmatpush1.bf16.msra.mxu0 %v14827_v3  ;;  %v14902_v3 = vld [vmem:[#allocation2 + $0xcd0] ss:$24 sps:$4 sm:$0xff]  }
 0x22d   :  { %4501 = vmatpush1.bf16.msra.mxu1 %v14824_v2  ;;  %4365 = vmatprep.subr.bf16.mxu0 %v14835_v5  ;;  %v14907_v2 = vld [vmem:[#allocation2 + $0xe7c] ss:$24 sps:$4 sm:$0xff]  }
 0x22e   :  { %4502 = vmatprep.subr.bf16.mxu1 %v14832_v4  ;;  %v14905_v4 = vld [vmem:[#allocation2 + $0xe78] ss:$24 sps:$4 sm:$0xff]   ;;  %v14910_v5 = vld [vmem:[#allocation2 + $0xd04] ss:$24 sps:$4 sm:$0xff]  }
 0x22f   :  { %4357 = vmatmul.mubr.bf16.vlgmr.msra.gmra.mrb[8].mxu0 %v16781_v8 }
 0x230   :  { %4366 = vmatpush1.bf16.msra.mxu0 %v14833_v7  ;;  %4397 = vmatprep.mubr.bf16.mxu0 %v16792_v35  ;;  %v14908_v7 = vld [vmem:[#allocation2 + $0xd00] ss:$24 sps:$4 sm:$0xff]  }
 0x231   :  { %4503 = vmatpush1.bf16.msra.mxu1 %v14830_v6  ;;  %4367 = vmatprep.subr.bf16.mxu0 %v14841_v10  ;;  %v14913_v6 = vld [vmem:[#allocation2 + $0xeac] ss:$24 sps:$4 sm:$0xff]  }
 0x232   :  { %4504 = vmatprep.subr.bf16.mxu1 %v14838_v9  ;;  %v14911_v9 = vld [vmem:[#allocation2 + $0xea8] ss:$24 sps:$4 sm:$0xff]   ;;  %v14916_v10 = vld [vmem:[#allocation2 + $0xd34] ss:$24 sps:$4 sm:$0xff]  }
 0x234   :  { %4368 = vmatpush1.bf16.msra.mxu0 %v14839_v12  ;;  %v14914_v12 = vld [vmem:[#allocation2 + $0xd30] ss:$24 sps:$4 sm:$0xff]  }
 0x235   :  { %4505 = vmatpush1.bf16.msra.mxu1 %v14836_v11  ;;  %4369 = vmatprep.subr.bf16.mxu0 %v14847_v16  ;;  %v14919_v11 = vld [vmem:[#allocation2 + $0xedc] ss:$24 sps:$4 sm:$0xff]  }
 0x236   :  { %4506 = vmatprep.subr.bf16.mxu1 %v14844_v13  ;;  %v14917_v13 = vld [vmem:[#allocation2 + $0xed8] ss:$24 sps:$4 sm:$0xff]   ;;  %v14922_v16 = vld [vmem:[#allocation2 + $0xd64] ss:$24 sps:$4 sm:$0xff]  }
 0x238   :  { %4370 = vmatpush1.bf16.msra.mxu0 %v14845_v21  ;;  %v14920_v21 = vld [vmem:[#allocation2 + $0xd60] ss:$24 sps:$4 sm:$0xff]  }
 0x239   :  { %4507 = vmatpush1.bf16.msra.mxu1 %v14842_v17  ;;  %4371 = vmatprep.subr.bf16.mxu0 %v14853_v24  ;;  %v14925_v17 = vld [vmem:[#allocation2 + $0xf0c] ss:$24 sps:$4 sm:$0xff]  }
 0x23a   :  { %4508 = vmatprep.subr.bf16.mxu1 %v14850_v22  ;;  %v14923_v22 = vld [vmem:[#allocation2 + $0xf08] ss:$24 sps:$4 sm:$0xff]   ;;  %v14928_v24 = vld [vmem:[#allocation2 + $0xd94] ss:$24 sps:$4 sm:$0xff]  }
 0x23c   :  { %4372 = vmatpush1.bf16.msra.mxu0 %v14851_v26  ;;  %v14926_v26 = vld [vmem:[#allocation2 + $0xd90] ss:$24 sps:$4 sm:$0xff]  }
 0x23d   :  { %4509 = vmatpush1.bf16.msra.mxu1 %v14848_v25  ;;  %4373 = vmatprep.subr.bf16.mxu0 %v14859_v47  ;;  %v14931_v25 = vld [vmem:[#allocation2 + $0xf3c] ss:$24 sps:$4 sm:$0xff]  }
 0x23e   :  { %4510 = vmatprep.subr.bf16.mxu1 %v14856_v27  ;;  %v14929_v27 = vld [vmem:[#allocation2 + $0xf38] ss:$24 sps:$4 sm:$0xff]   ;;  %v14934_v47 = vld [vmem:[#allocation2 + $0xdc4] ss:$24 sps:$4 sm:$0xff]  }
 0x240   :  { %4374 = vmatpush1.bf16.msra.mxu0 %v14857_v28  ;;  %v14932_v28 = vld [vmem:[#allocation2 + $0xdc0] ss:$24 sps:$4 sm:$0xff]  }
 0x241   :  { %4511 = vmatpush1.bf16.msra.mxu1 %v14854_v49  ;;  %4375 = vmatprep.subr.bf16.mxu0 %v14865_v30  ;;  %v14937_v49 = vld [vmem:[#allocation2 + $0xf6c] ss:$24 sps:$4 sm:$0xff]  }
 0x242   :  { %4512 = vmatprep.subr.bf16.mxu1 %v14862_v29  ;;  %v14935_v29 = vld [vmem:[#allocation2 + $0xf68] ss:$24 sps:$4 sm:$0xff]   ;;  %v14940_v30 = vld [vmem:[#allocation2 + $0xdf4] ss:$24 sps:$4 sm:$0xff]  }
 0x244   :  { %4376 = vmatpush1.bf16.msra.mxu0 %v14863_v18  ;;  %v14938_v18 = vld [vmem:[#allocation2 + $0xdf0] ss:$24 sps:$4 sm:$0xff]  }
 0x245   :  { %4513 = vmatpush1.bf16.msra.mxu1 %v14860_v31  ;;  %4377 = vmatprep.subr.bf16.mxu0 %v14871_v36  ;;  %v14943_v31 = vld [vmem:[#allocation2 + $0xf9c] ss:$24 sps:$4 sm:$0xff]  }
 0x246   :  { %4514 = vmatprep.subr.bf16.mxu1 %v14868_v33  ;;  %v14941_v33 = vld [vmem:[#allocation2 + $0xf98] ss:$24 sps:$4 sm:$0xff]   ;;  %v14946_v36 = vld [vmem:[#allocation2 + $0xe24] ss:$24 sps:$4 sm:$0xff]  }
 0x248   :  { %4378 = vmatpush1.bf16.msra.mxu0 %v14869_v38  ;;  %v14944_v38 = vld [vmem:[#allocation2 + $0xe20] ss:$24 sps:$4 sm:$0xff]  }
 0x249   :  { %4515 = vmatpush1.bf16.msra.mxu1 %v14866_v37  ;;  %4379 = vmatprep.subr.bf16.mxu0 %v14877_v40  ;;  %v14949_v37 = vld [vmem:[#allocation2 + $0xfcc] ss:$24 sps:$4 sm:$0xff]  }
 0x24a   :  { %4516 = vmatprep.subr.bf16.mxu1 %v14874_v39  ;;  %v14947_v39 = vld [vmem:[#allocation2 + $0xfc8] ss:$24 sps:$4 sm:$0xff]   ;;  %v14952_v40 = vld [vmem:[#allocation2 + $0xe54] ss:$24 sps:$4 sm:$0xff]  }
 0x24c   :  { %4380 = vmatpush1.bf16.msra.mxu0 %v14875_v42  ;;  %v14950_v42 = vld [vmem:[#allocation2 + $0xe50] ss:$24 sps:$4 sm:$0xff]  }
 0x24d   :  { %4517 = vmatpush1.bf16.msra.mxu1 %v14872_v41  ;;  %4381 = vmatprep.subr.bf16.mxu0 %v14883_v44  ;;  %v14955_v41 = vld [vmem:[#allocation2 + $0xffc] ss:$24 sps:$4 sm:$0xff]  }
 0x24e   :  { %4518 = vmatprep.subr.bf16.mxu1 %v14880_v43  ;;  %v14953_v43 = vld [vmem:[#allocation2 + $0xff8] ss:$24 sps:$4 sm:$0xff]   ;;  %v14958_v44 = vld [vmem:[#allocation2 + $0xe84] ss:$24 sps:$4 sm:$0xff]  }
 0x250   :  { %4382 = vmatpush1.bf16.msra.mxu0 %v14881_v48  ;;  %v14956_v48 = vld [vmem:[#allocation2 + $0xe80] ss:$24 sps:$4 sm:$0xff]  }
 0x251   :  { %4519 = vmatpush1.bf16.msra.mxu1 %v14878_v45  ;;  %4383 = vmatprep.subr.bf16.mxu0 %v14889_v53  ;;  %v14961_v45 = vld [vmem:[#allocation2 + $0x102c] ss:$24 sps:$4 sm:$0xff]  }
 0x252   :  { %4529 = vmatprep.subr.bf16.mxu1 %v14886_v51  ;;  %v14959_v51 = vld [vmem:[#allocation2 + $0x1028] ss:$24 sps:$4 sm:$0xff]   ;;  %v14964_v53 = vld [vmem:[#allocation2 + $0xeb4] ss:$24 sps:$4 sm:$0xff]  }
 0x254   :  { %4521 = vmatmul.mubr.bf16.vlgmr.msra.gmra.mrb[16].mxu1 %v16781_v8  ;;  %4384 = vmatpush1.bf16.msra.mxu0 %v14887_v55  ;;  %v14962_v55 = vld [vmem:[#allocation2 + $0xeb0] ss:$24 sps:$4 sm:$0xff]  }
 0x255   :  { %4530 = vmatpush1.bf16.msra.mxu1 %v14884_v54  ;;  %4385 = vmatprep.subr.bf16.mxu0 %v14895_v57  ;;  %v14967_v54 = vld [vmem:[#allocation2 + $0x105c] ss:$24 sps:$4 sm:$0xff]  }
 0x256   :  { %4531 = vmatprep.subr.bf16.mxu1 %v14892_v56  ;;  %4561 = vmatprep.mubr.bf16.mxu1 %v16792_v35  ;;  %v14965_v56 = vld [vmem:[#allocation2 + $0x1058] ss:$24 sps:$4 sm:$0xff]   ;;  %v14970_v57 = vld [vmem:[#allocation2 + $0xee4] ss:$24 sps:$4 sm:$0xff]  }
 0x258   :  { %4386 = vmatpush1.bf16.msra.mxu0 %v14893_v59  ;;  %v14968_v59 = vld [vmem:[#allocation2 + $0xee0] ss:$24 sps:$4 sm:$0xff]  }
 0x259   :  { %4532 = vmatpush1.bf16.msra.mxu1 %v14890_v58  ;;  %4387 = vmatprep.subr.bf16.mxu0 %v14901_v61  ;;  %v14973_v58 = vld [vmem:[#allocation2 + $0x108c] ss:$24 sps:$4 sm:$0xff]  }
 0x25a   :  { %4533 = vmatprep.subr.bf16.mxu1 %v14898_v60  ;;  %v14971_v60 = vld [vmem:[#allocation2 + $0x1088] ss:$24 sps:$4 sm:$0xff]   ;;  %v14976_v61 = vld [vmem:[#allocation2 + $0xf14] ss:$24 sps:$4 sm:$0xff]  }
 0x25c   :  { %4388 = vmatpush1.bf16.msra.mxu0 %v14899_v63  ;;  %v14974_v63 = vld [vmem:[#allocation2 + $0xf10] ss:$24 sps:$4 sm:$0xff]  }
 0x25d   :  { %4534 = vmatpush1.bf16.msra.mxu1 %v14896_v62  ;;  %4389 = vmatprep.subr.bf16.mxu0 %v14907_v2  ;;  %v14979_v62 = vld [vmem:[#allocation2 + $0x10bc] ss:$24 sps:$4 sm:$0xff]  }
 0x25e   :  { %4535 = vmatprep.subr.bf16.mxu1 %v14904_v1  ;;  %v14977_v1 = vld [vmem:[#allocation2 + $0x10b8] ss:$24 sps:$4 sm:$0xff]   ;;  %v14982_v2 = vld [vmem:[#allocation2 + $0xf44] ss:$24 sps:$4 sm:$0xff]  }
 0x260   :  { %4390 = vmatpush1.bf16.msra.mxu0 %v14905_v4  ;;  %v14980_v4 = vld [vmem:[#allocation2 + $0xf40] ss:$24 sps:$4 sm:$0xff]  }
 0x261   :  { %4536 = vmatpush1.bf16.msra.mxu1 %v14902_v3  ;;  %4391 = vmatprep.subr.bf16.mxu0 %v14913_v6  ;;  %v14985_v3 = vld [vmem:[#allocation2 + $0x10ec] ss:$24 sps:$4 sm:$0xff]  }
 0x262   :  { %4537 = vmatprep.subr.bf16.mxu1 %v14910_v5  ;;  %v14983_v5 = vld [vmem:[#allocation2 + $0x10e8] ss:$24 sps:$4 sm:$0xff]   ;;  %v14988_v6 = vld [vmem:[#allocation2 + $0xf74] ss:$24 sps:$4 sm:$0xff]  }
 0x264   :  { %4392 = vmatpush1.bf16.msra.mxu0 %v14911_v9  ;;  %v14986_v9 = vld [vmem:[#allocation2 + $0xf70] ss:$24 sps:$4 sm:$0xff]  }
 0x265   :  { %4538 = vmatpush1.bf16.msra.mxu1 %v14908_v7  ;;  %4393 = vmatprep.subr.bf16.mxu0 %v14919_v11  ;;  %v14991_v7 = vld [vmem:[#allocation2 + $0x111c] ss:$24 sps:$4 sm:$0xff]  }
 0x266   :  { %4539 = vmatprep.subr.bf16.mxu1 %v14916_v10  ;;  %v14989_v10 = vld [vmem:[#allocation2 + $0x1118] ss:$24 sps:$4 sm:$0xff]   ;;  %v14994_v11 = vld [vmem:[#allocation2 + $0xfa4] ss:$24 sps:$4 sm:$0xff]  }
 0x268   :  { %4394 = vmatpush1.bf16.msra.mxu0 %v14917_v13  ;;  %v14992_v13 = vld [vmem:[#allocation2 + $0xfa0] ss:$24 sps:$4 sm:$0xff]  }
 0x269   :  { %4540 = vmatpush1.bf16.msra.mxu1 %v14914_v12  ;;  %4395 = vmatprep.subr.bf16.mxu0 %v14925_v17  ;;  %v14997_v12 = vld [vmem:[#allocation2 + $0x114c] ss:$24 sps:$4 sm:$0xff]  }
 0x26a   :  { %4541 = vmatprep.subr.bf16.mxu1 %v14922_v16  ;;  %v14995_v16 = vld [vmem:[#allocation2 + $0x1148] ss:$24 sps:$4 sm:$0xff]   ;;  %v15000_v17 = vld [vmem:[#allocation2 + $0xfd4] ss:$24 sps:$4 sm:$0xff]  }
 0x26c   :  { %4396 = vmatpush1.bf16.msra.mxu0 %v14923_v22  ;;  %v14998_v22 = vld [vmem:[#allocation2 + $0xfd0] ss:$24 sps:$4 sm:$0xff]  }
 0x26d   :  { %4542 = vmatpush1.bf16.msra.mxu1 %v14920_v21  ;;  %4406 = vmatprep.subr.bf16.mxu0 %v14931_v25  ;;  %v15003_v21 = vld [vmem:[#allocation2 + $0x117c] ss:$24 sps:$4 sm:$0xff]  }
 0x26e   :  { %4543 = vmatprep.subr.bf16.mxu1 %v14928_v24  ;;  %v15001_v24 = vld [vmem:[#allocation2 + $0x1178] ss:$24 sps:$4 sm:$0xff]   ;;  %v15006_v25 = vld [vmem:[#allocation2 + $0x1004] ss:$24 sps:$4 sm:$0xff]  }
 0x26f   :  { %4398 = vmatmul.mubr.bf16.vlgmr.msra.gmra.mrb[8].mxu0 %v16798_v15 }
 0x270   :  { %4407 = vmatpush1.bf16.msra.mxu0 %v14929_v27  ;;  %4438 = vmatprep.mubr.bf16.mxu0 %v16807_v19  ;;  %v15004_v27 = vld [vmem:[#allocation2 + $0x1000] ss:$24 sps:$4 sm:$0xff]  }
 0x271   :  { %4544 = vmatpush1.bf16.msra.mxu1 %v14926_v26  ;;  %4408 = vmatprep.subr.bf16.mxu0 %v14937_v49  ;;  %v15009_v26 = vld [vmem:[#allocation2 + $0x11ac] ss:$24 sps:$4 sm:$0xff]  }
 0x272   :  { %4545 = vmatprep.subr.bf16.mxu1 %v14934_v47  ;;  %v15007_v47 = vld [vmem:[#allocation2 + $0x11a8] ss:$24 sps:$4 sm:$0xff]   ;;  %v15012_v49 = vld [vmem:[#allocation2 + $0x1034] ss:$24 sps:$4 sm:$0xff]  }
 0x274   :  { %4409 = vmatpush1.bf16.msra.mxu0 %v14935_v29  ;;  %v15010_v29 = vld [vmem:[#allocation2 + $0x1030] ss:$24 sps:$4 sm:$0xff]  }
 0x275   :  { %4546 = vmatpush1.bf16.msra.mxu1 %v14932_v28  ;;  %4410 = vmatprep.subr.bf16.mxu0 %v14943_v31  ;;  %v15015_v28 = vld [vmem:[#allocation2 + $0x11dc] ss:$24 sps:$4 sm:$0xff]  }
 0x276   :  { %4547 = vmatprep.subr.bf16.mxu1 %v14940_v30  ;;  %v15013_v30 = vld [vmem:[#allocation2 + $0x11d8] ss:$24 sps:$4 sm:$0xff]   ;;  %v15018_v31 = vld [vmem:[#allocation2 + $0x1064] ss:$24 sps:$4 sm:$0xff]  }
 0x278   :  { %4411 = vmatpush1.bf16.msra.mxu0 %v14941_v33  ;;  %v15016_v33 = vld [vmem:[#allocation2 + $0x1060] ss:$24 sps:$4 sm:$0xff]  }
 0x279   :  { %4548 = vmatpush1.bf16.msra.mxu1 %v14938_v18  ;;  %4412 = vmatprep.subr.bf16.mxu0 %v14949_v37  ;;  %v15021_v18 = vld [vmem:[#allocation2 + $0x120c] ss:$24 sps:$4 sm:$0xff]  }
 0x27a   :  { %4549 = vmatprep.subr.bf16.mxu1 %v14946_v36  ;;  %v15019_v36 = vld [vmem:[#allocation2 + $0x1208] ss:$24 sps:$4 sm:$0xff]   ;;  %v15024_v37 = vld [vmem:[#allocation2 + $0x1094] ss:$24 sps:$4 sm:$0xff]  }
 0x27c   :  { %4413 = vmatpush1.bf16.msra.mxu0 %v14947_v39  ;;  %v15022_v39 = vld [vmem:[#allocation2 + $0x1090] ss:$24 sps:$4 sm:$0xff]  }
 0x27d   :  { %4550 = vmatpush1.bf16.msra.mxu1 %v14944_v38  ;;  %4414 = vmatprep.subr.bf16.mxu0 %v14955_v41  ;;  %v15027_v38 = vld [vmem:[#allocation2 + $0x123c] ss:$24 sps:$4 sm:$0xff]  }
 0x27e   :  { %4551 = vmatprep.subr.bf16.mxu1 %v14952_v40  ;;  %v15025_v40 = vld [vmem:[#allocation2 + $0x1238] ss:$24 sps:$4 sm:$0xff]   ;;  %v15030_v41 = vld [vmem:[#allocation2 + $0x10c4] ss:$24 sps:$4 sm:$0xff]  }
 0x280   :  { %4415 = vmatpush1.bf16.msra.mxu0 %v14953_v43  ;;  %v15028_v43 = vld [vmem:[#allocation2 + $0x10c0] ss:$24 sps:$4 sm:$0xff]  }
 0x281   :  { %4552 = vmatpush1.bf16.msra.mxu1 %v14950_v42  ;;  %4416 = vmatprep.subr.bf16.mxu0 %v14961_v45  ;;  %v15039_v42 = vld [vmem:[#allocation2 + $0x1264] ss:$24 sps:$4 sm:$0xff]   ;;  %v15031_v45 = vld [vmem:[#allocation2 + $0x10f0] ss:$24 sps:$4 sm:$0xff]  }
 0x282   :  { %4553 = vmatprep.subr.bf16.mxu1 %v14958_v44  ;;  %v15033_v44 = vld [vmem:[#allocation2 + $0x10f4] ss:$24 sps:$4 sm:$0xff]  }
 0x284   :  { %4417 = vmatpush1.bf16.msra.mxu0 %v14959_v51  ;;  %v15034_v51 = vld [vmem:[#allocation2 + $0x1120] ss:$24 sps:$4 sm:$0xff]  }
 0x285   :  { %4554 = vmatpush1.bf16.msra.mxu1 %v14956_v48  ;;  %4418 = vmatprep.subr.bf16.mxu0 %v14967_v54  ;;  %v15036_v48 = vld [vmem:[#allocation2 + $0x1124] ss:$24 sps:$4 sm:$0xff]   ;;  %v15042_v54 = vld [vmem:[#allocation2 + $0x1154] ss:$24 sps:$4 sm:$0xff]  }
 0x286   :  { %4555 = vmatprep.subr.bf16.mxu1 %v14964_v53  ;;  %v15037_v53 = vld [vmem:[#allocation2 + $0x1260] ss:$24 sps:$4 sm:$0xff]  }
 0x288   :  { %4419 = vmatpush1.bf16.msra.mxu0 %v14965_v56  ;;  %v16876_v56 = vld [vmem:[%s18203_s0 + $0x18] ss:$0 sps:$4 sm:$0xff]  }
 0x289   :  { %4556 = vmatpush1.bf16.msra.mxu1 %v14962_v55  ;;  %4420 = vmatprep.subr.bf16.mxu0 %v14973_v58  ;;  %v15045_v55 = vld [vmem:[#allocation2 + $0x1294] ss:$24 sps:$4 sm:$0xff]   ;;  %v15043_v58 = vld [vmem:[#allocation2 + $0x1290] ss:$24 sps:$4 sm:$0xff]  }
 0x28a   :  { %4557 = vmatprep.subr.bf16.mxu1 %v14970_v57  ;;  %v15040_v57 = vld [vmem:[#allocation2 + $0x1150] ss:$24 sps:$4 sm:$0xff]  }
 0x28c   :  { %4421 = vmatpush1.bf16.msra.mxu0 %v14971_v60  ;;  %v15051_v60 = vld [vmem:[#allocation2 + $0x12c4] ss:$24 sps:$4 sm:$0xff]  }
 0x28d   :  { %4558 = vmatpush1.bf16.msra.mxu1 %v14968_v59  ;;  %4422 = vmatprep.subr.bf16.mxu0 %v14979_v62  ;;  %v15048_v59 = vld [vmem:[#allocation2 + $0x1184] ss:$24 sps:$4 sm:$0xff]   ;;  %v15049_v62 = vld [vmem:[#allocation2 + $0x12c0] ss:$24 sps:$4 sm:$0xff]  }
 0x28e   :  { %4559 = vmatprep.subr.bf16.mxu1 %v14976_v61  ;;  %v15046_v61 = vld [vmem:[#allocation2 + $0x1180] ss:$24 sps:$4 sm:$0xff]  }
 0x290   :  { %4423 = vmatpush1.bf16.msra.mxu0 %v14977_v1  ;;  %v15057_v1 = vld [vmem:[#allocation2 + $0x12f4] ss:$24 sps:$4 sm:$0xff]  }
 0x291   :  { %4560 = vmatpush1.bf16.msra.mxu1 %v14974_v63  ;;  %4424 = vmatprep.subr.bf16.mxu0 %v14985_v3  ;;  %v15054_v63 = vld [vmem:[#allocation2 + $0x11b4] ss:$24 sps:$4 sm:$0xff]  }
 0x292   :  { %4570 = vmatprep.subr.bf16.mxu1 %v14982_v2 }
 0x294   :  { %4562 = vmatmul.mubr.bf16.vlgmr.msra.gmra.mrb[16].mxu1 %v16798_v15  ;;  %4425 = vmatpush1.bf16.msra.mxu0 %v14983_v5  ;;  %v15052_v5 = vld [vmem:[#allocation2 + $0x11b0] ss:$24 sps:$4 sm:$0xff]  }
 0x295   :  { %4571 = vmatpush1.bf16.msra.mxu1 %v14980_v4  ;;  %4426 = vmatprep.subr.bf16.mxu0 %v14991_v7 }
 0x296   :  { %4572 = vmatprep.subr.bf16.mxu1 %v14988_v6  ;;  %4602 = vmatprep.mubr.bf16.mxu1 %v16807_v19 }
 0x298   :  { %4427 = vmatpush1.bf16.msra.mxu0 %v14989_v10  ;;  %v15060_v10 = vld [vmem:[#allocation2 + $0x11e4] ss:$24 sps:$4 sm:$0xff]  }
 0x299   :  { %4573 = vmatpush1.bf16.msra.mxu1 %v14986_v9  ;;  %4428 = vmatprep.subr.bf16.mxu0 %v14997_v12  ;;  %v15055_v9 = vld [vmem:[#allocation2 + $0x12f0] ss:$24 sps:$4 sm:$0xff]   ;;  %v15063_v12 = vld [vmem:[#allocation2 + $0x1324] ss:$24 sps:$4 sm:$0xff]  }
 0x29a   :  { %4574 = vmatprep.subr.bf16.mxu1 %v14994_v11 }
 0x29c   :  { %4429 = vmatpush1.bf16.msra.mxu0 %v14995_v16  ;;  %v15061_v16 = vld [vmem:[#allocation2 + $0x1320] ss:$24 sps:$4 sm:$0xff]  }
 0x29d   :  { %4575 = vmatpush1.bf16.msra.mxu1 %v14992_v13  ;;  %4430 = vmatprep.subr.bf16.mxu0 %v15003_v21  ;;  %v15058_v13 = vld [vmem:[#allocation2 + $0x11e0] ss:$24 sps:$4 sm:$0xff]   ;;  %v15064_v21 = vld [vmem:[#allocation2 + $0x1210] ss:$24 sps:$4 sm:$0xff]  }
 0x29e   :  { %4576 = vmatprep.subr.bf16.mxu1 %v15000_v17  ;;  %v15069_v17 = vld [vmem:[#allocation2 + $0x1354] ss:$24 sps:$4 sm:$0xff]  }
 0x2a0   :  { %4431 = vmatpush1.bf16.msra.mxu0 %v15001_v24  ;;  %v15078_v24 = vld [vmem:[#allocation2 + $0x1244] ss:$24 sps:$4 sm:$0xff]  }
 0x2a1   :  { %4577 = vmatpush1.bf16.msra.mxu1 %v14998_v22  ;;  %4432 = vmatprep.subr.bf16.mxu0 %v15009_v26  ;;  %v15072_v22 = vld [vmem:[#allocation2 + $0x1384] ss:$24 sps:$4 sm:$0xff]   ;;  %v15075_v26 = vld [vmem:[#allocation2 + $0x13b4] ss:$24 sps:$4 sm:$0xff]  }
 0x2a2   :  { %4578 = vmatprep.subr.bf16.mxu1 %v15006_v25  ;;  %v15070_v25 = vld [vmem:[#allocation2 + $0x1380] ss:$24 sps:$4 sm:$0xff]  }
 0x2a4   :  { %4433 = vmatpush1.bf16.msra.mxu0 %v15007_v47  ;;  %v15084_v47 = vld [vmem:[#allocation2 + $0x126c] ss:$24 sps:$4 sm:$0xff]  }
 0x2a5   :  { %4579 = vmatpush1.bf16.msra.mxu1 %v15004_v27  ;;  %4434 = vmatprep.subr.bf16.mxu0 %v15015_v28  ;;  %v15076_v27 = vld [vmem:[#allocation2 + $0x1240] ss:$24 sps:$4 sm:$0xff]   ;;  %v15081_v28 = vld [vmem:[#allocation2 + $0x13e4] ss:$24 sps:$4 sm:$0xff]  }
 0x2a6   :  { %4580 = vmatprep.subr.bf16.mxu1 %v15012_v49  ;;  %v15073_v49 = vld [vmem:[#allocation2 + $0x13b0] ss:$24 sps:$4 sm:$0xff]  }
 0x2a8   :  { %4435 = vmatpush1.bf16.msra.mxu0 %v15013_v30  ;;  %v15087_v30 = vld [vmem:[#allocation2 + $0x1414] ss:$24 sps:$4 sm:$0xff]  }
 0x2a9   :  { %4581 = vmatpush1.bf16.msra.mxu1 %v15010_v29  ;;  %4436 = vmatprep.subr.bf16.mxu0 %v15021_v18  ;;  %v15079_v29 = vld [vmem:[#allocation2 + $0x13e0] ss:$24 sps:$4 sm:$0xff]   ;;  %v15085_v18 = vld [vmem:[#allocation2 + $0x1410] ss:$24 sps:$4 sm:$0xff]  }
 0x2aa   :  { %4582 = vmatprep.subr.bf16.mxu1 %v15018_v31  ;;  %v15082_v31 = vld [vmem:[#allocation2 + $0x1268] ss:$24 sps:$4 sm:$0xff]  }
 0x2ac   :  { %4437 = vmatpush1.bf16.msra.mxu0 %v15019_v36  ;;  %v15093_v36 = vld [vmem:[#allocation2 + $0x1444] ss:$24 sps:$4 sm:$0xff]  }
 0x2ad   :  { %4583 = vmatpush1.bf16.msra.mxu1 %v15016_v33  ;;  %4447 = vmatprep.subr.bf16.mxu0 %v15027_v38  ;;  %v15090_v33 = vld [vmem:[#allocation2 + $0x129c] ss:$24 sps:$4 sm:$0xff]   ;;  %v15091_v38 = vld [vmem:[#allocation2 + $0x1440] ss:$24 sps:$4 sm:$0xff]  }
 0x2ae   :  { %4584 = vmatprep.subr.bf16.mxu1 %v15024_v37  ;;  %v15088_v37 = vld [vmem:[#allocation2 + $0x1298] ss:$24 sps:$4 sm:$0xff]  }
 0x2af   :  { %4439 = vmatmul.mubr.bf16.vlgmr.msra.gmra.mrb[8].mxu0 %v16815_v23 }
 0x2b0   :  { %4448 = vmatpush1.bf16.msra.mxu0 %v15025_v40  ;;  %4479 = vmatprep.mubr.bf16.mxu0 %v16644_v0  ;;  %v15099_v40 = vld [vmem:[#allocation2 + $0x1474] ss:$24 sps:$4 sm:$0xff]  }
 0x2b1   :  { %4585 = vmatpush1.bf16.msra.mxu1 %v15022_v39  ;;  %6417 = vmatprep.subr.bf16.mxu0 %v15039_v42  ;;  %v15096_v39 = vld [vmem:[#allocation2 + $0x12cc] ss:$24 sps:$4 sm:$0xff]   ;;  %v15097_v42 = vld [vmem:[#allocation2 + $0x1470] ss:$24 sps:$4 sm:$0xff]  }
 0x2b2   :  { %4586 = vmatprep.subr.bf16.mxu1 %v15030_v41  ;;  %v15094_v41 = vld [vmem:[#allocation2 + $0x12c8] ss:$24 sps:$4 sm:$0xff]  }
 0x2b5   :  { %4587 = vmatpush1.bf16.msra.mxu1 %v15028_v43  ;;  %v15102_v43 = vld [vmem:[#allocation2 + $0x12fc] ss:$24 sps:$4 sm:$0xff]  }
 0x2b6   :  { %4588 = vmatprep.subr.bf16.mxu1 %v15033_v44  ;;  %v15105_v44 = vld [vmem:[#allocation2 + $0x14a4] ss:$24 sps:$4 sm:$0xff]  }
 0x2b9   :  { %4589 = vmatpush1.bf16.msra.mxu1 %v15031_v45 }
 0x2ba   :  { %4590 = vmatprep.subr.bf16.mxu1 %v15036_v48 }
 0x2bb   :  { %12724 = vmatmul.mubr.msk.bf16.vlgmr.msra.gmra.mrb[8].mxu0 %vm1899_vm0, %v16876_v56 }
 0x2bc   :  { %6418 = vmatpush1.bf16.msra.mxu0 %v15037_v53  ;;  %6449 = vmatprep.mubr.bf16.mxu0 %v16777_v52  ;;  %v15100_v53 = vld [vmem:[#allocation2 + $0x12f8] ss:$24 sps:$4 sm:$0xff]  }
 0x2bd   :  { %4591 = vmatpush1.bf16.msra.mxu1 %v15034_v51  ;;  %6419 = vmatprep.subr.bf16.mxu0 %v15045_v55 }
 0x2be   :  { %4592 = vmatprep.subr.bf16.mxu1 %v15042_v54 }
 0x2c0   :  { %6420 = vmatpush1.bf16.msra.mxu0 %v15043_v58 }
 0x2c1   :  { %4593 = vmatpush1.bf16.msra.mxu1 %v15040_v57  ;;  %6421 = vmatprep.subr.bf16.mxu0 %v15051_v60  ;;  %v15108_v57 = vld [vmem:[#allocation2 + $0x132c] ss:$24 sps:$4 sm:$0xff]   ;;  %v15106_v60 = vld [vmem:[#allocation2 + $0x1328] ss:$24 sps:$4 sm:$0xff]  }
 0x2c2   :  { %4594 = vmatprep.subr.bf16.mxu1 %v15048_v59  ;;  %v2347_v2 = vpop.f32.mrb[4].mxu0  ;;  %v15111_v59 = vld [vmem:[#allocation2 + $0x14d4] ss:$24 sps:$4 sm:$0xff]  }
 0x2c3   :  { %v16882_v3 = vadd.f32 %v16859_v46, %v2347_v2  ;;  %v2349_v4 = vpop.f32.mrb[5].mxu0  ;;  %v15066_v46 = vld [vmem:[#allocation2 + $0x1214] ss:$24 sps:$4 sm:$0xff]   ;;  %v15115_v2 = vld [vmem:[#allocation2 + $0x1500] ss:$24 sps:$4 sm:$0xff]  }
 0x2c4   :  { %v16885_v6 = vadd.f32 %v16861_v50, %v2349_v4  ;;  %6422 = vmatpush1.bf16.msra.mxu0 %v15049_v62  ;;  %v2351_v7 = vpop.f32.mrb[6].mxu0  ;;  %v15067_v50 = vld [vmem:[#allocation2 + $0x1350] ss:$24 sps:$4 sm:$0xff]   ;;  %v15114_v62 = vld [vmem:[#allocation2 + $0x135c] ss:$24 sps:$4 sm:$0xff]  }
 0x2c5   :  { %4595 = vmatpush1.bf16.msra.mxu1 %v15046_v61  ;;  %v2352_v11 = vpop.f32.mrb[7].mxu0  ;;  %6423 = vmatprep.subr.bf16.mxu0 %v15057_v1  ;;  %v15109_v61 = vld [vmem:[#allocation2 + $0x14d0] ss:$24 sps:$4 sm:$0xff]   ;;  %v15120_v4 = vld [vmem:[#allocation2 + $0x138c] ss:$24 sps:$4 sm:$0xff]  }
 0x2c6   :  { %4596 = vmatprep.subr.bf16.mxu1 %v15054_v63  ;;  %v15117_v63 = vld [vmem:[#allocation2 + $0x1504] ss:$24 sps:$4 sm:$0xff]   ;;  %v15112_v1 = vld [vmem:[#allocation2 + $0x1358] ss:$24 sps:$4 sm:$0xff]   ;;  %v15118_v7 = vld [vmem:[#allocation2 + $0x1388] ss:$24 sps:$4 sm:$0xff]  }
 0x2c7   :  { %v15129_v11 = vld [vmem:[#allocation2 + $0x1564] ss:$24 sps:$4 sm:$0xff]  }
 0x2c8   :  { %6424 = vmatpush1.bf16.msra.mxu0 %v15055_v9  ;;  %v15121_v9 = vld [vmem:[#allocation2 + $0x1530] ss:$24 sps:$4 sm:$0xff]  }
 0x2c9   :  { %4597 = vmatpush1.bf16.msra.mxu1 %v15052_v5  ;;  %6425 = vmatprep.subr.bf16.mxu0 %v15063_v12  ;;  %v15123_v5 = vld [vmem:[#allocation2 + $0x1534] ss:$24 sps:$4 sm:$0xff]   ;;  %v15124_v12 = vld [vmem:[#allocation2 + $0x13b8] ss:$24 sps:$4 sm:$0xff]  }
 0x2ca   :  { %4598 = vmatprep.subr.bf16.mxu1 %v15060_v10  ;;  %v15126_v10 = vld [vmem:[#allocation2 + $0x13bc] ss:$24 sps:$4 sm:$0xff]  }
 0x2cc   :  { %6426 = vmatpush1.bf16.msra.mxu0 %v15061_v16  ;;  %v15132_v16 = vld [vmem:[#allocation2 + $0x13ec] ss:$24 sps:$4 sm:$0xff]  }
 0x2cd   :  { %4599 = vmatpush1.bf16.msra.mxu1 %v15058_v13  ;;  %6427 = vmatprep.subr.bf16.mxu0 %v15069_v17  ;;  %v15127_v13 = vld [vmem:[#allocation2 + $0x1560] ss:$24 sps:$4 sm:$0xff]  }
 0x2ce   :  { %4600 = vmatprep.subr.bf16.mxu1 %v15066_v46  ;;  %v15135_v46 = vld [vmem:[#allocation2 + $0x1594] ss:$24 sps:$4 sm:$0xff]   ;;  %v15130_v17 = vld [vmem:[#allocation2 + $0x13e8] ss:$24 sps:$4 sm:$0xff]  }
 0x2d0   :  { %6428 = vmatpush1.bf16.msra.mxu0 %v15067_v50  ;;  %v15138_v50 = vld [vmem:[#allocation2 + $0x141c] ss:$24 sps:$4 sm:$0xff]  }
 0x2d1   :  { %4601 = vmatpush1.bf16.msra.mxu1 %v15064_v21  ;;  %6429 = vmatprep.subr.bf16.mxu0 %v15072_v22  ;;  %v15133_v21 = vld [vmem:[#allocation2 + $0x1590] ss:$24 sps:$4 sm:$0xff]   ;;  %v15141_v22 = vld [vmem:[#allocation2 + $0x15c4] ss:$24 sps:$4 sm:$0xff]  }
 0x2d2   :  { %4611 = vmatprep.subr.bf16.mxu1 %v15078_v24  ;;  %v15136_v24 = vld [vmem:[#allocation2 + $0x1418] ss:$24 sps:$4 sm:$0xff]  }
 0x2d4   :  { %4603 = vmatmul.mubr.bf16.vlgmr.msra.gmra.mrb[16].mxu1 %v16815_v23  ;;  %6430 = vmatpush1.bf16.msra.mxu0 %v15070_v25  ;;  %v15139_v25 = vld [vmem:[#allocation2 + $0x15c0] ss:$24 sps:$4 sm:$0xff]  }
 0x2d5   :  { %4612 = vmatpush1.bf16.msra.mxu1 %v15076_v27  ;;  %6431 = vmatprep.subr.bf16.mxu0 %v15075_v26  ;;  %v15144_v26 = vld [vmem:[#allocation2 + $0x144c] ss:$24 sps:$4 sm:$0xff]  }
 0x2d6   :  { %4643 = vmatprep.mubr.bf16.mxu1 %v16644_v0  ;;  %6581 = vmatprep.subr.bf16.mxu1 %v15084_v47  ;;  %v15147_v27 = vld [vmem:[#allocation2 + $0x15f4] ss:$24 sps:$4 sm:$0xff]   ;;  %v15142_v47 = vld [vmem:[#allocation2 + $0x1448] ss:$24 sps:$4 sm:$0xff]  }
 0x2d8   :  { %6432 = vmatpush1.bf16.msra.mxu0 %v15073_v49  ;;  %v15145_v49 = vld [vmem:[#allocation2 + $0x15f0] ss:$24 sps:$4 sm:$0xff]  }
 0x2d9   :  { %6433 = vmatprep.subr.bf16.mxu0 %v15081_v28  ;;  %v15150_v28 = vld [vmem:[#allocation2 + $0x147c] ss:$24 sps:$4 sm:$0xff]  }
 0x2dc   :  { %6434 = vmatpush1.bf16.msra.mxu0 %v15079_v29  ;;  %v15153_v29 = vld [vmem:[#allocation2 + $0x1624] ss:$24 sps:$4 sm:$0xff]  }
 0x2dd   :  { %6435 = vmatprep.subr.bf16.mxu0 %v15087_v30  ;;  %v15148_v30 = vld [vmem:[#allocation2 + $0x1478] ss:$24 sps:$4 sm:$0xff]  }
 0x2e0   :  { %12725 = vmatmul.mubr.msk.bf16.vlgmr.msra.gmra.mrb[16].mxu1 %vm1899_vm0, %v16876_v56  ;;  %6436 = vmatpush1.bf16.msra.mxu0 %v15085_v18  ;;  %v15103_v56 = vld [vmem:[#allocation2 + $0x14a0] ss:$24 sps:$4 sm:$0xff]   ;;  %v15156_v18 = vld [vmem:[#allocation2 + $0x14ac] ss:$24 sps:$4 sm:$0xff]  }
 0x2e1   :  { %6582 = vmatpush1.bf16.msra.mxu1 %v15082_v31  ;;  %6437 = vmatprep.subr.bf16.mxu0 %v15093_v36  ;;  %v15151_v31 = vld [vmem:[#allocation2 + $0x1620] ss:$24 sps:$4 sm:$0xff]  }
 0x2e2   :  { %6583 = vmatprep.subr.bf16.mxu1 %v15090_v33  ;;  %6613 = vmatprep.mubr.bf16.mxu1 %v16777_v52  ;;  %v15159_v33 = vld [vmem:[#allocation2 + $0x1654] ss:$24 sps:$4 sm:$0xff]   ;;  %v15154_v36 = vld [vmem:[#allocation2 + $0x14a8] ss:$24 sps:$4 sm:$0xff]  }
 0x2e4   :  { %6438 = vmatpush1.bf16.msra.mxu0 %v15091_v38  ;;  %v15162_v38 = vld [vmem:[#allocation2 + $0x14dc] ss:$24 sps:$4 sm:$0xff]  }
 0x2e5   :  { %6584 = vmatpush1.bf16.msra.mxu1 %v15088_v37  ;;  %6439 = vmatprep.subr.bf16.mxu0 %v15099_v40  ;;  %v15157_v37 = vld [vmem:[#allocation2 + $0x1650] ss:$24 sps:$4 sm:$0xff]  }
 0x2e6   :  { %6585 = vmatprep.subr.bf16.mxu1 %v15096_v39  ;;  %v15165_v39 = vld [vmem:[#allocation2 + $0x1684] ss:$24 sps:$4 sm:$0xff]   ;;  %v15160_v40 = vld [vmem:[#allocation2 + $0x14d8] ss:$24 sps:$4 sm:$0xff]  }
 0x2e7   :  { %v16892_v45 = vpop.f32.mrb[12].mxu1 }
 0x2e8   :  { %v9166_v48 = vmax.f32 %v16843_v14, %v16892_v45  ;;  %v16896_v51 = vpop.f32.mrb[13].mxu1  ;;  %6440 = vmatpush1.bf16.msra.mxu0 %v15097_v42  ;;  %v15168_v42 = vld [vmem:[#allocation2 + $0x150c] ss:$24 sps:$4 sm:$0xff]   ;;  %v15988_v14 = vld [vmem:[%s18206_s3 + $0x310] ss:$8 sps:$4 sm:$0xff]  }
 0x2e9   :  { %6586 = vmatpush1.bf16.msra.mxu1 %v15094_v41  ;;  %v9167_v54 = vmax.f32 %v16846_v20, %v16896_v51  ;;  %v4321_v55 = vpop.f32.mrb[14].mxu1  ;;  %6441 = vmatprep.subr.bf16.mxu0 %v15105_v44  ;;  %v15163_v41 = vld [vmem:[#allocation2 + $0x1680] ss:$24 sps:$4 sm:$0xff]   ;;  %v15996_v20 = vld [vmem:[%s18206_s3 + $0x324] ss:$8 sps:$4 sm:$0xff]  }
 0x2ea   :  { %v4322_v58 = vpop.f32.mrb[15].mxu1  ;;  %6587 = vmatprep.subr.bf16.mxu1 %v15102_v43  ;;  %v15171_v43 = vld [vmem:[#allocation2 + $0x16b4] ss:$24 sps:$4 sm:$0xff]   ;;  %v15166_v44 = vld [vmem:[#allocation2 + $0x1508] ss:$24 sps:$4 sm:$0xff]  }
 0x2eb   :  { %v15174_v55 = vld [vmem:[#allocation2 + $0x153c] ss:$24 sps:$4 sm:$0xff]   ;;  %v15175_v58 = vld [vmem:[#allocation2 + $0x16e0] ss:$24 sps:$4 sm:$0xff]   ;;  %v15999_v51 = vld [vmem:[%s18206_s3 + $0xe4] ss:$8 sps:$4 sm:$0xff]  }
 0x2ec   :  { %6442 = vmatpush1.bf16.msra.mxu0 %v15103_v56  ;;  %v15177_v56 = vld [vmem:[#allocation2 + $0x16e4] ss:$24 sps:$4 sm:$0xff]   ;;  %v15991_v45 = vld [vmem:[%s18206_s3 + $0xd0] ss:$8 sps:$4 sm:$0xff]  }
 0x2ed   :  { %6588 = vmatpush1.bf16.msra.mxu1 %v15100_v53  ;;  %6443 = vmatprep.subr.bf16.mxu0 %v15111_v59  ;;  %v15169_v53 = vld [vmem:[#allocation2 + $0x16b0] ss:$24 sps:$4 sm:$0xff]   ;;  %v15180_v59 = vld [vmem:[#allocation2 + $0x156c] ss:$24 sps:$4 sm:$0xff]  }
 0x2ee   :  { %6589 = vmatprep.subr.bf16.mxu1 %v15108_v57  ;;  %v15172_v57 = vld [vmem:[#allocation2 + $0x1538] ss:$24 sps:$4 sm:$0xff]  }
 0x2f0   :  { %6444 = vmatpush1.bf16.msra.mxu0 %v15109_v61  ;;  %v15178_v61 = vld [vmem:[#allocation2 + $0x1568] ss:$24 sps:$4 sm:$0xff]  }
 0x2f1   :  { %6590 = vmatpush1.bf16.msra.mxu1 %v15106_v60  ;;  %6445 = vmatprep.subr.bf16.mxu0 %v15117_v63  ;;  %v15183_v60 = vld [vmem:[#allocation2 + $0x1714] ss:$24 sps:$4 sm:$0xff]  }
 0x2f2   :  { %6591 = vmatprep.subr.bf16.mxu1 %v15114_v62  ;;  %v15181_v62 = vld [vmem:[#allocation2 + $0x1710] ss:$24 sps:$4 sm:$0xff]   ;;  %v15186_v63 = vld [vmem:[#allocation2 + $0x159c] ss:$24 sps:$4 sm:$0xff]  }
 0x2f4   :  { %6446 = vmatpush1.bf16.msra.mxu0 %v15115_v2  ;;  %v15184_v2 = vld [vmem:[#allocation2 + $0x1598] ss:$24 sps:$4 sm:$0xff]  }
 0x2f5   :  { %6592 = vmatpush1.bf16.msra.mxu1 %v15112_v1  ;;  %6447 = vmatprep.subr.bf16.mxu0 %v15123_v5  ;;  %v15189_v1 = vld [vmem:[#allocation2 + $0x1744] ss:$24 sps:$4 sm:$0xff]  }
 0x2f6   :  { %6593 = vmatprep.subr.bf16.mxu1 %v15120_v4  ;;  %v15187_v4 = vld [vmem:[#allocation2 + $0x1740] ss:$24 sps:$4 sm:$0xff]   ;;  %v15192_v5 = vld [vmem:[#allocation2 + $0x15cc] ss:$24 sps:$4 sm:$0xff]  }
 0x2f8   :  { %6448 = vmatpush1.bf16.msra.mxu0 %v15121_v9  ;;  %v15190_v9 = vld [vmem:[#allocation2 + $0x15c8] ss:$24 sps:$4 sm:$0xff]  }
 0x2f9   :  { %6594 = vmatpush1.bf16.msra.mxu1 %v15118_v7  ;;  %6458 = vmatprep.subr.bf16.mxu0 %v15129_v11  ;;  %v15195_v7 = vld [vmem:[#allocation2 + $0x1774] ss:$24 sps:$4 sm:$0xff]  }
 0x2fa   :  { %6595 = vmatprep.subr.bf16.mxu1 %v15126_v10  ;;  %v15193_v10 = vld [vmem:[#allocation2 + $0x1770] ss:$24 sps:$4 sm:$0xff]   ;;  %v15198_v11 = vld [vmem:[#allocation2 + $0x15fc] ss:$24 sps:$4 sm:$0xff]  }
 0x2fb   :  { %6450 = vmatmul.mubr.bf16.vlgmr.msra.gmra.mrb[12].mxu0 %v16781_v8 }
 0x2fc   :  { %6459 = vmatpush1.bf16.msra.mxu0 %v15127_v13  ;;  %6490 = vmatprep.mubr.bf16.mxu0 %v16792_v35  ;;  %v15196_v13 = vld [vmem:[#allocation2 + $0x15f8] ss:$24 sps:$4 sm:$0xff]  }
 0x2fd   :  { %6596 = vmatpush1.bf16.msra.mxu1 %v15124_v12  ;;  %6460 = vmatprep.subr.bf16.mxu0 %v15135_v46  ;;  %v15201_v12 = vld [vmem:[#allocation2 + $0x17a4] ss:$24 sps:$4 sm:$0xff]  }
 0x2fe   :  { %6597 = vmatprep.subr.bf16.mxu1 %v15132_v16  ;;  %v15199_v16 = vld [vmem:[#allocation2 + $0x17a0] ss:$24 sps:$4 sm:$0xff]   ;;  %v15204_v46 = vld [vmem:[#allocation2 + $0x162c] ss:$24 sps:$4 sm:$0xff]  }
 0x300   :  { %6461 = vmatpush1.bf16.msra.mxu0 %v15133_v21  ;;  %v15202_v21 = vld [vmem:[#allocation2 + $0x1628] ss:$24 sps:$4 sm:$0xff]  }
 0x301   :  { %6598 = vmatpush1.bf16.msra.mxu1 %v15130_v17  ;;  %6462 = vmatprep.subr.bf16.mxu0 %v15141_v22  ;;  %v15207_v17 = vld [vmem:[#allocation2 + $0x17d4] ss:$24 sps:$4 sm:$0xff]  }
 0x302   :  { %6599 = vmatprep.subr.bf16.mxu1 %v15138_v50  ;;  %v15205_v50 = vld [vmem:[#allocation2 + $0x17d0] ss:$24 sps:$4 sm:$0xff]   ;;  %v15210_v22 = vld [vmem:[#allocation2 + $0x165c] ss:$24 sps:$4 sm:$0xff]  }
 0x304   :  { %6463 = vmatpush1.bf16.msra.mxu0 %v15139_v25  ;;  %v15208_v25 = vld [vmem:[#allocation2 + $0x1658] ss:$24 sps:$4 sm:$0xff]  }
 0x305   :  { %6600 = vmatpush1.bf16.msra.mxu1 %v15136_v24  ;;  %6464 = vmatprep.subr.bf16.mxu0 %v15147_v27  ;;  %v15213_v24 = vld [vmem:[#allocation2 + $0x1804] ss:$24 sps:$4 sm:$0xff]  }
 0x306   :  { %6601 = vmatprep.subr.bf16.mxu1 %v15144_v26  ;;  %v15211_v26 = vld [vmem:[#allocation2 + $0x1800] ss:$24 sps:$4 sm:$0xff]   ;;  %v15216_v27 = vld [vmem:[#allocation2 + $0x168c] ss:$24 sps:$4 sm:$0xff]  }
 0x308   :  { %6465 = vmatpush1.bf16.msra.mxu0 %v15145_v49  ;;  %v15214_v49 = vld [vmem:[#allocation2 + $0x1688] ss:$24 sps:$4 sm:$0xff]  }
 0x309   :  { %6602 = vmatpush1.bf16.msra.mxu1 %v15142_v47  ;;  %6466 = vmatprep.subr.bf16.mxu0 %v15153_v29  ;;  %v15219_v47 = vld [vmem:[#allocation2 + $0x1834] ss:$24 sps:$4 sm:$0xff]  }
 0x30a   :  { %6603 = vmatprep.subr.bf16.mxu1 %v15150_v28  ;;  %v15217_v28 = vld [vmem:[#allocation2 + $0x1830] ss:$24 sps:$4 sm:$0xff]   ;;  %v15222_v29 = vld [vmem:[#allocation2 + $0x16bc] ss:$24 sps:$4 sm:$0xff]  }
 0x30c   :  { %6467 = vmatpush1.bf16.msra.mxu0 %v15151_v31  ;;  %v15220_v31 = vld [vmem:[#allocation2 + $0x16b8] ss:$24 sps:$4 sm:$0xff]  }
 0x30d   :  { %6604 = vmatpush1.bf16.msra.mxu1 %v15148_v30  ;;  %6468 = vmatprep.subr.bf16.mxu0 %v15159_v33  ;;  %v15225_v30 = vld [vmem:[#allocation2 + $0x1864] ss:$24 sps:$4 sm:$0xff]  }
 0x30e   :  { %6605 = vmatprep.subr.bf16.mxu1 %v15156_v18  ;;  %v15223_v18 = vld [vmem:[#allocation2 + $0x1860] ss:$24 sps:$4 sm:$0xff]   ;;  %v15228_v33 = vld [vmem:[#allocation2 + $0x16ec] ss:$24 sps:$4 sm:$0xff]  }
 0x310   :  { %6469 = vmatpush1.bf16.msra.mxu0 %v15157_v37  ;;  %v15226_v37 = vld [vmem:[#allocation2 + $0x16e8] ss:$24 sps:$4 sm:$0xff]  }
 0x311   :  { %6606 = vmatpush1.bf16.msra.mxu1 %v15154_v36  ;;  %6470 = vmatprep.subr.bf16.mxu0 %v15165_v39  ;;  %v15231_v36 = vld [vmem:[#allocation2 + $0x1894] ss:$24 sps:$4 sm:$0xff]  }
 0x312   :  { %6607 = vmatprep.subr.bf16.mxu1 %v15162_v38  ;;  %v15229_v38 = vld [vmem:[#allocation2 + $0x1890] ss:$24 sps:$4 sm:$0xff]   ;;  %v15234_v39 = vld [vmem:[#allocation2 + $0x171c] ss:$24 sps:$4 sm:$0xff]  }
 0x314   :  { %6471 = vmatpush1.bf16.msra.mxu0 %v15163_v41  ;;  %v15232_v41 = vld [vmem:[#allocation2 + $0x1718] ss:$24 sps:$4 sm:$0xff]  }
 0x315   :  { %6608 = vmatpush1.bf16.msra.mxu1 %v15160_v40  ;;  %6472 = vmatprep.subr.bf16.mxu0 %v15171_v43  ;;  %v15237_v40 = vld [vmem:[#allocation2 + $0x18c4] ss:$24 sps:$4 sm:$0xff]  }
 0x316   :  { %6609 = vmatprep.subr.bf16.mxu1 %v15168_v42  ;;  %v15235_v42 = vld [vmem:[#allocation2 + $0x18c0] ss:$24 sps:$4 sm:$0xff]   ;;  %v15240_v43 = vld [vmem:[#allocation2 + $0x174c] ss:$24 sps:$4 sm:$0xff]  }
 0x318   :  { %6473 = vmatpush1.bf16.msra.mxu0 %v15169_v53  ;;  %v15238_v53 = vld [vmem:[#allocation2 + $0x1748] ss:$24 sps:$4 sm:$0xff]  }
 0x319   :  { %6610 = vmatpush1.bf16.msra.mxu1 %v15166_v44  ;;  %6474 = vmatprep.subr.bf16.mxu0 %v15177_v56  ;;  %v15243_v44 = vld [vmem:[#allocation2 + $0x18f4] ss:$24 sps:$4 sm:$0xff]  }
 0x31a   :  { %6611 = vmatprep.subr.bf16.mxu1 %v15174_v55  ;;  %v15241_v55 = vld [vmem:[#allocation2 + $0x18f0] ss:$24 sps:$4 sm:$0xff]   ;;  %v15246_v56 = vld [vmem:[#allocation2 + $0x177c] ss:$24 sps:$4 sm:$0xff]  }
 0x31c   :  { %6475 = vmatpush1.bf16.msra.mxu0 %v15175_v58  ;;  %v15244_v58 = vld [vmem:[#allocation2 + $0x1778] ss:$24 sps:$4 sm:$0xff]  }
 0x31d   :  { %6612 = vmatpush1.bf16.msra.mxu1 %v15172_v57  ;;  %6476 = vmatprep.subr.bf16.mxu0 %v15183_v60  ;;  %v15249_v57 = vld [vmem:[#allocation2 + $0x1924] ss:$24 sps:$4 sm:$0xff]  }
 0x31e   :  { %6622 = vmatprep.subr.bf16.mxu1 %v15180_v59  ;;  %v15247_v59 = vld [vmem:[#allocation2 + $0x1920] ss:$24 sps:$4 sm:$0xff]   ;;  %v15252_v60 = vld [vmem:[#allocation2 + $0x17ac] ss:$24 sps:$4 sm:$0xff]  }
 0x320   :  { %6614 = vmatmul.mubr.bf16.vlgmr.msra.gmra.mrb[20].mxu1 %v16781_v8  ;;  %6477 = vmatpush1.bf16.msra.mxu0 %v15181_v62  ;;  %v15250_v62 = vld [vmem:[#allocation2 + $0x17a8] ss:$24 sps:$4 sm:$0xff]  }
 0x321   :  { %6623 = vmatpush1.bf16.msra.mxu1 %v15178_v61  ;;  %6478 = vmatprep.subr.bf16.mxu0 %v15189_v1  ;;  %v15255_v61 = vld [vmem:[#allocation2 + $0x1954] ss:$24 sps:$4 sm:$0xff]  }
 0x322   :  { %6624 = vmatprep.subr.bf16.mxu1 %v15186_v63  ;;  %6654 = vmatprep.mubr.bf16.mxu1 %v16792_v35  ;;  %v15253_v63 = vld [vmem:[#allocation2 + $0x1950] ss:$24 sps:$4 sm:$0xff]   ;;  %v15258_v1 = vld [vmem:[#allocation2 + $0x17dc] ss:$24 sps:$4 sm:$0xff]  }
 0x324   :  { %6479 = vmatpush1.bf16.msra.mxu0 %v15187_v4  ;;  %v15256_v4 = vld [vmem:[#allocation2 + $0x17d8] ss:$24 sps:$4 sm:$0xff]  }
 0x325   :  { %6625 = vmatpush1.bf16.msra.mxu1 %v15184_v2  ;;  %6480 = vmatprep.subr.bf16.mxu0 %v15195_v7  ;;  %v15261_v2 = vld [vmem:[#allocation2 + $0x1984] ss:$24 sps:$4 sm:$0xff]  }
 0x326   :  { %6626 = vmatprep.subr.bf16.mxu1 %v15192_v5  ;;  %v15259_v5 = vld [vmem:[#allocation2 + $0x1980] ss:$24 sps:$4 sm:$0xff]   ;;  %v15264_v7 = vld [vmem:[#allocation2 + $0x180c] ss:$24 sps:$4 sm:$0xff]  }
 0x328   :  { %6481 = vmatpush1.bf16.msra.mxu0 %v15193_v10  ;;  %v15262_v10 = vld [vmem:[#allocation2 + $0x1808] ss:$24 sps:$4 sm:$0xff]  }
 0x329   :  { %6627 = vmatpush1.bf16.msra.mxu1 %v15190_v9  ;;  %6482 = vmatprep.subr.bf16.mxu0 %v15201_v12  ;;  %v15267_v9 = vld [vmem:[#allocation2 + $0x19b4] ss:$24 sps:$4 sm:$0xff]  }
 0x32a   :  { %6628 = vmatprep.subr.bf16.mxu1 %v15198_v11  ;;  %v15265_v11 = vld [vmem:[#allocation2 + $0x19b0] ss:$24 sps:$4 sm:$0xff]   ;;  %v15270_v12 = vld [vmem:[#allocation2 + $0x183c] ss:$24 sps:$4 sm:$0xff]  }
 0x32c   :  { %6483 = vmatpush1.bf16.msra.mxu0 %v15199_v16  ;;  %v15268_v16 = vld [vmem:[#allocation2 + $0x1838] ss:$24 sps:$4 sm:$0xff]  }
 0x32d   :  { %6629 = vmatpush1.bf16.msra.mxu1 %v15196_v13  ;;  %6484 = vmatprep.subr.bf16.mxu0 %v15207_v17  ;;  %v15273_v13 = vld [vmem:[#allocation2 + $0x19e4] ss:$24 sps:$4 sm:$0xff]  }
 0x32e   :  { %6630 = vmatprep.subr.bf16.mxu1 %v15204_v46  ;;  %v15271_v46 = vld [vmem:[#allocation2 + $0x19e0] ss:$24 sps:$4 sm:$0xff]   ;;  %v15276_v17 = vld [vmem:[#allocation2 + $0x186c] ss:$24 sps:$4 sm:$0xff]  }
 0x330   :  { %6485 = vmatpush1.bf16.msra.mxu0 %v15205_v50  ;;  %v15274_v50 = vld [vmem:[#allocation2 + $0x1868] ss:$24 sps:$4 sm:$0xff]  }
 0x331   :  { %6631 = vmatpush1.bf16.msra.mxu1 %v15202_v21  ;;  %6486 = vmatprep.subr.bf16.mxu0 %v15213_v24  ;;  %v15279_v21 = vld [vmem:[#allocation2 + $0x1a14] ss:$24 sps:$4 sm:$0xff]  }
 0x332   :  { %6632 = vmatprep.subr.bf16.mxu1 %v15210_v22  ;;  %v15277_v22 = vld [vmem:[#allocation2 + $0x1a10] ss:$24 sps:$4 sm:$0xff]   ;;  %v15282_v24 = vld [vmem:[#allocation2 + $0x189c] ss:$24 sps:$4 sm:$0xff]  }
 0x334   :  { %6487 = vmatpush1.bf16.msra.mxu0 %v15211_v26  ;;  %v15280_v26 = vld [vmem:[#allocation2 + $0x1898] ss:$24 sps:$4 sm:$0xff]  }
 0x335   :  { %6633 = vmatpush1.bf16.msra.mxu1 %v15208_v25  ;;  %6488 = vmatprep.subr.bf16.mxu0 %v15219_v47  ;;  %v15285_v25 = vld [vmem:[#allocation2 + $0x1a44] ss:$24 sps:$4 sm:$0xff]  }
 0x336   :  { %6634 = vmatprep.subr.bf16.mxu1 %v15216_v27  ;;  %v15283_v27 = vld [vmem:[#allocation2 + $0x1a40] ss:$24 sps:$4 sm:$0xff]   ;;  %v15288_v47 = vld [vmem:[#allocation2 + $0x18cc] ss:$24 sps:$4 sm:$0xff]  }
 0x338   :  { %6489 = vmatpush1.bf16.msra.mxu0 %v15217_v28  ;;  %v15286_v28 = vld [vmem:[#allocation2 + $0x18c8] ss:$24 sps:$4 sm:$0xff]  }
 0x339   :  { %6635 = vmatpush1.bf16.msra.mxu1 %v15214_v49  ;;  %6499 = vmatprep.subr.bf16.mxu0 %v15225_v30  ;;  %v15291_v49 = vld [vmem:[#allocation2 + $0x1a74] ss:$24 sps:$4 sm:$0xff]  }
 0x33a   :  { %6636 = vmatprep.subr.bf16.mxu1 %v15222_v29  ;;  %v15289_v29 = vld [vmem:[#allocation2 + $0x1a70] ss:$24 sps:$4 sm:$0xff]   ;;  %v15294_v30 = vld [vmem:[#allocation2 + $0x18fc] ss:$24 sps:$4 sm:$0xff]  }
 0x33b   :  { %6491 = vmatmul.mubr.bf16.vlgmr.msra.gmra.mrb[12].mxu0 %v16798_v15 }
 0x33c   :  { %6500 = vmatpush1.bf16.msra.mxu0 %v15223_v18  ;;  %6531 = vmatprep.mubr.bf16.mxu0 %v16807_v19  ;;  %v15292_v18 = vld [vmem:[#allocation2 + $0x18f8] ss:$24 sps:$4 sm:$0xff]  }
 0x33d   :  { %6637 = vmatpush1.bf16.msra.mxu1 %v15220_v31  ;;  %6501 = vmatprep.subr.bf16.mxu0 %v15231_v36  ;;  %v15297_v31 = vld [vmem:[#allocation2 + $0x1aa4] ss:$24 sps:$4 sm:$0xff]  }
 0x33e   :  { %6638 = vmatprep.subr.bf16.mxu1 %v15228_v33  ;;  %v15295_v33 = vld [vmem:[#allocation2 + $0x1aa0] ss:$24 sps:$4 sm:$0xff]   ;;  %v15300_v36 = vld [vmem:[#allocation2 + $0x192c] ss:$24 sps:$4 sm:$0xff]  }
 0x340   :  { %6502 = vmatpush1.bf16.msra.mxu0 %v15229_v38  ;;  %v15298_v38 = vld [vmem:[#allocation2 + $0x1928] ss:$24 sps:$4 sm:$0xff]  }
 0x341   :  { %6639 = vmatpush1.bf16.msra.mxu1 %v15226_v37  ;;  %6503 = vmatprep.subr.bf16.mxu0 %v15237_v40  ;;  %v15303_v37 = vld [vmem:[#allocation2 + $0x1ad4] ss:$24 sps:$4 sm:$0xff]  }
 0x342   :  { %6640 = vmatprep.subr.bf16.mxu1 %v15234_v39  ;;  %v15301_v39 = vld [vmem:[#allocation2 + $0x1ad0] ss:$24 sps:$4 sm:$0xff]   ;;  %v15306_v40 = vld [vmem:[#allocation2 + $0x195c] ss:$24 sps:$4 sm:$0xff]  }
 0x344   :  { %6504 = vmatpush1.bf16.msra.mxu0 %v15235_v42  ;;  %v15304_v42 = vld [vmem:[#allocation2 + $0x1958] ss:$24 sps:$4 sm:$0xff]  }
 0x345   :  { %6641 = vmatpush1.bf16.msra.mxu1 %v15232_v41  ;;  %6505 = vmatprep.subr.bf16.mxu0 %v15243_v44  ;;  %v15309_v41 = vld [vmem:[#allocation2 + $0x1b04] ss:$24 sps:$4 sm:$0xff]  }
 0x346   :  { %6642 = vmatprep.subr.bf16.mxu1 %v15240_v43  ;;  %v15307_v43 = vld [vmem:[#allocation2 + $0x1b00] ss:$24 sps:$4 sm:$0xff]   ;;  %v15312_v44 = vld [vmem:[#allocation2 + $0x198c] ss:$24 sps:$4 sm:$0xff]  }
 0x348   :  { %6506 = vmatpush1.bf16.msra.mxu0 %v15241_v55  ;;  %v15310_v55 = vld [vmem:[#allocation2 + $0x1988] ss:$24 sps:$4 sm:$0xff]  }
 0x349   :  { %6643 = vmatpush1.bf16.msra.mxu1 %v15238_v53  ;;  %6507 = vmatprep.subr.bf16.mxu0 %v15249_v57  ;;  %v15315_v53 = vld [vmem:[#allocation2 + $0x1b34] ss:$24 sps:$4 sm:$0xff]  }
 0x34a   :  { %6644 = vmatprep.subr.bf16.mxu1 %v15246_v56  ;;  %v15313_v56 = vld [vmem:[#allocation2 + $0x1b30] ss:$24 sps:$4 sm:$0xff]   ;;  %v15318_v57 = vld [vmem:[#allocation2 + $0x19bc] ss:$24 sps:$4 sm:$0xff]  }
 0x34c   :  { %6508 = vmatpush1.bf16.msra.mxu0 %v15247_v59  ;;  %v15316_v59 = vld [vmem:[#allocation2 + $0x19b8] ss:$24 sps:$4 sm:$0xff]  }
 0x34d   :  { %6645 = vmatpush1.bf16.msra.mxu1 %v15244_v58  ;;  %6509 = vmatprep.subr.bf16.mxu0 %v15255_v61  ;;  %v15321_v58 = vld [vmem:[#allocation2 + $0x1b64] ss:$24 sps:$4 sm:$0xff]  }
 0x34e   :  { %6646 = vmatprep.subr.bf16.mxu1 %v15252_v60  ;;  %v15319_v60 = vld [vmem:[#allocation2 + $0x1b60] ss:$24 sps:$4 sm:$0xff]   ;;  %v15324_v61 = vld [vmem:[#allocation2 + $0x19ec] ss:$24 sps:$4 sm:$0xff]  }
 0x350   :  { %6510 = vmatpush1.bf16.msra.mxu0 %v15253_v63  ;;  %v15322_v63 = vld [vmem:[#allocation2 + $0x19e8] ss:$24 sps:$4 sm:$0xff]  }
 0x351   :  { %6647 = vmatpush1.bf16.msra.mxu1 %v15250_v62  ;;  %6511 = vmatprep.subr.bf16.mxu0 %v15261_v2  ;;  %v15333_v62 = vld [vmem:[#allocation2 + $0x1274] ss:$24 sps:$4 sm:$0xff]   ;;  %v15325_v2 = vld [vmem:[#allocation2 + $0x1a18] ss:$24 sps:$4 sm:$0xff]  }
 0x352   :  { %6648 = vmatprep.subr.bf16.mxu1 %v15258_v1  ;;  %v15327_v1 = vld [vmem:[#allocation2 + $0x1a1c] ss:$24 sps:$4 sm:$0xff]  }
 0x354   :  { %6512 = vmatpush1.bf16.msra.mxu0 %v15259_v5  ;;  %v15328_v5 = vld [vmem:[#allocation2 + $0x1a48] ss:$24 sps:$4 sm:$0xff]  }
 0x355   :  { %6649 = vmatpush1.bf16.msra.mxu1 %v15256_v4  ;;  %6513 = vmatprep.subr.bf16.mxu0 %v15267_v9  ;;  %v15330_v4 = vld [vmem:[#allocation2 + $0x1a4c] ss:$24 sps:$4 sm:$0xff]   ;;  %v15336_v9 = vld [vmem:[#allocation2 + $0x1a7c] ss:$24 sps:$4 sm:$0xff]  }
 0x356   :  { %6650 = vmatprep.subr.bf16.mxu1 %v15264_v7  ;;  %v15331_v7 = vld [vmem:[#allocation2 + $0x1270] ss:$24 sps:$4 sm:$0xff]  }
 0x358   :  { %6514 = vmatpush1.bf16.msra.mxu0 %v15265_v11  ;;  %v16913_v11 = vld [vmem:[%s18203_s0 + $0x18] ss:$0 sps:$4 sm:$0xff]  }
 0x359   :  { %6651 = vmatpush1.bf16.msra.mxu1 %v15262_v10  ;;  %6515 = vmatprep.subr.bf16.mxu0 %v15273_v13  ;;  %v15339_v10 = vld [vmem:[#allocation2 + $0x12a4] ss:$24 sps:$4 sm:$0xff]   ;;  %v15337_v13 = vld [vmem:[#allocation2 + $0x12a0] ss:$24 sps:$4 sm:$0xff]  }
 0x35a   :  { %6652 = vmatprep.subr.bf16.mxu1 %v15270_v12  ;;  %v15334_v12 = vld [vmem:[#allocation2 + $0x1a78] ss:$24 sps:$4 sm:$0xff]  }
 0x35c   :  { %6516 = vmatpush1.bf16.msra.mxu0 %v15271_v46  ;;  %v15345_v46 = vld [vmem:[#allocation2 + $0x12d4] ss:$24 sps:$4 sm:$0xff]  }
 0x35d   :  { %6653 = vmatpush1.bf16.msra.mxu1 %v15268_v16  ;;  %6517 = vmatprep.subr.bf16.mxu0 %v15279_v21  ;;  %v15342_v16 = vld [vmem:[#allocation2 + $0x1aac] ss:$24 sps:$4 sm:$0xff]   ;;  %v15343_v21 = vld [vmem:[#allocation2 + $0x12d0] ss:$24 sps:$4 sm:$0xff]  }
 0x35e   :  { %6663 = vmatprep.subr.bf16.mxu1 %v15276_v17  ;;  %v15340_v17 = vld [vmem:[#allocation2 + $0x1aa8] ss:$24 sps:$4 sm:$0xff]  }
 0x360   :  { %6655 = vmatmul.mubr.bf16.vlgmr.msra.gmra.mrb[20].mxu1 %v16798_v15  ;;  %6518 = vmatpush1.bf16.msra.mxu0 %v15277_v22  ;;  %v15351_v22 = vld [vmem:[#allocation2 + $0x1304] ss:$24 sps:$4 sm:$0xff]  }
 0x361   :  { %6664 = vmatpush1.bf16.msra.mxu1 %v15274_v50  ;;  %6519 = vmatprep.subr.bf16.mxu0 %v15285_v25  ;;  %v15348_v50 = vld [vmem:[#allocation2 + $0x1adc] ss:$24 sps:$4 sm:$0xff]  }
 0x362   :  { %6665 = vmatprep.subr.bf16.mxu1 %v15282_v24  ;;  %6695 = vmatprep.mubr.bf16.mxu1 %v16807_v19 }
 0x364   :  { %6520 = vmatpush1.bf16.msra.mxu0 %v15283_v27  ;;  %v15346_v27 = vld [vmem:[#allocation2 + $0x1ad8] ss:$24 sps:$4 sm:$0xff]  }
 0x365   :  { %6666 = vmatpush1.bf16.msra.mxu1 %v15280_v26  ;;  %6521 = vmatprep.subr.bf16.mxu0 %v15291_v49 }
 0x366   :  { %6667 = vmatprep.subr.bf16.mxu1 %v15288_v47 }
 0x368   :  { %6522 = vmatpush1.bf16.msra.mxu0 %v15289_v29  ;;  %v15354_v29 = vld [vmem:[#allocation2 + $0x1b0c] ss:$24 sps:$4 sm:$0xff]  }
 0x369   :  { %6668 = vmatpush1.bf16.msra.mxu1 %v15286_v28  ;;  %6523 = vmatprep.subr.bf16.mxu0 %v15297_v31  ;;  %v15349_v28 = vld [vmem:[#allocation2 + $0x1300] ss:$24 sps:$4 sm:$0xff]   ;;  %v15357_v31 = vld [vmem:[#allocation2 + $0x1334] ss:$24 sps:$4 sm:$0xff]  }
 0x36a   :  { %6669 = vmatprep.subr.bf16.mxu1 %v15294_v30 }
 0x36c   :  { %6524 = vmatpush1.bf16.msra.mxu0 %v15295_v33  ;;  %v15355_v33 = vld [vmem:[#allocation2 + $0x1330] ss:$24 sps:$4 sm:$0xff]  }
 0x36d   :  { %6670 = vmatpush1.bf16.msra.mxu1 %v15292_v18  ;;  %6525 = vmatprep.subr.bf16.mxu0 %v15303_v37  ;;  %v15352_v18 = vld [vmem:[#allocation2 + $0x1b08] ss:$24 sps:$4 sm:$0xff]   ;;  %v15363_v37 = vld [vmem:[#allocation2 + $0x1364] ss:$24 sps:$4 sm:$0xff]  }
 0x36e   :  { %6671 = vmatprep.subr.bf16.mxu1 %v15300_v36  ;;  %v15360_v36 = vld [vmem:[#allocation2 + $0x1b3c] ss:$24 sps:$4 sm:$0xff]  }
 0x370   :  { %6526 = vmatpush1.bf16.msra.mxu0 %v15301_v39  ;;  %v15361_v39 = vld [vmem:[#allocation2 + $0x1360] ss:$24 sps:$4 sm:$0xff]  }
 0x371   :  { %6672 = vmatpush1.bf16.msra.mxu1 %v15298_v38  ;;  %6527 = vmatprep.subr.bf16.mxu0 %v15309_v41  ;;  %v15358_v38 = vld [vmem:[#allocation2 + $0x1b38] ss:$24 sps:$4 sm:$0xff]   ;;  %v15372_v41 = vld [vmem:[#allocation2 + $0x1b6c] ss:$24 sps:$4 sm:$0xff]  }
 0x372   :  { %6673 = vmatprep.subr.bf16.mxu1 %v15306_v40  ;;  %v15366_v40 = vld [vmem:[#allocation2 + $0x1394] ss:$24 sps:$4 sm:$0xff]  }
 0x374   :  { %6528 = vmatpush1.bf16.msra.mxu0 %v15307_v43  ;;  %v15369_v43 = vld [vmem:[#allocation2 + $0x13c4] ss:$24 sps:$4 sm:$0xff]  }
 0x375   :  { %6674 = vmatpush1.bf16.msra.mxu1 %v15304_v42  ;;  %6529 = vmatprep.subr.bf16.mxu0 %v15315_v53  ;;  %v15364_v42 = vld [vmem:[#allocation2 + $0x1390] ss:$24 sps:$4 sm:$0xff]   ;;  %v15378_v53 = vld [vmem:[#allocation2 + $0x1b94] ss:$24 sps:$4 sm:$0xff]  }
 0x376   :  { %6675 = vmatprep.subr.bf16.mxu1 %v15312_v44  ;;  %v15370_v44 = vld [vmem:[#allocation2 + $0x1b68] ss:$24 sps:$4 sm:$0xff]  }
 0x378   :  { %6530 = vmatpush1.bf16.msra.mxu0 %v15313_v56  ;;  %v15375_v56 = vld [vmem:[#allocation2 + $0x13f4] ss:$24 sps:$4 sm:$0xff]  }
 0x379   :  { %6676 = vmatpush1.bf16.msra.mxu1 %v15310_v55  ;;  %6540 = vmatprep.subr.bf16.mxu0 %v15321_v58  ;;  %v15367_v55 = vld [vmem:[#allocation2 + $0x13c0] ss:$24 sps:$4 sm:$0xff]   ;;  %v15381_v58 = vld [vmem:[#allocation2 + $0x1424] ss:$24 sps:$4 sm:$0xff]  }
 0x37a   :  { %6677 = vmatprep.subr.bf16.mxu1 %v15318_v57  ;;  %v15373_v57 = vld [vmem:[#allocation2 + $0x13f0] ss:$24 sps:$4 sm:$0xff]  }
 0x37b   :  { %6532 = vmatmul.mubr.bf16.vlgmr.msra.gmra.mrb[12].mxu0 %v16815_v23 }
 0x37c   :  { %6541 = vmatpush1.bf16.msra.mxu0 %v15319_v60  ;;  %6572 = vmatprep.mubr.bf16.mxu0 %v16644_v0  ;;  %v15379_v60 = vld [vmem:[#allocation2 + $0x1420] ss:$24 sps:$4 sm:$0xff]  }
 0x37d   :  { %6678 = vmatpush1.bf16.msra.mxu1 %v15316_v59  ;;  %6745 = vmatprep.subr.bf16.mxu0 %v15333_v62  ;;  %v15376_v59 = vld [vmem:[#allocation2 + $0x1b90] ss:$24 sps:$4 sm:$0xff]   ;;  %v15387_v62 = vld [vmem:[#allocation2 + $0x1454] ss:$24 sps:$4 sm:$0xff]  }
 0x37e   :  { %6679 = vmatprep.subr.bf16.mxu1 %v15324_v61  ;;  %v15384_v61 = vld [vmem:[#allocation2 + $0x1bc4] ss:$24 sps:$4 sm:$0xff]  }
 0x381   :  { %6680 = vmatpush1.bf16.msra.mxu1 %v15322_v63  ;;  %v15382_v63 = vld [vmem:[#allocation2 + $0x1bc0] ss:$24 sps:$4 sm:$0xff]  }
 0x382   :  { %6681 = vmatprep.subr.bf16.mxu1 %v15327_v1  ;;  %v15385_v1 = vld [vmem:[#allocation2 + $0x1450] ss:$24 sps:$4 sm:$0xff]  }
 0x385   :  { %6682 = vmatpush1.bf16.msra.mxu1 %v15325_v2  ;;  %v15390_v2 = vld [vmem:[#allocation2 + $0x1bf4] ss:$24 sps:$4 sm:$0xff]  }
 0x386   :  { %6683 = vmatprep.subr.bf16.mxu1 %v15330_v4  ;;  %v15393_v4 = vld [vmem:[#allocation2 + $0x1484] ss:$24 sps:$4 sm:$0xff]  }
 0x387   :  { %13020 = vmatmul.mubr.msk.bf16.vlgmr.msra.gmra.mrb[12].mxu0 %vm1899_vm0, %v16913_v11 }
 0x388   :  { %6746 = vmatpush1.bf16.msra.mxu0 %v15331_v7  ;;  %6777 = vmatprep.mubr.bf16.mxu0 %v16777_v52  ;;  %v15391_v7 = vld [vmem:[#allocation2 + $0x1480] ss:$24 sps:$4 sm:$0xff]  }
 0x389   :  { %6684 = vmatpush1.bf16.msra.mxu1 %v15328_v5  ;;  %6747 = vmatprep.subr.bf16.mxu0 %v15339_v10  ;;  %v15388_v5 = vld [vmem:[#allocation2 + $0x1bf0] ss:$24 sps:$4 sm:$0xff]   ;;  %v15399_v10 = vld [vmem:[#allocation2 + $0x14b4] ss:$24 sps:$4 sm:$0xff]  }
 0x38a   :  { %6685 = vmatprep.subr.bf16.mxu1 %v15336_v9  ;;  %v15396_v9 = vld [vmem:[#allocation2 + $0x1c24] ss:$24 sps:$4 sm:$0xff]  }
 0x38c   :  { %6748 = vmatpush1.bf16.msra.mxu0 %v15337_v13 }
 0x38d   :  { %6686 = vmatpush1.bf16.msra.mxu1 %v15334_v12  ;;  %6749 = vmatprep.subr.bf16.mxu0 %v15345_v46 }
 0x38e   :  { %6687 = vmatprep.subr.bf16.mxu1 %v15342_v16  ;;  %v16918_v24 = vpop.f32.mrb[8].mxu0 }
 0x38f   :  { %v9168_v25 = vmax.f32 %v16850_v32, %v16918_v24  ;;  %v16922_v26 = vpop.f32.mrb[9].mxu0  ;;  %v16132_v32 = vld [vmem:[%s18206_s3 + $0x4d0] ss:$8 sps:$4 sm:$0xff]  }
 0x390   :  { %6750 = vmatpush1.bf16.msra.mxu0 %v15343_v21  ;;  %v9169_v47 = vmax.f32 %v16856_v34, %v16922_v26  ;;  %v4485_v49 = vpop.f32.mrb[10].mxu0  ;;  %v15394_v21 = vld [vmem:[#allocation2 + $0x1c20] ss:$24 sps:$4 sm:$0xff]   ;;  %v16137_v34 = vld [vmem:[%s18206_s3 + $0x214] ss:$8 sps:$4 sm:$0xff]  }
 0x391   :  { %6688 = vmatpush1.bf16.msra.mxu1 %v15340_v17  ;;  %v4486_v30 = vpop.f32.mrb[11].mxu0  ;;  %6751 = vmatprep.subr.bf16.mxu0 %v15351_v22  ;;  %v15405_v49 = vld [vmem:[#allocation2 + $0x14e4] ss:$24 sps:$4 sm:$0xff]   ;;  %v16135_v26 = vld [vmem:[%s18206_s3 + $0x210] ss:$8 sps:$4 sm:$0xff]  }
 0x392   :  { %6689 = vmatprep.subr.bf16.mxu1 %v15348_v50  ;;  %v15397_v50 = vld [vmem:[#allocation2 + $0x14b0] ss:$24 sps:$4 sm:$0xff]   ;;  %v15408_v30 = vld [vmem:[#allocation2 + $0x1c84] ss:$24 sps:$4 sm:$0xff]  }
 0x394   :  { %6752 = vmatpush1.bf16.msra.mxu0 %v15349_v28  ;;  %v15400_v28 = vld [vmem:[#allocation2 + $0x1c50] ss:$24 sps:$4 sm:$0xff]  }
 0x395   :  { %6690 = vmatpush1.bf16.msra.mxu1 %v15346_v27  ;;  %6753 = vmatprep.subr.bf16.mxu0 %v15357_v31  ;;  %v15402_v27 = vld [vmem:[#allocation2 + $0x1c54] ss:$24 sps:$4 sm:$0xff]  }
 0x396   :  { %6691 = vmatprep.subr.bf16.mxu1 %v15354_v29  ;;  %v15403_v29 = vld [vmem:[#allocation2 + $0x14e0] ss:$24 sps:$4 sm:$0xff]   ;;  %v15411_v31 = vld [vmem:[#allocation2 + $0x1514] ss:$24 sps:$4 sm:$0xff]  }
 0x398   :  { %6754 = vmatpush1.bf16.msra.mxu0 %v15355_v33  ;;  %v15409_v33 = vld [vmem:[#allocation2 + $0x1510] ss:$24 sps:$4 sm:$0xff]  }
 0x399   :  { %6692 = vmatpush1.bf16.msra.mxu1 %v15352_v18  ;;  %6755 = vmatprep.subr.bf16.mxu0 %v15363_v37  ;;  %v15406_v18 = vld [vmem:[#allocation2 + $0x1c80] ss:$24 sps:$4 sm:$0xff]   ;;  %v15417_v37 = vld [vmem:[#allocation2 + $0x1544] ss:$24 sps:$4 sm:$0xff]  }
 0x39a   :  { %6693 = vmatprep.subr.bf16.mxu1 %v15360_v36  ;;  %v15414_v36 = vld [vmem:[#allocation2 + $0x1cb4] ss:$24 sps:$4 sm:$0xff]  }
 0x39c   :  { %6756 = vmatpush1.bf16.msra.mxu0 %v15361_v39  ;;  %v15415_v39 = vld [vmem:[#allocation2 + $0x1540] ss:$24 sps:$4 sm:$0xff]  }
 0x39d   :  { %6694 = vmatpush1.bf16.msra.mxu1 %v15358_v38  ;;  %6757 = vmatprep.subr.bf16.mxu0 %v15366_v40  ;;  %v15412_v38 = vld [vmem:[#allocation2 + $0x1cb0] ss:$24 sps:$4 sm:$0xff]   ;;  %v15420_v40 = vld [vmem:[#allocation2 + $0x1ce4] ss:$24 sps:$4 sm:$0xff]  }
 0x39e   :  { %6704 = vmatprep.subr.bf16.mxu1 %v15372_v41  ;;  %v15423_v41 = vld [vmem:[#allocation2 + $0x1574] ss:$24 sps:$4 sm:$0xff]  }
 0x3a0   :  { %6696 = vmatmul.mubr.bf16.vlgmr.msra.gmra.mrb[20].mxu1 %v16815_v23  ;;  %6758 = vmatpush1.bf16.msra.mxu0 %v15364_v42  ;;  %v15418_v42 = vld [vmem:[#allocation2 + $0x1ce0] ss:$24 sps:$4 sm:$0xff]  }
 0x3a1   :  { %6705 = vmatpush1.bf16.msra.mxu1 %v15370_v44  ;;  %6759 = vmatprep.subr.bf16.mxu0 %v15369_v43  ;;  %v15421_v43 = vld [vmem:[#allocation2 + $0x1570] ss:$24 sps:$4 sm:$0xff]   ;;  %v15426_v44 = vld [vmem:[#allocation2 + $0x1d14] ss:$24 sps:$4 sm:$0xff]  }
 0x3a2   :  { %6736 = vmatprep.mubr.bf16.mxu1 %v16644_v0  ;;  %8674 = vmatprep.subr.bf16.mxu1 %v15378_v53  ;;  %v15429_v53 = vld [vmem:[#allocation2 + $0x15a4] ss:$24 sps:$4 sm:$0xff]  }
 0x3a4   :  { %6760 = vmatpush1.bf16.msra.mxu0 %v15367_v55  ;;  %v15424_v55 = vld [vmem:[#allocation2 + $0x1d10] ss:$24 sps:$4 sm:$0xff]  }
 0x3a5   :  { %6761 = vmatprep.subr.bf16.mxu0 %v15375_v56  ;;  %v15427_v56 = vld [vmem:[#allocation2 + $0x15a0] ss:$24 sps:$4 sm:$0xff]  }
 0x3a8   :  { %6762 = vmatpush1.bf16.msra.mxu0 %v15373_v57  ;;  %v15432_v57 = vld [vmem:[#allocation2 + $0x1d44] ss:$24 sps:$4 sm:$0xff]  }
 0x3a9   :  { %6763 = vmatprep.subr.bf16.mxu0 %v15381_v58  ;;  %v15435_v58 = vld [vmem:[#allocation2 + $0x15d4] ss:$24 sps:$4 sm:$0xff]  }
 0x3ac   :  { %13021 = vmatmul.mubr.msk.bf16.vlgmr.msra.gmra.mrb[20].mxu1 %vm1899_vm0, %v16913_v11  ;;  %6764 = vmatpush1.bf16.msra.mxu0 %v15379_v60  ;;  %v15433_v60 = vld [vmem:[#allocation2 + $0x15d0] ss:$24 sps:$4 sm:$0xff]  }
 0x3ad   :  { %8675 = vmatpush1.bf16.msra.mxu1 %v15376_v59  ;;  %6765 = vmatprep.subr.bf16.mxu0 %v15387_v62  ;;  %v15430_v59 = vld [vmem:[#allocation2 + $0x1d40] ss:$24 sps:$4 sm:$0xff]   ;;  %v15441_v62 = vld [vmem:[#allocation2 + $0x1604] ss:$24 sps:$4 sm:$0xff]  }
 0x3ae   :  { %8676 = vmatprep.subr.bf16.mxu1 %v15384_v61  ;;  %8706 = vmatprep.mubr.bf16.mxu1 %v16777_v52  ;;  %v15438_v61 = vld [vmem:[#allocation2 + $0x1d74] ss:$24 sps:$4 sm:$0xff]  }
 0x3b0   :  { %6766 = vmatpush1.bf16.msra.mxu0 %v15385_v1  ;;  %v15439_v1 = vld [vmem:[#allocation2 + $0x1600] ss:$24 sps:$4 sm:$0xff]  }
 0x3b1   :  { %8677 = vmatpush1.bf16.msra.mxu1 %v15382_v63  ;;  %6767 = vmatprep.subr.bf16.mxu0 %v15393_v4  ;;  %v15436_v63 = vld [vmem:[#allocation2 + $0x1d70] ss:$24 sps:$4 sm:$0xff]   ;;  %v15447_v4 = vld [vmem:[#allocation2 + $0x1634] ss:$24 sps:$4 sm:$0xff]  }
 0x3b2   :  { %8678 = vmatprep.subr.bf16.mxu1 %v15390_v2  ;;  %v15444_v2 = vld [vmem:[#allocation2 + $0x1da4] ss:$24 sps:$4 sm:$0xff]  }
 0x3b3   :  { %v16931_v12 = vpop.f32.mrb[16].mxu1 }
 0x3b4   :  { %v9170_v13 = vmax.f32 %v16882_v3, %v16931_v12  ;;  %v16935_v16 = vpop.f32.mrb[17].mxu1  ;;  %6768 = vmatpush1.bf16.msra.mxu0 %v15391_v7  ;;  %v15445_v7 = vld [vmem:[#allocation2 + $0x1630] ss:$24 sps:$4 sm:$0xff]  }
 0x3b5   :  { %8679 = vmatpush1.bf16.msra.mxu1 %v15388_v5  ;;  %v9171_v46 = vmax.f32 %v16885_v6, %v16935_v16  ;;  %v4649_v17 = vpop.f32.mrb[18].mxu1  ;;  %6769 = vmatprep.subr.bf16.mxu0 %v15399_v10  ;;  %v15442_v5 = vld [vmem:[#allocation2 + $0x1da0] ss:$24 sps:$4 sm:$0xff]   ;;  %v15453_v10 = vld [vmem:[#allocation2 + $0x1664] ss:$24 sps:$4 sm:$0xff]  }
 0x3b6   :  { %v4650_v22 = vpop.f32.mrb[19].mxu1  ;;  %8680 = vmatprep.subr.bf16.mxu1 %v15396_v9  ;;  %v15450_v9 = vld [vmem:[#allocation2 + $0x1dd4] ss:$24 sps:$4 sm:$0xff]   ;;  %v15448_v17 = vld [vmem:[#allocation2 + $0x1dd0] ss:$24 sps:$4 sm:$0xff]  }
 0x3b7   :  { %v15459_v22 = vld [vmem:[#allocation2 + $0x1694] ss:$24 sps:$4 sm:$0xff]   ;;  %v16177_v3 = vld [vmem:[%s18206_s3 + $0x280] ss:$8 sps:$4 sm:$0xff]   ;;  %v16180_v12 = vld [vmem:[%s18206_s3 + $0x550] ss:$8 sps:$4 sm:$0xff]  }
 0x3b8   :  { %6770 = vmatpush1.bf16.msra.mxu0 %v15397_v50  ;;  %v15456_v50 = vld [vmem:[#allocation2 + $0x1e04] ss:$24 sps:$4 sm:$0xff]  }
 0x3b9   :  { %8681 = vmatpush1.bf16.msra.mxu1 %v15394_v21  ;;  %6771 = vmatprep.subr.bf16.mxu0 %v15405_v49  ;;  %v15451_v21 = vld [vmem:[#allocation2 + $0x1660] ss:$24 sps:$4 sm:$0xff]   ;;  %v15457_v49 = vld [vmem:[#allocation2 + $0x1690] ss:$24 sps:$4 sm:$0xff]   ;;  %v16188_v6 = vld [vmem:[%s18206_s3 + $0x564] ss:$8 sps:$4 sm:$0xff]  }
 0x3ba   :  { %8682 = vmatprep.subr.bf16.mxu1 %v15402_v27  ;;  %v15454_v27 = vld [vmem:[#allocation2 + $0x1e00] ss:$24 sps:$4 sm:$0xff]  }
 0x3bc   :  { %6772 = vmatpush1.bf16.msra.mxu0 %v15403_v29  ;;  %v15465_v29 = vld [vmem:[#allocation2 + $0x16c4] ss:$24 sps:$4 sm:$0xff]  }
 0x3bd   :  { %8683 = vmatpush1.bf16.msra.mxu1 %v15400_v28  ;;  %6773 = vmatprep.subr.bf16.mxu0 %v15411_v31  ;;  %v15462_v28 = vld [vmem:[#allocation2 + $0x1e34] ss:$24 sps:$4 sm:$0xff]   ;;  %v15463_v31 = vld [vmem:[#allocation2 + $0x16c0] ss:$24 sps:$4 sm:$0xff]  }
 0x3be   :  { %8684 = vmatprep.subr.bf16.mxu1 %v15408_v30  ;;  %v15460_v30 = vld [vmem:[#allocation2 + $0x1e30] ss:$24 sps:$4 sm:$0xff]  }
 0x3c0   :  { %6774 = vmatpush1.bf16.msra.mxu0 %v15409_v33  ;;  %v15471_v33 = vld [vmem:[#allocation2 + $0x16f4] ss:$24 sps:$4 sm:$0xff]  }
 0x3c1   :  { %8685 = vmatpush1.bf16.msra.mxu1 %v15406_v18  ;;  %6775 = vmatprep.subr.bf16.mxu0 %v15417_v37  ;;  %v15468_v18 = vld [vmem:[#allocation2 + $0x1e64] ss:$24 sps:$4 sm:$0xff]   ;;  %v15469_v37 = vld [vmem:[#allocation2 + $0x16f0] ss:$24 sps:$4 sm:$0xff]  }
 0x3c2   :  { %8686 = vmatprep.subr.bf16.mxu1 %v15414_v36  ;;  %v15466_v36 = vld [vmem:[#allocation2 + $0x1e60] ss:$24 sps:$4 sm:$0xff]  }
 0x3c4   :  { %6776 = vmatpush1.bf16.msra.mxu0 %v15415_v39  ;;  %v15477_v39 = vld [vmem:[#allocation2 + $0x1724] ss:$24 sps:$4 sm:$0xff]  }
 0x3c5   :  { %8687 = vmatpush1.bf16.msra.mxu1 %v15412_v38  ;;  %6786 = vmatprep.subr.bf16.mxu0 %v15423_v41  ;;  %v15474_v38 = vld [vmem:[#allocation2 + $0x1e94] ss:$24 sps:$4 sm:$0xff]   ;;  %v15475_v41 = vld [vmem:[#allocation2 + $0x1720] ss:$24 sps:$4 sm:$0xff]  }
 0x3c6   :  { %8688 = vmatprep.subr.bf16.mxu1 %v15420_v40  ;;  %v15472_v40 = vld [vmem:[#allocation2 + $0x1e90] ss:$24 sps:$4 sm:$0xff]  }
 0x3c7   :  { %6778 = vmatmul.mubr.bf16.vlgmr.msra.gmra.mrb[16].mxu0 %v16781_v8 }
 0x3c8   :  { %6787 = vmatpush1.bf16.msra.mxu0 %v15421_v43  ;;  %6818 = vmatprep.mubr.bf16.mxu0 %v16792_v35  ;;  %v15483_v43 = vld [vmem:[#allocation2 + $0x1754] ss:$24 sps:$4 sm:$0xff]  }
 0x3c9   :  { %8689 = vmatpush1.bf16.msra.mxu1 %v15418_v42  ;;  %6788 = vmatprep.subr.bf16.mxu0 %v15429_v53  ;;  %v15480_v42 = vld [vmem:[#allocation2 + $0x1ec4] ss:$24 sps:$4 sm:$0xff]   ;;  %v15481_v53 = vld [vmem:[#allocation2 + $0x1750] ss:$24 sps:$4 sm:$0xff]  }
 0x3ca   :  { %8690 = vmatprep.subr.bf16.mxu1 %v15426_v44  ;;  %v15478_v44 = vld [vmem:[#allocation2 + $0x1ec0] ss:$24 sps:$4 sm:$0xff]  }
 0x3cc   :  { %6789 = vmatpush1.bf16.msra.mxu0 %v15427_v56  ;;  %v15489_v56 = vld [vmem:[#allocation2 + $0x1784] ss:$24 sps:$4 sm:$0xff]  }
 0x3cd   :  { %8691 = vmatpush1.bf16.msra.mxu1 %v15424_v55  ;;  %6790 = vmatprep.subr.bf16.mxu0 %v15435_v58  ;;  %v15486_v55 = vld [vmem:[#allocation2 + $0x1ef4] ss:$24 sps:$4 sm:$0xff]   ;;  %v15487_v58 = vld [vmem:[#allocation2 + $0x1780] ss:$24 sps:$4 sm:$0xff]  }
 0x3ce   :  { %8692 = vmatprep.subr.bf16.mxu1 %v15432_v57  ;;  %v15484_v57 = vld [vmem:[#allocation2 + $0x1ef0] ss:$24 sps:$4 sm:$0xff]  }
 0x3d0   :  { %6791 = vmatpush1.bf16.msra.mxu0 %v15433_v60  ;;  %v15495_v60 = vld [vmem:[#allocation2 + $0x17b4] ss:$24 sps:$4 sm:$0xff]  }
 0x3d1   :  { %8693 = vmatpush1.bf16.msra.mxu1 %v15430_v59  ;;  %6792 = vmatprep.subr.bf16.mxu0 %v15441_v62  ;;  %v15492_v59 = vld [vmem:[#allocation2 + $0x1f24] ss:$24 sps:$4 sm:$0xff]   ;;  %v15493_v62 = vld [vmem:[#allocation2 + $0x17b0] ss:$24 sps:$4 sm:$0xff]  }
 0x3d2   :  { %8694 = vmatprep.subr.bf16.mxu1 %v15438_v61  ;;  %v15490_v61 = vld [vmem:[#allocation2 + $0x1f20] ss:$24 sps:$4 sm:$0xff]  }
 0x3d4   :  { %6793 = vmatpush1.bf16.msra.mxu0 %v15439_v1  ;;  %v15501_v1 = vld [vmem:[#allocation2 + $0x17e4] ss:$24 sps:$4 sm:$0xff]  }
 0x3d5   :  { %8695 = vmatpush1.bf16.msra.mxu1 %v15436_v63  ;;  %6794 = vmatprep.subr.bf16.mxu0 %v15447_v4  ;;  %v15498_v63 = vld [vmem:[#allocation2 + $0x1f54] ss:$24 sps:$4 sm:$0xff]   ;;  %v15499_v4 = vld [vmem:[#allocation2 + $0x17e0] ss:$24 sps:$4 sm:$0xff]  }
 0x3d6   :  { %8696 = vmatprep.subr.bf16.mxu1 %v15444_v2  ;;  %v15496_v2 = vld [vmem:[#allocation2 + $0x1f50] ss:$24 sps:$4 sm:$0xff]  }
 0x3d8   :  { %6795 = vmatpush1.bf16.msra.mxu0 %v15445_v7  ;;  %v15507_v7 = vld [vmem:[#allocation2 + $0x1814] ss:$24 sps:$4 sm:$0xff]  }
 0x3d9   :  { %8697 = vmatpush1.bf16.msra.mxu1 %v15442_v5  ;;  %6796 = vmatprep.subr.bf16.mxu0 %v15453_v10  ;;  %v15504_v5 = vld [vmem:[#allocation2 + $0x1f84] ss:$24 sps:$4 sm:$0xff]   ;;  %v15505_v10 = vld [vmem:[#allocation2 + $0x1810] ss:$24 sps:$4 sm:$0xff]  }
 0x3da   :  { %8698 = vmatprep.subr.bf16.mxu1 %v15450_v9  ;;  %v15502_v9 = vld [vmem:[#allocation2 + $0x1f80] ss:$24 sps:$4 sm:$0xff]  }
 0x3dc   :  { %6797 = vmatpush1.bf16.msra.mxu0 %v15451_v21  ;;  %v15513_v21 = vld [vmem:[#allocation2 + $0x1844] ss:$24 sps:$4 sm:$0xff]  }
 0x3dd   :  { %8699 = vmatpush1.bf16.msra.mxu1 %v15448_v17  ;;  %6798 = vmatprep.subr.bf16.mxu0 %v15459_v22  ;;  %v15510_v17 = vld [vmem:[#allocation2 + $0x1fb4] ss:$24 sps:$4 sm:$0xff]   ;;  %v15511_v22 = vld [vmem:[#allocation2 + $0x1840] ss:$24 sps:$4 sm:$0xff]  }
 0x3de   :  { %8700 = vmatprep.subr.bf16.mxu1 %v15456_v50  ;;  %v15508_v50 = vld [vmem:[#allocation2 + $0x1fb0] ss:$24 sps:$4 sm:$0xff]  }
 0x3e0   :  { %6799 = vmatpush1.bf16.msra.mxu0 %v15457_v49  ;;  %v15519_v49 = vld [vmem:[#allocation2 + $0x1874] ss:$24 sps:$4 sm:$0xff]  }
 0x3e1   :  { %8701 = vmatpush1.bf16.msra.mxu1 %v15454_v27  ;;  %6800 = vmatprep.subr.bf16.mxu0 %v15465_v29  ;;  %v15516_v27 = vld [vmem:[#allocation2 + $0x1fe4] ss:$24 sps:$4 sm:$0xff]   ;;  %v15517_v29 = vld [vmem:[#allocation2 + $0x1870] ss:$24 sps:$4 sm:$0xff]  }
 0x3e2   :  { %8702 = vmatprep.subr.bf16.mxu1 %v15462_v28  ;;  %v15514_v28 = vld [vmem:[#allocation2 + $0x1fe0] ss:$24 sps:$4 sm:$0xff]  }
 0x3e4   :  { %6801 = vmatpush1.bf16.msra.mxu0 %v15463_v31  ;;  %v15525_v31 = vld [vmem:[#allocation2 + $0x18a4] ss:$24 sps:$4 sm:$0xff]  }
 0x3e5   :  { %8703 = vmatpush1.bf16.msra.mxu1 %v15460_v30  ;;  %6802 = vmatprep.subr.bf16.mxu0 %v15471_v33  ;;  %v15522_v30 = vld [vmem:[#allocation2 + $0x2014] ss:$24 sps:$4 sm:$0xff]   ;;  %v15523_v33 = vld [vmem:[#allocation2 + $0x18a0] ss:$24 sps:$4 sm:$0xff]  }
 0x3e6   :  { %8704 = vmatprep.subr.bf16.mxu1 %v15468_v18  ;;  %v15520_v18 = vld [vmem:[#allocation2 + $0x2010] ss:$24 sps:$4 sm:$0xff]  }
 0x3e8   :  { %6803 = vmatpush1.bf16.msra.mxu0 %v15469_v37  ;;  %v15531_v37 = vld [vmem:[#allocation2 + $0x18d4] ss:$24 sps:$4 sm:$0xff]  }
 0x3e9   :  { %8705 = vmatpush1.bf16.msra.mxu1 %v15466_v36  ;;  %6804 = vmatprep.subr.bf16.mxu0 %v15477_v39  ;;  %v15528_v36 = vld [vmem:[#allocation2 + $0x2044] ss:$24 sps:$4 sm:$0xff]   ;;  %v15529_v39 = vld [vmem:[#allocation2 + $0x18d0] ss:$24 sps:$4 sm:$0xff]  }
 0x3ea   :  { %8715 = vmatprep.subr.bf16.mxu1 %v15474_v38  ;;  %v15526_v38 = vld [vmem:[#allocation2 + $0x2040] ss:$24 sps:$4 sm:$0xff]  }
 0x3ec   :  { %8707 = vmatmul.mubr.bf16.vlgmr.msra.gmra.mrb[24].mxu1 %v16781_v8  ;;  %6805 = vmatpush1.bf16.msra.mxu0 %v15475_v41  ;;  %v15537_v41 = vld [vmem:[#allocation2 + $0x1904] ss:$24 sps:$4 sm:$0xff]  }
 0x3ed   :  { %8716 = vmatpush1.bf16.msra.mxu1 %v15472_v40  ;;  %6806 = vmatprep.subr.bf16.mxu0 %v15483_v43  ;;  %v15534_v40 = vld [vmem:[#allocation2 + $0x2074] ss:$24 sps:$4 sm:$0xff]   ;;  %v15535_v43 = vld [vmem:[#allocation2 + $0x1900] ss:$24 sps:$4 sm:$0xff]  }
 0x3ee   :  { %8717 = vmatprep.subr.bf16.mxu1 %v15480_v42  ;;  %8747 = vmatprep.mubr.bf16.mxu1 %v16792_v35  ;;  %v15532_v42 = vld [vmem:[#allocation2 + $0x2070] ss:$24 sps:$4 sm:$0xff]  }
 0x3f0   :  { %6807 = vmatpush1.bf16.msra.mxu0 %v15481_v53  ;;  %v15543_v53 = vld [vmem:[#allocation2 + $0x1934] ss:$24 sps:$4 sm:$0xff]  }
 0x3f1   :  { %8718 = vmatpush1.bf16.msra.mxu1 %v15478_v44  ;;  %6808 = vmatprep.subr.bf16.mxu0 %v15489_v56  ;;  %v15540_v44 = vld [vmem:[#allocation2 + $0x20a4] ss:$24 sps:$4 sm:$0xff]   ;;  %v15541_v56 = vld [vmem:[#allocation2 + $0x1930] ss:$24 sps:$4 sm:$0xff]  }
 0x3f2   :  { %8719 = vmatprep.subr.bf16.mxu1 %v15486_v55  ;;  %v15538_v55 = vld [vmem:[#allocation2 + $0x20a0] ss:$24 sps:$4 sm:$0xff]  }
 0x3f4   :  { %6809 = vmatpush1.bf16.msra.mxu0 %v15487_v58  ;;  %v15549_v58 = vld [vmem:[#allocation2 + $0x1964] ss:$24 sps:$4 sm:$0xff]  }
 0x3f5   :  { %8720 = vmatpush1.bf16.msra.mxu1 %v15484_v57  ;;  %6810 = vmatprep.subr.bf16.mxu0 %v15495_v60  ;;  %v15546_v57 = vld [vmem:[#allocation2 + $0x20d4] ss:$24 sps:$4 sm:$0xff]   ;;  %v15547_v60 = vld [vmem:[#allocation2 + $0x1960] ss:$24 sps:$4 sm:$0xff]  }
 0x3f6   :  { %8721 = vmatprep.subr.bf16.mxu1 %v15492_v59  ;;  %v15544_v59 = vld [vmem:[#allocation2 + $0x20d0] ss:$24 sps:$4 sm:$0xff]  }
 0x3f8   :  { %6811 = vmatpush1.bf16.msra.mxu0 %v15493_v62  ;;  %v15555_v62 = vld [vmem:[#allocation2 + $0x1994] ss:$24 sps:$4 sm:$0xff]  }
 0x3f9   :  { %8722 = vmatpush1.bf16.msra.mxu1 %v15490_v61  ;;  %6812 = vmatprep.subr.bf16.mxu0 %v15501_v1  ;;  %v15552_v61 = vld [vmem:[#allocation2 + $0x2104] ss:$24 sps:$4 sm:$0xff]   ;;  %v15553_v1 = vld [vmem:[#allocation2 + $0x1990] ss:$24 sps:$4 sm:$0xff]  }
 0x3fa   :  { %8723 = vmatprep.subr.bf16.mxu1 %v15498_v63  ;;  %v15550_v63 = vld [vmem:[#allocation2 + $0x2100] ss:$24 sps:$4 sm:$0xff]  }
 0x3fc   :  { %6813 = vmatpush1.bf16.msra.mxu0 %v15499_v4  ;;  %v15561_v4 = vld [vmem:[#allocation2 + $0x19c4] ss:$24 sps:$4 sm:$0xff]  }
 0x3fd   :  { %8724 = vmatpush1.bf16.msra.mxu1 %v15496_v2  ;;  %6814 = vmatprep.subr.bf16.mxu0 %v15507_v7  ;;  %v15558_v2 = vld [vmem:[#allocation2 + $0x2134] ss:$24 sps:$4 sm:$0xff]   ;;  %v15559_v7 = vld [vmem:[#allocation2 + $0x19c0] ss:$24 sps:$4 sm:$0xff]  }
 0x3fe   :  { %8725 = vmatprep.subr.bf16.mxu1 %v15504_v5  ;;  %v15556_v5 = vld [vmem:[#allocation2 + $0x2130] ss:$24 sps:$4 sm:$0xff]  }
 0x400   :  { %6815 = vmatpush1.bf16.msra.mxu0 %v15505_v10  ;;  %v15567_v10 = vld [vmem:[#allocation2 + $0x19f4] ss:$24 sps:$4 sm:$0xff]  }
 0x401   :  { %8726 = vmatpush1.bf16.msra.mxu1 %v15502_v9  ;;  %6816 = vmatprep.subr.bf16.mxu0 %v15513_v21  ;;  %v15564_v9 = vld [vmem:[#allocation2 + $0x2164] ss:$24 sps:$4 sm:$0xff]   ;;  %v15565_v21 = vld [vmem:[#allocation2 + $0x19f0] ss:$24 sps:$4 sm:$0xff]  }
 0x402   :  { %8727 = vmatprep.subr.bf16.mxu1 %v15510_v17  ;;  %v15562_v17 = vld [vmem:[#allocation2 + $0x2160] ss:$24 sps:$4 sm:$0xff]  }
 0x404   :  { %6817 = vmatpush1.bf16.msra.mxu0 %v15511_v22  ;;  %v15573_v22 = vld [vmem:[#allocation2 + $0x1a24] ss:$24 sps:$4 sm:$0xff]  }
 0x405   :  { %8728 = vmatpush1.bf16.msra.mxu1 %v15508_v50  ;;  %6827 = vmatprep.subr.bf16.mxu0 %v15519_v49  ;;  %v15570_v50 = vld [vmem:[#allocation2 + $0x2194] ss:$24 sps:$4 sm:$0xff]   ;;  %v15571_v49 = vld [vmem:[#allocation2 + $0x1a20] ss:$24 sps:$4 sm:$0xff]  }
 0x406   :  { %8729 = vmatprep.subr.bf16.mxu1 %v15516_v27  ;;  %v15568_v27 = vld [vmem:[#allocation2 + $0x2190] ss:$24 sps:$4 sm:$0xff]  }
 0x407   :  { %6819 = vmatmul.mubr.bf16.vlgmr.msra.gmra.mrb[16].mxu0 %v16798_v15 }
 0x408   :  { %6828 = vmatpush1.bf16.msra.mxu0 %v15517_v29  ;;  %6859 = vmatprep.mubr.bf16.mxu0 %v16807_v19  ;;  %v15579_v29 = vld [vmem:[#allocation2 + $0x1a54] ss:$24 sps:$4 sm:$0xff]  }
 0x409   :  { %8730 = vmatpush1.bf16.msra.mxu1 %v15514_v28  ;;  %6829 = vmatprep.subr.bf16.mxu0 %v15525_v31  ;;  %v15576_v28 = vld [vmem:[#allocation2 + $0x21c4] ss:$24 sps:$4 sm:$0xff]   ;;  %v15577_v31 = vld [vmem:[#allocation2 + $0x1a50] ss:$24 sps:$4 sm:$0xff]  }
 0x40a   :  { %8731 = vmatprep.subr.bf16.mxu1 %v15522_v30  ;;  %v15574_v30 = vld [vmem:[#allocation2 + $0x21c0] ss:$24 sps:$4 sm:$0xff]  }
 0x40c   :  { %6830 = vmatpush1.bf16.msra.mxu0 %v15523_v33  ;;  %v15585_v33 = vld [vmem:[#allocation2 + $0x1a84] ss:$24 sps:$4 sm:$0xff]  }
 0x40d   :  { %8732 = vmatpush1.bf16.msra.mxu1 %v15520_v18  ;;  %6831 = vmatprep.subr.bf16.mxu0 %v15531_v37  ;;  %v15582_v18 = vld [vmem:[#allocation2 + $0x21f4] ss:$24 sps:$4 sm:$0xff]   ;;  %v15583_v37 = vld [vmem:[#allocation2 + $0x1a80] ss:$24 sps:$4 sm:$0xff]  }
 0x40e   :  { %8733 = vmatprep.subr.bf16.mxu1 %v15528_v36  ;;  %v15580_v36 = vld [vmem:[#allocation2 + $0x21f0] ss:$24 sps:$4 sm:$0xff]  }
 0x410   :  { %6832 = vmatpush1.bf16.msra.mxu0 %v15529_v39  ;;  %v15591_v39 = vld [vmem:[#allocation2 + $0x1ab4] ss:$24 sps:$4 sm:$0xff]  }
 0x411   :  { %8734 = vmatpush1.bf16.msra.mxu1 %v15526_v38  ;;  %6833 = vmatprep.subr.bf16.mxu0 %v15537_v41  ;;  %v15588_v38 = vld [vmem:[#allocation2 + $0x2224] ss:$24 sps:$4 sm:$0xff]   ;;  %v15589_v41 = vld [vmem:[#allocation2 + $0x1ab0] ss:$24 sps:$4 sm:$0xff]  }
 0x412   :  { %8735 = vmatprep.subr.bf16.mxu1 %v15534_v40  ;;  %v15586_v40 = vld [vmem:[#allocation2 + $0x2220] ss:$24 sps:$4 sm:$0xff]  }
 0x414   :  { %6834 = vmatpush1.bf16.msra.mxu0 %v15535_v43  ;;  %v15597_v43 = vld [vmem:[#allocation2 + $0x1ae4] ss:$24 sps:$4 sm:$0xff]  }
 0x415   :  { %8736 = vmatpush1.bf16.msra.mxu1 %v15532_v42  ;;  %6835 = vmatprep.subr.bf16.mxu0 %v15543_v53  ;;  %v15594_v42 = vld [vmem:[#allocation2 + $0x2254] ss:$24 sps:$4 sm:$0xff]   ;;  %v15595_v53 = vld [vmem:[#allocation2 + $0x1ae0] ss:$24 sps:$4 sm:$0xff]  }
 0x416   :  { %8737 = vmatprep.subr.bf16.mxu1 %v15540_v44  ;;  %v15592_v44 = vld [vmem:[#allocation2 + $0x2250] ss:$24 sps:$4 sm:$0xff]  }
 0x418   :  { %6836 = vmatpush1.bf16.msra.mxu0 %v15541_v56  ;;  %v15603_v56 = vld [vmem:[#allocation2 + $0x1b14] ss:$24 sps:$4 sm:$0xff]  }
 0x419   :  { %8738 = vmatpush1.bf16.msra.mxu1 %v15538_v55  ;;  %6837 = vmatprep.subr.bf16.mxu0 %v15549_v58  ;;  %v15600_v55 = vld [vmem:[#allocation2 + $0x2284] ss:$24 sps:$4 sm:$0xff]   ;;  %v15601_v58 = vld [vmem:[#allocation2 + $0x1b10] ss:$24 sps:$4 sm:$0xff]  }
 0x41a   :  { %8739 = vmatprep.subr.bf16.mxu1 %v15546_v57  ;;  %v15598_v57 = vld [vmem:[#allocation2 + $0x2280] ss:$24 sps:$4 sm:$0xff]  }
 0x41c   :  { %6838 = vmatpush1.bf16.msra.mxu0 %v15547_v60  ;;  %v15609_v60 = vld [vmem:[#allocation2 + $0x1b44] ss:$24 sps:$4 sm:$0xff]  }
 0x41d   :  { %8740 = vmatpush1.bf16.msra.mxu1 %v15544_v59  ;;  %6839 = vmatprep.subr.bf16.mxu0 %v15555_v62  ;;  %v15606_v59 = vld [vmem:[#allocation2 + $0x22b4] ss:$24 sps:$4 sm:$0xff]   ;;  %v15607_v62 = vld [vmem:[#allocation2 + $0x1b40] ss:$24 sps:$4 sm:$0xff]  }
 0x41e   :  { %8741 = vmatprep.subr.bf16.mxu1 %v15552_v61  ;;  %v15604_v61 = vld [vmem:[#allocation2 + $0x22b0] ss:$24 sps:$4 sm:$0xff]  }
 0x420   :  { %6840 = vmatpush1.bf16.msra.mxu0 %v15553_v1  ;;  %v15615_v1 = vld [vmem:[#allocation2 + $0x1b74] ss:$24 sps:$4 sm:$0xff]  }
 0x421   :  { %8742 = vmatpush1.bf16.msra.mxu1 %v15550_v63  ;;  %6841 = vmatprep.subr.bf16.mxu0 %v15561_v4  ;;  %v15612_v63 = vld [vmem:[#allocation2 + $0x22e4] ss:$24 sps:$4 sm:$0xff]   ;;  %v15613_v4 = vld [vmem:[#allocation2 + $0x1b70] ss:$24 sps:$4 sm:$0xff]  }
 0x422   :  { %8743 = vmatprep.subr.bf16.mxu1 %v15558_v2  ;;  %v15610_v2 = vld [vmem:[#allocation2 + $0x22e0] ss:$24 sps:$4 sm:$0xff]  }
 0x424   :  { %6842 = vmatpush1.bf16.msra.mxu0 %v15559_v7  ;;  %v15627_v7 = vld [vmem:[#allocation2 + $0x1b9c] ss:$24 sps:$4 sm:$0xff]  }
 0x425   :  { %8744 = vmatpush1.bf16.msra.mxu1 %v15556_v5  ;;  %6843 = vmatprep.subr.bf16.mxu0 %v15567_v10  ;;  %v15618_v5 = vld [vmem:[#allocation2 + $0x2314] ss:$24 sps:$4 sm:$0xff]   ;;  %v15621_v10 = vld [vmem:[#allocation2 + $0x2344] ss:$24 sps:$4 sm:$0xff]  }
 0x426   :  { %8745 = vmatprep.subr.bf16.mxu1 %v15564_v9  ;;  %v15616_v9 = vld [vmem:[#allocation2 + $0x2310] ss:$24 sps:$4 sm:$0xff]  }
 0x428   :  { %6844 = vmatpush1.bf16.msra.mxu0 %v15565_v21  ;;  %v15624_v21 = vld [vmem:[#allocation2 + $0x2374] ss:$24 sps:$4 sm:$0xff]  }
 0x429   :  { %8746 = vmatpush1.bf16.msra.mxu1 %v15562_v17  ;;  %6845 = vmatprep.subr.bf16.mxu0 %v15573_v22  ;;  %v15619_v17 = vld [vmem:[#allocation2 + $0x2340] ss:$24 sps:$4 sm:$0xff]  }
 0x42a   :  { %8756 = vmatprep.subr.bf16.mxu1 %v15570_v50  ;;  %v15622_v50 = vld [vmem:[#allocation2 + $0x2370] ss:$24 sps:$4 sm:$0xff]  }
 0x42b   :  { %v15625_v22 = vld [vmem:[#allocation2 + $0x1b98] ss:$24 sps:$4 sm:$0xff]  }
 0x42c   :  { %8748 = vmatmul.mubr.bf16.vlgmr.msra.gmra.mrb[24].mxu1 %v16798_v15  ;;  %6846 = vmatpush1.bf16.msra.mxu0 %v15571_v49  ;;  %v15633_v49 = vld [vmem:[#allocation2 + $0x1bcc] ss:$24 sps:$4 sm:$0xff]  }
 0x42d   :  { %8757 = vmatpush1.bf16.msra.mxu1 %v15568_v27  ;;  %6847 = vmatprep.subr.bf16.mxu0 %v15579_v29  ;;  %v15630_v27 = vld [vmem:[#allocation2 + $0x23a4] ss:$24 sps:$4 sm:$0xff]   ;;  %v15631_v29 = vld [vmem:[#allocation2 + $0x1bc8] ss:$24 sps:$4 sm:$0xff]  }
 0x42e   :  { %8758 = vmatprep.subr.bf16.mxu1 %v15576_v28  ;;  %8788 = vmatprep.mubr.bf16.mxu1 %v16807_v19  ;;  %v15628_v28 = vld [vmem:[#allocation2 + $0x23a0] ss:$24 sps:$4 sm:$0xff]  }
 0x430   :  { %6848 = vmatpush1.bf16.msra.mxu0 %v15577_v31  ;;  %v15639_v31 = vld [vmem:[#allocation2 + $0x1bfc] ss:$24 sps:$4 sm:$0xff]  }
 0x431   :  { %8759 = vmatpush1.bf16.msra.mxu1 %v15574_v30  ;;  %6849 = vmatprep.subr.bf16.mxu0 %v15585_v33  ;;  %v15636_v30 = vld [vmem:[#allocation2 + $0x23d4] ss:$24 sps:$4 sm:$0xff]   ;;  %v15637_v33 = vld [vmem:[#allocation2 + $0x1bf8] ss:$24 sps:$4 sm:$0xff]  }
 0x432   :  { %8760 = vmatprep.subr.bf16.mxu1 %v15582_v18  ;;  %v15634_v18 = vld [vmem:[#allocation2 + $0x23d0] ss:$24 sps:$4 sm:$0xff]  }
 0x434   :  { %6850 = vmatpush1.bf16.msra.mxu0 %v15583_v37  ;;  %v15645_v37 = vld [vmem:[#allocation2 + $0x1c2c] ss:$24 sps:$4 sm:$0xff]  }
 0x435   :  { %8761 = vmatpush1.bf16.msra.mxu1 %v15580_v36  ;;  %6851 = vmatprep.subr.bf16.mxu0 %v15591_v39  ;;  %v15642_v36 = vld [vmem:[#allocation2 + $0x2404] ss:$24 sps:$4 sm:$0xff]  }
 0x436   :  { %8762 = vmatprep.subr.bf16.mxu1 %v15588_v38 }
 0x438   :  { %6852 = vmatpush1.bf16.msra.mxu0 %v15589_v41  ;;  %v15643_v41 = vld [vmem:[#allocation2 + $0x1c28] ss:$24 sps:$4 sm:$0xff]  }
 0x439   :  { %8763 = vmatpush1.bf16.msra.mxu1 %v15586_v40  ;;  %6853 = vmatprep.subr.bf16.mxu0 %v15597_v43  ;;  %v15640_v40 = vld [vmem:[#allocation2 + $0x2400] ss:$24 sps:$4 sm:$0xff]   ;;  %v15648_v43 = vld [vmem:[#allocation2 + $0x2434] ss:$24 sps:$4 sm:$0xff]  }
 0x43a   :  { %8764 = vmatprep.subr.bf16.mxu1 %v15594_v42 }
 0x43c   :  { %6854 = vmatpush1.bf16.msra.mxu0 %v15595_v53  ;;  %v15646_v53 = vld [vmem:[#allocation2 + $0x2430] ss:$24 sps:$4 sm:$0xff]  }
 0x43d   :  { %8765 = vmatpush1.bf16.msra.mxu1 %v15592_v44  ;;  %6855 = vmatprep.subr.bf16.mxu0 %v15603_v56  ;;  %v15651_v44 = vld [vmem:[#allocation2 + $0x1c5c] ss:$24 sps:$4 sm:$0xff]  }
 0x43e   :  { %8766 = vmatprep.subr.bf16.mxu1 %v15600_v55  ;;  %v15649_v55 = vld [vmem:[#allocation2 + $0x1c58] ss:$24 sps:$4 sm:$0xff]   ;;  %v15654_v56 = vld [vmem:[#allocation2 + $0x2464] ss:$24 sps:$4 sm:$0xff]  }
 0x440   :  { %6856 = vmatpush1.bf16.msra.mxu0 %v15601_v58  ;;  %v15652_v58 = vld [vmem:[#allocation2 + $0x2460] ss:$24 sps:$4 sm:$0xff]  }
 0x441   :  { %8767 = vmatpush1.bf16.msra.mxu1 %v15598_v57  ;;  %6857 = vmatprep.subr.bf16.mxu0 %v15609_v60  ;;  %v15657_v57 = vld [vmem:[#allocation2 + $0x1c8c] ss:$24 sps:$4 sm:$0xff]   ;;  %v15660_v60 = vld [vmem:[#allocation2 + $0x1cbc] ss:$24 sps:$4 sm:$0xff]  }
 0x442   :  { %8768 = vmatprep.subr.bf16.mxu1 %v15606_v59  ;;  %v15655_v59 = vld [vmem:[#allocation2 + $0x1c88] ss:$24 sps:$4 sm:$0xff]  }
 0x444   :  { %6858 = vmatpush1.bf16.msra.mxu0 %v15607_v62  ;;  %v15658_v62 = vld [vmem:[#allocation2 + $0x1cb8] ss:$24 sps:$4 sm:$0xff]  }
 0x445   :  { %8769 = vmatpush1.bf16.msra.mxu1 %v15604_v61  ;;  %6868 = vmatprep.subr.bf16.mxu0 %v15615_v1  ;;  %v15666_v61 = vld [vmem:[#allocation2 + $0x2494] ss:$24 sps:$4 sm:$0xff]  }
 0x446   :  { %8770 = vmatprep.subr.bf16.mxu1 %v15612_v63  ;;  %v15664_v63 = vld [vmem:[#allocation2 + $0x2490] ss:$24 sps:$4 sm:$0xff]   ;;  %v15663_v1 = vld [vmem:[#allocation2 + $0x1cec] ss:$24 sps:$4 sm:$0xff]  }
 0x447   :  { %6860 = vmatmul.mubr.bf16.vlgmr.msra.gmra.mrb[16].mxu0 %v16815_v23 }
 0x448   :  { %6869 = vmatpush1.bf16.msra.mxu0 %v15613_v4  ;;  %6900 = vmatprep.mubr.bf16.mxu0 %v16644_v0  ;;  %v15661_v4 = vld [vmem:[#allocation2 + $0x1ce8] ss:$24 sps:$4 sm:$0xff]  }
 0x449   :  { %8771 = vmatpush1.bf16.msra.mxu1 %v15610_v2  ;;  %8838 = vmatprep.subr.bf16.mxu0 %v15627_v7  ;;  %v15672_v2 = vld [vmem:[#allocation2 + $0x1ba4] ss:$24 sps:$4 sm:$0xff]   ;;  %v15667_v7 = vld [vmem:[#allocation2 + $0x1d18] ss:$24 sps:$4 sm:$0xff]  }
 0x44a   :  { %8772 = vmatprep.subr.bf16.mxu1 %v15618_v5  ;;  %v15669_v5 = vld [vmem:[#allocation2 + $0x1d1c] ss:$24 sps:$4 sm:$0xff]  }
 0x44d   :  { %8773 = vmatpush1.bf16.msra.mxu1 %v15616_v9  ;;  %v15675_v9 = vld [vmem:[#allocation2 + $0x1d4c] ss:$24 sps:$4 sm:$0xff]  }
 0x44e   :  { %8774 = vmatprep.subr.bf16.mxu1 %v15621_v10  ;;  %v15670_v10 = vld [vmem:[#allocation2 + $0x1ba0] ss:$24 sps:$4 sm:$0xff]  }
 0x451   :  { %8775 = vmatpush1.bf16.msra.mxu1 %v15619_v17  ;;  %v15673_v17 = vld [vmem:[#allocation2 + $0x1d48] ss:$24 sps:$4 sm:$0xff]  }
 0x452   :  { %8776 = vmatprep.subr.bf16.mxu1 %v15624_v21  ;;  %v15678_v21 = vld [vmem:[#allocation2 + $0x1bd4] ss:$24 sps:$4 sm:$0xff]  }
 0x453   :  { %13022 = vmatmul.mubr.msk.bf16.vlgmr.msra.gmra.mrb[16].mxu0 %vm1899_vm0, %v16913_v11 }
 0x454   :  { %8839 = vmatpush1.bf16.msra.mxu0 %v15625_v22  ;;  %8870 = vmatprep.mubr.bf16.mxu0 %v16777_v52  ;;  %v16961_v22 = vld [vmem:[%s18203_s0 + $0x18] ss:$0 sps:$4 sm:$0xff]  }
 0x455   :  { %8777 = vmatpush1.bf16.msra.mxu1 %v15622_v50  ;;  %8840 = vmatprep.subr.bf16.mxu0 %v15633_v49  ;;  %v15681_v50 = vld [vmem:[#allocation2 + $0x1d7c] ss:$24 sps:$4 sm:$0xff]   ;;  %v15679_v49 = vld [vmem:[#allocation2 + $0x1d78] ss:$24 sps:$4 sm:$0xff]  }
 0x456   :  { %8778 = vmatprep.subr.bf16.mxu1 %v15630_v27  ;;  %v15676_v27 = vld [vmem:[#allocation2 + $0x1bd0] ss:$24 sps:$4 sm:$0xff]  }
 0x458   :  { %8841 = vmatpush1.bf16.msra.mxu0 %v15631_v29  ;;  %v15687_v29 = vld [vmem:[#allocation2 + $0x1dac] ss:$24 sps:$4 sm:$0xff]  }
 0x459   :  { %8779 = vmatpush1.bf16.msra.mxu1 %v15628_v28  ;;  %8842 = vmatprep.subr.bf16.mxu0 %v15639_v31  ;;  %v15684_v28 = vld [vmem:[#allocation2 + $0x1c04] ss:$24 sps:$4 sm:$0xff]   ;;  %v15685_v31 = vld [vmem:[#allocation2 + $0x1da8] ss:$24 sps:$4 sm:$0xff]  }
 0x45a   :  { %8780 = vmatprep.subr.bf16.mxu1 %v15636_v30  ;;  %v16952_v38 = vpop.f32.mrb[12].mxu0  ;;  %v15682_v30 = vld [vmem:[#allocation2 + $0x1c00] ss:$24 sps:$4 sm:$0xff]  }
 0x45b   :  { %v16954_v11 = vpop.f32.mrb[13].mxu0 }
 0x45c   :  { %8843 = vmatpush1.bf16.msra.mxu0 %v15637_v33  ;;  %v6578_v39 = vpop.f32.mrb[14].mxu0  ;;  %v15693_v33 = vld [vmem:[#allocation2 + $0x1ddc] ss:$24 sps:$4 sm:$0xff]  }
 0x45d   :  { %8781 = vmatpush1.bf16.msra.mxu1 %v15634_v18  ;;  %v6579_v42 = vpop.f32.mrb[15].mxu0  ;;  %8844 = vmatprep.subr.bf16.mxu0 %v15645_v37  ;;  %v15690_v18 = vld [vmem:[#allocation2 + $0x1c34] ss:$24 sps:$4 sm:$0xff]  }
 0x45e   :  { %8782 = vmatprep.subr.bf16.mxu1 %v15642_v36 }
 0x460   :  { %8845 = vmatpush1.bf16.msra.mxu0 %v15643_v41  ;;  %v15691_v41 = vld [vmem:[#allocation2 + $0x1dd8] ss:$24 sps:$4 sm:$0xff]  }
 0x461   :  { %8783 = vmatpush1.bf16.msra.mxu1 %v15640_v40  ;;  %8846 = vmatprep.subr.bf16.mxu0 %v15651_v44  ;;  %v15688_v40 = vld [vmem:[#allocation2 + $0x1c30] ss:$24 sps:$4 sm:$0xff]   ;;  %v15694_v44 = vld [vmem:[#allocation2 + $0x1c60] ss:$24 sps:$4 sm:$0xff]  }
 0x462   :  { %8784 = vmatprep.subr.bf16.mxu1 %v15648_v43  ;;  %v15699_v43 = vld [vmem:[#allocation2 + $0x1e0c] ss:$24 sps:$4 sm:$0xff]  }
 0x464   :  { %8847 = vmatpush1.bf16.msra.mxu0 %v15649_v55  ;;  %v15702_v55 = vld [vmem:[#allocation2 + $0x1c94] ss:$24 sps:$4 sm:$0xff]  }
 0x465   :  { %8785 = vmatpush1.bf16.msra.mxu1 %v15646_v53  ;;  %8848 = vmatprep.subr.bf16.mxu0 %v15657_v57  ;;  %v15697_v53 = vld [vmem:[#allocation2 + $0x1e08] ss:$24 sps:$4 sm:$0xff]  }
 0x466   :  { %8786 = vmatprep.subr.bf16.mxu1 %v15654_v56  ;;  %v15705_v56 = vld [vmem:[#allocation2 + $0x1e3c] ss:$24 sps:$4 sm:$0xff]   ;;  %v15700_v57 = vld [vmem:[#allocation2 + $0x1c90] ss:$24 sps:$4 sm:$0xff]  }
 0x468   :  { %8849 = vmatpush1.bf16.msra.mxu0 %v15655_v59  ;;  %v15708_v59 = vld [vmem:[#allocation2 + $0x1cc4] ss:$24 sps:$4 sm:$0xff]  }
 0x469   :  { %8787 = vmatpush1.bf16.msra.mxu1 %v15652_v58  ;;  %8850 = vmatprep.subr.bf16.mxu0 %v15660_v60  ;;  %v15703_v58 = vld [vmem:[#allocation2 + $0x1e38] ss:$24 sps:$4 sm:$0xff]   ;;  %v15711_v60 = vld [vmem:[#allocation2 + $0x1e6c] ss:$24 sps:$4 sm:$0xff]  }
 0x46a   :  { %8797 = vmatprep.subr.bf16.mxu1 %v15666_v61  ;;  %v15706_v61 = vld [vmem:[#allocation2 + $0x1cc0] ss:$24 sps:$4 sm:$0xff]  }
 0x46c   :  { %8789 = vmatmul.mubr.bf16.vlgmr.msra.gmra.mrb[24].mxu1 %v16815_v23  ;;  %8851 = vmatpush1.bf16.msra.mxu0 %v15658_v62  ;;  %v15709_v62 = vld [vmem:[#allocation2 + $0x1e68] ss:$24 sps:$4 sm:$0xff]  }
 0x46d   :  { %8798 = vmatpush1.bf16.msra.mxu1 %v15664_v63  ;;  %8852 = vmatprep.subr.bf16.mxu0 %v15663_v1  ;;  %v15714_v63 = vld [vmem:[#allocation2 + $0x1cf4] ss:$24 sps:$4 sm:$0xff]  }
 0x46e   :  { %8829 = vmatprep.mubr.bf16.mxu1 %v16644_v0  ;;  %9002 = vmatprep.subr.bf16.mxu1 %v15672_v2  ;;  %v15717_v1 = vld [vmem:[#allocation2 + $0x1e9c] ss:$24 sps:$4 sm:$0xff]   ;;  %v15712_v2 = vld [vmem:[#allocation2 + $0x1cf0] ss:$24 sps:$4 sm:$0xff]  }
 0x470   :  { %8853 = vmatpush1.bf16.msra.mxu0 %v15661_v4  ;;  %v15715_v4 = vld [vmem:[#allocation2 + $0x1e98] ss:$24 sps:$4 sm:$0xff]  }
 0x471   :  { %8854 = vmatprep.subr.bf16.mxu0 %v15669_v5  ;;  %v15720_v5 = vld [vmem:[#allocation2 + $0x1d24] ss:$24 sps:$4 sm:$0xff]  }
 0x474   :  { %8855 = vmatpush1.bf16.msra.mxu0 %v15667_v7  ;;  %v15723_v7 = vld [vmem:[#allocation2 + $0x1ecc] ss:$24 sps:$4 sm:$0xff]  }
 0x475   :  { %8856 = vmatprep.subr.bf16.mxu0 %v15675_v9  ;;  %v15718_v9 = vld [vmem:[#allocation2 + $0x1d20] ss:$24 sps:$4 sm:$0xff]  }
 0x478   :  { %13317 = vmatmul.mubr.msk.bf16.vlgmr.msra.gmra.mrb[24].mxu1 %vm1899_vm0, %v16961_v22  ;;  %8857 = vmatpush1.bf16.msra.mxu0 %v15673_v17  ;;  %v15726_v17 = vld [vmem:[#allocation2 + $0x1d54] ss:$24 sps:$4 sm:$0xff]  }
 0x479   :  { %9003 = vmatpush1.bf16.msra.mxu1 %v15670_v10  ;;  %8858 = vmatprep.subr.bf16.mxu0 %v15681_v50  ;;  %v15721_v10 = vld [vmem:[#allocation2 + $0x1ec8] ss:$24 sps:$4 sm:$0xff]  }
 0x47a   :  { %9004 = vmatprep.subr.bf16.mxu1 %v15678_v21  ;;  %9034 = vmatprep.mubr.bf16.mxu1 %v16777_v52  ;;  %v15696_v52 = vld [vmem:[#allocation2 + $0x1c64] ss:$24 sps:$4 sm:$0xff]   ;;  %v15724_v50 = vld [vmem:[#allocation2 + $0x1d50] ss:$24 sps:$4 sm:$0xff]  }
 0x47b   :  { %v15729_v21 = vld [vmem:[#allocation2 + $0x1efc] ss:$24 sps:$4 sm:$0xff]  }
 0x47c   :  { %8859 = vmatpush1.bf16.msra.mxu0 %v15679_v49  ;;  %v15732_v49 = vld [vmem:[#allocation2 + $0x1d84] ss:$24 sps:$4 sm:$0xff]  }
 0x47d   :  { %9005 = vmatpush1.bf16.msra.mxu1 %v15676_v27  ;;  %8860 = vmatprep.subr.bf16.mxu0 %v15687_v29  ;;  %v15727_v27 = vld [vmem:[#allocation2 + $0x1ef8] ss:$24 sps:$4 sm:$0xff]  }
 0x47e   :  { %9006 = vmatprep.subr.bf16.mxu1 %v15684_v28  ;;  %v15735_v28 = vld [vmem:[#allocation2 + $0x1f2c] ss:$24 sps:$4 sm:$0xff]   ;;  %v15730_v29 = vld [vmem:[#allocation2 + $0x1d80] ss:$24 sps:$4 sm:$0xff]  }
 0x47f   :  { %v16966_v36 = vpop.f32.mrb[20].mxu1 }
 0x480   :  { %v16968_v37 = vpop.f32.mrb[21].mxu1  ;;  %8861 = vmatpush1.bf16.msra.mxu0 %v15685_v31  ;;  %v15738_v31 = vld [vmem:[#allocation2 + $0x1db4] ss:$24 sps:$4 sm:$0xff]  }
 0x481   :  { %9007 = vmatpush1.bf16.msra.mxu1 %v15682_v30  ;;  %v6742_v39 = vpop.f32.mrb[22].mxu1  ;;  %8862 = vmatprep.subr.bf16.mxu0 %v15693_v33  ;;  %v15733_v30 = vld [vmem:[#allocation2 + $0x1f28] ss:$24 sps:$4 sm:$0xff]  }
 0x482   :  { %v6743_v42 = vpop.f32.mrb[23].mxu1  ;;  %9008 = vmatprep.subr.bf16.mxu1 %v15690_v18  ;;  %v15741_v18 = vld [vmem:[#allocation2 + $0x1f5c] ss:$24 sps:$4 sm:$0xff]   ;;  %v15736_v33 = vld [vmem:[#allocation2 + $0x1db0] ss:$24 sps:$4 sm:$0xff]  }
 0x483   :  { %v15739_v39 = vld [vmem:[#allocation2 + $0x1f58] ss:$24 sps:$4 sm:$0xff]  }
 0x484   :  { %8863 = vmatpush1.bf16.msra.mxu0 %v15691_v41  ;;  %v15747_v41 = vld [vmem:[#allocation2 + $0x1f8c] ss:$24 sps:$4 sm:$0xff]   ;;  %v15742_v42 = vld [vmem:[#allocation2 + $0x1de0] ss:$24 sps:$4 sm:$0xff]  }
 0x485   :  { %9009 = vmatpush1.bf16.msra.mxu1 %v15688_v40  ;;  %8864 = vmatprep.subr.bf16.mxu0 %v15699_v43  ;;  %v15744_v40 = vld [vmem:[#allocation2 + $0x1de4] ss:$24 sps:$4 sm:$0xff]   ;;  %v15750_v43 = vld [vmem:[#allocation2 + $0x1e14] ss:$24 sps:$4 sm:$0xff]  }
 0x486   :  { %9010 = vmatprep.subr.bf16.mxu1 %v15696_v52  ;;  %v15745_v52 = vld [vmem:[#allocation2 + $0x1f88] ss:$24 sps:$4 sm:$0xff]  }
 0x488   :  { %8865 = vmatpush1.bf16.msra.mxu0 %v15697_v53  ;;  %v15748_v53 = vld [vmem:[#allocation2 + $0x1e10] ss:$24 sps:$4 sm:$0xff]  }
 0x489   :  { %9011 = vmatpush1.bf16.msra.mxu1 %v15694_v44  ;;  %8866 = vmatprep.subr.bf16.mxu0 %v15705_v56  ;;  %v15753_v44 = vld [vmem:[#allocation2 + $0x1fbc] ss:$24 sps:$4 sm:$0xff]  }
 0x48a   :  { %9012 = vmatprep.subr.bf16.mxu1 %v15702_v55  ;;  %v15751_v55 = vld [vmem:[#allocation2 + $0x1fb8] ss:$24 sps:$4 sm:$0xff]   ;;  %v15756_v56 = vld [vmem:[#allocation2 + $0x1e44] ss:$24 sps:$4 sm:$0xff]  }
 0x48c   :  { %8867 = vmatpush1.bf16.msra.mxu0 %v15703_v58  ;;  %v15754_v58 = vld [vmem:[#allocation2 + $0x1e40] ss:$24 sps:$4 sm:$0xff]  }
 0x48d   :  { %9013 = vmatpush1.bf16.msra.mxu1 %v15700_v57  ;;  %8868 = vmatprep.subr.bf16.mxu0 %v15711_v60  ;;  %v15759_v57 = vld [vmem:[#allocation2 + $0x1fec] ss:$24 sps:$4 sm:$0xff]  }
 0x48e   :  { %9014 = vmatprep.subr.bf16.mxu1 %v15708_v59  ;;  %v15757_v59 = vld [vmem:[#allocation2 + $0x1fe8] ss:$24 sps:$4 sm:$0xff]   ;;  %v15762_v60 = vld [vmem:[#allocation2 + $0x1e74] ss:$24 sps:$4 sm:$0xff]  }
 0x490   :  { %8869 = vmatpush1.bf16.msra.mxu0 %v15709_v62  ;;  %v15760_v62 = vld [vmem:[#allocation2 + $0x1e70] ss:$24 sps:$4 sm:$0xff]  }
 0x491   :  { %9015 = vmatpush1.bf16.msra.mxu1 %v15706_v61  ;;  %8879 = vmatprep.subr.bf16.mxu0 %v15717_v1  ;;  %v15765_v61 = vld [vmem:[#allocation2 + $0x201c] ss:$24 sps:$4 sm:$0xff]  }
 0x492   :  { %9016 = vmatprep.subr.bf16.mxu1 %v15714_v63  ;;  %v15763_v63 = vld [vmem:[#allocation2 + $0x2018] ss:$24 sps:$4 sm:$0xff]   ;;  %v15768_v1 = vld [vmem:[#allocation2 + $0x1ea4] ss:$24 sps:$4 sm:$0xff]  }
 0x493   :  { %8871 = vmatmul.mubr.bf16.vlgmr.msra.gmra.mrb[20].mxu0 %v16781_v8 }
 0x494   :  { %8880 = vmatpush1.bf16.msra.mxu0 %v15715_v4  ;;  %8911 = vmatprep.mubr.bf16.mxu0 %v16792_v35  ;;  %v15766_v4 = vld [vmem:[#allocation2 + $0x1ea0] ss:$24 sps:$4 sm:$0xff]  }
 0x495   :  { %9017 = vmatpush1.bf16.msra.mxu1 %v15712_v2  ;;  %8881 = vmatprep.subr.bf16.mxu0 %v15723_v7  ;;  %v15771_v2 = vld [vmem:[#allocation2 + $0x204c] ss:$24 sps:$4 sm:$0xff]  }
 0x496   :  { %9018 = vmatprep.subr.bf16.mxu1 %v15720_v5  ;;  %v15769_v5 = vld [vmem:[#allocation2 + $0x2048] ss:$24 sps:$4 sm:$0xff]   ;;  %v15774_v7 = vld [vmem:[#allocation2 + $0x1ed4] ss:$24 sps:$4 sm:$0xff]  }
 0x498   :  { %8882 = vmatpush1.bf16.msra.mxu0 %v15721_v10  ;;  %v15772_v10 = vld [vmem:[#allocation2 + $0x1ed0] ss:$24 sps:$4 sm:$0xff]  }
 0x499   :  { %9019 = vmatpush1.bf16.msra.mxu1 %v15718_v9  ;;  %8883 = vmatprep.subr.bf16.mxu0 %v15729_v21  ;;  %v15777_v9 = vld [vmem:[#allocation2 + $0x207c] ss:$24 sps:$4 sm:$0xff]  }
 0x49a   :  { %9020 = vmatprep.subr.bf16.mxu1 %v15726_v17  ;;  %v15775_v17 = vld [vmem:[#allocation2 + $0x2078] ss:$24 sps:$4 sm:$0xff]   ;;  %v15780_v21 = vld [vmem:[#allocation2 + $0x1f04] ss:$24 sps:$4 sm:$0xff]  }
 0x49c   :  { %8884 = vmatpush1.bf16.msra.mxu0 %v15727_v27  ;;  %v15778_v27 = vld [vmem:[#allocation2 + $0x1f00] ss:$24 sps:$4 sm:$0xff]  }
 0x49d   :  { %9021 = vmatpush1.bf16.msra.mxu1 %v15724_v50  ;;  %8885 = vmatprep.subr.bf16.mxu0 %v15735_v28  ;;  %v15783_v50 = vld [vmem:[#allocation2 + $0x20ac] ss:$24 sps:$4 sm:$0xff]  }
 0x49e   :  { %9022 = vmatprep.subr.bf16.mxu1 %v15732_v49  ;;  %v15781_v49 = vld [vmem:[#allocation2 + $0x20a8] ss:$24 sps:$4 sm:$0xff]   ;;  %v15786_v28 = vld [vmem:[#allocation2 + $0x1f34] ss:$24 sps:$4 sm:$0xff]  }
 0x4a0   :  { %8886 = vmatpush1.bf16.msra.mxu0 %v15733_v30  ;;  %v15787_v30 = vld [vmem:[#allocation2 + $0x20d8] ss:$24 sps:$4 sm:$0xff]  }
 0x4a1   :  { %9023 = vmatpush1.bf16.msra.mxu1 %v15730_v29  ;;  %8887 = vmatprep.subr.bf16.mxu0 %v15741_v18  ;;  %v15789_v29 = vld [vmem:[#allocation2 + $0x20dc] ss:$24 sps:$4 sm:$0xff]   ;;  %v15795_v18 = vld [vmem:[#allocation2 + $0x210c] ss:$24 sps:$4 sm:$0xff]  }
 0x4a2   :  { %9024 = vmatprep.subr.bf16.mxu1 %v15738_v31  ;;  %v15792_v31 = vld [vmem:[#allocation2 + $0x1f64] ss:$24 sps:$4 sm:$0xff]  }
 0x4a4   :  { %8888 = vmatpush1.bf16.msra.mxu0 %v15739_v39  ;;  %v15798_v39 = vld [vmem:[#allocation2 + $0x1f94] ss:$24 sps:$4 sm:$0xff]  }
 0x4a5   :  { %9025 = vmatpush1.bf16.msra.mxu1 %v15736_v33  ;;  %8889 = vmatprep.subr.bf16.mxu0 %v15747_v41  ;;  %v15790_v33 = vld [vmem:[#allocation2 + $0x1f60] ss:$24 sps:$4 sm:$0xff]   ;;  %v15796_v41 = vld [vmem:[#allocation2 + $0x1f90] ss:$24 sps:$4 sm:$0xff]  }
 0x4a6   :  { %9026 = vmatprep.subr.bf16.mxu1 %v15744_v40  ;;  %v15801_v40 = vld [vmem:[#allocation2 + $0x213c] ss:$24 sps:$4 sm:$0xff]  }
 0x4a8   :  { %8890 = vmatpush1.bf16.msra.mxu0 %v15745_v52  ;;  %v15804_v52 = vld [vmem:[#allocation2 + $0x1fc4] ss:$24 sps:$4 sm:$0xff]  }
 0x4a9   :  { %9027 = vmatpush1.bf16.msra.mxu1 %v15742_v42  ;;  %8891 = vmatprep.subr.bf16.mxu0 %v15753_v44  ;;  %v15799_v42 = vld [vmem:[#allocation2 + $0x2138] ss:$24 sps:$4 sm:$0xff]  }
 0x4aa   :  { %9028 = vmatprep.subr.bf16.mxu1 %v15750_v43  ;;  %v15807_v43 = vld [vmem:[#allocation2 + $0x216c] ss:$24 sps:$4 sm:$0xff]   ;;  %v15802_v44 = vld [vmem:[#allocation2 + $0x1fc0] ss:$24 sps:$4 sm:$0xff]  }
 0x4ac   :  { %8892 = vmatpush1.bf16.msra.mxu0 %v15751_v55  ;;  %v15810_v55 = vld [vmem:[#allocation2 + $0x1ff4] ss:$24 sps:$4 sm:$0xff]  }
 0x4ad   :  { %9029 = vmatpush1.bf16.msra.mxu1 %v15748_v53  ;;  %8893 = vmatprep.subr.bf16.mxu0 %v15759_v57  ;;  %v15805_v53 = vld [vmem:[#allocation2 + $0x2168] ss:$24 sps:$4 sm:$0xff]  }
 0x4ae   :  { %9030 = vmatprep.subr.bf16.mxu1 %v15756_v56  ;;  %v15813_v56 = vld [vmem:[#allocation2 + $0x219c] ss:$24 sps:$4 sm:$0xff]   ;;  %v15808_v57 = vld [vmem:[#allocation2 + $0x1ff0] ss:$24 sps:$4 sm:$0xff]  }
 0x4b0   :  { %8894 = vmatpush1.bf16.msra.mxu0 %v15757_v59  ;;  %v15816_v59 = vld [vmem:[#allocation2 + $0x2024] ss:$24 sps:$4 sm:$0xff]  }
 0x4b1   :  { %9031 = vmatpush1.bf16.msra.mxu1 %v15754_v58  ;;  %8895 = vmatprep.subr.bf16.mxu0 %v15765_v61  ;;  %v15811_v58 = vld [vmem:[#allocation2 + $0x2198] ss:$24 sps:$4 sm:$0xff]  }
 0x4b2   :  { %9032 = vmatprep.subr.bf16.mxu1 %v15762_v60  ;;  %v15819_v60 = vld [vmem:[#allocation2 + $0x21cc] ss:$24 sps:$4 sm:$0xff]   ;;  %v15814_v61 = vld [vmem:[#allocation2 + $0x2020] ss:$24 sps:$4 sm:$0xff]  }
 0x4b4   :  { %8896 = vmatpush1.bf16.msra.mxu0 %v15763_v63  ;;  %v15822_v63 = vld [vmem:[#allocation2 + $0x2054] ss:$24 sps:$4 sm:$0xff]  }
 0x4b5   :  { %9033 = vmatpush1.bf16.msra.mxu1 %v15760_v62  ;;  %8897 = vmatprep.subr.bf16.mxu0 %v15771_v2  ;;  %v15817_v62 = vld [vmem:[#allocation2 + $0x21c8] ss:$24 sps:$4 sm:$0xff]  }
 0x4b6   :  { %9043 = vmatprep.subr.bf16.mxu1 %v15768_v1  ;;  %v15825_v1 = vld [vmem:[#allocation2 + $0x21fc] ss:$24 sps:$4 sm:$0xff]   ;;  %v15820_v2 = vld [vmem:[#allocation2 + $0x2050] ss:$24 sps:$4 sm:$0xff]  }
 0x4b8   :  { %9035 = vmatmul.mubr.bf16.vlgmr.msra.gmra.mrb[28].mxu1 %v16781_v8  ;;  %8898 = vmatpush1.bf16.msra.mxu0 %v15769_v5  ;;  %v15784_v8 = vld [vmem:[#allocation2 + $0x1f30] ss:$24 sps:$4 sm:$0xff]   ;;  %v15828_v5 = vld [vmem:[#allocation2 + $0x2084] ss:$24 sps:$4 sm:$0xff]  }
 0x4b9   :  { %9044 = vmatpush1.bf16.msra.mxu1 %v15766_v4  ;;  %8899 = vmatprep.subr.bf16.mxu0 %v15777_v9  ;;  %v15823_v4 = vld [vmem:[#allocation2 + $0x21f8] ss:$24 sps:$4 sm:$0xff]  }
 0x4ba   :  { %9045 = vmatprep.subr.bf16.mxu1 %v15774_v7  ;;  %9075 = vmatprep.mubr.bf16.mxu1 %v16792_v35  ;;  %v15793_v35 = vld [vmem:[#allocation2 + $0x2108] ss:$24 sps:$4 sm:$0xff]   ;;  %v15831_v7 = vld [vmem:[#allocation2 + $0x222c] ss:$24 sps:$4 sm:$0xff]  }
 0x4bb   :  { %v15826_v9 = vld [vmem:[#allocation2 + $0x2080] ss:$24 sps:$4 sm:$0xff]  }
 0x4bc   :  { %8900 = vmatpush1.bf16.msra.mxu0 %v15775_v17  ;;  %v15834_v17 = vld [vmem:[#allocation2 + $0x20b4] ss:$24 sps:$4 sm:$0xff]  }
 0x4bd   :  { %9046 = vmatpush1.bf16.msra.mxu1 %v15772_v10  ;;  %8901 = vmatprep.subr.bf16.mxu0 %v15783_v50  ;;  %v15829_v10 = vld [vmem:[#allocation2 + $0x2228] ss:$24 sps:$4 sm:$0xff]  }
 0x4be   :  { %9047 = vmatprep.subr.bf16.mxu1 %v15780_v21  ;;  %v15837_v21 = vld [vmem:[#allocation2 + $0x225c] ss:$24 sps:$4 sm:$0xff]   ;;  %v15832_v50 = vld [vmem:[#allocation2 + $0x20b0] ss:$24 sps:$4 sm:$0xff]  }
 0x4c0   :  { %8902 = vmatpush1.bf16.msra.mxu0 %v15781_v49  ;;  %v15840_v49 = vld [vmem:[#allocation2 + $0x20e4] ss:$24 sps:$4 sm:$0xff]  }
 0x4c1   :  { %9048 = vmatpush1.bf16.msra.mxu1 %v15778_v27  ;;  %8903 = vmatprep.subr.bf16.mxu0 %v15789_v29  ;;  %v15835_v27 = vld [vmem:[#allocation2 + $0x2258] ss:$24 sps:$4 sm:$0xff]  }
 0x4c2   :  { %9049 = vmatprep.subr.bf16.mxu1 %v15786_v28  ;;  %v15843_v28 = vld [vmem:[#allocation2 + $0x228c] ss:$24 sps:$4 sm:$0xff]   ;;  %v15838_v29 = vld [vmem:[#allocation2 + $0x20e0] ss:$24 sps:$4 sm:$0xff]  }
 0x4c4   :  { %8904 = vmatpush1.bf16.msra.mxu0 %v15787_v30  ;;  %v15846_v30 = vld [vmem:[#allocation2 + $0x2114] ss:$24 sps:$4 sm:$0xff]  }
 0x4c5   :  { %9050 = vmatpush1.bf16.msra.mxu1 %v15784_v8  ;;  %8905 = vmatprep.subr.bf16.mxu0 %v15795_v18  ;;  %v15841_v8 = vld [vmem:[#allocation2 + $0x2288] ss:$24 sps:$4 sm:$0xff]  }
 0x4c6   :  { %9051 = vmatprep.subr.bf16.mxu1 %v15792_v31  ;;  %v15849_v31 = vld [vmem:[#allocation2 + $0x22bc] ss:$24 sps:$4 sm:$0xff]   ;;  %v15844_v18 = vld [vmem:[#allocation2 + $0x2110] ss:$24 sps:$4 sm:$0xff]  }
 0x4c8   :  { %8906 = vmatpush1.bf16.msra.mxu0 %v15793_v35  ;;  %v15852_v35 = vld [vmem:[#allocation2 + $0x2144] ss:$24 sps:$4 sm:$0xff]  }
 0x4c9   :  { %9052 = vmatpush1.bf16.msra.mxu1 %v15790_v33  ;;  %8907 = vmatprep.subr.bf16.mxu0 %v15801_v40  ;;  %v15847_v33 = vld [vmem:[#allocation2 + $0x22b8] ss:$24 sps:$4 sm:$0xff]  }
 0x4ca   :  { %9053 = vmatprep.subr.bf16.mxu1 %v15798_v39  ;;  %v15855_v39 = vld [vmem:[#allocation2 + $0x22ec] ss:$24 sps:$4 sm:$0xff]   ;;  %v15850_v40 = vld [vmem:[#allocation2 + $0x2140] ss:$24 sps:$4 sm:$0xff]  }
 0x4cc   :  { %8908 = vmatpush1.bf16.msra.mxu0 %v15799_v42  ;;  %v15858_v42 = vld [vmem:[#allocation2 + $0x2174] ss:$24 sps:$4 sm:$0xff]  }
 0x4cd   :  { %9054 = vmatpush1.bf16.msra.mxu1 %v15796_v41  ;;  %8909 = vmatprep.subr.bf16.mxu0 %v15807_v43  ;;  %v15853_v41 = vld [vmem:[#allocation2 + $0x22e8] ss:$24 sps:$4 sm:$0xff]  }
 0x4ce   :  { %9055 = vmatprep.subr.bf16.mxu1 %v15804_v52  ;;  %v15861_v52 = vld [vmem:[#allocation2 + $0x231c] ss:$24 sps:$4 sm:$0xff]   ;;  %v15856_v43 = vld [vmem:[#allocation2 + $0x2170] ss:$24 sps:$4 sm:$0xff]  }
 0x4d0   :  { %8910 = vmatpush1.bf16.msra.mxu0 %v15805_v53  ;;  %v15864_v53 = vld [vmem:[#allocation2 + $0x21a4] ss:$24 sps:$4 sm:$0xff]  }
 0x4d1   :  { %9056 = vmatpush1.bf16.msra.mxu1 %v15802_v44  ;;  %8920 = vmatprep.subr.bf16.mxu0 %v15813_v56  ;;  %v15859_v44 = vld [vmem:[#allocation2 + $0x2318] ss:$24 sps:$4 sm:$0xff]  }
 0x4d2   :  { %9057 = vmatprep.subr.bf16.mxu1 %v15810_v55  ;;  %v15867_v55 = vld [vmem:[#allocation2 + $0x234c] ss:$24 sps:$4 sm:$0xff]   ;;  %v15862_v56 = vld [vmem:[#allocation2 + $0x21a0] ss:$24 sps:$4 sm:$0xff]  }
 0x4d3   :  { %8912 = vmatmul.mubr.bf16.vlgmr.msra.gmra.mrb[20].mxu0 %v16798_v15 }
 0x4d4   :  { %8921 = vmatpush1.bf16.msra.mxu0 %v15811_v58  ;;  %8952 = vmatprep.mubr.bf16.mxu0 %v16807_v19  ;;  %v15870_v58 = vld [vmem:[#allocation2 + $0x21d4] ss:$24 sps:$4 sm:$0xff]  }
 0x4d5   :  { %9058 = vmatpush1.bf16.msra.mxu1 %v15808_v57  ;;  %8922 = vmatprep.subr.bf16.mxu0 %v15819_v60  ;;  %v15865_v57 = vld [vmem:[#allocation2 + $0x2348] ss:$24 sps:$4 sm:$0xff]  }
 0x4d6   :  { %9059 = vmatprep.subr.bf16.mxu1 %v15816_v59  ;;  %v15873_v59 = vld [vmem:[#allocation2 + $0x237c] ss:$24 sps:$4 sm:$0xff]   ;;  %v15868_v60 = vld [vmem:[#allocation2 + $0x21d0] ss:$24 sps:$4 sm:$0xff]  }
 0x4d8   :  { %8923 = vmatpush1.bf16.msra.mxu0 %v15817_v62  ;;  %v15876_v62 = vld [vmem:[#allocation2 + $0x2204] ss:$24 sps:$4 sm:$0xff]  }
 0x4d9   :  { %9060 = vmatpush1.bf16.msra.mxu1 %v15814_v61  ;;  %8924 = vmatprep.subr.bf16.mxu0 %v15825_v1  ;;  %v15871_v61 = vld [vmem:[#allocation2 + $0x2378] ss:$24 sps:$4 sm:$0xff]  }
 0x4da   :  { %9061 = vmatprep.subr.bf16.mxu1 %v15822_v63  ;;  %v15879_v63 = vld [vmem:[#allocation2 + $0x23ac] ss:$24 sps:$4 sm:$0xff]   ;;  %v15874_v1 = vld [vmem:[#allocation2 + $0x2200] ss:$24 sps:$4 sm:$0xff]  }
 0x4dc   :  { %8925 = vmatpush1.bf16.msra.mxu0 %v15823_v4  ;;  %v15882_v4 = vld [vmem:[#allocation2 + $0x2234] ss:$24 sps:$4 sm:$0xff]  }
 0x4dd   :  { %9062 = vmatpush1.bf16.msra.mxu1 %v15820_v2  ;;  %8926 = vmatprep.subr.bf16.mxu0 %v15831_v7  ;;  %v15877_v2 = vld [vmem:[#allocation2 + $0x23a8] ss:$24 sps:$4 sm:$0xff]   ;;  %v15883_v7 = vld [vmem:[#allocation2 + $0x23d8] ss:$24 sps:$4 sm:$0xff]  }
 0x4de   :  { %9063 = vmatprep.subr.bf16.mxu1 %v15828_v5  ;;  %v15885_v5 = vld [vmem:[#allocation2 + $0x23dc] ss:$24 sps:$4 sm:$0xff]  }
 0x4e0   :  { %8927 = vmatpush1.bf16.msra.mxu0 %v15829_v10  ;;  %v15891_v10 = vld [vmem:[#allocation2 + $0x240c] ss:$24 sps:$4 sm:$0xff]  }
 0x4e1   :  { %9064 = vmatpush1.bf16.msra.mxu1 %v15826_v9  ;;  %8928 = vmatprep.subr.bf16.mxu0 %v15837_v21  ;;  %v15888_v9 = vld [vmem:[#allocation2 + $0x2264] ss:$24 sps:$4 sm:$0xff]   ;;  %v15894_v21 = vld [vmem:[#allocation2 + $0x2294] ss:$24 sps:$4 sm:$0xff]  }
 0x4e2   :  { %9065 = vmatprep.subr.bf16.mxu1 %v15834_v17  ;;  %v15886_v17 = vld [vmem:[#allocation2 + $0x2260] ss:$24 sps:$4 sm:$0xff]  }
 0x4e4   :  { %8929 = vmatpush1.bf16.msra.mxu0 %v15835_v27  ;;  %v15892_v27 = vld [vmem:[#allocation2 + $0x2290] ss:$24 sps:$4 sm:$0xff]  }
 0x4e5   :  { %9066 = vmatpush1.bf16.msra.mxu1 %v15832_v50  ;;  %8930 = vmatprep.subr.bf16.mxu0 %v15843_v28  ;;  %v15897_v50 = vld [vmem:[#allocation2 + $0x243c] ss:$24 sps:$4 sm:$0xff]  }
 0x4e6   :  { %9067 = vmatprep.subr.bf16.mxu1 %v15840_v49  ;;  %v15895_v49 = vld [vmem:[#allocation2 + $0x2438] ss:$24 sps:$4 sm:$0xff]   ;;  %v15900_v28 = vld [vmem:[#allocation2 + $0x22c4] ss:$24 sps:$4 sm:$0xff]  }
 0x4e8   :  { %8931 = vmatpush1.bf16.msra.mxu0 %v15841_v8  ;;  %v15898_v8 = vld [vmem:[#allocation2 + $0x22c0] ss:$24 sps:$4 sm:$0xff]  }
 0x4e9   :  { %9068 = vmatpush1.bf16.msra.mxu1 %v15838_v29  ;;  %8932 = vmatprep.subr.bf16.mxu0 %v15849_v31  ;;  %v15903_v29 = vld [vmem:[#allocation2 + $0x246c] ss:$24 sps:$4 sm:$0xff]  }
 0x4ea   :  { %9069 = vmatprep.subr.bf16.mxu1 %v15846_v30  ;;  %v15901_v30 = vld [vmem:[#allocation2 + $0x2468] ss:$24 sps:$4 sm:$0xff]   ;;  %v15906_v31 = vld [vmem:[#allocation2 + $0x22f4] ss:$24 sps:$4 sm:$0xff]  }
 0x4ec   :  { %8933 = vmatpush1.bf16.msra.mxu0 %v15847_v33  ;;  %v15904_v33 = vld [vmem:[#allocation2 + $0x22f0] ss:$24 sps:$4 sm:$0xff]  }
 0x4ed   :  { %9070 = vmatpush1.bf16.msra.mxu1 %v15844_v18  ;;  %8934 = vmatprep.subr.bf16.mxu0 %v15855_v39  ;;  %v15909_v18 = vld [vmem:[#allocation2 + $0x249c] ss:$24 sps:$4 sm:$0xff]  }
 0x4ee   :  { %9071 = vmatprep.subr.bf16.mxu1 %v15852_v35  ;;  %v15907_v35 = vld [vmem:[#allocation2 + $0x2498] ss:$24 sps:$4 sm:$0xff]   ;;  %v15912_v39 = vld [vmem:[#allocation2 + $0x2324] ss:$24 sps:$4 sm:$0xff]  }
 0x4f0   :  { %8935 = vmatpush1.bf16.msra.mxu0 %v15853_v41  ;;  %v15910_v41 = vld [vmem:[#allocation2 + $0x2320] ss:$24 sps:$4 sm:$0xff]  }
 0x4f1   :  { %9072 = vmatpush1.bf16.msra.mxu1 %v15850_v40  ;;  %8936 = vmatprep.subr.bf16.mxu0 %v15861_v52  ;;  %v15921_v40 = vld [vmem:[%s18206_s3 + $0x4] ss:$8 sps:$4 sm:$0xff]   ;;  %v15913_v52 = vld [vmem:[#allocation2 + $0x2350] ss:$24 sps:$4 sm:$0xff]  }
 0x4f2   :  { %9073 = vmatprep.subr.bf16.mxu1 %v15858_v42  ;;  %v15915_v42 = vld [vmem:[#allocation2 + $0x2354] ss:$24 sps:$4 sm:$0xff]  }
 0x4f4   :  { %8937 = vmatpush1.bf16.msra.mxu0 %v15859_v44  ;;  %v15916_v44 = vld [vmem:[#allocation2 + $0x2380] ss:$24 sps:$4 sm:$0xff]  }
 0x4f5   :  { %9074 = vmatpush1.bf16.msra.mxu1 %v15856_v43  ;;  %8938 = vmatprep.subr.bf16.mxu0 %v15867_v55  ;;  %v15918_v43 = vld [vmem:[#allocation2 + $0x2384] ss:$24 sps:$4 sm:$0xff]   ;;  %v15924_v55 = vld [vmem:[#allocation2 + $0x23b4] ss:$24 sps:$4 sm:$0xff]  }
 0x4f6   :  { %9084 = vmatprep.subr.bf16.mxu1 %v15864_v53  ;;  %v15919_v53 = vld [vmem:[%s18206_s3] ss:$8 sps:$4 sm:$0xff]  }
 0x4f8   :  { %9076 = vmatmul.mubr.bf16.vlgmr.msra.gmra.mrb[28].mxu1 %v16798_v15  ;;  %8939 = vmatpush1.bf16.msra.mxu0 %v15865_v57  ;;  %v15880_v15 = vld [vmem:[#allocation2 + $0x2230] ss:$24 sps:$4 sm:$0xff]  }
 0x4f9   :  { %9085 = vmatpush1.bf16.msra.mxu1 %v15862_v56  ;;  %8940 = vmatprep.subr.bf16.mxu0 %v15873_v59  ;;  %v15927_v56 = vld [vmem:[%s18206_s3 + $0x14] ss:$8 sps:$4 sm:$0xff]   ;;  %v15922_v57 = vld [vmem:[#allocation2 + $0x23b0] ss:$24 sps:$4 sm:$0xff]  }
 0x4fa   :  { %9086 = vmatprep.subr.bf16.mxu1 %v15870_v58  ;;  %9116 = vmatprep.mubr.bf16.mxu1 %v16807_v19  ;;  %v15889_v19 = vld [vmem:[#allocation2 + $0x2408] ss:$24 sps:$4 sm:$0xff]   ;;  %v15925_v58 = vld [vmem:[%s18206_s3 + $0x10] ss:$8 sps:$4 sm:$0xff]   ;;  %v15930_v59 = vld [vmem:[#allocation2 + $0x23e4] ss:$24 sps:$4 sm:$0xff]  }
 0x4fc   :  { %8941 = vmatpush1.bf16.msra.mxu0 %v15871_v61  ;;  %v15928_v61 = vld [vmem:[#allocation2 + $0x23e0] ss:$24 sps:$4 sm:$0xff]  }
 0x4fd   :  { %9087 = vmatpush1.bf16.msra.mxu1 %v15868_v60  ;;  %8942 = vmatprep.subr.bf16.mxu0 %v15879_v63  ;;  %v15933_v60 = vld [vmem:[%s18206_s3 + $0x24] ss:$8 sps:$4 sm:$0xff]  }
 0x4fe   :  { %9088 = vmatprep.subr.bf16.mxu1 %v15876_v62  ;;  %v15931_v62 = vld [vmem:[%s18206_s3 + $0x20] ss:$8 sps:$4 sm:$0xff]   ;;  %v15936_v63 = vld [vmem:[#allocation2 + $0x2414] ss:$24 sps:$4 sm:$0xff]  }
 0x500   :  { %8943 = vmatpush1.bf16.msra.mxu0 %v15877_v2 }
 0x501   :  { %9089 = vmatpush1.bf16.msra.mxu1 %v15874_v1  ;;  %8944 = vmatprep.subr.bf16.mxu0 %v15885_v5  ;;  %v15939_v1 = vld [vmem:[%s18206_s3 + $0x34] ss:$8 sps:$4 sm:$0xff]  }
 0x502   :  { %9090 = vmatprep.subr.bf16.mxu1 %v15882_v4 }
 0x504   :  { %8945 = vmatpush1.bf16.msra.mxu0 %v15883_v7  ;;  %v15937_v7 = vld [vmem:[%s18206_s3 + $0x30] ss:$8 sps:$4 sm:$0xff]  }
 0x505   :  { %9091 = vmatpush1.bf16.msra.mxu1 %v15880_v15  ;;  %8946 = vmatprep.subr.bf16.mxu0 %v15891_v10  ;;  %v15934_v15 = vld [vmem:[#allocation2 + $0x2410] ss:$24 sps:$4 sm:$0xff]   ;;  %v15942_v10 = vld [vmem:[#allocation2 + $0x2444] ss:$24 sps:$4 sm:$0xff]  }
 0x506   :  { %9092 = vmatprep.subr.bf16.mxu1 %v15888_v9 }
 0x508   :  { %8947 = vmatpush1.bf16.msra.mxu0 %v15889_v19  ;;  %v15940_v19 = vld [vmem:[#allocation2 + $0x2440] ss:$24 sps:$4 sm:$0xff]  }
 0x509   :  { %9093 = vmatpush1.bf16.msra.mxu1 %v15886_v17  ;;  %8948 = vmatprep.subr.bf16.mxu0 %v15897_v50  ;;  %v15945_v17 = vld [vmem:[%s18206_s3 + $0x44] ss:$8 sps:$4 sm:$0xff]  }
 0x50a   :  { %9094 = vmatprep.subr.bf16.mxu1 %v15894_v21  ;;  %v15943_v21 = vld [vmem:[%s18206_s3 + $0x40] ss:$8 sps:$4 sm:$0xff]   ;;  %v15948_v50 = vld [vmem:[#allocation2 + $0x2474] ss:$24 sps:$4 sm:$0xff]  }
 0x50c   :  { %8949 = vmatpush1.bf16.msra.mxu0 %v15895_v49  ;;  %v15946_v49 = vld [vmem:[#allocation2 + $0x2470] ss:$24 sps:$4 sm:$0xff]  }
 0x50d   :  { %9095 = vmatpush1.bf16.msra.mxu1 %v15892_v27  ;;  %8950 = vmatprep.subr.bf16.mxu0 %v15903_v29  ;;  %v15951_v27 = vld [vmem:[%s18206_s3 + $0x54] ss:$8 sps:$4 sm:$0xff]   ;;  %v15954_v29 = vld [vmem:[%s18206_s3 + $0x64] ss:$8 sps:$4 sm:$0xff]  }
 0x50e   :  { %9096 = vmatprep.subr.bf16.mxu1 %v15900_v28  ;;  %v15949_v28 = vld [vmem:[%s18206_s3 + $0x50] ss:$8 sps:$4 sm:$0xff]  }
 0x510   :  { %8951 = vmatpush1.bf16.msra.mxu0 %v15901_v30  ;;  %v15952_v30 = vld [vmem:[%s18206_s3 + $0x60] ss:$8 sps:$4 sm:$0xff]  }
 0x511   :  { %9097 = vmatpush1.bf16.msra.mxu1 %v15898_v8  ;;  %8961 = vmatprep.subr.bf16.mxu0 %v15909_v18  ;;  %v15960_v8 = vld [vmem:[#allocation2 + $0x24a4] ss:$24 sps:$4 sm:$0xff]  }
 0x512   :  { %9098 = vmatprep.subr.bf16.mxu1 %v15906_v31  ;;  %v15958_v31 = vld [vmem:[#allocation2 + $0x24a0] ss:$24 sps:$4 sm:$0xff]   ;;  %v15957_v18 = vld [vmem:[%s18206_s3 + $0x74] ss:$8 sps:$4 sm:$0xff]  }
 0x513   :  { %8953 = vmatmul.mubr.bf16.vlgmr.msra.gmra.mrb[20].mxu0 %v16815_v23 }
 0x514   :  { %8962 = vmatpush1.bf16.msra.mxu0 %v15907_v35  ;;  %8993 = vmatprep.mubr.bf16.mxu0 %v16644_v0  ;;  %v15955_v35 = vld [vmem:[%s18206_s3 + $0x70] ss:$8 sps:$4 sm:$0xff]  }
 0x515   :  { %9099 = vmatpush1.bf16.msra.mxu1 %v15904_v33  ;;  %9778 = vmatprep.subr.bf16.mxu0 %v15921_v40  ;;  %v15966_v33 = vld [vmem:[%s18206_s3 + $0x2d4] ss:$8 sps:$4 sm:$0xff]   ;;  %v15961_v40 = vld [vmem:[%s18206_s3 + $0x80] ss:$8 sps:$4 sm:$0xff]  }
 0x516   :  { %9100 = vmatprep.subr.bf16.mxu1 %v15912_v39  ;;  %v15963_v39 = vld [vmem:[%s18206_s3 + $0x84] ss:$8 sps:$4 sm:$0xff]  }
 0x519   :  { %9101 = vmatpush1.bf16.msra.mxu1 %v15910_v41  ;;  %v15964_v41 = vld [vmem:[%s18206_s3 + $0x2d0] ss:$8 sps:$4 sm:$0xff]  }
 0x51a   :  { %9102 = vmatprep.subr.bf16.mxu1 %v15915_v42  ;;  %v15967_v42 = vld [vmem:[%s18206_s3 + $0x90] ss:$8 sps:$4 sm:$0xff]  }
 0x51d   :  { %9103 = vmatpush1.bf16.msra.mxu1 %v15913_v52  ;;  %v9186_v52 = vlaneseq }
 0x51e   :  { %9104 = vmatprep.subr.bf16.mxu1 %v15918_v43  ;;  %v15972_v43 = vld [vmem:[%s18206_s3 + $0x2e4] ss:$8 sps:$4 sm:$0xff]  }
 0x51f   :  { %13318 = vmatmul.mubr.msk.bf16.vlgmr.msra.gmra.mrb[20].mxu0 %vm1899_vm0, %v16961_v22 }
 0x520   :  { %9779 = vmatpush1.bf16.msra.mxu0 %v15919_v53  ;;  %v15970_v53 = vld [vmem:[%s18206_s3 + $0x2e0] ss:$8 sps:$4 sm:$0xff]  }
 0x521   :  { %9105 = vmatpush1.bf16.msra.mxu1 %v15916_v44  ;;  %9780 = vmatprep.subr.bf16.mxu0 %v15927_v56  ;;  %v15975_v44 = vld [vmem:[%s18206_s3 + $0xa4] ss:$8 sps:$4 sm:$0xff]   ;;  %v17068_v56 = vshrl.u32 %v9186_v52, 7  ;;  %v16033_v52 = vld [vmem:[%s18206_s3 + $0x100] ss:$8 sps:$4 sm:$0xff]  }
 0x522   :  { %9106 = vmatprep.subr.bf16.mxu1 %v15924_v55  ;;  %v15973_v55 = vld [vmem:[%s18206_s3 + $0xa0] ss:$8 sps:$4 sm:$0xff]  }
 0x524   :  { %9781 = vmatpush1.bf16.msra.mxu0 %v15925_v58  ;;  %v15976_v58 = vld [vmem:[%s18206_s3 + $0x2f0] ss:$8 sps:$4 sm:$0xff]  }
 0x525   :  { %9107 = vmatpush1.bf16.msra.mxu1 %v15922_v57  ;;  %9782 = vmatprep.subr.bf16.mxu0 %v15933_v60  ;;  %v15978_v57 = vld [vmem:[%s18206_s3 + $0x2f4] ss:$8 sps:$4 sm:$0xff]   ;;  %v15979_v60 = vld [vmem:[%s18206_s3 + $0xb0] ss:$8 sps:$4 sm:$0xff]  }
 0x526   :  { %9108 = vmatprep.subr.bf16.mxu1 %v15930_v59  ;;  %v17003_v2 = vpop.f32.mrb[16].mxu0  ;;  %v9192_v59 = vsub.s32 1, %v17068_v56 }
 0x527   :  { %v17005_v4 = vpop.f32.mrb[17].mxu0 }
 0x528   :  { %9783 = vmatpush1.bf16.msra.mxu0 %v15931_v62  ;;  %v6906_v5 = vpop.f32.mrb[18].mxu0  ;;  %v15984_v62 = vld [vmem:[%s18206_s3 + $0x304] ss:$8 sps:$4 sm:$0xff]  }
 0x529   :  { %9109 = vmatpush1.bf16.msra.mxu1 %v15928_v61  ;;  %v6907_v9 = vpop.f32.mrb[19].mxu0  ;;  %9784 = vmatprep.subr.bf16.mxu0 %v15939_v1  ;;  %v17083_v61 = vld [vmem:[#allocation4] sm:$0x3f] }
 0x52a   :  { %9110 = vmatprep.subr.bf16.mxu1 %v15936_v63  ;;  %v15987_v63 = vld [vmem:[%s18206_s3 + $0xc4] ss:$8 sps:$4 sm:$0xff]   ;;  %v9193_v9 = vrot.slane %v17083_v61, %v9192_v59 }
 0x52c   :  { %9785 = vmatpush1.bf16.msra.mxu0 %v15937_v7 }
 0x52d   :  { %9111 = vmatpush1.bf16.msra.mxu1 %v15934_v15  ;;  %9786 = vmatprep.subr.bf16.mxu0 %v15945_v17  ;;  %v15982_v17 = vld [vmem:[%s18206_s3 + $0x300] ss:$8 sps:$4 sm:$0xff]  }
 0x52e   :  { %9112 = vmatprep.subr.bf16.mxu1 %v15942_v10 }
 0x530   :  { %9787 = vmatpush1.bf16.msra.mxu0 %v15943_v21 }
 0x531   :  { %9113 = vmatpush1.bf16.msra.mxu1 %v15940_v19  ;;  %9788 = vmatprep.subr.bf16.mxu0 %v15951_v27  ;;  %v15985_v19 = vld [vmem:[%s18206_s3 + $0xc0] ss:$8 sps:$4 sm:$0xff]   ;;  %v15993_v27 = vld [vmem:[%s18206_s3 + $0xd4] ss:$8 sps:$4 sm:$0xff]  }
 0x532   :  { %9114 = vmatprep.subr.bf16.mxu1 %v15948_v50  ;;  %v15990_v50 = vld [vmem:[%s18206_s3 + $0x314] ss:$8 sps:$4 sm:$0xff]  }
 0x534   :  { %9789 = vmatpush1.bf16.msra.mxu0 %v15949_v28 }
 0x535   :  { %9115 = vmatpush1.bf16.msra.mxu1 %v15946_v49  ;;  %9790 = vmatprep.subr.bf16.mxu0 %v15954_v29 }
 0x536   :  { %9125 = vmatprep.subr.bf16.mxu1 %v15960_v8  ;;  %v15994_v8 = vld [vmem:[%s18206_s3 + $0x320] ss:$8 sps:$4 sm:$0xff]  }
 0x538   :  { %9117 = vmatmul.mubr.bf16.vlgmr.msra.gmra.mrb[28].mxu1 %v16815_v23  ;;  %9791 = vmatpush1.bf16.msra.mxu0 %v15952_v30  ;;  %v15969_v23 = vld [vmem:[%s18206_s3 + $0x94] ss:$8 sps:$4 sm:$0xff]   ;;  %v15997_v30 = vld [vmem:[%s18206_s3 + $0xe0] ss:$8 sps:$4 sm:$0xff]  }
 0x539   :  { %9126 = vmatpush1.bf16.msra.mxu1 %v15958_v31  ;;  %9792 = vmatprep.subr.bf16.mxu0 %v15957_v18  ;;  %v16002_v18 = vld [vmem:[%s18206_s3 + $0x334] ss:$8 sps:$4 sm:$0xff]  }
 0x53a   :  { %9157 = vmatprep.mubr.bf16.mxu1 %v16644_v0  ;;  %10442 = vmatprep.subr.bf16.mxu1 %v15966_v33  ;;  %v16005_v33 = vld [vmem:[%s18206_s3 + $0xf4] ss:$8 sps:$4 sm:$0xff]  }
 0x53c   :  { %9793 = vmatpush1.bf16.msra.mxu0 %v15955_v35  ;;  %v16000_v35 = vld [vmem:[%s18206_s3 + $0x330] ss:$8 sps:$4 sm:$0xff]  }
 0x53d   :  { %9794 = vmatprep.subr.bf16.mxu0 %v15963_v39  ;;  %v16003_v39 = vld [vmem:[%s18206_s3 + $0xf0] ss:$8 sps:$4 sm:$0xff]  }
 0x540   :  { %9795 = vmatpush1.bf16.msra.mxu0 %v15961_v40 }
 0x541   :  { %9796 = vmatprep.subr.bf16.mxu0 %v15969_v23  ;;  %v16008_v23 = vld [vmem:[%s18206_s3 + $0x344] ss:$8 sps:$4 sm:$0xff]  }
 0x544   :  { %13319 = vmatmul.mubr.msk.bf16.vlgmr.msra.gmra.mrb[28].mxu1 %vm1899_vm0, %v16961_v22  ;;  %9797 = vmatpush1.bf16.msra.mxu0 %v15967_v42  ;;  %v15981_v22 = vld [vmem:[%s18206_s3 + $0xb4] ss:$8 sps:$4 sm:$0xff]   ;;  %v16006_v42 = vld [vmem:[%s18206_s3 + $0x340] ss:$8 sps:$4 sm:$0xff]  }
 0x545   :  { %10443 = vmatpush1.bf16.msra.mxu1 %v15964_v41  ;;  %9798 = vmatprep.subr.bf16.mxu0 %v15975_v44  ;;  %v16035_v41 = vld [vmem:[%s18206_s3 + $0x104] ss:$8 sps:$4 sm:$0xff]   ;;  %v16011_v44 = vld [vmem:[%s18206_s3 + $0x354] ss:$8 sps:$4 sm:$0xff]  }
 0x546   :  { %10444 = vmatprep.subr.bf16.mxu1 %v15972_v43 }
 0x548   :  { %9799 = vmatpush1.bf16.msra.mxu0 %v15973_v55  ;;  %v16009_v55 = vld [vmem:[%s18206_s3 + $0x350] ss:$8 sps:$4 sm:$0xff]  }
 0x549   :  { %10445 = vmatpush1.bf16.msra.mxu1 %v15970_v53  ;;  %9800 = vmatprep.subr.bf16.mxu0 %v15981_v22  ;;  %v16041_v53 = vld [vmem:[%s18206_s3 + $0x114] ss:$8 sps:$4 sm:$0xff]   ;;  %v16014_v22 = vld [vmem:[%s18206_s3 + $0x364] ss:$8 sps:$4 sm:$0xff]  }
 0x54a   :  { %10446 = vmatprep.subr.bf16.mxu1 %v15978_v57  ;;  %v16039_v57 = vld [vmem:[%s18206_s3 + $0x110] ss:$8 sps:$4 sm:$0xff]  }
 0x54b   :  { %v8831_v1 = vpop.f32.mrb[24].mxu1 }
 0x54c   :  { %v9172_v5 = vmax.f32 %v16952_v38, %v8831_v1  ;;  %v8833_v15 = vpop.f32.mrb[25].mxu1  ;;  %9801 = vmatpush1.bf16.msra.mxu0 %v15979_v60  ;;  %v16012_v60 = vld [vmem:[%s18206_s3 + $0x360] ss:$8 sps:$4 sm:$0xff]   ;;  %v16053_v1 = vld [vmem:[%s18206_s3 + $0x134] ss:$8 sps:$4 sm:$0xff]  }
 0x54d   :  { %10447 = vmatpush1.bf16.msra.mxu1 %v15976_v58  ;;  %v9173_v7 = vmax.f32 %v16954_v11, %v8833_v15  ;;  %v8835_v10 = vpop.f32.mrb[26].mxu1  ;;  %v9188_v11 = vsub.s32 0, %v17068_v56  ;;  %9802 = vmatprep.subr.bf16.mxu0 %v15987_v63  ;;  %v16047_v58 = vld [vmem:[%s18206_s3 + $0x124] ss:$8 sps:$4 sm:$0xff]   ;;  %v16017_v63 = vld [vmem:[%s18206_s3 + $0x374] ss:$8 sps:$4 sm:$0xff]  }
 0x54e   :  { %v9178_v38 = vmax.f32 %v9166_v48, %v9172_v5  ;;  %v8836_v21 = vpop.f32.mrb[27].mxu1  ;;  %10448 = vmatprep.subr.bf16.mxu1 %v15984_v62  ;;  %v16045_v62 = vld [vmem:[%s18206_s3 + $0x120] ss:$8 sps:$4 sm:$0xff]   ;;  %v16015_v5 = vld [vmem:[%s18206_s3 + $0x370] ss:$8 sps:$4 sm:$0xff]  }
 0x54f   :  { %v9179_v49 = vmax.f32 %v9167_v54, %v9173_v7  ;;  %v9189_v48 = vrot.slane %v17083_v61, %v9188_v11  ;;  %v16051_v15 = vld [vmem:[%s18206_s3 + $0x130] ss:$8 sps:$4 sm:$0xff]   ;;  %v16020_v7 = vld [vmem:[%s18206_s3 + $0x384] ss:$8 sps:$4 sm:$0xff]   ;;  %v16018_v10 = vld [vmem:[%s18206_s3 + $0x380] ss:$8 sps:$4 sm:$0xff]  }
 0x550   :  { %9803 = vmatpush1.bf16.msra.mxu0 %v15985_v19  ;;  %v16023_v19 = vld [vmem:[%s18206_s3 + $0x394] ss:$8 sps:$4 sm:$0xff]   ;;  %v16021_v21 = vld [vmem:[%s18206_s3 + $0x390] ss:$8 sps:$4 sm:$0xff]  }
 0x551   :  { %v9217_v28 = vadd.f32 %v9193_v9, %v9179_v49  ;;  %10449 = vmatpush1.bf16.msra.mxu1 %v15982_v17  ;;  %9804 = vmatprep.subr.bf16.mxu0 %v15993_v27  ;;  %v9216_v31 = vadd.f32 %v9189_v48, %v9178_v38  ;;  %v16059_v9 = vld [vmem:[%s18206_s3 + $0x144] ss:$8 sps:$4 sm:$0xff]   ;;  %v16057_v17 = vld [vmem:[%s18206_s3 + $0x140] ss:$8 sps:$4 sm:$0xff]   ;;  %v16065_v38 = vld [vmem:[%s18206_s3 + $0x154] ss:$8 sps:$4 sm:$0xff]  }
 0x552   :  { %10450 = vmatprep.subr.bf16.mxu1 %v15990_v50  ;;  %v16063_v50 = vld [vmem:[%s18206_s3 + $0x150] ss:$8 sps:$4 sm:$0xff]   ;;  %v16026_v27 = vld [vmem:[%s18206_s3 + $0x3a4] ss:$8 sps:$4 sm:$0xff]   ;;  %v16077_v48 = vld [vmem:[%s18206_s3 + $0x174] ss:$8 sps:$4 sm:$0xff]  }
 0x553   :  { %v9223_v54 = vmax.f32 %v9217_v28, 0.0  ;;  %v9222_v40 = vmax.f32 %v9216_v31, 0.0  ;;  %v16071_v49 = vld [vmem:[%s18206_s3 + $0x164] ss:$8 sps:$4 sm:$0xff]   ;;  %v16024_v28 = vld [vmem:[%s18206_s3 + $0x3a0] ss:$8 sps:$4 sm:$0xff]  }
 0x554   :  { %9805 = vmatpush1.bf16.msra.mxu0 %v15991_v45  ;;  %v16029_v45 = vld [vmem:[%s18206_s3 + $0x3b4] ss:$8 sps:$4 sm:$0xff]   ;;  %v16081_v31 = vld [vmem:[%s18206_s3 + $0x180] ss:$8 sps:$4 sm:$0xff]  }
 0x555   :  { %v17130_v29 = vpack.c.bf16 %v9223_v54, %v9223_v54  ;;  %10451 = vmatpush1.bf16.msra.mxu1 %v15988_v14  ;;  %9806 = vmatprep.subr.bf16.mxu0 %v15999_v51  ;;  %v17164_v43 = vpack.c.bf16 %v9222_v40, %v9222_v40  ;;  %v16069_v14 = vld [vmem:[%s18206_s3 + $0x160] ss:$8 sps:$4 sm:$0xff]   ;;  %v16075_v51 = vld [vmem:[%s18206_s3 + $0x170] ss:$8 sps:$4 sm:$0xff]   ;;  %v16032_v54 = vld [vmem:[%s18206_s3 + $0x3c4] ss:$8 sps:$4 sm:$0xff]  }
 0x556   :  { %10452 = vmatprep.subr.bf16.mxu1 %v15996_v20  ;;  %v16027_v20 = vld [vmem:[%s18206_s3 + $0x3b0] ss:$8 sps:$4 sm:$0xff]   ;;  %v16044_v40 = vld [vmem:[%s18206_s3 + $0x3e4] ss:$8 sps:$4 sm:$0xff]  }
 0x557   :  { %9810 = vmatprep.mubr.bf16.mxu0 %v17130_v29  ;;  %10474 = vmatprep.mubr.bf16.mxu1 %v17130_v29 }
 0x558   :  { %9807 = vmatpush1.bf16.msra.mxu0 %v15997_v30  ;;  %v16030_v30 = vld [vmem:[%s18206_s3 + $0x3c0] ss:$8 sps:$4 sm:$0xff]  }
 0x559   :  { %10453 = vmatpush1.bf16.msra.mxu1 %v15994_v8  ;;  %9808 = vmatprep.subr.bf16.mxu0 %v16005_v33  ;;  %v16083_v8 = vld [vmem:[%s18206_s3 + $0x184] ss:$8 sps:$4 sm:$0xff]   ;;  %v16089_v33 = vld [vmem:[%s18206_s3 + $0x194] ss:$8 sps:$4 sm:$0xff]  }
 0x55a   :  { %10454 = vmatprep.subr.bf16.mxu1 %v16002_v18  ;;  %v16038_v18 = vld [vmem:[%s18206_s3 + $0x3d4] ss:$8 sps:$4 sm:$0xff]  }
 0x55c   :  { %9809 = vmatpush1.bf16.msra.mxu0 %v16003_v39  ;;  %v16087_v39 = vld [vmem:[%s18206_s3 + $0x190] ss:$8 sps:$4 sm:$0xff]  }
 0x55d   :  { %10455 = vmatpush1.bf16.msra.mxu1 %v16000_v35  ;;  %9819 = vmatprep.subr.bf16.mxu0 %v16035_v41  ;;  %v16036_v35 = vld [vmem:[%s18206_s3 + $0x3d0] ss:$8 sps:$4 sm:$0xff]   ;;  %v16042_v41 = vld [vmem:[%s18206_s3 + $0x3e0] ss:$8 sps:$4 sm:$0xff]  }
 0x55e   :  { %10456 = vmatprep.subr.bf16.mxu1 %v16008_v23  ;;  %v16095_v23 = vld [vmem:[%s18206_s3 + $0x1a4] ss:$8 sps:$4 sm:$0xff]  }
 0x55f   :  { %9811 = vmatmul.mubr.bf16.vlgmr.msra.gmra.mrb[24].mxu0 %v17164_v43 }
 0x560   :  { %9820 = vmatpush1.bf16.msra.mxu0 %v16033_v52  ;;  %v16050_v52 = vld [vmem:[%s18206_s3 + $0x3f4] ss:$8 sps:$4 sm:$0xff]  }
 0x561   :  { %10457 = vmatpush1.bf16.msra.mxu1 %v16006_v42  ;;  %9821 = vmatprep.subr.bf16.mxu0 %v16041_v53  ;;  %v16093_v42 = vld [vmem:[%s18206_s3 + $0x1a0] ss:$8 sps:$4 sm:$0xff]   ;;  %v16048_v53 = vld [vmem:[%s18206_s3 + $0x3f0] ss:$8 sps:$4 sm:$0xff]  }
 0x562   :  { %10458 = vmatprep.subr.bf16.mxu1 %v16011_v44  ;;  %v16101_v44 = vld [vmem:[%s18206_s3 + $0x1b4] ss:$8 sps:$4 sm:$0xff]  }
 0x564   :  { %9822 = vmatpush1.bf16.msra.mxu0 %v16039_v57  ;;  %v16056_v57 = vld [vmem:[%s18206_s3 + $0x404] ss:$8 sps:$4 sm:$0xff]  }
 0x565   :  { %10459 = vmatpush1.bf16.msra.mxu1 %v16009_v55  ;;  %9823 = vmatprep.subr.bf16.mxu0 %v16047_v58  ;;  %v16099_v55 = vld [vmem:[%s18206_s3 + $0x1b0] ss:$8 sps:$4 sm:$0xff]   ;;  %v16054_v58 = vld [vmem:[%s18206_s3 + $0x400] ss:$8 sps:$4 sm:$0xff]  }
 0x566   :  { %10460 = vmatprep.subr.bf16.mxu1 %v16014_v22  ;;  %v16107_v22 = vld [vmem:[%s18206_s3 + $0x1c4] ss:$8 sps:$4 sm:$0xff]  }
 0x568   :  { %9824 = vmatpush1.bf16.msra.mxu0 %v16045_v62  ;;  %v16062_v62 = vld [vmem:[%s18206_s3 + $0x414] ss:$8 sps:$4 sm:$0xff]  }
 0x569   :  { %10461 = vmatpush1.bf16.msra.mxu1 %v16012_v60  ;;  %9825 = vmatprep.subr.bf16.mxu0 %v16053_v1  ;;  %v16105_v60 = vld [vmem:[%s18206_s3 + $0x1c0] ss:$8 sps:$4 sm:$0xff]   ;;  %v16060_v1 = vld [vmem:[%s18206_s3 + $0x410] ss:$8 sps:$4 sm:$0xff]  }
 0x56a   :  { %10462 = vmatprep.subr.bf16.mxu1 %v16017_v63  ;;  %v16113_v63 = vld [vmem:[%s18206_s3 + $0x1d4] ss:$8 sps:$4 sm:$0xff]  }
 0x56c   :  { %9826 = vmatpush1.bf16.msra.mxu0 %v16051_v15  ;;  %v16068_v15 = vld [vmem:[%s18206_s3 + $0x424] ss:$8 sps:$4 sm:$0xff]  }
 0x56d   :  { %10463 = vmatpush1.bf16.msra.mxu1 %v16015_v5  ;;  %9827 = vmatprep.subr.bf16.mxu0 %v16059_v9  ;;  %v16111_v5 = vld [vmem:[%s18206_s3 + $0x1d0] ss:$8 sps:$4 sm:$0xff]   ;;  %v16066_v9 = vld [vmem:[%s18206_s3 + $0x420] ss:$8 sps:$4 sm:$0xff]  }
 0x56e   :  { %10464 = vmatprep.subr.bf16.mxu1 %v16020_v7  ;;  %v16119_v7 = vld [vmem:[%s18206_s3 + $0x1e4] ss:$8 sps:$4 sm:$0xff]  }
 0x570   :  { %9828 = vmatpush1.bf16.msra.mxu0 %v16057_v17  ;;  %v16074_v17 = vld [vmem:[%s18206_s3 + $0x434] ss:$8 sps:$4 sm:$0xff]  }
 0x571   :  { %10465 = vmatpush1.bf16.msra.mxu1 %v16018_v10  ;;  %9829 = vmatprep.subr.bf16.mxu0 %v16065_v38  ;;  %v16117_v10 = vld [vmem:[%s18206_s3 + $0x1e0] ss:$8 sps:$4 sm:$0xff]   ;;  %v16072_v38 = vld [vmem:[%s18206_s3 + $0x430] ss:$8 sps:$4 sm:$0xff]  }
 0x572   :  { %10466 = vmatprep.subr.bf16.mxu1 %v16023_v19  ;;  %v16125_v19 = vld [vmem:[%s18206_s3 + $0x1f4] ss:$8 sps:$4 sm:$0xff]  }
 0x574   :  { %9830 = vmatpush1.bf16.msra.mxu0 %v16063_v50  ;;  %v16080_v50 = vld [vmem:[%s18206_s3 + $0x444] ss:$8 sps:$4 sm:$0xff]  }
 0x575   :  { %10467 = vmatpush1.bf16.msra.mxu1 %v16021_v21  ;;  %9831 = vmatprep.subr.bf16.mxu0 %v16071_v49  ;;  %v16123_v21 = vld [vmem:[%s18206_s3 + $0x1f0] ss:$8 sps:$4 sm:$0xff]   ;;  %v16078_v49 = vld [vmem:[%s18206_s3 + $0x440] ss:$8 sps:$4 sm:$0xff]  }
 0x576   :  { %10468 = vmatprep.subr.bf16.mxu1 %v16026_v27  ;;  %v16131_v27 = vld [vmem:[%s18206_s3 + $0x204] ss:$8 sps:$4 sm:$0xff]  }
 0x578   :  { %9832 = vmatpush1.bf16.msra.mxu0 %v16069_v14  ;;  %v16084_v14 = vld [vmem:[%s18206_s3 + $0x450] ss:$8 sps:$4 sm:$0xff]  }
 0x579   :  { %10469 = vmatpush1.bf16.msra.mxu1 %v16024_v28  ;;  %9833 = vmatprep.subr.bf16.mxu0 %v16077_v48  ;;  %v16086_v28 = vld [vmem:[%s18206_s3 + $0x454] ss:$8 sps:$4 sm:$0xff]   ;;  %v16090_v48 = vld [vmem:[%s18206_s3 + $0x460] ss:$8 sps:$4 sm:$0xff]  }
 0x57a   :  { %10470 = vmatprep.subr.bf16.mxu1 %v16029_v45  ;;  %v16092_v45 = vld [vmem:[%s18206_s3 + $0x464] ss:$8 sps:$4 sm:$0xff]  }
 0x57c   :  { %9834 = vmatpush1.bf16.msra.mxu0 %v16075_v51  ;;  %v16096_v51 = vld [vmem:[%s18206_s3 + $0x470] ss:$8 sps:$4 sm:$0xff]  }
 0x57d   :  { %10471 = vmatpush1.bf16.msra.mxu1 %v16027_v20  ;;  %9835 = vmatprep.subr.bf16.mxu0 %v16083_v8  ;;  %v16098_v20 = vld [vmem:[%s18206_s3 + $0x474] ss:$8 sps:$4 sm:$0xff]   ;;  %v16102_v8 = vld [vmem:[%s18206_s3 + $0x480] ss:$8 sps:$4 sm:$0xff]  }
 0x57e   :  { %10472 = vmatprep.subr.bf16.mxu1 %v16032_v54  ;;  %v16104_v54 = vld [vmem:[%s18206_s3 + $0x484] ss:$8 sps:$4 sm:$0xff]  }
 0x580   :  { %9836 = vmatpush1.bf16.msra.mxu0 %v16081_v31  ;;  %v16108_v31 = vld [vmem:[%s18206_s3 + $0x490] ss:$8 sps:$4 sm:$0xff]  }
 0x581   :  { %10473 = vmatpush1.bf16.msra.mxu1 %v16030_v30  ;;  %9837 = vmatprep.subr.bf16.mxu0 %v16089_v33  ;;  %v16110_v30 = vld [vmem:[%s18206_s3 + $0x494] ss:$8 sps:$4 sm:$0xff]   ;;  %v16114_v33 = vld [vmem:[%s18206_s3 + $0x4a0] ss:$8 sps:$4 sm:$0xff]  }
 0x582   :  { %10483 = vmatprep.subr.bf16.mxu1 %v16038_v18  ;;  %v16116_v18 = vld [vmem:[%s18206_s3 + $0x4a4] ss:$8 sps:$4 sm:$0xff]  }
 0x584   :  { %10475 = vmatmul.mubr.bf16.vlgmr.msra.gmra.mrb[32].mxu1 %v17164_v43  ;;  %9838 = vmatpush1.bf16.msra.mxu0 %v16087_v39  ;;  %v16120_v39 = vld [vmem:[%s18206_s3 + $0x4b0] ss:$8 sps:$4 sm:$0xff]  }
 0x585   :  { %10484 = vmatpush1.bf16.msra.mxu1 %v16036_v35  ;;  %9839 = vmatprep.subr.bf16.mxu0 %v16095_v23  ;;  %v16122_v35 = vld [vmem:[%s18206_s3 + $0x4b4] ss:$8 sps:$4 sm:$0xff]   ;;  %v16126_v23 = vld [vmem:[%s18206_s3 + $0x4c0] ss:$8 sps:$4 sm:$0xff]  }
 0x586   :  { %10485 = vmatprep.subr.bf16.mxu1 %v16044_v40  ;;  %v16128_v40 = vld [vmem:[%s18206_s3 + $0x4c4] ss:$8 sps:$4 sm:$0xff]  }
 0x588   :  { %9840 = vmatpush1.bf16.msra.mxu0 %v16093_v42  ;;  %v9196_v42 = vsub.s32 2, %v17068_v56 }
 0x589   :  { %10486 = vmatpush1.bf16.msra.mxu1 %v16042_v41  ;;  %9841 = vmatprep.subr.bf16.mxu0 %v16101_v44  ;;  %v16134_v41 = vld [vmem:[%s18206_s3 + $0x4d4] ss:$8 sps:$4 sm:$0xff]  }
 0x58a   :  { %10487 = vmatprep.subr.bf16.mxu1 %v16050_v52  ;;  %v9200_v52 = vsub.s32 3, %v17068_v56 }
 0x58c   :  { %9842 = vmatpush1.bf16.msra.mxu0 %v16099_v55  ;;  %v9197_v55 = vrot.slane %v17083_v61, %v9196_v42 }
 0x58d   :  { %10488 = vmatpush1.bf16.msra.mxu1 %v16048_v53  ;;  %9843 = vmatprep.subr.bf16.mxu0 %v16107_v22 }
 0x58e   :  { %10489 = vmatprep.subr.bf16.mxu1 %v16056_v57 }
 0x590   :  { %9844 = vmatpush1.bf16.msra.mxu0 %v16105_v60 }
 0x591   :  { %10490 = vmatpush1.bf16.msra.mxu1 %v16054_v58  ;;  %9845 = vmatprep.subr.bf16.mxu0 %v16113_v63  ;;  %v9201_v58 = vrot.slane %v17083_v61, %v9200_v52 }
 0x592   :  { %10491 = vmatprep.subr.bf16.mxu1 %v16062_v62 }
 0x594   :  { %9846 = vmatpush1.bf16.msra.mxu0 %v16111_v5 }
 0x595   :  { %10492 = vmatpush1.bf16.msra.mxu1 %v16060_v1  ;;  %9847 = vmatprep.subr.bf16.mxu0 %v16119_v7 }
 0x596   :  { %10493 = vmatprep.subr.bf16.mxu1 %v16068_v15 }
 0x598   :  { %9848 = vmatpush1.bf16.msra.mxu0 %v16117_v10  ;;  %v16143_v10 = vld [vmem:[%s18206_s3 + $0x224] ss:$8 sps:$4 sm:$0xff]  }
 0x599   :  { %10494 = vmatpush1.bf16.msra.mxu1 %v16066_v9  ;;  %9849 = vmatprep.subr.bf16.mxu0 %v16125_v19  ;;  %v16141_v19 = vld [vmem:[%s18206_s3 + $0x220] ss:$8 sps:$4 sm:$0xff]  }
 0x59a   :  { %10495 = vmatprep.subr.bf16.mxu1 %v16074_v17  ;;  %v16146_v17 = vld [vmem:[%s18206_s3 + $0x4f4] ss:$8 sps:$4 sm:$0xff]  }
 0x59c   :  { %9850 = vmatpush1.bf16.msra.mxu0 %v16123_v21  ;;  %v16149_v21 = vld [vmem:[%s18206_s3 + $0x234] ss:$8 sps:$4 sm:$0xff]  }
 0x59d   :  { %10496 = vmatpush1.bf16.msra.mxu1 %v16072_v38  ;;  %9860 = vmatprep.subr.bf16.mxu0 %v16131_v27  ;;  %v16144_v38 = vld [vmem:[%s18206_s3 + $0x4f0] ss:$8 sps:$4 sm:$0xff]  }
 0x59e   :  { %10497 = vmatprep.subr.bf16.mxu1 %v16080_v50  ;;  %v16152_v50 = vld [vmem:[%s18206_s3 + $0x504] ss:$8 sps:$4 sm:$0xff]   ;;  %v16147_v27 = vld [vmem:[%s18206_s3 + $0x230] ss:$8 sps:$4 sm:$0xff]  }
 0x5a1   :  { %10498 = vmatpush1.bf16.msra.mxu1 %v16078_v49  ;;  %v16150_v49 = vld [vmem:[%s18206_s3 + $0x500] ss:$8 sps:$4 sm:$0xff]  }
 0x5a2   :  { %10499 = vmatprep.subr.bf16.mxu1 %v16086_v28  ;;  %v16155_v28 = vld [vmem:[%s18206_s3 + $0x244] ss:$8 sps:$4 sm:$0xff]  }
 0x5a5   :  { %10500 = vmatpush1.bf16.msra.mxu1 %v16084_v14  ;;  %v16158_v14 = vld [vmem:[%s18206_s3 + $0x514] ss:$8 sps:$4 sm:$0xff]  }
 0x5a6   :  { %10501 = vmatprep.subr.bf16.mxu1 %v16092_v45  ;;  %v16153_v45 = vld [vmem:[%s18206_s3 + $0x240] ss:$8 sps:$4 sm:$0xff]  }
 0x5a9   :  { %10502 = vmatpush1.bf16.msra.mxu1 %v16090_v48  ;;  %v16156_v48 = vld [vmem:[%s18206_s3 + $0x510] ss:$8 sps:$4 sm:$0xff]  }
 0x5aa   :  { %10503 = vmatprep.subr.bf16.mxu1 %v16098_v20  ;;  %v16161_v20 = vld [vmem:[%s18206_s3 + $0x254] ss:$8 sps:$4 sm:$0xff]  }
 0x5ad   :  { %10504 = vmatpush1.bf16.msra.mxu1 %v16096_v51  ;;  %v16164_v51 = vld [vmem:[%s18206_s3 + $0x524] ss:$8 sps:$4 sm:$0xff]  }
 0x5ae   :  { %10505 = vmatprep.subr.bf16.mxu1 %v16104_v54  ;;  %v16159_v54 = vld [vmem:[%s18206_s3 + $0x250] ss:$8 sps:$4 sm:$0xff]  }
 0x5b1   :  { %10506 = vmatpush1.bf16.msra.mxu1 %v16102_v8  ;;  %v16162_v8 = vld [vmem:[%s18206_s3 + $0x520] ss:$8 sps:$4 sm:$0xff]  }
 0x5b2   :  { %10507 = vmatprep.subr.bf16.mxu1 %v16110_v30  ;;  %v16167_v30 = vld [vmem:[%s18206_s3 + $0x264] ss:$8 sps:$4 sm:$0xff]  }
 0x5b5   :  { %10508 = vmatpush1.bf16.msra.mxu1 %v16108_v31  ;;  %v16170_v31 = vld [vmem:[%s18206_s3 + $0x534] ss:$8 sps:$4 sm:$0xff]  }
 0x5b6   :  { %10509 = vmatprep.subr.bf16.mxu1 %v16116_v18  ;;  %v9208_v18 = vsub.s32 5, %v17068_v56 }
 0x5b9   :  { %10510 = vmatpush1.bf16.msra.mxu1 %v16114_v33  ;;  %v16165_v33 = vld [vmem:[%s18206_s3 + $0x260] ss:$8 sps:$4 sm:$0xff]  }
 0x5ba   :  { %10511 = vmatprep.subr.bf16.mxu1 %v16122_v35  ;;  %v16168_v35 = vld [vmem:[%s18206_s3 + $0x530] ss:$8 sps:$4 sm:$0xff]  }
 0x5bd   :  { %10512 = vmatpush1.bf16.msra.mxu1 %v16120_v39  ;;  %v16173_v39 = vld [vmem:[%s18206_s3 + $0x274] ss:$8 sps:$4 sm:$0xff]  }
 0x5be   :  { %10513 = vmatprep.subr.bf16.mxu1 %v16128_v40  ;;  %v16176_v40 = vld [vmem:[%s18206_s3 + $0x544] ss:$8 sps:$4 sm:$0xff]  }
 0x5c1   :  { %10514 = vmatpush1.bf16.msra.mxu1 %v16126_v23 }
 0x5c2   :  { %10524 = vmatprep.subr.bf16.mxu1 %v16134_v41 }
 0x5f2   :  { %v8995_v44 = vpop.f32.mrb[20].mxu0 }
 0x5f3   :  { %v9174_v53 = vmax.f32 %v16966_v36, %v8995_v44  ;;  %v8997_v57 = vpop.f32.mrb[21].mxu0  ;;  %v9209_v44 = vrot.slane %v17083_v61, %v9208_v18  ;;  %v16230_v18 = vld [vmem:[%s18206_s3 + $0x8a4] ss:$8 sps:$4 sm:$0xff]  }
 0x5f4   :  { %v9175_v22 = vmax.f32 %v16968_v37, %v8997_v57  ;;  %v8999_v60 = vpop.f32.mrb[22].mxu0  ;;  %v16129_v37 = vld [vmem:[%s18206_s3 + $0x200] ss:$8 sps:$4 sm:$0xff]  }
 0x5f5   :  { %v9180_v62 = vmax.f32 %v9168_v25, %v9174_v53  ;;  %v9000_v63 = vpop.f32.mrb[23].mxu0  ;;  %v16140_v25 = vld [vmem:[%s18206_s3 + $0x4e4] ss:$8 sps:$4 sm:$0xff]   ;;  %v16174_v57 = vld [vmem:[%s18206_s3 + $0x540] ss:$8 sps:$4 sm:$0xff]  }
 0x5f6   :  { %v9181_v1 = vmax.f32 %v9169_v47, %v9175_v22  ;;  %v16138_v47 = vld [vmem:[%s18206_s3 + $0x4e0] ss:$8 sps:$4 sm:$0xff]   ;;  %v16183_v63 = vld [vmem:[%s18206_s3 + $0x290] ss:$8 sps:$4 sm:$0xff]  }
 0x5f7   :  { %v9218_v5 = vadd.f32 %v9197_v55, %v9180_v62  ;;  %v16171_v55 = vld [vmem:[%s18206_s3 + $0x270] ss:$8 sps:$4 sm:$0xff]  }
 0x5f8   :  { %v9219_v15 = vadd.f32 %v9201_v58, %v9181_v1  ;;  %v16182_v58 = vld [vmem:[%s18206_s3 + $0x554] ss:$8 sps:$4 sm:$0xff]   ;;  %v16186_v1 = vld [vmem:[%s18206_s3 + $0x560] ss:$8 sps:$4 sm:$0xff]  }
 0x5f9   :  { %v9224_v36 = vmax.f32 %v9218_v5, 0.0  ;;  %v9204_v5 = vsub.s32 4, %v17068_v56  ;;  %v16488_v56 = vld [vmem:[#allocation9 + $0x8] sm:$0xff]  }
 0x5fa   :  { %v9225_v7 = vmax.f32 %v9219_v15, 0.0  ;;  %v16191_v15 = vld [vmem:[%s18206_s3 + $0x2a4] ss:$8 sps:$4 sm:$0xff]  }
 0x5fb   :  { %v17428_v24 = vpack.c.bf16 %v9224_v36, %v9224_v36  ;;  %v16194_v36 = vld [vmem:[%s18206_s3 + $0x574] ss:$8 sps:$4 sm:$0xff]  }
 0x5fc   :  { %v17420_v9 = vpack.c.bf16 %v9225_v7, %v9225_v7  ;;  %v16189_v7 = vld [vmem:[%s18206_s3 + $0x2a0] ss:$8 sps:$4 sm:$0xff]  }
 0x5fe   :  { %9851 = vmatprep.mubr.bf16.mxu0 %v17420_v9  ;;  %10515 = vmatprep.mubr.bf16.mxu1 %v17420_v9 }
 0x5ff   :  { %9852 = vmatmul.mubr.bf16.vlgmr.msra.gmra.mrb[24].mxu0 %v17428_v24  ;;  %10516 = vmatmul.mubr.bf16.vlgmr.msra.gmra.mrb[32].mxu1 %v17428_v24 }
 0x600   :  { %9861 = vmatpush1.bf16.msra.mxu0 %v16129_v37  ;;  %10525 = vmatpush1.bf16.msra.mxu1 %v16132_v32  ;;  %v16192_v37 = vld [vmem:[%s18206_s3 + $0x570] ss:$8 sps:$4 sm:$0xff]   ;;  %v9205_v32 = vrot.slane %v17083_v61, %v9204_v5  ;;  %v16198_v61 = vld [vmem:[%s18206_s3 + $0x580] ss:$8 sps:$4 sm:$0xff]  }
 0x601   :  { %9862 = vmatprep.subr.bf16.mxu0 %v16137_v34  ;;  %10526 = vmatprep.subr.bf16.mxu1 %v16140_v25  ;;  %v16197_v34 = vld [vmem:[%s18206_s3 + $0x2b4] ss:$8 sps:$4 sm:$0xff]   ;;  %v16200_v25 = vld [vmem:[%s18206_s3 + $0x584] ss:$8 sps:$4 sm:$0xff]   ;;  %v16264_v5 = vld [vmem:[%s18206_s3 + $0x900] ss:$8 sps:$4 sm:$0xff]  }
 0x604   :  { %9863 = vmatpush1.bf16.msra.mxu0 %v16135_v26  ;;  %10527 = vmatpush1.bf16.msra.mxu1 %v16138_v47  ;;  %v16195_v26 = vld [vmem:[%s18206_s3 + $0x2b0] ss:$8 sps:$4 sm:$0xff]  }
 0x605   :  { %9864 = vmatprep.subr.bf16.mxu0 %v16143_v10  ;;  %10528 = vmatprep.subr.bf16.mxu1 %v16146_v17  ;;  %v16203_v10 = vld [vmem:[%s18206_s3 + $0x2c4] ss:$8 sps:$4 sm:$0xff]   ;;  %v16206_v17 = vld [vmem:[%s18206_s3 + $0x594] ss:$8 sps:$4 sm:$0xff]  }
 0x608   :  { %9865 = vmatpush1.bf16.msra.mxu0 %v16141_v19  ;;  %10529 = vmatpush1.bf16.msra.mxu1 %v16144_v38  ;;  %v16201_v19 = vld [vmem:[%s18206_s3 + $0x2c0] ss:$8 sps:$4 sm:$0xff]   ;;  %v16204_v38 = vld [vmem:[%s18206_s3 + $0x590] ss:$8 sps:$4 sm:$0xff]  }
 0x609   :  { %9866 = vmatprep.subr.bf16.mxu0 %v16149_v21  ;;  %10530 = vmatprep.subr.bf16.mxu1 %v16152_v50  ;;  %v16209_v50 = vld [vmem:[%s18206_s3 + $0x5a4] ss:$8 sps:$4 sm:$0xff]  }
 0x60c   :  { %9867 = vmatpush1.bf16.msra.mxu0 %v16147_v27  ;;  %10531 = vmatpush1.bf16.msra.mxu1 %v16150_v49  ;;  %v16212_v27 = vld [vmem:[%s18206_s3 + $0x874] ss:$8 sps:$4 sm:$0xff]   ;;  %v16207_v49 = vld [vmem:[%s18206_s3 + $0x5a0] ss:$8 sps:$4 sm:$0xff]  }
 0x60d   :  { %9868 = vmatprep.subr.bf16.mxu0 %v16155_v28  ;;  %10532 = vmatprep.subr.bf16.mxu1 %v16158_v14  ;;  %v16210_v14 = vld [vmem:[%s18206_s3 + $0x870] ss:$8 sps:$4 sm:$0xff]  }
 0x610   :  { %9869 = vmatpush1.bf16.msra.mxu0 %v16153_v45  ;;  %10533 = vmatpush1.bf16.msra.mxu1 %v16156_v48  ;;  %v16215_v45 = vld [vmem:[%s18206_s3 + $0x5b4] ss:$8 sps:$4 sm:$0xff]   ;;  %v16218_v48 = vld [vmem:[%s18206_s3 + $0x884] ss:$8 sps:$4 sm:$0xff]  }
 0x611   :  { %9870 = vmatprep.subr.bf16.mxu0 %v16161_v20  ;;  %10534 = vmatprep.subr.bf16.mxu1 %v16164_v51  ;;  %v16213_v20 = vld [vmem:[%s18206_s3 + $0x5b0] ss:$8 sps:$4 sm:$0xff]   ;;  %v16216_v51 = vld [vmem:[%s18206_s3 + $0x880] ss:$8 sps:$4 sm:$0xff]  }
 0x614   :  { %9871 = vmatpush1.bf16.msra.mxu0 %v16159_v54  ;;  %10535 = vmatpush1.bf16.msra.mxu1 %v16162_v8  ;;  %v16221_v54 = vld [vmem:[%s18206_s3 + $0x5c4] ss:$8 sps:$4 sm:$0xff]   ;;  %v16224_v8 = vld [vmem:[%s18206_s3 + $0x894] ss:$8 sps:$4 sm:$0xff]  }
 0x615   :  { %9872 = vmatprep.subr.bf16.mxu0 %v16167_v30  ;;  %10536 = vmatprep.subr.bf16.mxu1 %v16170_v31  ;;  %v16219_v30 = vld [vmem:[%s18206_s3 + $0x5c0] ss:$8 sps:$4 sm:$0xff]   ;;  %v16227_v31 = vld [vmem:[%s18206_s3 + $0x5d4] ss:$8 sps:$4 sm:$0xff]  }
 0x617   :  { %v9159_v23 = vpop.f32.mrb[28].mxu1 }
 0x618   :  { %v9176_v41 = vmax.f32 %v17003_v2, %v9159_v23  ;;  %v9161_v42 = vpop.f32.mrb[29].mxu1  ;;  %9873 = vmatpush1.bf16.msra.mxu0 %v16165_v33  ;;  %10537 = vmatpush1.bf16.msra.mxu1 %v16168_v35  ;;  %v16225_v33 = vld [vmem:[%s18206_s3 + $0x5d0] ss:$8 sps:$4 sm:$0xff]   ;;  %v16228_v35 = vld [vmem:[%s18206_s3 + $0x8a0] ss:$8 sps:$4 sm:$0xff]  }
 0x619   :  { %v9177_v52 = vmax.f32 %v17005_v4, %v9161_v42  ;;  %v9163_v53 = vpop.f32.mrb[30].mxu1  ;;  %9874 = vmatprep.subr.bf16.mxu0 %v16173_v39  ;;  %10538 = vmatprep.subr.bf16.mxu1 %v16176_v40  ;;  %v16179_v4 = vld [vmem:[%s18206_s3 + $0x284] ss:$8 sps:$4 sm:$0xff]   ;;  %v16236_v40 = vld [vmem:[%s18206_s3 + $0x8b4] ss:$8 sps:$4 sm:$0xff]  }
 0x61a   :  { %v9182_v2 = vmax.f32 %v9170_v13, %v9176_v41  ;;  %v9164_v22 = vpop.f32.mrb[31].mxu1  ;;  %v16185_v13 = vld [vmem:[%s18206_s3 + $0x294] ss:$8 sps:$4 sm:$0xff]   ;;  %v16233_v39 = vld [vmem:[%s18206_s3 + $0x5e4] ss:$8 sps:$4 sm:$0xff]  }
 0x61b   :  { %v9183_v60 = vmax.f32 %v9171_v46, %v9177_v52  ;;  %v16231_v23 = vld [vmem:[%s18206_s3 + $0x5e0] ss:$8 sps:$4 sm:$0xff]   ;;  %v16234_v41 = vld [vmem:[%s18206_s3 + $0x8b0] ss:$8 sps:$4 sm:$0xff]   ;;  %v16239_v42 = vld [vmem:[%s18206_s3 + $0x5f4] ss:$8 sps:$4 sm:$0xff]  }
 0x61c   :  { %9875 = vmatpush1.bf16.msra.mxu0 %v16171_v55  ;;  %10539 = vmatpush1.bf16.msra.mxu1 %v16174_v57  ;;  %v9220_v47 = vadd.f32 %v9205_v32, %v9182_v2  ;;  %v16242_v52 = vld [vmem:[%s18206_s3 + $0x8c4] ss:$8 sps:$4 sm:$0xff]   ;;  %v16240_v53 = vld [vmem:[%s18206_s3 + $0x8c0] ss:$8 sps:$4 sm:$0xff]   ;;  %v16248_v57 = vld [vmem:[%s18206_s3 + $0x8d4] ss:$8 sps:$4 sm:$0xff]  }
 0x61d   :  { %v9221_v62 = vadd.f32 %v9209_v44, %v9183_v60  ;;  %9876 = vmatprep.subr.bf16.mxu0 %v16179_v4  ;;  %10540 = vmatprep.subr.bf16.mxu1 %v16182_v58  ;;  %v16237_v44 = vld [vmem:[%s18206_s3 + $0x5f0] ss:$8 sps:$4 sm:$0xff]   ;;  %v16245_v55 = vld [vmem:[%s18206_s3 + $0x604] ss:$8 sps:$4 sm:$0xff]   ;;  %v16243_v2 = vld [vmem:[%s18206_s3 + $0x600] ss:$8 sps:$4 sm:$0xff]  }
 0x61e   :  { %v9226_v21 = vmax.f32 %v9220_v47, 0.0  ;;  %v16246_v22 = vld [vmem:[%s18206_s3 + $0x8d0] ss:$8 sps:$4 sm:$0xff]   ;;  %v16251_v4 = vld [vmem:[%s18206_s3 + $0x614] ss:$8 sps:$4 sm:$0xff]  }
 0x61f   :  { %v9227_v16 = vmax.f32 %v9221_v62, 0.0  ;;  %v16254_v58 = vld [vmem:[%s18206_s3 + $0x8e4] ss:$8 sps:$4 sm:$0xff]   ;;  %v16249_v60 = vld [vmem:[%s18206_s3 + $0x610] ss:$8 sps:$4 sm:$0xff]  }
 0x620   :  { %9877 = vmatpush1.bf16.msra.mxu0 %v16177_v3  ;;  %10541 = vmatpush1.bf16.msra.mxu1 %v16180_v12  ;;  %v17605_v28 = vpack.c.bf16 %v9226_v21, %v9226_v21  ;;  %v16252_v62 = vld [vmem:[%s18206_s3 + $0x8e0] ss:$8 sps:$4 sm:$0xff]   ;;  %v16257_v3 = vld [vmem:[%s18206_s3 + $0x624] ss:$8 sps:$4 sm:$0xff]   ;;  %v16260_v12 = vld [vmem:[%s18206_s3 + $0x8f4] ss:$8 sps:$4 sm:$0xff]  }
 0x621   :  { %v17546_v46 = vpack.c.bf16 %v9227_v16, %v9227_v16  ;;  %9878 = vmatprep.subr.bf16.mxu0 %v16185_v13  ;;  %10542 = vmatprep.subr.bf16.mxu1 %v16188_v6  ;;  %v16255_v13 = vld [vmem:[%s18206_s3 + $0x620] ss:$8 sps:$4 sm:$0xff]   ;;  %v16258_v6 = vld [vmem:[%s18206_s3 + $0x8f0] ss:$8 sps:$4 sm:$0xff]   ;;  %v16263_v16 = vld [vmem:[%s18206_s3 + $0x634] ss:$8 sps:$4 sm:$0xff]  }
 0x622   :  { %v16275_v32 = vld [vmem:[%s18206_s3 + $0x654] ss:$8 sps:$4 sm:$0xff]   ;;  %v16285_v21 = vld [vmem:[%s18206_s3 + $0x670] ss:$8 sps:$4 sm:$0xff]  }
 0x623   :  { %13410 = vmatprep.mubr.msk.bf16.mxu0 %vm9774_vm1, %v17546_v46  ;;  %13591 = vmatprep.mubr.msk.bf16.mxu1 %vm9774_vm1, %v17546_v46  ;;  %v16284_v47 = vld [vmem:[%s18206_s3 + $0x934] ss:$8 sps:$4 sm:$0xff]  }
 0x624   :  { %9879 = vmatpush1.bf16.msra.mxu0 %v16183_v63  ;;  %10543 = vmatpush1.bf16.msra.mxu1 %v16186_v1  ;;  %v16266_v63 = vld [vmem:[%s18206_s3 + $0x904] ss:$8 sps:$4 sm:$0xff]   ;;  %v16261_v1 = vld [vmem:[%s18206_s3 + $0x630] ss:$8 sps:$4 sm:$0xff]  }
 0x625   :  { %9880 = vmatprep.subr.bf16.mxu0 %v16191_v15  ;;  %10544 = vmatprep.subr.bf16.mxu1 %v16194_v36  ;;  %v16269_v15 = vld [vmem:[%s18206_s3 + $0x644] ss:$8 sps:$4 sm:$0xff]   ;;  %v16272_v36 = vld [vmem:[%s18206_s3 + $0x914] ss:$8 sps:$4 sm:$0xff]  }
 0x628   :  { %9881 = vmatpush1.bf16.msra.mxu0 %v16189_v7  ;;  %10545 = vmatpush1.bf16.msra.mxu1 %v16192_v37  ;;  %v16267_v7 = vld [vmem:[%s18206_s3 + $0x640] ss:$8 sps:$4 sm:$0xff]   ;;  %v16270_v37 = vld [vmem:[%s18206_s3 + $0x910] ss:$8 sps:$4 sm:$0xff]  }
 0x629   :  { %9882 = vmatprep.subr.bf16.mxu0 %v16197_v34  ;;  %10546 = vmatprep.subr.bf16.mxu1 %v16200_v25  ;;  %v16278_v34 = vld [vmem:[%s18206_s3 + $0x924] ss:$8 sps:$4 sm:$0xff]   ;;  %v16273_v25 = vld [vmem:[%s18206_s3 + $0x650] ss:$8 sps:$4 sm:$0xff]  }
 0x62c   :  { %9883 = vmatpush1.bf16.msra.mxu0 %v16195_v26  ;;  %10547 = vmatpush1.bf16.msra.mxu1 %v16198_v61  ;;  %v16276_v26 = vld [vmem:[%s18206_s3 + $0x920] ss:$8 sps:$4 sm:$0xff]   ;;  %v16281_v61 = vld [vmem:[%s18206_s3 + $0x664] ss:$8 sps:$4 sm:$0xff]  }
 0x62d   :  { %9884 = vmatprep.subr.bf16.mxu0 %v16203_v10  ;;  %10548 = vmatprep.subr.bf16.mxu1 %v16206_v17  ;;  %v16279_v10 = vld [vmem:[%s18206_s3 + $0x660] ss:$8 sps:$4 sm:$0xff]   ;;  %v16282_v17 = vld [vmem:[%s18206_s3 + $0x930] ss:$8 sps:$4 sm:$0xff]  }
 0x630   :  { %9885 = vmatpush1.bf16.msra.mxu0 %v16201_v19  ;;  %10549 = vmatpush1.bf16.msra.mxu1 %v16204_v38  ;;  %v16287_v19 = vld [vmem:[%s18206_s3 + $0x674] ss:$8 sps:$4 sm:$0xff]   ;;  %v16290_v38 = vld [vmem:[%s18206_s3 + $0x944] ss:$8 sps:$4 sm:$0xff]  }
 0x631   :  { %11106 = vmatprep.subr.bf16.mxu0 %v16209_v50  ;;  %11770 = vmatprep.subr.bf16.mxu1 %v16212_v27  ;;  %v16288_v50 = vld [vmem:[%s18206_s3 + $0x940] ss:$8 sps:$4 sm:$0xff]   ;;  %v16293_v27 = vld [vmem:[%s18206_s3 + $0x684] ss:$8 sps:$4 sm:$0xff]  }
 0x633   :  { %9893 = vmatmul.mubr.bf16.vlgmr.msra.gmra.mrb[24].mxu0 %v17605_v28  ;;  %10557 = vmatmul.mubr.bf16.vlgmr.msra.gmra.mrb[32].mxu1 %v17605_v28 }
 0x634   :  { %11107 = vmatpush1.bf16.msra.mxu0 %v16207_v49  ;;  %11138 = vmatprep.mubr.bf16.mxu0 %v17130_v29  ;;  %v16296_v49 = vld [vmem:[%s18206_s3 + $0x954] ss:$8 sps:$4 sm:$0xff]  }
 0x635   :  { %11771 = vmatpush1.bf16.msra.mxu1 %v16210_v14  ;;  %11802 = vmatprep.mubr.bf16.mxu1 %v17130_v29  ;;  %v16222_v29 = vld [vmem:[%s18206_s3 + $0x890] ss:$8 sps:$4 sm:$0xff]   ;;  %v16291_v14 = vld [vmem:[%s18206_s3 + $0x680] ss:$8 sps:$4 sm:$0xff]  }
 0x636   :  { %11108 = vmatprep.subr.bf16.mxu0 %v16215_v45  ;;  %11772 = vmatprep.subr.bf16.mxu1 %v16218_v48  ;;  %v16294_v45 = vld [vmem:[%s18206_s3 + $0x950] ss:$8 sps:$4 sm:$0xff]   ;;  %v16299_v48 = vld [vmem:[%s18206_s3 + $0x694] ss:$8 sps:$4 sm:$0xff]  }
 0x638   :  { %11109 = vmatpush1.bf16.msra.mxu0 %v16213_v20  ;;  %v16302_v20 = vld [vmem:[%s18206_s3 + $0x964] ss:$8 sps:$4 sm:$0xff]  }
 0x639   :  { %11773 = vmatpush1.bf16.msra.mxu1 %v16216_v51  ;;  %11110 = vmatprep.subr.bf16.mxu0 %v16221_v54  ;;  %v16297_v51 = vld [vmem:[%s18206_s3 + $0x690] ss:$8 sps:$4 sm:$0xff]   ;;  %v16300_v54 = vld [vmem:[%s18206_s3 + $0x960] ss:$8 sps:$4 sm:$0xff]  }
 0x63a   :  { %11774 = vmatprep.subr.bf16.mxu1 %v16224_v8  ;;  %v16305_v8 = vld [vmem:[%s18206_s3 + $0x6a4] ss:$8 sps:$4 sm:$0xff]  }
 0x63c   :  { %11111 = vmatpush1.bf16.msra.mxu0 %v16219_v30  ;;  %v16308_v30 = vld [vmem:[%s18206_s3 + $0x974] ss:$8 sps:$4 sm:$0xff]  }
 0x63d   :  { %11775 = vmatpush1.bf16.msra.mxu1 %v16222_v29  ;;  %11112 = vmatprep.subr.bf16.mxu0 %v16227_v31  ;;  %v16303_v29 = vld [vmem:[%s18206_s3 + $0x6a0] ss:$8 sps:$4 sm:$0xff]   ;;  %v16306_v31 = vld [vmem:[%s18206_s3 + $0x970] ss:$8 sps:$4 sm:$0xff]  }
 0x63e   :  { %11776 = vmatprep.subr.bf16.mxu1 %v16230_v18  ;;  %v16311_v18 = vld [vmem:[%s18206_s3 + $0x6b4] ss:$8 sps:$4 sm:$0xff]  }
 0x640   :  { %11113 = vmatpush1.bf16.msra.mxu0 %v16225_v33  ;;  %v16314_v33 = vld [vmem:[%s18206_s3 + $0x984] ss:$8 sps:$4 sm:$0xff]  }
 0x641   :  { %11777 = vmatpush1.bf16.msra.mxu1 %v16228_v35  ;;  %11114 = vmatprep.subr.bf16.mxu0 %v16233_v39  ;;  %v16309_v35 = vld [vmem:[%s18206_s3 + $0x6b0] ss:$8 sps:$4 sm:$0xff]   ;;  %v16312_v39 = vld [vmem:[%s18206_s3 + $0x980] ss:$8 sps:$4 sm:$0xff]  }
 0x642   :  { %11778 = vmatprep.subr.bf16.mxu1 %v16236_v40  ;;  %v16317_v40 = vld [vmem:[%s18206_s3 + $0x6c4] ss:$8 sps:$4 sm:$0xff]  }
 0x644   :  { %11115 = vmatpush1.bf16.msra.mxu0 %v16231_v23  ;;  %v16315_v23 = vld [vmem:[%s18206_s3 + $0x6c0] ss:$8 sps:$4 sm:$0xff]  }
 0x645   :  { %11779 = vmatpush1.bf16.msra.mxu1 %v16234_v41  ;;  %11116 = vmatprep.subr.bf16.mxu0 %v16239_v42  ;;  %v16318_v41 = vld [vmem:[%s18206_s3 + $0x990] ss:$8 sps:$4 sm:$0xff]   ;;  %v16326_v42 = vld [vmem:[%s18206_s3 + $0x9a4] ss:$8 sps:$4 sm:$0xff]  }
 0x646   :  { %11780 = vmatprep.subr.bf16.mxu1 %v16242_v52  ;;  %v16321_v52 = vld [vmem:[%s18206_s3 + $0x6d0] ss:$8 sps:$4 sm:$0xff]  }
 0x648   :  { %11117 = vmatpush1.bf16.msra.mxu0 %v16237_v44  ;;  %v16324_v44 = vld [vmem:[%s18206_s3 + $0x9a0] ss:$8 sps:$4 sm:$0xff]  }
 0x649   :  { %11781 = vmatpush1.bf16.msra.mxu1 %v16240_v53  ;;  %11118 = vmatprep.subr.bf16.mxu0 %v16245_v55  ;;  %v16329_v53 = vld [vmem:[%s18206_s3 + $0x6e4] ss:$8 sps:$4 sm:$0xff]   ;;  %v16332_v55 = vld [vmem:[%s18206_s3 + $0x9b4] ss:$8 sps:$4 sm:$0xff]  }
 0x64a   :  { %11782 = vmatprep.subr.bf16.mxu1 %v16248_v57  ;;  %v16327_v57 = vld [vmem:[%s18206_s3 + $0x6e0] ss:$8 sps:$4 sm:$0xff]  }
 0x64c   :  { %11119 = vmatpush1.bf16.msra.mxu0 %v16243_v2  ;;  %v16330_v2 = vld [vmem:[%s18206_s3 + $0x9b0] ss:$8 sps:$4 sm:$0xff]  }
 0x64d   :  { %11783 = vmatpush1.bf16.msra.mxu1 %v16246_v22  ;;  %11120 = vmatprep.subr.bf16.mxu0 %v16251_v4  ;;  %v16335_v22 = vld [vmem:[%s18206_s3 + $0x6f4] ss:$8 sps:$4 sm:$0xff]   ;;  %v16338_v4 = vld [vmem:[%s18206_s3 + $0x9c4] ss:$8 sps:$4 sm:$0xff]  }
 0x64e   :  { %11784 = vmatprep.subr.bf16.mxu1 %v16254_v58  ;;  %v16333_v58 = vld [vmem:[%s18206_s3 + $0x6f0] ss:$8 sps:$4 sm:$0xff]  }
 0x650   :  { %11121 = vmatpush1.bf16.msra.mxu0 %v16249_v60  ;;  %v16336_v60 = vld [vmem:[%s18206_s3 + $0x9c0] ss:$8 sps:$4 sm:$0xff]  }
 0x651   :  { %11785 = vmatpush1.bf16.msra.mxu1 %v16252_v62  ;;  %11122 = vmatprep.subr.bf16.mxu0 %v16257_v3  ;;  %v16341_v62 = vld [vmem:[%s18206_s3 + $0x704] ss:$8 sps:$4 sm:$0xff]   ;;  %v16344_v3 = vld [vmem:[%s18206_s3 + $0x9d4] ss:$8 sps:$4 sm:$0xff]  }
 0x652   :  { %11786 = vmatprep.subr.bf16.mxu1 %v16260_v12  ;;  %v16339_v12 = vld [vmem:[%s18206_s3 + $0x700] ss:$8 sps:$4 sm:$0xff]  }
 0x654   :  { %11123 = vmatpush1.bf16.msra.mxu0 %v16255_v13  ;;  %v16342_v13 = vld [vmem:[%s18206_s3 + $0x9d0] ss:$8 sps:$4 sm:$0xff]  }
 0x655   :  { %11787 = vmatpush1.bf16.msra.mxu1 %v16258_v6  ;;  %11124 = vmatprep.subr.bf16.mxu0 %v16263_v16  ;;  %v16347_v6 = vld [vmem:[%s18206_s3 + $0x714] ss:$8 sps:$4 sm:$0xff]   ;;  %v16350_v16 = vld [vmem:[%s18206_s3 + $0x9e4] ss:$8 sps:$4 sm:$0xff]  }
 0x656   :  { %11788 = vmatprep.subr.bf16.mxu1 %v16266_v63  ;;  %v16345_v63 = vld [vmem:[%s18206_s3 + $0x710] ss:$8 sps:$4 sm:$0xff]  }
 0x658   :  { %11125 = vmatpush1.bf16.msra.mxu0 %v16261_v1  ;;  %v16348_v1 = vld [vmem:[%s18206_s3 + $0x9e0] ss:$8 sps:$4 sm:$0xff]  }
 0x659   :  { %11789 = vmatpush1.bf16.msra.mxu1 %v16264_v5  ;;  %11126 = vmatprep.subr.bf16.mxu0 %v16269_v15  ;;  %v16353_v5 = vld [vmem:[%s18206_s3 + $0x724] ss:$8 sps:$4 sm:$0xff]   ;;  %v16356_v15 = vld [vmem:[%s18206_s3 + $0x9f4] ss:$8 sps:$4 sm:$0xff]  }
 0x65a   :  { %11790 = vmatprep.subr.bf16.mxu1 %v16272_v36  ;;  %v16351_v36 = vld [vmem:[%s18206_s3 + $0x720] ss:$8 sps:$4 sm:$0xff]  }
 0x65c   :  { %11127 = vmatpush1.bf16.msra.mxu0 %v16267_v7  ;;  %v16354_v7 = vld [vmem:[%s18206_s3 + $0x9f0] ss:$8 sps:$4 sm:$0xff]  }
 0x65d   :  { %11791 = vmatpush1.bf16.msra.mxu1 %v16270_v37  ;;  %11128 = vmatprep.subr.bf16.mxu0 %v16275_v32  ;;  %v16359_v37 = vld [vmem:[%s18206_s3 + $0x734] ss:$8 sps:$4 sm:$0xff]   ;;  %v16362_v32 = vld [vmem:[%s18206_s3 + $0xa04] ss:$8 sps:$4 sm:$0xff]  }
 0x65e   :  { %11792 = vmatprep.subr.bf16.mxu1 %v16278_v34  ;;  %v16357_v34 = vld [vmem:[%s18206_s3 + $0x730] ss:$8 sps:$4 sm:$0xff]  }
 0x660   :  { %11129 = vmatpush1.bf16.msra.mxu0 %v16273_v25  ;;  %v16360_v25 = vld [vmem:[%s18206_s3 + $0xa00] ss:$8 sps:$4 sm:$0xff]  }
 0x661   :  { %11793 = vmatpush1.bf16.msra.mxu1 %v16276_v26  ;;  %11130 = vmatprep.subr.bf16.mxu0 %v16281_v61  ;;  %v16365_v26 = vld [vmem:[%s18206_s3 + $0x744] ss:$8 sps:$4 sm:$0xff]   ;;  %v16368_v61 = vld [vmem:[%s18206_s3 + $0xa14] ss:$8 sps:$4 sm:$0xff]  }
 0x662   :  { %11794 = vmatprep.subr.bf16.mxu1 %v16284_v47  ;;  %v16363_v47 = vld [vmem:[%s18206_s3 + $0x740] ss:$8 sps:$4 sm:$0xff]  }
 0x664   :  { %11131 = vmatpush1.bf16.msra.mxu0 %v16279_v10  ;;  %v16366_v10 = vld [vmem:[%s18206_s3 + $0xa10] ss:$8 sps:$4 sm:$0xff]  }
 0x665   :  { %11795 = vmatpush1.bf16.msra.mxu1 %v16282_v17  ;;  %11132 = vmatprep.subr.bf16.mxu0 %v16287_v19  ;;  %v16371_v17 = vld [vmem:[%s18206_s3 + $0x754] ss:$8 sps:$4 sm:$0xff]   ;;  %v16374_v19 = vld [vmem:[%s18206_s3 + $0xa24] ss:$8 sps:$4 sm:$0xff]  }
 0x666   :  { %11796 = vmatprep.subr.bf16.mxu1 %v16290_v38  ;;  %v16369_v38 = vld [vmem:[%s18206_s3 + $0x750] ss:$8 sps:$4 sm:$0xff]  }
 0x668   :  { %11133 = vmatpush1.bf16.msra.mxu0 %v16285_v21  ;;  %v16372_v21 = vld [vmem:[%s18206_s3 + $0xa20] ss:$8 sps:$4 sm:$0xff]  }
 0x669   :  { %11797 = vmatpush1.bf16.msra.mxu1 %v16288_v50  ;;  %11134 = vmatprep.subr.bf16.mxu0 %v16293_v27  ;;  %v16377_v50 = vld [vmem:[%s18206_s3 + $0x764] ss:$8 sps:$4 sm:$0xff]   ;;  %v16380_v27 = vld [vmem:[%s18206_s3 + $0xa34] ss:$8 sps:$4 sm:$0xff]  }
 0x66a   :  { %11798 = vmatprep.subr.bf16.mxu1 %v16296_v49  ;;  %v16375_v49 = vld [vmem:[%s18206_s3 + $0x760] ss:$8 sps:$4 sm:$0xff]  }
 0x66c   :  { %11135 = vmatpush1.bf16.msra.mxu0 %v16291_v14  ;;  %v16378_v14 = vld [vmem:[%s18206_s3 + $0xa30] ss:$8 sps:$4 sm:$0xff]  }
 0x66d   :  { %11799 = vmatpush1.bf16.msra.mxu1 %v16294_v45  ;;  %11136 = vmatprep.subr.bf16.mxu0 %v16299_v48  ;;  %v16383_v45 = vld [vmem:[%s18206_s3 + $0x774] ss:$8 sps:$4 sm:$0xff]   ;;  %v16386_v48 = vld [vmem:[%s18206_s3 + $0xa44] ss:$8 sps:$4 sm:$0xff]  }
 0x66e   :  { %11800 = vmatprep.subr.bf16.mxu1 %v16302_v20  ;;  %v16381_v20 = vld [vmem:[%s18206_s3 + $0x770] ss:$8 sps:$4 sm:$0xff]  }
 0x670   :  { %11137 = vmatpush1.bf16.msra.mxu0 %v16297_v51  ;;  %v16384_v51 = vld [vmem:[%s18206_s3 + $0xa40] ss:$8 sps:$4 sm:$0xff]  }
 0x671   :  { %11801 = vmatpush1.bf16.msra.mxu1 %v16300_v54  ;;  %11147 = vmatprep.subr.bf16.mxu0 %v16305_v8  ;;  %v16389_v54 = vld [vmem:[%s18206_s3 + $0x784] ss:$8 sps:$4 sm:$0xff]   ;;  %v16392_v8 = vld [vmem:[%s18206_s3 + $0xa54] ss:$8 sps:$4 sm:$0xff]  }
 0x672   :  { %11811 = vmatprep.subr.bf16.mxu1 %v16308_v30  ;;  %v16387_v30 = vld [vmem:[%s18206_s3 + $0x780] ss:$8 sps:$4 sm:$0xff]  }
 0x673   :  { %11139 = vmatmul.mubr.bf16.vlgmr.msra.gmra.mrb[28].mxu0 %v17164_v43 }
 0x674   :  { %11803 = vmatmul.mubr.bf16.vlgmr.msra.gmra.mrb[36].mxu1 %v17164_v43  ;;  %11148 = vmatpush1.bf16.msra.mxu0 %v16303_v29  ;;  %v16320_v43 = vld [vmem:[%s18206_s3 + $0x994] ss:$8 sps:$4 sm:$0xff]   ;;  %v16390_v29 = vld [vmem:[%s18206_s3 + $0xa50] ss:$8 sps:$4 sm:$0xff]  }
 0x675   :  { %11179 = vmatprep.mubr.bf16.mxu0 %v17420_v9  ;;  %11812 = vmatpush1.bf16.msra.mxu1 %v16306_v31  ;;  %v16395_v31 = vld [vmem:[%s18206_s3 + $0x794] ss:$8 sps:$4 sm:$0xff]  }
 0x676   :  { %11843 = vmatprep.mubr.bf16.mxu1 %v17420_v9  ;;  %11149 = vmatprep.subr.bf16.mxu0 %v16311_v18  ;;  %v16323_v9 = vld [vmem:[%s18206_s3 + $0x6d4] ss:$8 sps:$4 sm:$0xff]   ;;  %v16398_v18 = vld [vmem:[%s18206_s3 + $0xa64] ss:$8 sps:$4 sm:$0xff]  }
 0x677   :  { %11813 = vmatprep.subr.bf16.mxu1 %v16314_v33  ;;  %v16393_v33 = vld [vmem:[%s18206_s3 + $0x790] ss:$8 sps:$4 sm:$0xff]  }
 0x678   :  { %11150 = vmatpush1.bf16.msra.mxu0 %v16309_v35  ;;  %v16396_v35 = vld [vmem:[%s18206_s3 + $0xa60] ss:$8 sps:$4 sm:$0xff]  }
 0x679   :  { %11814 = vmatpush1.bf16.msra.mxu1 %v16312_v39  ;;  %11151 = vmatprep.subr.bf16.mxu0 %v16317_v40  ;;  %v16401_v39 = vld [vmem:[%s18206_s3 + $0x7a4] ss:$8 sps:$4 sm:$0xff]   ;;  %v16404_v40 = vld [vmem:[%s18206_s3 + $0xa74] ss:$8 sps:$4 sm:$0xff]  }
 0x67a   :  { %11815 = vmatprep.subr.bf16.mxu1 %v16320_v43  ;;  %v16399_v43 = vld [vmem:[%s18206_s3 + $0x7a0] ss:$8 sps:$4 sm:$0xff]  }
 0x67c   :  { %11152 = vmatpush1.bf16.msra.mxu0 %v16315_v23  ;;  %v16402_v23 = vld [vmem:[%s18206_s3 + $0xa70] ss:$8 sps:$4 sm:$0xff]  }
 0x67d   :  { %11816 = vmatpush1.bf16.msra.mxu1 %v16318_v41  ;;  %11153 = vmatprep.subr.bf16.mxu0 %v16323_v9  ;;  %v16407_v41 = vld [vmem:[%s18206_s3 + $0x7b4] ss:$8 sps:$4 sm:$0xff]   ;;  %v16410_v9 = vld [vmem:[%s18206_s3 + $0xa84] ss:$8 sps:$4 sm:$0xff]  }
 0x67e   :  { %11817 = vmatprep.subr.bf16.mxu1 %v16326_v42  ;;  %v16405_v42 = vld [vmem:[%s18206_s3 + $0x7b0] ss:$8 sps:$4 sm:$0xff]  }
 0x680   :  { %11154 = vmatpush1.bf16.msra.mxu0 %v16321_v52  ;;  %v16408_v52 = vld [vmem:[%s18206_s3 + $0xa80] ss:$8 sps:$4 sm:$0xff]  }
 0x681   :  { %11818 = vmatpush1.bf16.msra.mxu1 %v16324_v44  ;;  %11155 = vmatprep.subr.bf16.mxu0 %v16329_v53  ;;  %v16413_v44 = vld [vmem:[%s18206_s3 + $0x7c4] ss:$8 sps:$4 sm:$0xff]   ;;  %v16411_v53 = vld [vmem:[%s18206_s3 + $0x7c0] ss:$8 sps:$4 sm:$0xff]  }
 0x682   :  { %11819 = vmatprep.subr.bf16.mxu1 %v16332_v55  ;;  %v16414_v55 = vld [vmem:[%s18206_s3 + $0xa90] ss:$8 sps:$4 sm:$0xff]  }
 0x684   :  { %11156 = vmatpush1.bf16.msra.mxu0 %v16327_v57  ;;  %v16422_v57 = vld [vmem:[%s18206_s3 + $0xaa4] ss:$8 sps:$4 sm:$0xff]  }
 0x685   :  { %11820 = vmatpush1.bf16.msra.mxu1 %v16330_v2  ;;  %11157 = vmatprep.subr.bf16.mxu0 %v16335_v22  ;;  %v16417_v2 = vld [vmem:[%s18206_s3 + $0x7d0] ss:$8 sps:$4 sm:$0xff]   ;;  %v16420_v22 = vld [vmem:[%s18206_s3 + $0xaa0] ss:$8 sps:$4 sm:$0xff]  }
 0x686   :  { %11821 = vmatprep.subr.bf16.mxu1 %v16338_v4  ;;  %v16425_v4 = vld [vmem:[%s18206_s3 + $0x7e4] ss:$8 sps:$4 sm:$0xff]  }
 0x688   :  { %11158 = vmatpush1.bf16.msra.mxu0 %v16333_v58  ;;  %v16428_v58 = vld [vmem:[%s18206_s3 + $0xab4] ss:$8 sps:$4 sm:$0xff]  }
 0x689   :  { %11822 = vmatpush1.bf16.msra.mxu1 %v16336_v60  ;;  %11159 = vmatprep.subr.bf16.mxu0 %v16341_v62  ;;  %v16423_v60 = vld [vmem:[%s18206_s3 + $0x7e0] ss:$8 sps:$4 sm:$0xff]   ;;  %v16426_v62 = vld [vmem:[%s18206_s3 + $0xab0] ss:$8 sps:$4 sm:$0xff]  }
 0x68a   :  { %11823 = vmatprep.subr.bf16.mxu1 %v16344_v3  ;;  %v16431_v3 = vld [vmem:[%s18206_s3 + $0x7f4] ss:$8 sps:$4 sm:$0xff]  }
 0x68c   :  { %11160 = vmatpush1.bf16.msra.mxu0 %v16339_v12  ;;  %v16434_v12 = vld [vmem:[%s18206_s3 + $0xac4] ss:$8 sps:$4 sm:$0xff]  }
 0x68d   :  { %11824 = vmatpush1.bf16.msra.mxu1 %v16342_v13  ;;  %11161 = vmatprep.subr.bf16.mxu0 %v16347_v6  ;;  %v16429_v13 = vld [vmem:[%s18206_s3 + $0x7f0] ss:$8 sps:$4 sm:$0xff]   ;;  %v16432_v6 = vld [vmem:[%s18206_s3 + $0xac0] ss:$8 sps:$4 sm:$0xff]  }
 0x68e   :  { %11825 = vmatprep.subr.bf16.mxu1 %v16350_v16  ;;  %v16437_v16 = vld [vmem:[%s18206_s3 + $0x804] ss:$8 sps:$4 sm:$0xff]  }
 0x690   :  { %11162 = vmatpush1.bf16.msra.mxu0 %v16345_v63  ;;  %v16440_v63 = vld [vmem:[%s18206_s3 + $0xad4] ss:$8 sps:$4 sm:$0xff]  }
 0x691   :  { %11826 = vmatpush1.bf16.msra.mxu1 %v16348_v1  ;;  %11163 = vmatprep.subr.bf16.mxu0 %v16353_v5  ;;  %v16435_v1 = vld [vmem:[%s18206_s3 + $0x800] ss:$8 sps:$4 sm:$0xff]   ;;  %v16438_v5 = vld [vmem:[%s18206_s3 + $0xad0] ss:$8 sps:$4 sm:$0xff]  }
 0x692   :  { %11827 = vmatprep.subr.bf16.mxu1 %v16356_v15  ;;  %v16443_v15 = vld [vmem:[%s18206_s3 + $0x814] ss:$8 sps:$4 sm:$0xff]  }
 0x694   :  { %11164 = vmatpush1.bf16.msra.mxu0 %v16351_v36  ;;  %v16446_v36 = vld [vmem:[%s18206_s3 + $0xae4] ss:$8 sps:$4 sm:$0xff]  }
 0x695   :  { %11828 = vmatpush1.bf16.msra.mxu1 %v16354_v7  ;;  %11165 = vmatprep.subr.bf16.mxu0 %v16359_v37  ;;  %v16441_v7 = vld [vmem:[%s18206_s3 + $0x810] ss:$8 sps:$4 sm:$0xff]   ;;  %v16444_v37 = vld [vmem:[%s18206_s3 + $0xae0] ss:$8 sps:$4 sm:$0xff]  }
 0x696   :  { %11829 = vmatprep.subr.bf16.mxu1 %v16362_v32  ;;  %v16449_v32 = vld [vmem:[%s18206_s3 + $0x824] ss:$8 sps:$4 sm:$0xff]  }
 0x698   :  { %11166 = vmatpush1.bf16.msra.mxu0 %v16357_v34  ;;  %v16452_v34 = vld [vmem:[%s18206_s3 + $0xaf4] ss:$8 sps:$4 sm:$0xff]  }
 0x699   :  { %11830 = vmatpush1.bf16.msra.mxu1 %v16360_v25  ;;  %11167 = vmatprep.subr.bf16.mxu0 %v16365_v26  ;;  %v16447_v25 = vld [vmem:[%s18206_s3 + $0x820] ss:$8 sps:$4 sm:$0xff]   ;;  %v16450_v26 = vld [vmem:[%s18206_s3 + $0xaf0] ss:$8 sps:$4 sm:$0xff]  }
 0x69a   :  { %11831 = vmatprep.subr.bf16.mxu1 %v16368_v61  ;;  %v16455_v61 = vld [vmem:[%s18206_s3 + $0x834] ss:$8 sps:$4 sm:$0xff]  }
 0x69c   :  { %11168 = vmatpush1.bf16.msra.mxu0 %v16363_v47  ;;  %v16458_v47 = vld [vmem:[%s18206_s3 + $0xb04] ss:$8 sps:$4 sm:$0xff]  }
 0x69d   :  { %11832 = vmatpush1.bf16.msra.mxu1 %v16366_v10  ;;  %11169 = vmatprep.subr.bf16.mxu0 %v16371_v17  ;;  %v16453_v10 = vld [vmem:[%s18206_s3 + $0x830] ss:$8 sps:$4 sm:$0xff]   ;;  %v16456_v17 = vld [vmem:[%s18206_s3 + $0xb00] ss:$8 sps:$4 sm:$0xff]  }
 0x69e   :  { %11833 = vmatprep.subr.bf16.mxu1 %v16374_v19  ;;  %v16461_v19 = vld [vmem:[%s18206_s3 + $0x844] ss:$8 sps:$4 sm:$0xff]  }
 0x6a0   :  { %11170 = vmatpush1.bf16.msra.mxu0 %v16369_v38  ;;  %v16464_v38 = vld [vmem:[%s18206_s3 + $0xb14] ss:$8 sps:$4 sm:$0xff]  }
 0x6a1   :  { %11834 = vmatpush1.bf16.msra.mxu1 %v16372_v21  ;;  %11171 = vmatprep.subr.bf16.mxu0 %v16377_v50  ;;  %v16459_v21 = vld [vmem:[%s18206_s3 + $0x840] ss:$8 sps:$4 sm:$0xff]   ;;  %v16462_v50 = vld [vmem:[%s18206_s3 + $0xb10] ss:$8 sps:$4 sm:$0xff]  }
 0x6a2   :  { %11835 = vmatprep.subr.bf16.mxu1 %v16380_v27  ;;  %v16467_v27 = vld [vmem:[%s18206_s3 + $0x854] ss:$8 sps:$4 sm:$0xff]  }
 0x6a4   :  { %11172 = vmatpush1.bf16.msra.mxu0 %v16375_v49  ;;  %v16470_v49 = vld [vmem:[%s18206_s3 + $0xb24] ss:$8 sps:$4 sm:$0xff]  }
 0x6a5   :  { %11836 = vmatpush1.bf16.msra.mxu1 %v16378_v14  ;;  %11173 = vmatprep.subr.bf16.mxu0 %v16383_v45  ;;  %v16465_v14 = vld [vmem:[%s18206_s3 + $0x850] ss:$8 sps:$4 sm:$0xff]   ;;  %v16468_v45 = vld [vmem:[%s18206_s3 + $0xb20] ss:$8 sps:$4 sm:$0xff]  }
 0x6a6   :  { %11837 = vmatprep.subr.bf16.mxu1 %v16386_v48  ;;  %v16473_v48 = vld [vmem:[%s18206_s3 + $0x864] ss:$8 sps:$4 sm:$0xff]  }
 0x6a8   :  { %11174 = vmatpush1.bf16.msra.mxu0 %v16381_v20  ;;  %v16476_v20 = vld [vmem:[%s18206_s3 + $0xb34] ss:$8 sps:$4 sm:$0xff]  }
 0x6a9   :  { %11838 = vmatpush1.bf16.msra.mxu1 %v16384_v51  ;;  %11175 = vmatprep.subr.bf16.mxu0 %v16389_v54  ;;  %v16471_v51 = vld [vmem:[%s18206_s3 + $0x860] ss:$8 sps:$4 sm:$0xff]   ;;  %v16474_v54 = vld [vmem:[%s18206_s3 + $0xb30] ss:$8 sps:$4 sm:$0xff]  }
 0x6aa   :  { %11839 = vmatprep.subr.bf16.mxu1 %v16392_v8  ;;  %v16477_v8 = vld [vmem:[%s18208_s5] sm:$0xff]  }
 0x6ac   :  { %11176 = vmatpush1.bf16.msra.mxu0 %v16387_v30  ;;  %v16478_v30 = vld [vmem:[%s18208_s5 + $0x8] sm:$0xff]  }
 0x6ad   :  { %11840 = vmatpush1.bf16.msra.mxu1 %v16390_v29  ;;  %11177 = vmatprep.subr.bf16.mxu0 %v16395_v31  ;;  %v16479_v29 = vld [vmem:[%s18208_s5 + $0x10] sm:$0xff]   ;;  %v16480_v31 = vld [vmem:[%s18208_s5 + $0x18] sm:$0xff]  }
 0x6ae   :  { %11841 = vmatprep.subr.bf16.mxu1 %v16398_v18  ;;  %v16482_v18 = vld [vmem:[%s18208_s5 + $0x28] sm:$0xff]  }
 0x6b0   :  { %11178 = vmatpush1.bf16.msra.mxu0 %v16393_v33  ;;  %v16483_v33 = vld [vmem:[%s18208_s5 + $0x30] sm:$0xff]  }
 0x6b1   :  { %11842 = vmatpush1.bf16.msra.mxu1 %v16396_v35  ;;  %11188 = vmatprep.subr.bf16.mxu0 %v16401_v39 }
 0x6b2   :  { %11852 = vmatprep.subr.bf16.mxu1 %v16404_v40 }
 0x6b3   :  { %11180 = vmatmul.mubr.bf16.vlgmr.msra.gmra.mrb[28].mxu0 %v17428_v24 }
 0x6b4   :  { %11844 = vmatmul.mubr.bf16.vlgmr.msra.gmra.mrb[36].mxu1 %v17428_v24  ;;  %11189 = vmatpush1.bf16.msra.mxu0 %v16399_v43  ;;  %v16416_v24 = vld [vmem:[%s18206_s3 + $0xa94] ss:$8 sps:$4 sm:$0xff]  }
 0x6b5   :  { %13772 = vmatprep.mubr.msk.bf16.mxu0 %vm9774_vm1, %v17546_v46  ;;  %11853 = vmatpush1.bf16.msra.mxu1 %v16402_v23 }
 0x6b6   :  { %13953 = vmatprep.mubr.msk.bf16.mxu1 %vm9774_vm1, %v17546_v46  ;;  %11190 = vmatprep.subr.bf16.mxu0 %v16407_v41  ;;  %v16419_v46 = vld [vmem:[%s18206_s3 + $0x7d4] ss:$8 sps:$4 sm:$0xff]  }
 0x6b7   :  { %11854 = vmatprep.subr.bf16.mxu1 %v16410_v9 }
 0x6b8   :  { %11191 = vmatpush1.bf16.msra.mxu0 %v16405_v42 }
 0x6b9   :  { %11855 = vmatpush1.bf16.msra.mxu1 %v16408_v52  ;;  %11192 = vmatprep.subr.bf16.mxu0 %v16413_v44 }
 0x6ba   :  { %11856 = vmatprep.subr.bf16.mxu1 %v16416_v24  ;;  %v16484_v24 = vld [vmem:[%s18208_s5 + $0x38] sm:$0xff]  }
 0x6bc   :  { %11193 = vmatpush1.bf16.msra.mxu0 %v16411_v53  ;;  %v16485_v53 = vld [vmem:[%s18208_s5 + $0x40] sm:$0xff]  }
 0x6bd   :  { %11857 = vmatpush1.bf16.msra.mxu1 %v16414_v55  ;;  %11194 = vmatprep.subr.bf16.mxu0 %v16419_v46  ;;  %v16486_v55 = vld [vmem:[%s18208_s5 + $0x48] sm:$0xff]   ;;  %v16645_v46 = vmov 0.0  }
 0x6be   :  { %11858 = vmatprep.subr.bf16.mxu1 %v16422_v57  ;;  %v11899_v57 = vld [vmem:[#allocation6] sm:$0x3] }
 0x6c0   :  { %11195 = vmatpush1.bf16.msra.mxu0 %v16417_v2 }
 0x6c1   :  { %11859 = vmatpush1.bf16.msra.mxu1 %v16420_v22  ;;  %11196 = vmatprep.subr.bf16.mxu0 %v16425_v4 }
 0x6c2   :  { %11860 = vmatprep.subr.bf16.mxu1 %v16428_v58 }
 0x6c4   :  { %11197 = vmatpush1.bf16.msra.mxu0 %v16423_v60  ;;  %v11904_v60 = vrot.slane %v11899_v57, %v9188_v11  ;;  %v16487_v11 = vld [vmem:[#allocation9] sm:$0xff]  }
 0x6c5   :  { %11861 = vmatpush1.bf16.msra.mxu1 %v16426_v62  ;;  %11198 = vmatprep.subr.bf16.mxu0 %v16431_v3 }
 0x6c6   :  { %11862 = vmatprep.subr.bf16.mxu1 %v16434_v12 }
 0x6c8   :  { %11199 = vmatpush1.bf16.msra.mxu0 %v16429_v13 }
 0x6c9   :  { %11863 = vmatpush1.bf16.msra.mxu1 %v16432_v6  ;;  %11200 = vmatprep.subr.bf16.mxu0 %v16437_v16 }
 0x6ca   :  { %11864 = vmatprep.subr.bf16.mxu1 %v16440_v63 }
 0x6cc   :  { %11201 = vmatpush1.bf16.msra.mxu0 %v16435_v1 }
 0x6cd   :  { %11865 = vmatpush1.bf16.msra.mxu1 %v16438_v5  ;;  %11202 = vmatprep.subr.bf16.mxu0 %v16443_v15 }
 0x6ce   :  { %11866 = vmatprep.subr.bf16.mxu1 %v16446_v36 }
 0x6d0   :  { %11203 = vmatpush1.bf16.msra.mxu0 %v16441_v7 }
 0x6d1   :  { %11867 = vmatpush1.bf16.msra.mxu1 %v16444_v37  ;;  %11204 = vmatprep.subr.bf16.mxu0 %v16449_v32 }
 0x6d2   :  { %11868 = vmatprep.subr.bf16.mxu1 %v16452_v34 }
 0x6d4   :  { %11205 = vmatpush1.bf16.msra.mxu0 %v16447_v25 }
 0x6d5   :  { %11869 = vmatpush1.bf16.msra.mxu1 %v16450_v26  ;;  %11206 = vmatprep.subr.bf16.mxu0 %v16455_v61 }
 0x6d6   :  { %11870 = vmatprep.subr.bf16.mxu1 %v16458_v47 }
 0x6d8   :  { %11207 = vmatpush1.bf16.msra.mxu0 %v16453_v10 }
 0x6d9   :  { %11871 = vmatpush1.bf16.msra.mxu1 %v16456_v17  ;;  %11208 = vmatprep.subr.bf16.mxu0 %v16461_v19  ;;  %v13966_v19 = vld [vmem:[#allocation10] ss:$0 sm:$0xff] }
 0x6da   :  { %11872 = vmatprep.subr.bf16.mxu1 %v16464_v38 }
 0x6dc   :  { %11209 = vmatpush1.bf16.msra.mxu0 %v16459_v21 }
 0x6dd   :  { %11873 = vmatpush1.bf16.msra.mxu1 %v16462_v50  ;;  %11210 = vmatprep.subr.bf16.mxu0 %v16467_v27 }
 0x6de   :  { %11874 = vmatprep.subr.bf16.mxu1 %v16470_v49 }
 0x6e0   :  { %11211 = vmatpush1.bf16.msra.mxu0 %v16465_v14 }
 0x6e1   :  { %11875 = vmatpush1.bf16.msra.mxu1 %v16468_v45  ;;  %11212 = vmatprep.subr.bf16.mxu0 %v16473_v48 }
 0x6e2   :  { %11876 = vmatprep.subr.bf16.mxu1 %v16476_v20 }
 0x6e4   :  { %11213 = vmatpush1.bf16.msra.mxu0 %v16471_v51 }
 0x6e5   :  { %11877 = vmatpush1.bf16.msra.mxu1 %v16474_v54  ;;  %12008 = vmatprep.subr.bf16.mxu0 %v16644_v0 }
 0x6e6   :  { %13973 = vmatprep.subr.bf16.mxu1 %v16645_v46 }
 0x6e7   :  { %11221 = vmatmul.mubr.bf16.vlgmr.msra.gmra.mrb[28].mxu0 %v17605_v28 }
 0x6e8   :  { %11885 = vmatmul.mubr.bf16.vlgmr.msra.gmra.mrb[36].mxu1 %v17605_v28  ;;  %12009 = vmatpush1.bf16.msra.mxu0 %v16477_v8  ;;  %v16481_v28 = vld [vmem:[%s18208_s5 + $0x20] sm:$0xff]  }
 0x6e9   :  { %12010 = vmatprep.subr.bf16.mxu0 %v16644_v0  ;;  %13974 = vmatpush3.bf16.msra.mxu1 %v16487_v11 }
 0x6ea   :  { %13975 = vmatprep.subr.bf16.mxu1 %v16645_v46  ;;  %13977 = vmatprep.mubr.msk.bf16.mxu1 %vm16646_vm3, %v16645_v46 }
 0x6ec   :  { %12011 = vmatpush1.bf16.msra.mxu0 %v16478_v30 }
 0x6ed   :  { %12012 = vmatprep.subr.bf16.mxu0 %v16644_v0  ;;  %13976 = vmatpush3.bf16.msra.mxu1 %v16488_v56 }
 0x6f0   :  { %12013 = vmatpush1.bf16.msra.mxu0 %v16479_v29 }
 0x6f1   :  { %12014 = vmatprep.subr.bf16.mxu0 %v16644_v0 }
 0x6f4   :  { %12015 = vmatpush1.bf16.msra.mxu0 %v16480_v31 }
 0x6f5   :  { %12016 = vmatprep.subr.bf16.mxu0 %v16644_v0 }
 0x6f8   :  { %12017 = vmatpush1.bf16.msra.mxu0 %v16481_v28 }
 0x6f9   :  { %12018 = vmatprep.subr.bf16.mxu0 %v16644_v0 }
 0x6fc   :  { %12019 = vmatpush1.bf16.msra.mxu0 %v16482_v18 }
 0x6fd   :  { %12020 = vmatprep.subr.bf16.mxu0 %v16644_v0 }
 0x700   :  { %12021 = vmatpush1.bf16.msra.mxu0 %v16483_v33 }
 0x701   :  { %12022 = vmatprep.subr.bf16.mxu0 %v16644_v0 }
 0x704   :  { %12023 = vmatpush1.bf16.msra.mxu0 %v16484_v24 }
 0x705   :  { %12024 = vmatprep.subr.bf16.mxu0 %v16644_v0 }
 0x706   :  { %v9894_v35 = vpop.f32.mrb[24].mxu0  ;;  %v10558_v39 = vpop.f32.mrb[32].mxu1 }
 0x707   :  { %v11893_v40 = vmax.f32 %v9894_v35, %v10558_v39  ;;  %v9896_v43 = vpop.f32.mrb[25].mxu0  ;;  %v10560_v23 = vpop.f32.mrb[33].mxu1 }
 0x708   :  { %v11894_v41 = vmax.f32 %v9896_v43, %v10560_v23  ;;  %v9898_v9 = vpop.f32.mrb[26].mxu0  ;;  %v10562_v42 = vpop.f32.mrb[34].mxu1  ;;  %12025 = vmatpush1.bf16.msra.mxu0 %v16485_v53 }
 0x709   :  { %v9899_v52 = vpop.f32.mrb[27].mxu0  ;;  %v10563_v44 = vpop.f32.mrb[35].mxu1  ;;  %12026 = vmatprep.subr.bf16.mxu0 %v16644_v0  ;;  %v11908_v0 = vrot.slane %v11899_v57, %v9192_v59  ;;  %v13954_v59 = vld [vmem:[#allocation7] ss:$0 sm:$0xff] }
 0x70c   :  { %12027 = vmatpush1.bf16.msra.mxu0 %v16486_v55 }
 0x7ba   :  { %v11222_v2 = vpop.f32.mrb[28].mxu0 }
 0x7bb   :  { %v11886_v22 = vpop.f32.mrb[36].mxu1  ;;  %v11224_v4 = vpop.f32.mrb[29].mxu0 }
 0x7bc   :  { %v11895_v58 = vmax.f32 %v11222_v2, %v11886_v22  ;;  %v11888_v62 = vpop.f32.mrb[37].mxu1  ;;  %v11226_v3 = vpop.f32.mrb[30].mxu0 }
 0x7bd   :  { %v11896_v12 = vmax.f32 %v11224_v4, %v11888_v62  ;;  %v11890_v13 = vpop.f32.mrb[38].mxu1  ;;  %v11227_v6 = vpop.f32.mrb[31].mxu0 }
 0x7be   :  { %v11897_v16 = vmax.f32 %v11893_v40, %v11895_v58  ;;  %v11891_v63 = vpop.f32.mrb[39].mxu1 }
 0x7bf   :  { %v11898_v1 = vmax.f32 %v11894_v41, %v11896_v12 }
 0x7c0   :  { %v11911_v5 = vadd.f32 %v11904_v60, %v11897_v16 }
 0x7c1   :  { %v11912_v15 = vadd.f32 %v11908_v0, %v11898_v1 }
 0x7c2   :  { %v11913_v36 = vmax.f32 %v11911_v5, 0.0 }
 0x7c3   :  { %v11914_v7 = vmax.f32 %v11912_v15, 0.0 }
 0x7c4   :  { %v11915_v32 = vpack.c.bf16 %v11913_v36, %v11913_v36 }
 0x7c5   :  { %v11916_v37 = vpack.c.bf16 %v11914_v7, %v11914_v7 }
 0x7c7   :  { %13965 = vmatprep.mubr.msk.bf16.mxu0 %vm12004_vm2, %v11916_v37 }
 0x7c8   :  { %12041 = vmatmul.mubr.bf16.vlgmr.msra.gmra.mrb[32].mxu0 %v11915_v32 }
 0x89b   :  { %v12042_v34 = vpop.f32.mrb[32].mxu0 }
 0x89c   :  { %v12043_v25 = vadd.f32 %v13954_v59, %v12042_v34  ;;  %v12044_v26 = vpop.f32.mrb[33].mxu0 }
 0x89d   :  { %v12045_v61 = vpop.f32.mrb[34].mxu0 }
 0x89e   :  { %v12048_v47 = vmax.f32 %v12043_v25, 0.0  ;;  %v12046_v10 = vpop.f32.mrb[35].mxu0 }
 0x8a0   :  { %v12049_v17 = vpack.c.bf16 %v12048_v47, %v12048_v47 }
 0x8a2   :  { %13978 = vmatmul.mubr.msk.bf16.vlgmr.msra.gmra.mrb[40].mxu1 %vm12004_vm2, %v12049_v17 }
 0x975   :  { %v12110_v38 = vpop.f32.mrb[40].mxu1 }
 0x976   :  { %v12111_v21 = vadd.f32 %v13966_v19, %v12110_v38  ;;  %v13979_v50 = vpop.f32.mrb[41].mxu1 }
 0x977   :  { %v12113_v27 = vpop.f32.mrb[42].mxu1 }
 0x978   :  { %12116 = vst [vmem:[%s18212_s9] sm:$0xff] %v12111_v21  ;;  %v13980_v49 = vpop.f32.mrb[43].mxu1 }
 0x979   :  { %12121 = vsyncpa [#allocation3], 1 }
 0x97a   :  { %12122 = vsyncpa [#allocation5], 1 }
 0x97b   :  { %12123 = vsyncpa [#allocation8], 1 }
 0x97c   :  { %12124 = vsyncpa [#allocation11], 1 }

</bundles_post_ra>
